<compile_context>
chip_gen: v6e
topology: v6e:2x2x1
jax: 0.10.0
libtpu: 0.0.40
codegen_flags: <defaults>
</compile_context>

<pallas_src>
import functools

import jax
import jax.numpy as jnp
import numpy as np
from jax.experimental import pallas as pl
from jax.experimental.pallas import tpu as pltpu

EPS = 1e-5
LANE = 128
VMEM_LIMIT = 48 * 1024 * 1024   # scoped-VMEM budget, below v7x's 64 MiB physical


def _round_up(v, m=LANE):
    return ((v + m - 1) // m) * m


def _pick_th(H, Wp, cin_p, cout_p, budget=20 * 1024 * 1024):
    """Largest divisor of H (<=32) whose per-step working set fits the budget."""
    for cand in range(min(H, 32), 0, -1):
        if H % cand:
            continue
        ws = (2 * (cand + 2) * Wp * cin_p * 2      # double-buffered input tile (bf16)
              + (cand + 2) * Wp * cin_p * 2        # fused-activation scratch (bf16)
              + cand * Wp * 3 * cin_p * 2          # K-slab (bf16)
              + 3 * cand * Wp * cout_p * 4         # matmul result + f32 accumulator
              + 2 * cand * Wp * cout_p * 2         # double-buffered conv output (bf16)
              + 2 * 9 * cin_p * cout_p * 2)        # double-buffered weights (bf16)
        if ws <= budget:
            return cand
    return 1


def _pick_rows(tot, target=2048):
    """Row-block size for the pointwise pass: big, lane-dense, divides tot."""
    if tot <= target:
        return tot
    rb = target - (target % 8)
    while rb >= 8:
        if tot % rb == 0:
            return rb
        rb -= 8
    return tot


# ---------------------------------------------------------------------------
# Conv kernel: 3x3 conv (padding=1, no bias) + per-tile BN partial statistics.
# Optionally fuses relu(y*scale+shift) (the previous layer's BN+ReLU) onto the
# freshly DMA'd input tile.
#
#   x_hbm  : (N, H+2, Wp, Cin_p)  bf16  padded image, memory_space=ANY
#   w_ref  : (3*Cin_p, 3*Cout_p)  bf16  K = (dy, ci), N = (dx, co)
#   sc/sh  : (1, Cin_p)           f32   only when fused
#   y_ref  : (1, th, W, Cout_p)   bf16  pre-BN conv output tile
#   st_ref : (1, 2, Cout_p)       f32   row 0 = sum, row 1 = sum of squares
#   xbuf   : (2, th+2, Wp, Cin_p) bf16  double-buffered input window
#   hbuf   : (th+2, Wp, Cin_p)    bf16  post-activation input (fused only)
#   sem    : DMA semaphores (2,)
# ---------------------------------------------------------------------------
def _conv3x3_kernel(*refs, fused, H, W, th, nt, cin_p, cout_p):
    if fused:
        x_hbm, w_ref, sc_ref, sh_ref, y_ref, st_ref, xbuf, hbuf, sem = refs
    else:
        x_hbm, w_ref, y_ref, st_ref, xbuf, sem = refs
        sc_ref = sh_ref = hbuf = None

    n = pl.program_id(0)
    r = pl.program_id(1)
    r0 = r * th
    slot = r % 2
    Wp = xbuf.shape[2]

    def start_fetch(row_start, s):
        pltpu.make_async_copy(x_hbm.at[n, pl.ds(row_start, th + 2)],
                              xbuf.at[s], sem.at[s]).start()

    # Prime the first window of this image; prefetch the next one.
    @pl.when(r == 0)
    def _():
        start_fetch(0, slot)

    @pl.when(r + 1 < nt)
    def _():
        start_fetch((r + 1) * th, 1 - slot)

    pltpu.make_async_copy(x_hbm.at[n, pl.ds(r0, th + 2)],
                          xbuf.at[slot], sem.at[slot]).wait()

    if fused:
        # Previous layer's BN+ReLU on the pre-BN tile, then force the spatial
        # zero-padding positions back to 0 (relu(0*sc+sh) != 0 in general).
        raw = xbuf[slot]
        h = jnp.maximum(raw.astype(jnp.float32) * sc_ref[0] + sh_ref[0], 0.0)
        hbuf[...] = h.astype(jnp.bfloat16)
        hbuf[:, 0:1, :] = jnp.zeros((th + 2, 1, cin_p), jnp.bfloat16)
        hbuf[:, W + 1:Wp, :] = jnp.zeros((th + 2, Wp - W - 1, cin_p), jnp.bfloat16)

        @pl.when(r == 0)
        def _():
            hbuf[0:1] = jnp.zeros((1, Wp, cin_p), jnp.bfloat16)

        @pl.when(r == nt - 1)
        def _():
            hbuf[th + 1:th + 2] = jnp.zeros((1, Wp, cin_p), jnp.bfloat16)

        xin = hbuf[...]
    else:
        xin = xbuf[slot]

    # K-slab over the three dy taps (Wp % 8 == 0 -> reshapes are layout no-ops).
    rows = [xin[dy:dy + th].reshape(th * Wp, cin_p) for dy in range(3)]
    slab = jnp.concatenate(rows, axis=-1)            # (th*Wp, 3*Cin_p) bf16

    w = w_ref[...]
    acc = jnp.dot(slab, w[:, 0:cout_p],
                  preferred_element_type=jnp.float32
                  ).reshape(th, Wp, cout_p)[:, 0:W]
    acc = acc + jnp.dot(slab, w[:, cout_p:2 * cout_p],
                        preferred_element_type=jnp.float32
                        ).reshape(th, Wp, cout_p)[:, 1:W + 1]
    acc = acc + jnp.dot(slab, w[:, 2 * cout_p:3 * cout_p],
                        preferred_element_type=jnp.float32
                        ).reshape(th, Wp, cout_p)[:, 2:W + 2]

    y_ref[0] = acc.astype(y_ref.dtype)               # bf16 pre-BN output

    # One-pass BN partial stats (from the f32 accumulator).
    flat = acc.reshape(th * W, cout_p)
    s = jnp.sum(flat, axis=0, keepdims=True)
    sq = jnp.sum(flat * flat, axis=0, keepdims=True)
    st_ref[0] = jnp.concatenate([s, sq], axis=0)


def _conv_layer(xp, wmat, cout_p, *, H, W, th, scale=None, shift=None):
    N, Hp, Wp, cin_p = xp.shape
    nt = H // th
    fused = scale is not None

    kern = functools.partial(_conv3x3_kernel, fused=fused, H=H, W=W, th=th,
                             nt=nt, cin_p=cin_p, cout_p=cout_p)

    in_specs = [pl.BlockSpec(memory_space=pl.ANY),
                pl.BlockSpec((3 * cin_p, 3 * cout_p), lambda n, r: (0, 0))]
    inputs = [xp, wmat]
    if fused:
        in_specs += [pl.BlockSpec((1, cin_p), lambda n, r: (0, 0)),
                     pl.BlockSpec((1, cin_p), lambda n, r: (0, 0))]
        inputs += [scale, shift]

    scratch = [pltpu.VMEM((2, th + 2, Wp, cin_p), jnp.bfloat16)]
    if fused:
        scratch.append(pltpu.VMEM((th + 2, Wp, cin_p), jnp.bfloat16))
    scratch.append(pltpu.SemaphoreType.DMA((2,)))

    flops = 2 * N * H * Wp * (3 * cin_p) * (3 * cout_p)
    bytes_accessed = (xp.size * 2 + wmat.size * 2
                      + N * H * W * cout_p * 2 + N * nt * 2 * cout_p * 4)

    return pl.pallas_call(
        kern,
        out_shape=(jax.ShapeDtypeStruct((N, H, W, cout_p), jnp.bfloat16),
                   jax.ShapeDtypeStruct((N * nt, 2, cout_p), jnp.float32)),
        grid=(N, nt),
        in_specs=in_specs,
        out_specs=(pl.BlockSpec((1, th, W, cout_p), lambda n, r: (n, r, 0, 0)),
                   pl.BlockSpec((1, 2, cout_p), lambda n, r: (n * nt + r, 0, 0))),
        scratch_shapes=scratch,
        compiler_params=pltpu.CompilerParams(
            dimension_semantics=("parallel", "arbitrary"),
            vmem_limit_bytes=VMEM_LIMIT),
        cost_estimate=pl.CostEstimate(flops=flops, transcendentals=0,
                                      bytes_accessed=bytes_accessed),
    )(*inputs)


# ---------------------------------------------------------------------------
# Final pointwise BN + ReLU, over large lane-dense flattened blocks.
# ---------------------------------------------------------------------------
def _affine_relu_kernel(y_ref, sc_ref, sh_ref, o_ref):
    y = y_ref[...].astype(jnp.float32)
    o_ref[...] = jnp.maximum(y * sc_ref[0] + sh_ref[0], 0.0).astype(o_ref.dtype)


def _affine_relu(y2d, scale, shift, out_dtype, rb):
    tot, c_p = y2d.shape
    return pl.pallas_call(
        _affine_relu_kernel,
        out_shape=jax.ShapeDtypeStruct((tot, c_p), out_dtype),
        grid=(tot // rb,),
        in_specs=[pl.BlockSpec((rb, c_p), lambda i: (i, 0)),
                  pl.BlockSpec((1, c_p), lambda i: (0, 0)),
                  pl.BlockSpec((1, c_p), lambda i: (0, 0))],
        out_specs=pl.BlockSpec((rb, c_p), lambda i: (i, 0)),
        compiler_params=pltpu.CompilerParams(
            dimension_semantics=("parallel",),
            vmem_limit_bytes=VMEM_LIMIT),
    )(y2d, scale, shift)


# ---------------------------------------------------------------------------
# Wrappers
# ---------------------------------------------------------------------------
def _prep_weight(w, cin_p, cout_p):
    """Torch OIHW (Cout, Cin, 3, 3) -> (3*Cin_p, 3*Cout_p) bf16, K=(dy,ci), N=(dx,co)."""
    co, ci, kh, kw = w.shape
    wt = jnp.transpose(w, (2, 1, 3, 0))                      # (dy, ci, dx, co)
    wt = jnp.pad(wt, ((0, 0), (0, cin_p - ci), (0, 0), (0, cout_p - co)))
    return wt.reshape(3 * cin_p, 3 * cout_p).astype(jnp.bfloat16)


def _bn_scale_shift(pstats, gamma_p, beta_p, count):
    """Fold training-mode batch stats + affine params into scale/shift (f32)."""
    sums = jnp.sum(pstats, axis=0)                           # (2, C_p)
    mean = sums[0] / count
    var = jnp.maximum(sums[1] / count - mean * mean, 0.0)    # biased variance
    inv = jax.lax.rsqrt(var + EPS)
    scale = gamma_p * inv
    shift = beta_p - mean * scale
    return (scale.reshape(1, -1).astype(jnp.float32),
            shift.reshape(1, -1).astype(jnp.float32))


def unet_block(x_nchw, w1, g1, b1, w2, g2, b2):
    """x_nchw: (N, Cin, H, W) f32; w1: (Cmid, Cin, 3, 3); w2: (Cout, Cmid, 3, 3)."""
    N, Cin, H, W = x_nchw.shape
    Cmid, Cout = w1.shape[0], w2.shape[0]
    cin_p, cmid_p, cout_p = _round_up(Cin), _round_up(Cmid), _round_up(Cout)
    Wp = _round_up(W + 2, 8)                                 # sublane-aligned padded width
    count = N * H * W
    th = _pick_th(H, Wp, max(cin_p, cmid_p), max(cmid_p, cout_p))

    # Layer-1 input: NHWC, spatial zero-pad to (H+2, Wp), lane-dense channel pad, bf16.
    x = jnp.transpose(x_nchw, (0, 2, 3, 1))
    xpad = jnp.pad(x, ((0, 0), (1, 1), (1, Wp - 1 - W),
                       (0, cin_p - Cin))).astype(jnp.bfloat16)

    w1m = _prep_weight(w1, cin_p, cmid_p)
    w2m = _prep_weight(w2, cmid_p, cout_p)

    # ---- conv1 + BN1 batch stats ----
    y1, ps1 = _conv_layer(xpad, w1m, cmid_p, H=H, W=W, th=th)
    sc1, sh1 = _bn_scale_shift(ps1, jnp.pad(g1, (0, cmid_p - Cmid)),
                               jnp.pad(b1, (0, cmid_p - Cmid)), count)

    # ---- conv2 with BN1+ReLU fused onto its input + BN2 batch stats ----
    y1p = jnp.pad(y1, ((0, 0), (1, 1), (1, Wp - 1 - W), (0, 0)))   # bf16 pre-BN, padded coords
    y2, ps2 = _conv_layer(y1p, w2m, cout_p, H=H, W=W, th=th, scale=sc1, shift=sh1)
    sc2, sh2 = _bn_scale_shift(ps2, jnp.pad(g2, (0, cout_p - Cout)),
                               jnp.pad(b2, (0, cout_p - Cout)), count)

    # ---- final BN2 + ReLU over big flattened blocks ----
    tot = N * H * W
    rb = _pick_rows(tot)
    out2d = _affine_relu(y2.reshape(tot, cout_p), sc2, sh2, jnp.float32, rb)
    out = out2d.reshape(N, H, W, cout_p)[..., :Cout]
    return jnp.transpose(out, (0, 3, 1, 2))                  # back to NCHW


# ---------------------------------------------------------------------------
# Pure-JAX reference mirroring the PyTorch forward (training-mode BN, f32).
# ---------------------------------------------------------------------------
def reference(x, w1, g1, b1, w2, g2, b2):
    def conv(x, w):
        return jax.lax.conv_general_dilated(
            x, w, window_strides=(1, 1), padding=((1, 1), (1, 1)),
            dimension_numbers=('NCHW', 'OIHW', 'NCHW'))

    def bn_relu(x, g, b):
        mean = jnp.mean(x, axis=(0, 2, 3), keepdims=True)
        var = jnp.mean((x - mean) ** 2, axis=(0, 2, 3), keepdims=True)
        y = (x - mean) * jax.lax.rsqrt(var + EPS)
        y = y * g.reshape(1, -1, 1, 1) + b.reshape(1, -1, 1, 1)
        return jnp.maximum(y, 0.0)

    h = bn_relu(conv(x, w1), g1, b1)
    return bn_relu(conv(h, w2), g2, b2)


if __name__ == "__main__":
    N, Cin, Cout, H, W = 2, 4, 8, 16, 16

    key = jax.random.PRNGKey(0)
    kx, kw1, kw2 = jax.random.split(key, 3)

    x = jax.random.normal(kx, (N, Cin, H, W), jnp.float32)
    w1 = 0.1 * jax.random.normal(kw1, (Cout, Cin, 3, 3), jnp.float32)
    w2 = 0.1 * jax.random.normal(kw2, (Cout, Cout, 3, 3), jnp.float32)
    g1 = jnp.ones((Cout,), jnp.float32)   # bn1.weight (PyTorch default init)
    b1 = jnp.zeros((Cout,), jnp.float32)  # bn1.bias
    g2 = jnp.ones((Cout,), jnp.float32)   # bn2.weight
    b2 = jnp.zeros((Cout,), jnp.float32)  # bn2.bias

    out = jax.block_until_ready(jax.jit(unet_block)(x, w1, g1, b1, w2, g2, b2))
    ref = jax.block_until_ready(reference(x, w1, g1, b1, w2, g2, b2))

    # Tolerance sized for bf16 MXU operands / bf16 intermediates through two conv+BN layers.
    np.testing.assert_allclose(np.asarray(out), np.asarray(ref),
                               rtol=3e-2, atol=3e-2)

    print("KERNEL_OK")
</pallas_src>

<mosaic_0001>
module attributes {stable_mosaic.version = 11 : i64} {
  func.func @_conv3x3_kernel(%arg0: i32, %arg1: i32, %arg2: memref<2x18x24x128xbf16, #tpu.memory_space<any>>, %arg3: memref<384x384xbf16, #tpu.memory_space<vmem>>, %arg4: memref<1x16x16x128xbf16, #tpu.memory_space<vmem>>, %arg5: memref<1x2x128xf32, #tpu.memory_space<vmem>>, %arg6: memref<2x18x24x128xbf16, #tpu.memory_space<vmem>>, %arg7: memref<2x!tpu.dma_semaphore, #tpu.memory_space<semaphore_mem>>) attributes {dimension_semantics = [#tpu.dimension_semantics<parallel>, #tpu.dimension_semantics<arbitrary>], iteration_bounds = array<i64: 2, 1>, scalar_prefetch = 0 : i64, scratch_operands = 2 : i64, tpu.core_type = #tpu.core_type<tc>, window_params = [{}, {pipeline_mode = #tpu.pipeline_mode<synchronous>, transform_indices = @transform_1, window_bounds = array<i64: 384, 384>}, {transform_indices = @transform_2, window_bounds = array<i64: 1, 16, 16, 128>}, {transform_indices = @transform_3, window_bounds = array<i64: 1, 2, 128>}]} {
    %c16_i32 = arith.constant 16 : i32
    %0 = arith.muli %arg1, %c16_i32 : i32
    %c2_i32 = arith.constant 2 : i32
    %c0_i32 = arith.constant 0 : i32
    %1 = arith.cmpi eq, %c2_i32, %c0_i32 : i32
    %c1_i32 = arith.constant 1 : i32
    %2 = arith.select %1, %c1_i32, %c2_i32 : i32
    %3 = arith.remsi %arg1, %2 : i32
    %c0_i32_0 = arith.constant 0 : i32
    %4 = arith.cmpi ne, %3, %c0_i32_0 : i32
    %c0_i32_1 = arith.constant 0 : i32
    %5 = arith.cmpi slt, %3, %c0_i32_1 : i32
    %c0_i32_2 = arith.constant 0 : i32
    %6 = arith.cmpi slt, %2, %c0_i32_2 : i32
    %7 = arith.xori %5, %6 : i1
    %8 = arith.andi %7, %4 : i1
    %9 = arith.addi %3, %2 : i32
    %10 = arith.select %8, %9, %3 : i32
    %c0_i32_3 = arith.constant 0 : i32
    %11 = arith.cmpi eq, %arg1, %c0_i32_3 : i32
    %12 = arith.extui %11 : i1 to i32
    %c0_i32_4 = arith.constant 0 : i32
    %13 = arith.cmpi ne, %12, %c0_i32_4 : i32
    scf.if %13 {
      %c0_i32_28 = arith.constant 0 : i32
      %c0_i32_29 = arith.constant 0 : i32
      %c0_i32_30 = arith.constant 0 : i32
      %63 = tpu.memref_slice %arg2[%arg0, %c0_i32_28, %c0_i32_29, %c0_i32_30] : memref<2x18x24x128xbf16, #tpu.memory_space<any>> -> memref<1x18x24x128xbf16, #tpu.memory_space<any>>
      %64 = tpu.memref_squeeze %63 : memref<1x18x24x128xbf16, #tpu.memory_space<any>> -> memref<18x24x128xbf16, #tpu.memory_space<any>>
      %c0_i32_31 = arith.constant 0 : i32
      %c0_i32_32 = arith.constant 0 : i32
      %c0_i32_33 = arith.constant 0 : i32
      %65 = tpu.memref_slice %arg6[%10, %c0_i32_31, %c0_i32_32, %c0_i32_33] : memref<2x18x24x128xbf16, #tpu.memory_space<vmem>> -> memref<1x18x24x128xbf16, #tpu.memory_space<vmem>>
      %66 = tpu.memref_squeeze %65 : memref<1x18x24x128xbf16, #tpu.memory_space<vmem>> -> memref<18x24x128xbf16, #tpu.memory_space<vmem>>
      %67 = tpu.memref_slice %arg7[%10] : memref<2x!tpu.dma_semaphore, #tpu.memory_space<semaphore_mem>> -> memref<1x!tpu.dma_semaphore, #tpu.memory_space<semaphore_mem>>
      %68 = tpu.memref_squeeze %67 : memref<1x!tpu.dma_semaphore, #tpu.memory_space<semaphore_mem>> -> memref<!tpu.dma_semaphore, #tpu.memory_space<semaphore_mem>>
      tpu.enqueue_dma source(%64 : memref<18x24x128xbf16, #tpu.memory_space<any>>) target(%66 : memref<18x24x128xbf16, #tpu.memory_space<vmem>>) target_semaphore(%68 : memref<!tpu.dma_semaphore, #tpu.memory_space<semaphore_mem>>)
    } else {
    }
    %c1_i32_5 = arith.constant 1 : i32
    %14 = arith.addi %arg1, %c1_i32_5 : i32
    %c1_i32_6 = arith.constant 1 : i32
    %15 = arith.cmpi slt, %14, %c1_i32_6 : i32
    %16 = arith.extui %15 : i1 to i32
    %c0_i32_7 = arith.constant 0 : i32
    %17 = arith.cmpi ne, %16, %c0_i32_7 : i32
    scf.if %17 {
      %c1_i32_28 = arith.constant 1 : i32
      %63 = arith.addi %arg1, %c1_i32_28 : i32
      %c16_i32_29 = arith.constant 16 : i32
      %64 = arith.muli %63, %c16_i32_29 : i32
      %c1_i32_30 = arith.constant 1 : i32
      %65 = arith.subi %c1_i32_30, %10 : i32
      %c0_i32_31 = arith.constant 0 : i32
      %c0_i32_32 = arith.constant 0 : i32
      %66 = tpu.memref_slice %arg2[%arg0, %64, %c0_i32_31, %c0_i32_32] : memref<2x18x24x128xbf16, #tpu.memory_space<any>> -> memref<1x18x24x128xbf16, #tpu.memory_space<any>>
      %67 = tpu.memref_squeeze %66 : memref<1x18x24x128xbf16, #tpu.memory_space<any>> -> memref<18x24x128xbf16, #tpu.memory_space<any>>
      %c0_i32_33 = arith.constant 0 : i32
      %c0_i32_34 = arith.constant 0 : i32
      %c0_i32_35 = arith.constant 0 : i32
      %68 = tpu.memref_slice %arg6[%65, %c0_i32_33, %c0_i32_34, %c0_i32_35] : memref<2x18x24x128xbf16, #tpu.memory_space<vmem>> -> memref<1x18x24x128xbf16, #tpu.memory_space<vmem>>
      %69 = tpu.memref_squeeze %68 : memref<1x18x24x128xbf16, #tpu.memory_space<vmem>> -> memref<18x24x128xbf16, #tpu.memory_space<vmem>>
      %70 = tpu.memref_slice %arg7[%65] : memref<2x!tpu.dma_semaphore, #tpu.memory_space<semaphore_mem>> -> memref<1x!tpu.dma_semaphore, #tpu.memory_space<semaphore_mem>>
      %71 = tpu.memref_squeeze %70 : memref<1x!tpu.dma_semaphore, #tpu.memory_space<semaphore_mem>> -> memref<!tpu.dma_semaphore, #tpu.memory_space<semaphore_mem>>
      tpu.enqueue_dma source(%67 : memref<18x24x128xbf16, #tpu.memory_space<any>>) target(%69 : memref<18x24x128xbf16, #tpu.memory_space<vmem>>) target_semaphore(%71 : memref<!tpu.dma_semaphore, #tpu.memory_space<semaphore_mem>>)
    } else {
    }
    %c0_i32_8 = arith.constant 0 : i32
    %c0_i32_9 = arith.constant 0 : i32
    %18 = tpu.memref_slice %arg2[%arg0, %0, %c0_i32_8, %c0_i32_9] : memref<2x18x24x128xbf16, #tpu.memory_space<any>> -> memref<1x18x24x128xbf16, #tpu.memory_space<any>>
    %19 = tpu.memref_squeeze %18 : memref<1x18x24x128xbf16, #tpu.memory_space<any>> -> memref<18x24x128xbf16, #tpu.memory_space<any>>
    %c0_i32_10 = arith.constant 0 : i32
    %c0_i32_11 = arith.constant 0 : i32
    %c0_i32_12 = arith.constant 0 : i32
    %20 = tpu.memref_slice %arg6[%10, %c0_i32_10, %c0_i32_11, %c0_i32_12] : memref<2x18x24x128xbf16, #tpu.memory_space<vmem>> -> memref<1x18x24x128xbf16, #tpu.memory_space<vmem>>
    %21 = tpu.memref_squeeze %20 : memref<1x18x24x128xbf16, #tpu.memory_space<vmem>> -> memref<18x24x128xbf16, #tpu.memory_space<vmem>>
    %22 = tpu.memref_slice %arg7[%10] : memref<2x!tpu.dma_semaphore, #tpu.memory_space<semaphore_mem>> -> memref<1x!tpu.dma_semaphore, #tpu.memory_space<semaphore_mem>>
    %23 = tpu.memref_squeeze %22 : memref<1x!tpu.dma_semaphore, #tpu.memory_space<semaphore_mem>> -> memref<!tpu.dma_semaphore, #tpu.memory_space<semaphore_mem>>
    tpu.wait_dma2 semaphore(%23 : memref<!tpu.dma_semaphore, #tpu.memory_space<semaphore_mem>>) src(%19 : memref<18x24x128xbf16, #tpu.memory_space<any>>) dst(%21 : memref<18x24x128xbf16, #tpu.memory_space<vmem>>)
    %24 = arith.index_cast %10 : i32 to index
    %c0 = arith.constant 0 : index
    %c0_13 = arith.constant 0 : index
    %c0_14 = arith.constant 0 : index
    %25 = vector.load %arg6[%24, %c0, %c0_13, %c0_14] : memref<2x18x24x128xbf16, #tpu.memory_space<vmem>>, vector<1x18x24x128xbf16>
    %26 = vector.shape_cast %25 : vector<1x18x24x128xbf16> to vector<18x24x128xbf16>
    %27 = vector.extract_strided_slice %26 {offsets = [0, 0, 0], sizes = [16, 24, 128], strides = [1, 1, 1]} : vector<18x24x128xbf16> to vector<16x24x128xbf16>
    %28 = vector.shape_cast %27 : vector<16x24x128xbf16> to vector<384x128xbf16>
    %29 = vector.extract_strided_slice %26 {offsets = [1, 0, 0], sizes = [16, 24, 128], strides = [1, 1, 1]} : vector<18x24x128xbf16> to vector<16x24x128xbf16>
    %30 = vector.shape_cast %29 : vector<16x24x128xbf16> to vector<384x128xbf16>
    %31 = vector.extract_strided_slice %26 {offsets = [2, 0, 0], sizes = [16, 24, 128], strides = [1, 1, 1]} : vector<18x24x128xbf16> to vector<16x24x128xbf16>
    %32 = vector.shape_cast %31 : vector<16x24x128xbf16> to vector<384x128xbf16>
    %33 = tpu.concatenate %28, %30, %32 in 1 : vector<384x128xbf16>, vector<384x128xbf16>, vector<384x128xbf16> -> vector<384x384xbf16>
    %c0_15 = arith.constant 0 : index
    %c0_16 = arith.constant 0 : index
    %34 = vector.load %arg3[%c0_15, %c0_16] : memref<384x384xbf16, #tpu.memory_space<vmem>>, vector<384x384xbf16>
    %35 = vector.extract_strided_slice %34 {offsets = [0, 0], sizes = [384, 128], strides = [1, 1]} : vector<384x384xbf16> to vector<384x128xbf16>
    %cst = arith.constant dense<0.000000e+00> : vector<384x128xf32>
    %36 = tpu.matmul %33, %35, %cst {dimension_numbers = #tpu.dot_dimension_numbers<[1], [0], [0], [1], [0, 0, 1, 1], [], []>} : vector<384x384xbf16>, vector<384x128xbf16>, vector<384x128xf32> -> vector<384x128xf32>
    %37 = vector.shape_cast %36 : vector<384x128xf32> to vector<16x24x128xf32>
    %38 = vector.extract_strided_slice %37 {offsets = [0, 0, 0], sizes = [16, 16, 128], strides = [1, 1, 1]} : vector<16x24x128xf32> to vector<16x16x128xf32>
    %39 = vector.extract_strided_slice %34 {offsets = [0, 128], sizes = [384, 128], strides = [1, 1]} : vector<384x384xbf16> to vector<384x128xbf16>
    %cst_17 = arith.constant dense<0.000000e+00> : vector<384x128xf32>
    %40 = tpu.matmul %33, %39, %cst_17 {dimension_numbers = #tpu.dot_dimension_numbers<[1], [0], [0], [1], [0, 0, 1, 1], [], []>} : vector<384x384xbf16>, vector<384x128xbf16>, vector<384x128xf32> -> vector<384x128xf32>
    %41 = vector.shape_cast %40 : vector<384x128xf32> to vector<16x24x128xf32>
    %42 = vector.extract_strided_slice %41 {offsets = [0, 1, 0], sizes = [16, 16, 128], strides = [1, 1, 1]} : vector<16x24x128xf32> to vector<16x16x128xf32>
    %43 = arith.addf %38, %42 : vector<16x16x128xf32>
    %44 = vector.extract_strided_slice %34 {offsets = [0, 256], sizes = [384, 128], strides = [1, 1]} : vector<384x384xbf16> to vector<384x128xbf16>
    %cst_18 = arith.constant dense<0.000000e+00> : vector<384x128xf32>
    %45 = tpu.matmul %33, %44, %cst_18 {dimension_numbers = #tpu.dot_dimension_numbers<[1], [0], [0], [1], [0, 0, 1, 1], [], []>} : vector<384x384xbf16>, vector<384x128xbf16>, vector<384x128xf32> -> vector<384x128xf32>
    %46 = vector.shape_cast %45 : vector<384x128xf32> to vector<16x24x128xf32>
    %47 = vector.extract_strided_slice %46 {offsets = [0, 2, 0], sizes = [16, 16, 128], strides = [1, 1, 1]} : vector<16x24x128xf32> to vector<16x16x128xf32>
    %48 = arith.addf %43, %47 : vector<16x16x128xf32>
    %49 = arith.truncf %48 : vector<16x16x128xf32> to vector<16x16x128xbf16>
    %c0_19 = arith.constant 0 : index
    %c0_20 = arith.constant 0 : index
    %c0_21 = arith.constant 0 : index
    %c0_22 = arith.constant 0 : index
    %50 = vector.load %arg4[%c0_19, %c0_20, %c0_21, %c0_22] : memref<1x16x16x128xbf16, #tpu.memory_space<vmem>>, vector<1x16x16x128xbf16>
    %51 = vector.shape_cast %50 : vector<1x16x16x128xbf16> to vector<16x16x128xbf16>
    %52 = vector.shape_cast %49 : vector<16x16x128xbf16> to vector<1x16x16x128xbf16>
    tpu.vector_store %arg4[%c0_19, %c0_20, %c0_21, %c0_22], %52 {strides = array<i32>} : memref<1x16x16x128xbf16, #tpu.memory_space<vmem>>, vector<1x16x16x128xbf16>,
    %53 = vector.shape_cast %48 : vector<16x16x128xf32> to vector<256x128xf32>
    %cst_23 = arith.constant dense<0.000000e+00> : vector<128xf32>
    %54 = vector.multi_reduction <add>, %53, %cst_23 [0] : vector<256x128xf32> to vector<128xf32>
    %55 = vector.shape_cast %54 : vector<128xf32> to vector<1x128xf32>
    %56 = arith.mulf %53, %53 : vector<256x128xf32>
    %cst_24 = arith.constant dense<0.000000e+00> : vector<128xf32>
    %57 = vector.multi_reduction <add>, %56, %cst_24 [0] : vector<256x128xf32> to vector<128xf32>
    %58 = vector.shape_cast %57 : vector<128xf32> to vector<1x128xf32>
    %59 = tpu.concatenate %55, %58 in 0 : vector<1x128xf32>, vector<1x128xf32> -> vector<2x128xf32>
    %c0_25 = arith.constant 0 : index
    %c0_26 = arith.constant 0 : index
    %c0_27 = arith.constant 0 : index
    %60 = vector.load %arg5[%c0_25, %c0_26, %c0_27] : memref<1x2x128xf32, #tpu.memory_space<vmem>>, vector<1x2x128xf32>
    %61 = vector.shape_cast %60 : vector<1x2x128xf32> to vector<2x128xf32>
    %62 = vector.shape_cast %59 : vector<2x128xf32> to vector<1x2x128xf32>
    tpu.vector_store %arg5[%c0_25, %c0_26, %c0_27], %62 {strides = array<i32>} : memref<1x2x128xf32, #tpu.memory_space<vmem>>, vector<1x2x128xf32>,
    return
  }
  func.func @transform_1(%arg0: i32, %arg1: i32) -> (i32, i32) {
    %c0_i32 = arith.constant 0 : i32
    %c0_i32_0 = arith.constant 0 : i32
    %c0_i32_1 = arith.constant 0 : i32
    return %c0_i32, %c0_i32_0 : i32, i32
  }
  func.func @transform_2(%arg0: i32, %arg1: i32) -> (i32, i32, i32, i32) {
    %c0_i32 = arith.constant 0 : i32
    %c0_i32_0 = arith.constant 0 : i32
    %c0_i32_1 = arith.constant 0 : i32
    return %arg0, %arg1, %c0_i32, %c0_i32_0 : i32, i32, i32, i32
  }
  func.func @transform_3(%arg0: i32, %arg1: i32) -> (i32, i32, i32) {
    %c1_i32 = arith.constant 1 : i32
    %0 = arith.muli %arg0, %c1_i32 : i32
    %1 = arith.addi %0, %arg1 : i32
    %c0_i32 = arith.constant 0 : i32
    %c0_i32_0 = arith.constant 0 : i32
    %c0_i32_1 = arith.constant 0 : i32
    return %1, %c0_i32, %c0_i32_0 : i32, i32, i32
  }
}

module attributes {stable_mosaic.version = 11 : i64} {
  func.func @_affine_relu_kernel(%arg0: i32, %arg1: memref<512x128xbf16, #tpu.memory_space<vmem>>, %arg2: memref<1x128xf32, #tpu.memory_space<vmem>>, %arg3: memref<1x128xf32, #tpu.memory_space<vmem>>, %arg4: memref<512x128xf32, #tpu.memory_space<vmem>>) attributes {dimension_semantics = [#tpu.dimension_semantics<parallel>], iteration_bounds = array<i64: 1>, scalar_prefetch = 0 : i64, scratch_operands = 0 : i64, tpu.core_type = #tpu.core_type<tc>, window_params = [{transform_indices = @transform_0, window_bounds = array<i64: 512, 128>}, {pipeline_mode = #tpu.pipeline_mode<synchronous>, transform_indices = @transform_1, window_bounds = array<i64: 1, 128>}, {pipeline_mode = #tpu.pipeline_mode<synchronous>, transform_indices = @transform_2, window_bounds = array<i64: 1, 128>}, {transform_indices = @transform_3, window_bounds = array<i64: 512, 128>}]} {
    %c0 = arith.constant 0 : index
    %c0_0 = arith.constant 0 : index
    %0 = vector.load %arg1[%c0, %c0_0] : memref<512x128xbf16, #tpu.memory_space<vmem>>, vector<512x128xbf16>
    %1 = arith.extf %0 : vector<512x128xbf16> to vector<512x128xf32>
    %c0_1 = arith.constant 0 : index
    %c0_2 = arith.constant 0 : index
    %2 = vector.load %arg2[%c0_1, %c0_2] : memref<1x128xf32, #tpu.memory_space<vmem>>, vector<1x128xf32>
    %3 = vector.shape_cast %2 : vector<1x128xf32> to vector<128xf32>
    %4 = vector.shape_cast %3 : vector<128xf32> to vector<1x128xf32>
    %5 = vector.broadcast %4 : vector<1x128xf32> to vector<512x128xf32>
    %6 = arith.mulf %1, %5 : vector<512x128xf32>
    %c0_3 = arith.constant 0 : index
    %c0_4 = arith.constant 0 : index
    %7 = vector.load %arg3[%c0_3, %c0_4] : memref<1x128xf32, #tpu.memory_space<vmem>>, vector<1x128xf32>
    %8 = vector.shape_cast %7 : vector<1x128xf32> to vector<128xf32>
    %9 = vector.shape_cast %8 : vector<128xf32> to vector<1x128xf32>
    %10 = vector.broadcast %9 : vector<1x128xf32> to vector<512x128xf32>
    %11 = arith.addf %6, %10 : vector<512x128xf32>
    %cst = arith.constant 0.000000e+00 : f32
    %12 = vector.broadcast %cst : f32 to vector<512x128xf32>
    %13 = arith.maximumf %11, %12 : vector<512x128xf32>
    %c0_5 = arith.constant 0 : index
    %c0_6 = arith.constant 0 : index
    %14 = vector.load %arg4[%c0_5, %c0_6] : memref<512x128xf32, #tpu.memory_space<vmem>>, vector<512x128xf32>
    tpu.vector_store %arg4[%c0_5, %c0_6], %13 {strides = array<i32>} : memref<512x128xf32, #tpu.memory_space<vmem>>, vector<512x128xf32>,
    return
  }
  func.func @transform_0(%arg0: i32) -> (i32, i32) {
    %c0_i32 = arith.constant 0 : i32
    %c0_i32_0 = arith.constant 0 : i32
    return %arg0, %c0_i32 : i32, i32
  }
  func.func @transform_1(%arg0: i32) -> (i32, i32) {
    %c0_i32 = arith.constant 0 : i32
    %c0_i32_0 = arith.constant 0 : i32
    %c0_i32_1 = arith.constant 0 : i32
    return %c0_i32, %c0_i32_0 : i32, i32
  }
  func.func @transform_2(%arg0: i32) -> (i32, i32) {
    %c0_i32 = arith.constant 0 : i32
    %c0_i32_0 = arith.constant 0 : i32
    %c0_i32_1 = arith.constant 0 : i32
    return %c0_i32, %c0_i32_0 : i32, i32
  }
  func.func @transform_3(%arg0: i32) -> (i32, i32) {
    %c0_i32 = arith.constant 0 : i32
    %c0_i32_0 = arith.constant 0 : i32
    return %arg0, %c0_i32 : i32, i32
  }
}

module attributes {stable_mosaic.version = 11 : i64} {
  func.func @_conv3x3_kernel(%arg0: i32, %arg1: i32, %arg2: memref<2x18x24x128xbf16, #tpu.memory_space<any>>, %arg3: memref<384x384xbf16, #tpu.memory_space<vmem>>, %arg4: memref<1x128xf32, #tpu.memory_space<vmem>>, %arg5: memref<1x128xf32, #tpu.memory_space<vmem>>, %arg6: memref<1x16x16x128xbf16, #tpu.memory_space<vmem>>, %arg7: memref<1x2x128xf32, #tpu.memory_space<vmem>>, %arg8: memref<2x18x24x128xbf16, #tpu.memory_space<vmem>>, %arg9: memref<18x24x128xbf16, #tpu.memory_space<vmem>>, %arg10: memref<2x!tpu.dma_semaphore, #tpu.memory_space<semaphore_mem>>) attributes {dimension_semantics = [#tpu.dimension_semantics<parallel>, #tpu.dimension_semantics<arbitrary>], iteration_bounds = array<i64: 2, 1>, scalar_prefetch = 0 : i64, scratch_operands = 3 : i64, tpu.core_type = #tpu.core_type<tc>, window_params = [{}, {pipeline_mode = #tpu.pipeline_mode<synchronous>, transform_indices = @transform_1, window_bounds = array<i64: 384, 384>}, {pipeline_mode = #tpu.pipeline_mode<synchronous>, transform_indices = @transform_2, window_bounds = array<i64: 1, 128>}, {pipeline_mode = #tpu.pipeline_mode<synchronous>, transform_indices = @transform_3, window_bounds = array<i64: 1, 128>}, {transform_indices = @transform_4, window_bounds = array<i64: 1, 16, 16, 128>}, {transform_indices = @transform_5, window_bounds = array<i64: 1, 2, 128>}]} {
    %c16_i32 = arith.constant 16 : i32
    %0 = arith.muli %arg1, %c16_i32 : i32
    %c2_i32 = arith.constant 2 : i32
    %c0_i32 = arith.constant 0 : i32
    %1 = arith.cmpi eq, %c2_i32, %c0_i32 : i32
    %c1_i32 = arith.constant 1 : i32
    %2 = arith.select %1, %c1_i32, %c2_i32 : i32
    %3 = arith.remsi %arg1, %2 : i32
    %c0_i32_0 = arith.constant 0 : i32
    %4 = arith.cmpi ne, %3, %c0_i32_0 : i32
    %c0_i32_1 = arith.constant 0 : i32
    %5 = arith.cmpi slt, %3, %c0_i32_1 : i32
    %c0_i32_2 = arith.constant 0 : i32
    %6 = arith.cmpi slt, %2, %c0_i32_2 : i32
    %7 = arith.xori %5, %6 : i1
    %8 = arith.andi %7, %4 : i1
    %9 = arith.addi %3, %2 : i32
    %10 = arith.select %8, %9, %3 : i32
    %c0_i32_3 = arith.constant 0 : i32
    %11 = arith.cmpi eq, %arg1, %c0_i32_3 : i32
    %12 = arith.extui %11 : i1 to i32
    %c0_i32_4 = arith.constant 0 : i32
    %13 = arith.cmpi ne, %12, %c0_i32_4 : i32
    scf.if %13 {
      %c0_i32_50 = arith.constant 0 : i32
      %c0_i32_51 = arith.constant 0 : i32
      %c0_i32_52 = arith.constant 0 : i32
      %89 = tpu.memref_slice %arg2[%arg0, %c0_i32_50, %c0_i32_51, %c0_i32_52] : memref<2x18x24x128xbf16, #tpu.memory_space<any>> -> memref<1x18x24x128xbf16, #tpu.memory_space<any>>
      %90 = tpu.memref_squeeze %89 : memref<1x18x24x128xbf16, #tpu.memory_space<any>> -> memref<18x24x128xbf16, #tpu.memory_space<any>>
      %c0_i32_53 = arith.constant 0 : i32
      %c0_i32_54 = arith.constant 0 : i32
      %c0_i32_55 = arith.constant 0 : i32
      %91 = tpu.memref_slice %arg8[%10, %c0_i32_53, %c0_i32_54, %c0_i32_55] : memref<2x18x24x128xbf16, #tpu.memory_space<vmem>> -> memref<1x18x24x128xbf16, #tpu.memory_space<vmem>>
      %92 = tpu.memref_squeeze %91 : memref<1x18x24x128xbf16, #tpu.memory_space<vmem>> -> memref<18x24x128xbf16, #tpu.memory_space<vmem>>
      %93 = tpu.memref_slice %arg10[%10] : memref<2x!tpu.dma_semaphore, #tpu.memory_space<semaphore_mem>> -> memref<1x!tpu.dma_semaphore, #tpu.memory_space<semaphore_mem>>
      %94 = tpu.memref_squeeze %93 : memref<1x!tpu.dma_semaphore, #tpu.memory_space<semaphore_mem>> -> memref<!tpu.dma_semaphore, #tpu.memory_space<semaphore_mem>>
      tpu.enqueue_dma source(%90 : memref<18x24x128xbf16, #tpu.memory_space<any>>) target(%92 : memref<18x24x128xbf16, #tpu.memory_space<vmem>>) target_semaphore(%94 : memref<!tpu.dma_semaphore, #tpu.memory_space<semaphore_mem>>)
    } else {
    }
    %c1_i32_5 = arith.constant 1 : i32
    %14 = arith.addi %arg1, %c1_i32_5 : i32
    %c1_i32_6 = arith.constant 1 : i32
    %15 = arith.cmpi slt, %14, %c1_i32_6 : i32
    %16 = arith.extui %15 : i1 to i32
    %c0_i32_7 = arith.constant 0 : i32
    %17 = arith.cmpi ne, %16, %c0_i32_7 : i32
    scf.if %17 {
      %c1_i32_50 = arith.constant 1 : i32
      %89 = arith.addi %arg1, %c1_i32_50 : i32
      %c16_i32_51 = arith.constant 16 : i32
      %90 = arith.muli %89, %c16_i32_51 : i32
      %c1_i32_52 = arith.constant 1 : i32
      %91 = arith.subi %c1_i32_52, %10 : i32
      %c0_i32_53 = arith.constant 0 : i32
      %c0_i32_54 = arith.constant 0 : i32
      %92 = tpu.memref_slice %arg2[%arg0, %90, %c0_i32_53, %c0_i32_54] : memref<2x18x24x128xbf16, #tpu.memory_space<any>> -> memref<1x18x24x128xbf16, #tpu.memory_space<any>>
      %93 = tpu.memref_squeeze %92 : memref<1x18x24x128xbf16, #tpu.memory_space<any>> -> memref<18x24x128xbf16, #tpu.memory_space<any>>
      %c0_i32_55 = arith.constant 0 : i32
      %c0_i32_56 = arith.constant 0 : i32
      %c0_i32_57 = arith.constant 0 : i32
      %94 = tpu.memref_slice %arg8[%91, %c0_i32_55, %c0_i32_56, %c0_i32_57] : memref<2x18x24x128xbf16, #tpu.memory_space<vmem>> -> memref<1x18x24x128xbf16, #tpu.memory_space<vmem>>
      %95 = tpu.memref_squeeze %94 : memref<1x18x24x128xbf16, #tpu.memory_space<vmem>> -> memref<18x24x128xbf16, #tpu.memory_space<vmem>>
      %96 = tpu.memref_slice %arg10[%91] : memref<2x!tpu.dma_semaphore, #tpu.memory_space<semaphore_mem>> -> memref<1x!tpu.dma_semaphore, #tpu.memory_space<semaphore_mem>>
      %97 = tpu.memref_squeeze %96 : memref<1x!tpu.dma_semaphore, #tpu.memory_space<semaphore_mem>> -> memref<!tpu.dma_semaphore, #tpu.memory_space<semaphore_mem>>
      tpu.enqueue_dma source(%93 : memref<18x24x128xbf16, #tpu.memory_space<any>>) target(%95 : memref<18x24x128xbf16, #tpu.memory_space<vmem>>) target_semaphore(%97 : memref<!tpu.dma_semaphore, #tpu.memory_space<semaphore_mem>>)
    } else {
    }
    %c0_i32_8 = arith.constant 0 : i32
    %c0_i32_9 = arith.constant 0 : i32
    %18 = tpu.memref_slice %arg2[%arg0, %0, %c0_i32_8, %c0_i32_9] : memref<2x18x24x128xbf16, #tpu.memory_space<any>> -> memref<1x18x24x128xbf16, #tpu.memory_space<any>>
    %19 = tpu.memref_squeeze %18 : memref<1x18x24x128xbf16, #tpu.memory_space<any>> -> memref<18x24x128xbf16, #tpu.memory_space<any>>
    %c0_i32_10 = arith.constant 0 : i32
    %c0_i32_11 = arith.constant 0 : i32
    %c0_i32_12 = arith.constant 0 : i32
    %20 = tpu.memref_slice %arg8[%10, %c0_i32_10, %c0_i32_11, %c0_i32_12] : memref<2x18x24x128xbf16, #tpu.memory_space<vmem>> -> memref<1x18x24x128xbf16, #tpu.memory_space<vmem>>
    %21 = tpu.memref_squeeze %20 : memref<1x18x24x128xbf16, #tpu.memory_space<vmem>> -> memref<18x24x128xbf16, #tpu.memory_space<vmem>>
    %22 = tpu.memref_slice %arg10[%10] : memref<2x!tpu.dma_semaphore, #tpu.memory_space<semaphore_mem>> -> memref<1x!tpu.dma_semaphore, #tpu.memory_space<semaphore_mem>>
    %23 = tpu.memref_squeeze %22 : memref<1x!tpu.dma_semaphore, #tpu.memory_space<semaphore_mem>> -> memref<!tpu.dma_semaphore, #tpu.memory_space<semaphore_mem>>
    tpu.wait_dma2 semaphore(%23 : memref<!tpu.dma_semaphore, #tpu.memory_space<semaphore_mem>>) src(%19 : memref<18x24x128xbf16, #tpu.memory_space<any>>) dst(%21 : memref<18x24x128xbf16, #tpu.memory_space<vmem>>)
    %24 = arith.index_cast %10 : i32 to index
    %c0 = arith.constant 0 : index
    %c0_13 = arith.constant 0 : index
    %c0_14 = arith.constant 0 : index
    %25 = vector.load %arg8[%24, %c0, %c0_13, %c0_14] : memref<2x18x24x128xbf16, #tpu.memory_space<vmem>>, vector<1x18x24x128xbf16>
    %26 = vector.shape_cast %25 : vector<1x18x24x128xbf16> to vector<18x24x128xbf16>
    %27 = arith.extf %26 : vector<18x24x128xbf16> to vector<18x24x128xf32>
    %c0_15 = arith.constant 0 : index
    %c0_16 = arith.constant 0 : index
    %28 = vector.load %arg4[%c0_15, %c0_16] : memref<1x128xf32, #tpu.memory_space<vmem>>, vector<1x128xf32>
    %29 = vector.shape_cast %28 : vector<1x128xf32> to vector<128xf32>
    %30 = vector.shape_cast %29 : vector<128xf32> to vector<1x1x128xf32>
    %31 = vector.broadcast %30 : vector<1x1x128xf32> to vector<18x24x128xf32>
    %32 = arith.mulf %27, %31 : vector<18x24x128xf32>
    %c0_17 = arith.constant 0 : index
    %c0_18 = arith.constant 0 : index
    %33 = vector.load %arg5[%c0_17, %c0_18] : memref<1x128xf32, #tpu.memory_space<vmem>>, vector<1x128xf32>
    %34 = vector.shape_cast %33 : vector<1x128xf32> to vector<128xf32>
    %35 = vector.shape_cast %34 : vector<128xf32> to vector<1x1x128xf32>
    %36 = vector.broadcast %35 : vector<1x1x128xf32> to vector<18x24x128xf32>
    %37 = arith.addf %32, %36 : vector<18x24x128xf32>
    %cst = arith.constant 0.000000e+00 : f32
    %38 = vector.broadcast %cst : f32 to vector<18x24x128xf32>
    %39 = arith.maximumf %37, %38 : vector<18x24x128xf32>
    %40 = arith.truncf %39 : vector<18x24x128xf32> to vector<18x24x128xbf16>
    %c0_19 = arith.constant 0 : index
    %c0_20 = arith.constant 0 : index
    %c0_21 = arith.constant 0 : index
    %41 = vector.load %arg9[%c0_19, %c0_20, %c0_21] : memref<18x24x128xbf16, #tpu.memory_space<vmem>>, vector<18x24x128xbf16>
    tpu.vector_store %arg9[%c0_19, %c0_20, %c0_21], %40 {strides = array<i32>} : memref<18x24x128xbf16, #tpu.memory_space<vmem>>, vector<18x24x128xbf16>,
    %cst_22 = arith.constant 0.000000e+00 : bf16
    %42 = vector.broadcast %cst_22 : bf16 to vector<18x1x128xbf16>
    %c0_23 = arith.constant 0 : index
    %c0_24 = arith.constant 0 : index
    %c0_25 = arith.constant 0 : index
    %43 = vector.load %arg9[%c0_23, %c0_24, %c0_25] : memref<18x24x128xbf16, #tpu.memory_space<vmem>>, vector<18x1x128xbf16>
    tpu.vector_store %arg9[%c0_23, %c0_24, %c0_25], %42 {strides = array<i32>} : memref<18x24x128xbf16, #tpu.memory_space<vmem>>, vector<18x1x128xbf16>,
    %cst_26 = arith.constant 0.000000e+00 : bf16
    %44 = vector.broadcast %cst_26 : bf16 to vector<18x7x128xbf16>
    %c0_27 = arith.constant 0 : index
    %c17 = arith.constant 17 : index
    %c0_28 = arith.constant 0 : index
    %45 = vector.load %arg9[%c0_27, %c17, %c0_28] : memref<18x24x128xbf16, #tpu.memory_space<vmem>>, vector<18x7x128xbf16>
    tpu.vector_store %arg9[%c0_27, %c17, %c0_28], %44 {strides = array<i32>} : memref<18x24x128xbf16, #tpu.memory_space<vmem>>, vector<18x7x128xbf16>,
    %c0_i32_29 = arith.constant 0 : i32
    %46 = arith.cmpi eq, %arg1, %c0_i32_29 : i32
    %47 = arith.extui %46 : i1 to i32
    %c0_i32_30 = arith.constant 0 : i32
    %48 = arith.cmpi ne, %47, %c0_i32_30 : i32
    scf.if %48 {
      %cst_50 = arith.constant 0.000000e+00 : bf16
      %89 = vector.broadcast %cst_50 : bf16 to vector<1x24x128xbf16>
      %c0_51 = arith.constant 0 : index
      %c0_52 = arith.constant 0 : index
      %c0_53 = arith.constant 0 : index
      %90 = vector.load %arg9[%c0_51, %c0_52, %c0_53] : memref<18x24x128xbf16, #tpu.memory_space<vmem>>, vector<1x24x128xbf16>
      tpu.vector_store %arg9[%c0_51, %c0_52, %c0_53], %89 {strides = array<i32>} : memref<18x24x128xbf16, #tpu.memory_space<vmem>>, vector<1x24x128xbf16>,
    } else {
    }
    %c0_i32_31 = arith.constant 0 : i32
    %49 = arith.cmpi eq, %arg1, %c0_i32_31 : i32
    %50 = arith.extui %49 : i1 to i32
    %c0_i32_32 = arith.constant 0 : i32
    %51 = arith.cmpi ne, %50, %c0_i32_32 : i32
    scf.if %51 {
      %cst_50 = arith.constant 0.000000e+00 : bf16
      %89 = vector.broadcast %cst_50 : bf16 to vector<1x24x128xbf16>
      %c17_51 = arith.constant 17 : index
      %c0_52 = arith.constant 0 : index
      %c0_53 = arith.constant 0 : index
      %90 = vector.load %arg9[%c17_51, %c0_52, %c0_53] : memref<18x24x128xbf16, #tpu.memory_space<vmem>>, vector<1x24x128xbf16>
      tpu.vector_store %arg9[%c17_51, %c0_52, %c0_53], %89 {strides = array<i32>} : memref<18x24x128xbf16, #tpu.memory_space<vmem>>, vector<1x24x128xbf16>,
    } else {
    }
    %c0_33 = arith.constant 0 : index
    %c0_34 = arith.constant 0 : index
    %c0_35 = arith.constant 0 : index
    %52 = vector.load %arg9[%c0_33, %c0_34, %c0_35] : memref<18x24x128xbf16, #tpu.memory_space<vmem>>, vector<18x24x128xbf16>
    %53 = vector.extract_strided_slice %52 {offsets = [0, 0, 0], sizes = [16, 24, 128], strides = [1, 1, 1]} : vector<18x24x128xbf16> to vector<16x24x128xbf16>
    %54 = vector.shape_cast %53 : vector<16x24x128xbf16> to vector<384x128xbf16>
    %55 = vector.extract_strided_slice %52 {offsets = [1, 0, 0], sizes = [16, 24, 128], strides = [1, 1, 1]} : vector<18x24x128xbf16> to vector<16x24x128xbf16>
    %56 = vector.shape_cast %55 : vector<16x24x128xbf16> to vector<384x128xbf16>
    %57 = vector.extract_strided_slice %52 {offsets = [2, 0, 0], sizes = [16, 24, 128], strides = [1, 1, 1]} : vector<18x24x128xbf16> to vector<16x24x128xbf16>
    %58 = vector.shape_cast %57 : vector<16x24x128xbf16> to vector<384x128xbf16>
    %59 = tpu.concatenate %54, %56, %58 in 1 : vector<384x128xbf16>, vector<384x128xbf16>, vector<384x128xbf16> -> vector<384x384xbf16>
    %c0_36 = arith.constant 0 : index
    %c0_37 = arith.constant 0 : index
    %60 = vector.load %arg3[%c0_36, %c0_37] : memref<384x384xbf16, #tpu.memory_space<vmem>>, vector<384x384xbf16>
    %61 = vector.extract_strided_slice %60 {offsets = [0, 0], sizes = [384, 128], strides = [1, 1]} : vector<384x384xbf16> to vector<384x128xbf16>
    %cst_38 = arith.constant dense<0.000000e+00> : vector<384x128xf32>
    %62 = tpu.matmul %59, %61, %cst_38 {dimension_numbers = #tpu.dot_dimension_numbers<[1], [0], [0], [1], [0, 0, 1, 1], [], []>} : vector<384x384xbf16>, vector<384x128xbf16>, vector<384x128xf32> -> vector<384x128xf32>
    %63 = vector.shape_cast %62 : vector<384x128xf32> to vector<16x24x128xf32>
    %64 = vector.extract_strided_slice %63 {offsets = [0, 0, 0], sizes = [16, 16, 128], strides = [1, 1, 1]} : vector<16x24x128xf32> to vector<16x16x128xf32>
    %65 = vector.extract_strided_slice %60 {offsets = [0, 128], sizes = [384, 128], strides = [1, 1]} : vector<384x384xbf16> to vector<384x128xbf16>
    %cst_39 = arith.constant dense<0.000000e+00> : vector<384x128xf32>
    %66 = tpu.matmul %59, %65, %cst_39 {dimension_numbers = #tpu.dot_dimension_numbers<[1], [0], [0], [1], [0, 0, 1, 1], [], []>} : vector<384x384xbf16>, vector<384x128xbf16>, vector<384x128xf32> -> vector<384x128xf32>
    %67 = vector.shape_cast %66 : vector<384x128xf32> to vector<16x24x128xf32>
    %68 = vector.extract_strided_slice %67 {offsets = [0, 1, 0], sizes = [16, 16, 128], strides = [1, 1, 1]} : vector<16x24x128xf32> to vector<16x16x128xf32>
    %69 = arith.addf %64, %68 : vector<16x16x128xf32>
    %70 = vector.extract_strided_slice %60 {offsets = [0, 256], sizes = [384, 128], strides = [1, 1]} : vector<384x384xbf16> to vector<384x128xbf16>
    %cst_40 = arith.constant dense<0.000000e+00> : vector<384x128xf32>
    %71 = tpu.matmul %59, %70, %cst_40 {dimension_numbers = #tpu.dot_dimension_numbers<[1], [0], [0], [1], [0, 0, 1, 1], [], []>} : vector<384x384xbf16>, vector<384x128xbf16>, vector<384x128xf32> -> vector<384x128xf32>
    %72 = vector.shape_cast %71 : vector<384x128xf32> to vector<16x24x128xf32>
    %73 = vector.extract_strided_slice %72 {offsets = [0, 2, 0], sizes = [16, 16, 128], strides = [1, 1, 1]} : vector<16x24x128xf32> to vector<16x16x128xf32>
    %74 = arith.addf %69, %73 : vector<16x16x128xf32>
    %75 = arith.truncf %74 : vector<16x16x128xf32> to vector<16x16x128xbf16>
    %c0_41 = arith.constant 0 : index
    %c0_42 = arith.constant 0 : index
    %c0_43 = arith.constant 0 : index
    %c0_44 = arith.constant 0 : index
    %76 = vector.load %arg6[%c0_41, %c0_42, %c0_43, %c0_44] : memref<1x16x16x128xbf16, #tpu.memory_space<vmem>>, vector<1x16x16x128xbf16>
    %77 = vector.shape_cast %76 : vector<1x16x16x128xbf16> to vector<16x16x128xbf16>
    %78 = vector.shape_cast %75 : vector<16x16x128xbf16> to vector<1x16x16x128xbf16>
    tpu.vector_store %arg6[%c0_41, %c0_42, %c0_43, %c0_44], %78 {strides = array<i32>} : memref<1x16x16x128xbf16, #tpu.memory_space<vmem>>, vector<1x16x16x128xbf16>,
    %79 = vector.shape_cast %74 : vector<16x16x128xf32> to vector<256x128xf32>
    %cst_45 = arith.constant dense<0.000000e+00> : vector<128xf32>
    %80 = vector.multi_reduction <add>, %79, %cst_45 [0] : vector<256x128xf32> to vector<128xf32>
    %81 = vector.shape_cast %80 : vector<128xf32> to vector<1x128xf32>
    %82 = arith.mulf %79, %79 : vector<256x128xf32>
    %cst_46 = arith.constant dense<0.000000e+00> : vector<128xf32>
    %83 = vector.multi_reduction <add>, %82, %cst_46 [0] : vector<256x128xf32> to vector<128xf32>
    %84 = vector.shape_cast %83 : vector<128xf32> to vector<1x128xf32>
    %85 = tpu.concatenate %81, %84 in 0 : vector<1x128xf32>, vector<1x128xf32> -> vector<2x128xf32>
    %c0_47 = arith.constant 0 : index
    %c0_48 = arith.constant 0 : index
    %c0_49 = arith.constant 0 : index
    %86 = vector.load %arg7[%c0_47, %c0_48, %c0_49] : memref<1x2x128xf32, #tpu.memory_space<vmem>>, vector<1x2x128xf32>
    %87 = vector.shape_cast %86 : vector<1x2x128xf32> to vector<2x128xf32>
    %88 = vector.shape_cast %85 : vector<2x128xf32> to vector<1x2x128xf32>
    tpu.vector_store %arg7[%c0_47, %c0_48, %c0_49], %88 {strides = array<i32>} : memref<1x2x128xf32, #tpu.memory_space<vmem>>, vector<1x2x128xf32>,
    return
  }
  func.func @transform_1(%arg0: i32, %arg1: i32) -> (i32, i32) {
    %c0_i32 = arith.constant 0 : i32
    %c0_i32_0 = arith.constant 0 : i32
    %c0_i32_1 = arith.constant 0 : i32
    return %c0_i32, %c0_i32_0 : i32, i32
  }
  func.func @transform_2(%arg0: i32, %arg1: i32) -> (i32, i32) {
    %c0_i32 = arith.constant 0 : i32
    %c0_i32_0 = arith.constant 0 : i32
    %c0_i32_1 = arith.constant 0 : i32
    return %c0_i32, %c0_i32_0 : i32, i32
  }
  func.func @transform_3(%arg0: i32, %arg1: i32) -> (i32, i32) {
    %c0_i32 = arith.constant 0 : i32
    %c0_i32_0 = arith.constant 0 : i32
    %c0_i32_1 = arith.constant 0 : i32
    return %c0_i32, %c0_i32_0 : i32, i32
  }
  func.func @transform_4(%arg0: i32, %arg1: i32) -> (i32, i32, i32, i32) {
    %c0_i32 = arith.constant 0 : i32
    %c0_i32_0 = arith.constant 0 : i32
    %c0_i32_1 = arith.constant 0 : i32
    return %arg0, %arg1, %c0_i32, %c0_i32_0 : i32, i32, i32, i32
  }
  func.func @transform_5(%arg0: i32, %arg1: i32) -> (i32, i32, i32) {
    %c1_i32 = arith.constant 1 : i32
    %0 = arith.muli %arg0, %c1_i32 : i32
    %1 = arith.addi %0, %arg1 : i32
    %c0_i32 = arith.constant 0 : i32
    %c0_i32_0 = arith.constant 0 : i32
    %c0_i32_1 = arith.constant 0 : i32
    return %1, %c0_i32, %c0_i32_0 : i32, i32, i32
  }
}

</mosaic_0001>

<bundles_post_ra>
// kernel: unet_block.5
= control target key start
LH: loop header
LB: loop body
LE: loop exit
PB: predicated region body
PF: predicated region fallthrough
CT: control target
= control target key end

     0   :  { %s1023_s0 = inlined_call_operand.vmem [shape: bf16[512,128], index: 0, kind: input, shape index: {}]   ;;  %s1024_s1 = inlined_call_operand.vmem [shape: f32[1,128], index: 1, kind: input, shape index: {}]   ;;  %s1025_s2 = inlined_call_operand.vmem [shape: f32[1,128], index: 2, kind: input, shape index: {}]   ;;  %s1026_s3 = inlined_call_operand.vmem [shape: f32[512,128], index: 3, kind: output, shape index: {}]  }
   0x1   :  { %v419_v0 = vld [vmem:[%s1023_s0] sm:$0xff]   ;;  %v546_v4 = vld [vmem:[%s1023_s0 + $0x8] sm:$0xff]   ;;  %v547_v5 = vld [vmem:[%s1023_s0 + $0x10] sm:$0xff]  }
   0x2   :  { %v603_v1 = vld [vmem:[%s1024_s1] ss:$0 sm:$0xff]  ;;  %v420_v2 = vunpack.c.l.bf16 %v419_v0  ;;  %v421_v3 = vunpack.c.h.bf16 %v419_v0  ;;  %v548_v6 = vld [vmem:[%s1023_s0 + $0x18] sm:$0xff]   ;;  %v424_v8 = vunpack.c.l.bf16 %v546_v4  ;;  %v425_v9 = vunpack.c.h.bf16 %v546_v4  ;;  %v550_v33 = vld [vmem:[%s1023_s0 + $0x28] sm:$0xff]  }
   0x3   :  { %v617_v7 = vld [vmem:[%s1025_s2] ss:$0 sm:$0xff]  ;;  %v428_v10 = vunpack.c.l.bf16 %v547_v5  ;;  %v429_v11 = vunpack.c.h.bf16 %v547_v5  ;;  %v432_v14 = vunpack.c.l.bf16 %v548_v6  ;;  %v433_v15 = vunpack.c.h.bf16 %v548_v6  ;;  %v551_v34 = vld [vmem:[%s1023_s0 + $0x30] sm:$0xff]   ;;  %v552_v39 = vld [vmem:[%s1023_s0 + $0x38] sm:$0xff]  }
   0x4   :  { %v149_v12 = vmul.f32 %v420_v2, %v603_v1  ;;  %v150_v13 = vmul.f32 %v421_v3, %v603_v1  ;;  %v151_v16 = vmul.f32 %v424_v8, %v603_v1  ;;  %v152_v17 = vmul.f32 %v425_v9, %v603_v1  ;;  %v549_v28 = vld [vmem:[%s1023_s0 + $0x20] sm:$0xff]   ;;  %v554_v6 = vld [vmem:[%s1023_s0 + $0x48] sm:$0xff]   ;;  %v555_v8 = vld [vmem:[%s1023_s0 + $0x50] sm:$0xff]  }
   0x5   :  { %v153_v18 = vmul.f32 %v428_v10, %v603_v1  ;;  %v154_v19 = vmul.f32 %v429_v11, %v603_v1  ;;  %v155_v22 = vmul.f32 %v432_v14, %v603_v1  ;;  %v156_v23 = vmul.f32 %v433_v15, %v603_v1  ;;  %v553_v0 = vld [vmem:[%s1023_s0 + $0x40] sm:$0xff]  }
   0x6   :  { %v220_v20 = vadd.f32 %v617_v7, %v149_v12  ;;  %v221_v21 = vadd.f32 %v617_v7, %v150_v13  ;;  %v222_v24 = vadd.f32 %v617_v7, %v151_v16  ;;  %v223_v25 = vadd.f32 %v617_v7, %v152_v17  ;;  %v556_v13 = vld [vmem:[%s1023_s0 + $0x58] sm:$0xff]  }
   0x7   :  { %v224_v26 = vadd.f32 %v617_v7, %v153_v18  ;;  %v225_v27 = vadd.f32 %v617_v7, %v154_v19  ;;  %v226_v31 = vadd.f32 %v617_v7, %v155_v22  ;;  %v227_v32 = vadd.f32 %v617_v7, %v156_v23 }
   0x8   :  { %v284_v29 = vmax.f32 %v220_v20, 0.0  ;;  %v285_v30 = vmax.f32 %v221_v21, 0.0  ;;  %v286_v35 = vmax.f32 %v222_v24, 0.0  ;;  %v287_v36 = vmax.f32 %v223_v25, 0.0 }
   0x9   :  { %v288_v37 = vmax.f32 %v224_v26, 0.0  ;;  %v289_v38 = vmax.f32 %v225_v27, 0.0  ;;  %v290_v40 = vmax.f32 %v226_v31, 0.0  ;;  %v291_v41 = vmax.f32 %v227_v32, 0.0 }
   0xa   :  { %348 = vst [vmem:[%s1026_s3] sm:$0xff] %v284_v29  ;;  %349 = vst [vmem:[%s1026_s3 + $0x8] sm:$0xff] %v285_v30  ;;  %v436_v42 = vunpack.c.l.bf16 %v549_v28  ;;  %v437_v43 = vunpack.c.h.bf16 %v549_v28  ;;  %v440_v44 = vunpack.c.l.bf16 %v550_v33  ;;  %v441_v45 = vunpack.c.h.bf16 %v550_v33 }
   0xb   :  { %350 = vst [vmem:[%s1026_s3 + $0x10] sm:$0xff] %v286_v35  ;;  %351 = vst [vmem:[%s1026_s3 + $0x18] sm:$0xff] %v287_v36  ;;  %v444_v46 = vunpack.c.l.bf16 %v551_v34  ;;  %v445_v47 = vunpack.c.h.bf16 %v551_v34  ;;  %v448_v50 = vunpack.c.l.bf16 %v552_v39  ;;  %v449_v51 = vunpack.c.h.bf16 %v552_v39 }
   0xc   :  { %352 = vst [vmem:[%s1026_s3 + $0x20] sm:$0xff] %v288_v37  ;;  %353 = vst [vmem:[%s1026_s3 + $0x28] sm:$0xff] %v289_v38  ;;  %v157_v48 = vmul.f32 %v436_v42, %v603_v1  ;;  %v158_v49 = vmul.f32 %v437_v43, %v603_v1  ;;  %v159_v52 = vmul.f32 %v440_v44, %v603_v1  ;;  %v452_v16 = vunpack.c.l.bf16 %v553_v0  ;;  %v557_v38 = vld [vmem:[%s1023_s0 + $0x60] sm:$0xff]   ;;  %v558_v43 = vld [vmem:[%s1023_s0 + $0x68] sm:$0xff]  }
   0xd   :  { %354 = vst [vmem:[%s1026_s3 + $0x30] sm:$0xff] %v290_v40  ;;  %355 = vst [vmem:[%s1026_s3 + $0x38] sm:$0xff] %v291_v41  ;;  %v160_v53 = vmul.f32 %v441_v45, %v603_v1  ;;  %v161_v54 = vmul.f32 %v444_v46, %v603_v1  ;;  %v162_v55 = vmul.f32 %v445_v47, %v603_v1  ;;  %v453_v17 = vunpack.c.h.bf16 %v553_v0  ;;  %v559_v44 = vld [vmem:[%s1023_s0 + $0x70] sm:$0xff]  }
   0xe   :  { %v228_v56 = vadd.f32 %v617_v7, %v157_v48  ;;  %v229_v57 = vadd.f32 %v617_v7, %v158_v49  ;;  %v163_v58 = vmul.f32 %v448_v50, %v603_v1  ;;  %v164_v59 = vmul.f32 %v449_v51, %v603_v1  ;;  %v560_v49 = vld [vmem:[%s1023_s0 + $0x78] sm:$0xff]  }
   0xf   :  { %v230_v60 = vadd.f32 %v617_v7, %v159_v52  ;;  %v231_v61 = vadd.f32 %v617_v7, %v160_v53  ;;  %v232_v62 = vadd.f32 %v617_v7, %v161_v54  ;;  %v233_v63 = vadd.f32 %v617_v7, %v162_v55 }
  0x10   :  { %v292_v2 = vmax.f32 %v228_v56, 0.0  ;;  %v293_v3 = vmax.f32 %v229_v57, 0.0  ;;  %v234_v4 = vadd.f32 %v617_v7, %v163_v58  ;;  %v235_v5 = vadd.f32 %v617_v7, %v164_v59 }
  0x11   :  { %v294_v9 = vmax.f32 %v230_v60, 0.0  ;;  %v295_v10 = vmax.f32 %v231_v61, 0.0  ;;  %v296_v11 = vmax.f32 %v232_v62, 0.0  ;;  %v297_v12 = vmax.f32 %v233_v63, 0.0 }
  0x12   :  { %356 = vst [vmem:[%s1026_s3 + $0x40] sm:$0xff] %v292_v2  ;;  %357 = vst [vmem:[%s1026_s3 + $0x48] sm:$0xff] %v293_v3  ;;  %v298_v14 = vmax.f32 %v234_v4, 0.0  ;;  %v299_v15 = vmax.f32 %v235_v5, 0.0  ;;  %v456_v18 = vunpack.c.l.bf16 %v554_v6  ;;  %v457_v19 = vunpack.c.h.bf16 %v554_v6 }
  0x13   :  { %358 = vst [vmem:[%s1026_s3 + $0x50] sm:$0xff] %v294_v9  ;;  %359 = vst [vmem:[%s1026_s3 + $0x58] sm:$0xff] %v295_v10  ;;  %v460_v20 = vunpack.c.l.bf16 %v555_v8  ;;  %v461_v21 = vunpack.c.h.bf16 %v555_v8  ;;  %v165_v22 = vmul.f32 %v452_v16, %v603_v1  ;;  %v166_v23 = vmul.f32 %v453_v17, %v603_v1  ;;  %v562_v17 = vld [vmem:[%s1023_s0 + $0x88] sm:$0xff]  }
  0x14   :  { %360 = vst [vmem:[%s1026_s3 + $0x60] sm:$0xff] %v296_v11  ;;  %361 = vst [vmem:[%s1026_s3 + $0x68] sm:$0xff] %v297_v12  ;;  %v464_v24 = vunpack.c.l.bf16 %v556_v13  ;;  %v465_v25 = vunpack.c.h.bf16 %v556_v13  ;;  %v167_v26 = vmul.f32 %v456_v18, %v603_v1  ;;  %v168_v27 = vmul.f32 %v457_v19, %v603_v1  ;;  %v561_v12 = vld [vmem:[%s1023_s0 + $0x80] sm:$0xff]   ;;  %v563_v18 = vld [vmem:[%s1023_s0 + $0x90] sm:$0xff]  }
  0x15   :  { %362 = vst [vmem:[%s1026_s3 + $0x70] sm:$0xff] %v298_v14  ;;  %363 = vst [vmem:[%s1026_s3 + $0x78] sm:$0xff] %v299_v15  ;;  %v169_v28 = vmul.f32 %v460_v20, %v603_v1  ;;  %v170_v29 = vmul.f32 %v461_v21, %v603_v1  ;;  %v236_v30 = vadd.f32 %v617_v7, %v165_v22  ;;  %v468_v52 = vunpack.c.l.bf16 %v557_v38 }
  0x16   :  { %v237_v31 = vadd.f32 %v617_v7, %v166_v23  ;;  %v171_v32 = vmul.f32 %v464_v24, %v603_v1  ;;  %v172_v33 = vmul.f32 %v465_v25, %v603_v1  ;;  %v238_v34 = vadd.f32 %v617_v7, %v167_v26  ;;  %v564_v23 = vld [vmem:[%s1023_s0 + $0x98] sm:$0xff]  }
  0x17   :  { %v239_v35 = vadd.f32 %v617_v7, %v168_v27  ;;  %v240_v36 = vadd.f32 %v617_v7, %v169_v28  ;;  %v241_v37 = vadd.f32 %v617_v7, %v170_v29  ;;  %v300_v39 = vmax.f32 %v236_v30, 0.0 }
  0x18   :  { %v301_v40 = vmax.f32 %v237_v31, 0.0  ;;  %v242_v41 = vadd.f32 %v617_v7, %v171_v32  ;;  %v243_v42 = vadd.f32 %v617_v7, %v172_v33  ;;  %v302_v45 = vmax.f32 %v238_v34, 0.0 }
  0x19   :  { %v303_v46 = vmax.f32 %v239_v35, 0.0  ;;  %v304_v47 = vmax.f32 %v240_v36, 0.0  ;;  %v305_v48 = vmax.f32 %v241_v37, 0.0  ;;  %364 = vst [vmem:[%s1026_s3 + $0x80] sm:$0xff] %v300_v39  ;;  %v469_v53 = vunpack.c.h.bf16 %v557_v38 }
  0x1a   :  { %365 = vst [vmem:[%s1026_s3 + $0x88] sm:$0xff] %v301_v40  ;;  %v306_v50 = vmax.f32 %v242_v41, 0.0  ;;  %v307_v51 = vmax.f32 %v243_v42, 0.0  ;;  %366 = vst [vmem:[%s1026_s3 + $0x90] sm:$0xff] %v302_v45  ;;  %v472_v54 = vunpack.c.l.bf16 %v558_v43  ;;  %v473_v55 = vunpack.c.h.bf16 %v558_v43 }
  0x1b   :  { %367 = vst [vmem:[%s1026_s3 + $0x98] sm:$0xff] %v303_v46  ;;  %368 = vst [vmem:[%s1026_s3 + $0xa0] sm:$0xff] %v304_v47  ;;  %v476_v56 = vunpack.c.l.bf16 %v559_v44  ;;  %v477_v57 = vunpack.c.h.bf16 %v559_v44  ;;  %v173_v58 = vmul.f32 %v468_v52, %v603_v1  ;;  %v174_v59 = vmul.f32 %v469_v53, %v603_v1  ;;  %v566_v53 = vld [vmem:[%s1023_s0 + $0xa8] sm:$0xff]  }
  0x1c   :  { %369 = vst [vmem:[%s1026_s3 + $0xa8] sm:$0xff] %v305_v48  ;;  %370 = vst [vmem:[%s1026_s3 + $0xb0] sm:$0xff] %v306_v50  ;;  %v480_v60 = vunpack.c.l.bf16 %v560_v49  ;;  %v481_v61 = vunpack.c.h.bf16 %v560_v49  ;;  %v175_v62 = vmul.f32 %v472_v54, %v603_v1  ;;  %v176_v63 = vmul.f32 %v473_v55, %v603_v1  ;;  %v565_v48 = vld [vmem:[%s1023_s0 + $0xa0] sm:$0xff]   ;;  %v567_v54 = vld [vmem:[%s1023_s0 + $0xb0] sm:$0xff]  }
  0x1d   :  { %371 = vst [vmem:[%s1026_s3 + $0xb8] sm:$0xff] %v307_v51  ;;  %v177_v0 = vmul.f32 %v476_v56, %v603_v1  ;;  %v178_v2 = vmul.f32 %v477_v57, %v603_v1  ;;  %v244_v3 = vadd.f32 %v617_v7, %v173_v58  ;;  %v245_v4 = vadd.f32 %v617_v7, %v174_v59  ;;  %v568_v59 = vld [vmem:[%s1023_s0 + $0xb8] sm:$0xff]  }
  0x1e   :  { %v179_v5 = vmul.f32 %v480_v60, %v603_v1  ;;  %v180_v6 = vmul.f32 %v481_v61, %v603_v1  ;;  %v246_v8 = vadd.f32 %v617_v7, %v175_v62  ;;  %v247_v9 = vadd.f32 %v617_v7, %v176_v63 }
  0x1f   :  { %v248_v10 = vadd.f32 %v617_v7, %v177_v0  ;;  %v249_v11 = vadd.f32 %v617_v7, %v178_v2  ;;  %v308_v13 = vmax.f32 %v244_v3, 0.0  ;;  %v309_v14 = vmax.f32 %v245_v4, 0.0 }
  0x20   :  { %v250_v15 = vadd.f32 %v617_v7, %v179_v5  ;;  %v251_v16 = vadd.f32 %v617_v7, %v180_v6  ;;  %v310_v19 = vmax.f32 %v246_v8, 0.0  ;;  %v311_v20 = vmax.f32 %v247_v9, 0.0 }
  0x21   :  { %v312_v21 = vmax.f32 %v248_v10, 0.0  ;;  %v313_v22 = vmax.f32 %v249_v11, 0.0  ;;  %372 = vst [vmem:[%s1026_s3 + $0xc0] sm:$0xff] %v308_v13  ;;  %373 = vst [vmem:[%s1026_s3 + $0xc8] sm:$0xff] %v309_v14  ;;  %v484_v26 = vunpack.c.l.bf16 %v561_v12  ;;  %v485_v27 = vunpack.c.h.bf16 %v561_v12 }
  0x22   :  { %v314_v24 = vmax.f32 %v250_v15, 0.0  ;;  %v315_v25 = vmax.f32 %v251_v16, 0.0  ;;  %374 = vst [vmem:[%s1026_s3 + $0xd0] sm:$0xff] %v310_v19  ;;  %375 = vst [vmem:[%s1026_s3 + $0xd8] sm:$0xff] %v311_v20  ;;  %v488_v28 = vunpack.c.l.bf16 %v562_v17  ;;  %v489_v29 = vunpack.c.h.bf16 %v562_v17 }
  0x23   :  { %376 = vst [vmem:[%s1026_s3 + $0xe0] sm:$0xff] %v312_v21  ;;  %377 = vst [vmem:[%s1026_s3 + $0xe8] sm:$0xff] %v313_v22  ;;  %v492_v30 = vunpack.c.l.bf16 %v563_v18  ;;  %v493_v31 = vunpack.c.h.bf16 %v563_v18  ;;  %v181_v32 = vmul.f32 %v484_v26, %v603_v1  ;;  %v182_v33 = vmul.f32 %v485_v27, %v603_v1  ;;  %v569_v22 = vld [vmem:[%s1023_s0 + $0xc0] sm:$0xff]   ;;  %v570_v27 = vld [vmem:[%s1023_s0 + $0xc8] sm:$0xff]  }
  0x24   :  { %378 = vst [vmem:[%s1026_s3 + $0xf0] sm:$0xff] %v314_v24  ;;  %379 = vst [vmem:[%s1026_s3 + $0xf8] sm:$0xff] %v315_v25  ;;  %v496_v34 = vunpack.c.l.bf16 %v564_v23  ;;  %v497_v35 = vunpack.c.h.bf16 %v564_v23  ;;  %v183_v36 = vmul.f32 %v488_v28, %v603_v1  ;;  %v184_v37 = vmul.f32 %v489_v29, %v603_v1  ;;  %v571_v28 = vld [vmem:[%s1023_s0 + $0xd0] sm:$0xff]  }
  0x25   :  { %v185_v38 = vmul.f32 %v492_v30, %v603_v1  ;;  %v186_v39 = vmul.f32 %v493_v31, %v603_v1  ;;  %v252_v40 = vadd.f32 %v617_v7, %v181_v32  ;;  %v253_v41 = vadd.f32 %v617_v7, %v182_v33  ;;  %v572_v33 = vld [vmem:[%s1023_s0 + $0xd8] sm:$0xff]  }
  0x26   :  { %v187_v42 = vmul.f32 %v496_v34, %v603_v1  ;;  %v188_v43 = vmul.f32 %v497_v35, %v603_v1  ;;  %v254_v44 = vadd.f32 %v617_v7, %v183_v36  ;;  %v255_v45 = vadd.f32 %v617_v7, %v184_v37 }
  0x27   :  { %v256_v46 = vadd.f32 %v617_v7, %v185_v38  ;;  %v257_v47 = vadd.f32 %v617_v7, %v186_v39  ;;  %v316_v49 = vmax.f32 %v252_v40, 0.0  ;;  %v317_v50 = vmax.f32 %v253_v41, 0.0 }
  0x28   :  { %v258_v51 = vadd.f32 %v617_v7, %v187_v42  ;;  %v259_v52 = vadd.f32 %v617_v7, %v188_v43  ;;  %v318_v55 = vmax.f32 %v254_v44, 0.0  ;;  %v319_v56 = vmax.f32 %v255_v45, 0.0 }
  0x29   :  { %v320_v57 = vmax.f32 %v256_v46, 0.0  ;;  %v321_v58 = vmax.f32 %v257_v47, 0.0  ;;  %380 = vst [vmem:[%s1026_s3 + $0x100] sm:$0xff] %v316_v49  ;;  %381 = vst [vmem:[%s1026_s3 + $0x108] sm:$0xff] %v317_v50  ;;  %v500_v62 = vunpack.c.l.bf16 %v565_v48  ;;  %v501_v63 = vunpack.c.h.bf16 %v565_v48 }
  0x2a   :  { %v322_v60 = vmax.f32 %v258_v51, 0.0  ;;  %v323_v61 = vmax.f32 %v259_v52, 0.0  ;;  %382 = vst [vmem:[%s1026_s3 + $0x110] sm:$0xff] %v318_v55  ;;  %383 = vst [vmem:[%s1026_s3 + $0x118] sm:$0xff] %v319_v56  ;;  %v504_v0 = vunpack.c.l.bf16 %v566_v53  ;;  %v505_v2 = vunpack.c.h.bf16 %v566_v53 }
  0x2b   :  { %384 = vst [vmem:[%s1026_s3 + $0x120] sm:$0xff] %v320_v57  ;;  %385 = vst [vmem:[%s1026_s3 + $0x128] sm:$0xff] %v321_v58  ;;  %v508_v3 = vunpack.c.l.bf16 %v567_v54  ;;  %v509_v4 = vunpack.c.h.bf16 %v567_v54  ;;  %v189_v5 = vmul.f32 %v500_v62, %v603_v1  ;;  %v190_v6 = vmul.f32 %v501_v63, %v603_v1  ;;  %v573_v58 = vld [vmem:[%s1023_s0 + $0xe0] sm:$0xff]   ;;  %v574_v63 = vld [vmem:[%s1023_s0 + $0xe8] sm:$0xff]  }
  0x2c   :  { %386 = vst [vmem:[%s1026_s3 + $0x130] sm:$0xff] %v322_v60  ;;  %387 = vst [vmem:[%s1026_s3 + $0x138] sm:$0xff] %v323_v61  ;;  %v512_v8 = vunpack.c.l.bf16 %v568_v59  ;;  %v513_v9 = vunpack.c.h.bf16 %v568_v59  ;;  %v191_v10 = vmul.f32 %v504_v0, %v603_v1  ;;  %v192_v11 = vmul.f32 %v505_v2, %v603_v1  ;;  %v575_v0 = vld [vmem:[%s1023_s0 + $0xf0] sm:$0xff]  }
  0x2d   :  { %v193_v12 = vmul.f32 %v508_v3, %v603_v1  ;;  %v194_v13 = vmul.f32 %v509_v4, %v603_v1  ;;  %v260_v14 = vadd.f32 %v617_v7, %v189_v5  ;;  %v261_v15 = vadd.f32 %v617_v7, %v190_v6  ;;  %v576_v6 = vld [vmem:[%s1023_s0 + $0xf8] sm:$0xff]  }
  0x2e   :  { %v195_v16 = vmul.f32 %v512_v8, %v603_v1  ;;  %v196_v17 = vmul.f32 %v513_v9, %v603_v1  ;;  %v262_v18 = vadd.f32 %v617_v7, %v191_v10  ;;  %v263_v19 = vadd.f32 %v617_v7, %v192_v11 }
  0x2f   :  { %v264_v20 = vadd.f32 %v617_v7, %v193_v12  ;;  %v265_v21 = vadd.f32 %v617_v7, %v194_v13  ;;  %v324_v23 = vmax.f32 %v260_v14, 0.0  ;;  %v325_v24 = vmax.f32 %v261_v15, 0.0 }
  0x30   :  { %v266_v25 = vadd.f32 %v617_v7, %v195_v16  ;;  %v267_v26 = vadd.f32 %v617_v7, %v196_v17  ;;  %v326_v29 = vmax.f32 %v262_v18, 0.0  ;;  %v327_v30 = vmax.f32 %v263_v19, 0.0 }
  0x31   :  { %v328_v31 = vmax.f32 %v264_v20, 0.0  ;;  %v329_v32 = vmax.f32 %v265_v21, 0.0  ;;  %388 = vst [vmem:[%s1026_s3 + $0x140] sm:$0xff] %v324_v23  ;;  %389 = vst [vmem:[%s1026_s3 + $0x148] sm:$0xff] %v325_v24  ;;  %v516_v36 = vunpack.c.l.bf16 %v569_v22  ;;  %v517_v37 = vunpack.c.h.bf16 %v569_v22 }
  0x32   :  { %v330_v34 = vmax.f32 %v266_v25, 0.0  ;;  %v331_v35 = vmax.f32 %v267_v26, 0.0  ;;  %390 = vst [vmem:[%s1026_s3 + $0x150] sm:$0xff] %v326_v29  ;;  %391 = vst [vmem:[%s1026_s3 + $0x158] sm:$0xff] %v327_v30  ;;  %v520_v38 = vunpack.c.l.bf16 %v570_v27  ;;  %v521_v39 = vunpack.c.h.bf16 %v570_v27 }
  0x33   :  { %392 = vst [vmem:[%s1026_s3 + $0x160] sm:$0xff] %v328_v31  ;;  %393 = vst [vmem:[%s1026_s3 + $0x168] sm:$0xff] %v329_v32  ;;  %v524_v40 = vunpack.c.l.bf16 %v571_v28  ;;  %v525_v41 = vunpack.c.h.bf16 %v571_v28  ;;  %v197_v42 = vmul.f32 %v516_v36, %v603_v1  ;;  %v198_v43 = vmul.f32 %v517_v37, %v603_v1 }
  0x34   :  { %394 = vst [vmem:[%s1026_s3 + $0x170] sm:$0xff] %v330_v34  ;;  %395 = vst [vmem:[%s1026_s3 + $0x178] sm:$0xff] %v331_v35  ;;  %v528_v44 = vunpack.c.l.bf16 %v572_v33  ;;  %v529_v45 = vunpack.c.h.bf16 %v572_v33  ;;  %v199_v46 = vmul.f32 %v520_v38, %v603_v1  ;;  %v200_v47 = vmul.f32 %v521_v39, %v603_v1 }
  0x35   :  { %v201_v48 = vmul.f32 %v524_v40, %v603_v1  ;;  %v202_v49 = vmul.f32 %v525_v41, %v603_v1  ;;  %v268_v50 = vadd.f32 %v617_v7, %v197_v42  ;;  %v269_v51 = vadd.f32 %v617_v7, %v198_v43 }
  0x36   :  { %v203_v52 = vmul.f32 %v528_v44, %v603_v1  ;;  %v204_v53 = vmul.f32 %v529_v45, %v603_v1  ;;  %v270_v54 = vadd.f32 %v617_v7, %v199_v46  ;;  %v271_v55 = vadd.f32 %v617_v7, %v200_v47 }
  0x37   :  { %v272_v56 = vadd.f32 %v617_v7, %v201_v48  ;;  %v273_v57 = vadd.f32 %v617_v7, %v202_v49  ;;  %v332_v59 = vmax.f32 %v268_v50, 0.0  ;;  %v333_v60 = vmax.f32 %v269_v51, 0.0 }
  0x38   :  { %v274_v61 = vadd.f32 %v617_v7, %v203_v52  ;;  %v275_v62 = vadd.f32 %v617_v7, %v204_v53  ;;  %v334_v2 = vmax.f32 %v270_v54, 0.0  ;;  %v335_v3 = vmax.f32 %v271_v55, 0.0 }
  0x39   :  { %v336_v4 = vmax.f32 %v272_v56, 0.0  ;;  %v337_v5 = vmax.f32 %v273_v57, 0.0  ;;  %396 = vst [vmem:[%s1026_s3 + $0x180] sm:$0xff] %v332_v59  ;;  %397 = vst [vmem:[%s1026_s3 + $0x188] sm:$0xff] %v333_v60  ;;  %v532_v10 = vunpack.c.l.bf16 %v573_v58  ;;  %v533_v11 = vunpack.c.h.bf16 %v573_v58 }
  0x3a   :  { %v338_v8 = vmax.f32 %v274_v61, 0.0  ;;  %v339_v9 = vmax.f32 %v275_v62, 0.0  ;;  %398 = vst [vmem:[%s1026_s3 + $0x190] sm:$0xff] %v334_v2  ;;  %399 = vst [vmem:[%s1026_s3 + $0x198] sm:$0xff] %v335_v3  ;;  %v536_v12 = vunpack.c.l.bf16 %v574_v63  ;;  %v537_v13 = vunpack.c.h.bf16 %v574_v63 }
  0x3b   :  { %400 = vst [vmem:[%s1026_s3 + $0x1a0] sm:$0xff] %v336_v4  ;;  %401 = vst [vmem:[%s1026_s3 + $0x1a8] sm:$0xff] %v337_v5  ;;  %v540_v14 = vunpack.c.l.bf16 %v575_v0  ;;  %v541_v15 = vunpack.c.h.bf16 %v575_v0  ;;  %v205_v16 = vmul.f32 %v532_v10, %v603_v1  ;;  %v206_v17 = vmul.f32 %v533_v11, %v603_v1 }
  0x3c   :  { %402 = vst [vmem:[%s1026_s3 + $0x1b0] sm:$0xff] %v338_v8  ;;  %403 = vst [vmem:[%s1026_s3 + $0x1b8] sm:$0xff] %v339_v9  ;;  %v544_v18 = vunpack.c.l.bf16 %v576_v6  ;;  %v545_v19 = vunpack.c.h.bf16 %v576_v6  ;;  %v207_v20 = vmul.f32 %v536_v12, %v603_v1  ;;  %v208_v21 = vmul.f32 %v537_v13, %v603_v1 }
  0x3d   :  { %v209_v22 = vmul.f32 %v540_v14, %v603_v1  ;;  %v210_v23 = vmul.f32 %v541_v15, %v603_v1  ;;  %v276_v24 = vadd.f32 %v617_v7, %v205_v16  ;;  %v277_v25 = vadd.f32 %v617_v7, %v206_v17 }
  0x3e   :  { %v211_v26 = vmul.f32 %v544_v18, %v603_v1  ;;  %v212_v27 = vmul.f32 %v545_v19, %v603_v1  ;;  %v278_v28 = vadd.f32 %v617_v7, %v207_v20  ;;  %v279_v29 = vadd.f32 %v617_v7, %v208_v21 }
  0x3f   :  { %v280_v30 = vadd.f32 %v617_v7, %v209_v22  ;;  %v281_v31 = vadd.f32 %v617_v7, %v210_v23  ;;  %v340_v32 = vmax.f32 %v276_v24, 0.0  ;;  %v341_v33 = vmax.f32 %v277_v25, 0.0 }
  0x40   :  { %v282_v34 = vadd.f32 %v617_v7, %v211_v26  ;;  %v283_v35 = vadd.f32 %v617_v7, %v212_v27  ;;  %v342_v36 = vmax.f32 %v278_v28, 0.0  ;;  %v343_v37 = vmax.f32 %v279_v29, 0.0 }
  0x41   :  { %v344_v38 = vmax.f32 %v280_v30, 0.0  ;;  %v345_v39 = vmax.f32 %v281_v31, 0.0  ;;  %404 = vst [vmem:[%s1026_s3 + $0x1c0] sm:$0xff] %v340_v32  ;;  %405 = vst [vmem:[%s1026_s3 + $0x1c8] sm:$0xff] %v341_v33 }
  0x42   :  { %v346_v1 = vmax.f32 %v282_v34, 0.0  ;;  %v347_v40 = vmax.f32 %v283_v35, 0.0  ;;  %406 = vst [vmem:[%s1026_s3 + $0x1d0] sm:$0xff] %v342_v36  ;;  %407 = vst [vmem:[%s1026_s3 + $0x1d8] sm:$0xff] %v343_v37 }
  0x43   :  { %408 = vst [vmem:[%s1026_s3 + $0x1e0] sm:$0xff] %v344_v38  ;;  %409 = vst [vmem:[%s1026_s3 + $0x1e8] sm:$0xff] %v345_v39 }
  0x44   :  { %410 = vst [vmem:[%s1026_s3 + $0x1f0] sm:$0xff] %v346_v1  ;;  %411 = vst [vmem:[%s1026_s3 + $0x1f8] sm:$0xff] %v347_v40 }

// kernel: unet_block.3
= control target key start
LH: loop header
LB: loop body
LE: loop exit
PB: predicated region body
PF: predicated region fallthrough
CT: control target
= control target key end

     0   :  { %s4154_s12 = smov 0   ;;  %s4156_s13 = smov 0   ;;  %s5557_s0 = inlined_call_operand.vmem [shape: bf16[2,18,24,128], index: 0, kind: input, shape index: {}]   ;;  %s5558_s1 = inlined_call_operand.vmem [shape: bf16[384,384], index: 1, kind: input, shape index: {}]   ;;  %s5559_s2 = inlined_call_operand.vmem [shape: bf16[2,16,16,128], index: 2, kind: output, shape index: {0}]   ;;  %s5560_s3 = inlined_call_operand.vmem [shape: f32[2,2,128], index: 3, kind: output, shape index: {1}]  }
   0x1   :  { %s4158_s14 = smov 0  }
   0x2 LB: > { %s26_s15 = sadd.s32 1, %s4127_s13  ;;  %p3280_p0 = scmp.ge.s32.totalorder %s4131_s14, 1  ;;  %s4131_s14 = sphi %s4158_s14, %s14_s14   ;;  %s4127_s13 = sphi %s4156_s13, %s5712_s13   ;;  %s4123_s12 = sphi %s4154_s12, %s5711_s12  }
   0x3   : > { %p28_p1 = scmp.ge.s32.totalorder %s26_s15, 2  ;;  %p122_p2 = scmp.lt.s32.totalorder %s4131_s14, 3 }
   0x5   : > { %s5714_s15 = smov (%p28_p1, %s26_s15), 0  ;;  %p123_p3 = pnand %p3280_p0, %p122_p2 }
   0x7   : > { %126 = sbr.rel (%p123_p3) target bundleno = 731 (0x2db), region = 24 }
   0xc   : > { %p150_p4 = scmp.lt.s32.totalorder %s4123_s12, 1  ;;  %s3502_s16 = smul.u32 216, %s4123_s12 }
   0xe   : > { %s5716_s12 = smov (!%p150_p4, %s4123_s12), 1  ;;  %s4175_s19 = scalar_lea.vmem %s5557_s0, %s3502_s16 }
   0xf   : > { %s3501_s20 = sshll.u32 %s5716_s12, 7  ;;  %s3283_s21 = sshll.u32 %s5716_s12, 1  ;;  %v223_v0 = vld [vmem:[%s4175_s19] sm:$0xff]  ;;  %v225_v1 = vld [vmem:[%s4175_s19 + $0x8] sm:$0xff]  ;;  %v227_v2 = vld [vmem:[%s4175_s19 + $0x10] sm:$0xff] }
  0x10   : > { %s4183_s24 = scalar_lea.vmem %s5559_s2, %s3501_s20  ;;  %s4188_s27 = scalar_lea.vmem %s5560_s3, %s3283_s21  ;;  %224 = vst [vmem:[#allocation2] sm:$0xff] %v223_v0  ;;  %226 = vst [vmem:[#allocation2 + $0x8] sm:$0xff] %v225_v1  ;;  %v229_v3 = vld [vmem:[%s4175_s19 + $0x18] sm:$0xff]  ;;  %v231_v4 = vld [vmem:[%s4175_s19 + $0x20] sm:$0xff] }
  0x11   : > { %228 = vst [vmem:[#allocation2 + $0x10] sm:$0xff] %v227_v2  ;;  %v233_v5 = vld [vmem:[%s4175_s19 + $0x28] sm:$0xff]  ;;  %230 = vst [vmem:[#allocation2 + $0x18] sm:$0xff] %v229_v3  ;;  %v235_v6 = vld [vmem:[%s4175_s19 + $0x30] sm:$0xff] }
  0x12   : > { %232 = vst [vmem:[#allocation2 + $0x20] sm:$0xff] %v231_v4  ;;  %234 = vst [vmem:[#allocation2 + $0x28] sm:$0xff] %v233_v5  ;;  %v237_v7 = vld [vmem:[%s4175_s19 + $0x38] sm:$0xff]  ;;  %v239_v8 = vld [vmem:[%s4175_s19 + $0x40] sm:$0xff] }
  0x13   : > { %236 = vst [vmem:[#allocation2 + $0x30] sm:$0xff] %v235_v6  ;;  %238 = vst [vmem:[#allocation2 + $0x38] sm:$0xff] %v237_v7  ;;  %v241_v9 = vld [vmem:[%s4175_s19 + $0x48] sm:$0xff]  ;;  %v243_v10 = vld [vmem:[%s4175_s19 + $0x50] sm:$0xff] }
  0x14   : > { %240 = vst [vmem:[#allocation2 + $0x40] sm:$0xff] %v239_v8  ;;  %v245_v11 = vld [vmem:[%s4175_s19 + $0x58] sm:$0xff]  ;;  %242 = vst [vmem:[#allocation2 + $0x48] sm:$0xff] %v241_v9  ;;  %v247_v12 = vld [vmem:[%s4175_s19 + $0x60] sm:$0xff] }
  0x15   : > { %244 = vst [vmem:[#allocation2 + $0x50] sm:$0xff] %v243_v10  ;;  %246 = vst [vmem:[#allocation2 + $0x58] sm:$0xff] %v245_v11  ;;  %v249_v13 = vld [vmem:[%s4175_s19 + $0x68] sm:$0xff]  ;;  %v251_v14 = vld [vmem:[%s4175_s19 + $0x70] sm:$0xff] }
  0x16   : > { %248 = vst [vmem:[#allocation2 + $0x60] sm:$0xff] %v247_v12  ;;  %250 = vst [vmem:[#allocation2 + $0x68] sm:$0xff] %v249_v13  ;;  %v253_v15 = vld [vmem:[%s4175_s19 + $0x78] sm:$0xff]  ;;  %v255_v16 = vld [vmem:[%s4175_s19 + $0x80] sm:$0xff] }
  0x17   : > { %252 = vst [vmem:[#allocation2 + $0x70] sm:$0xff] %v251_v14  ;;  %v257_v17 = vld [vmem:[%s4175_s19 + $0x88] sm:$0xff]  ;;  %254 = vst [vmem:[#allocation2 + $0x78] sm:$0xff] %v253_v15  ;;  %v259_v18 = vld [vmem:[%s4175_s19 + $0x90] sm:$0xff] }
  0x18   : > { %256 = vst [vmem:[#allocation2 + $0x80] sm:$0xff] %v255_v16  ;;  %258 = vst [vmem:[#allocation2 + $0x88] sm:$0xff] %v257_v17  ;;  %v261_v19 = vld [vmem:[%s4175_s19 + $0x98] sm:$0xff]  ;;  %v263_v20 = vld [vmem:[%s4175_s19 + $0xa0] sm:$0xff] }
  0x19   : > { %260 = vst [vmem:[#allocation2 + $0x90] sm:$0xff] %v259_v18  ;;  %262 = vst [vmem:[#allocation2 + $0x98] sm:$0xff] %v261_v19  ;;  %v265_v21 = vld [vmem:[%s4175_s19 + $0xa8] sm:$0xff]  ;;  %v267_v22 = vld [vmem:[%s4175_s19 + $0xb0] sm:$0xff] }
  0x1a   : > { %264 = vst [vmem:[#allocation2 + $0xa0] sm:$0xff] %v263_v20  ;;  %v269_v23 = vld [vmem:[%s4175_s19 + $0xb8] sm:$0xff]  ;;  %266 = vst [vmem:[#allocation2 + $0xa8] sm:$0xff] %v265_v21  ;;  %v271_v24 = vld [vmem:[%s4175_s19 + $0xc0] sm:$0xff] }
  0x1b   : > { %268 = vst [vmem:[#allocation2 + $0xb0] sm:$0xff] %v267_v22  ;;  %270 = vst [vmem:[#allocation2 + $0xb8] sm:$0xff] %v269_v23  ;;  %v273_v25 = vld [vmem:[%s4175_s19 + $0xc8] sm:$0xff]  ;;  %v275_v26 = vld [vmem:[%s4175_s19 + $0xd0] sm:$0xff] }
  0x1c   : > { %272 = vst [vmem:[#allocation2 + $0xc0] sm:$0xff] %v271_v24  ;;  %274 = vst [vmem:[#allocation2 + $0xc8] sm:$0xff] %v273_v25 }
  0x1d   : > { %276 = vst [vmem:[#allocation2 + $0xd0] sm:$0xff] %v275_v26 }
  0x1e   : > { %284 = vsyncadd [#allocation3], 3456 }
  0x1f   : > { %4119 = dma.done.wait [#allocation3], 3456 }
  0x20   : > { %4120 = vsyncadd [#allocation3], 4294963840  ;;  %v4133_v27 = vmov 0   ;;  %v3959_v28 = vld [vmem:[%s5558_s1 + $0xa8] ss:$12 sps:$4 sm:$0xff]   ;;  %vm1921_vm0 = vcmask 1046528  }
  0x21   : > { %909 = vmatprep.subr.bf16.mxu0 %v4133_v27  ;;  %v4221_v29 = vld [vmem:[%s5558_s1 + $0x228] ss:$12 sps:$4 sm:$0xff]   ;;  %v3964_v30 = vld [vmem:[%s5558_s1 + $0x90] ss:$12 sps:$4 sm:$0xff]   ;;  %v3969_v32 = vld [vmem:[%s5558_s1 + $0x78] ss:$12 sps:$4 sm:$0xff]  }
  0x22   : > { %910 = vmatpush1.bf16.msra.mxu0 %v3959_v28  ;;  %3918 = vmatprep.subr.bf16.mxu1 %v4221_v29  ;;  %v4231_v31 = vld [vmem:[%s5558_s1 + $0x210] ss:$12 sps:$4 sm:$0xff]   ;;  %v4241_v33 = vld [vmem:[%s5558_s1 + $0x1f8] ss:$12 sps:$4 sm:$0xff]   ;;  %v3974_v34 = vld [vmem:[%s5558_s1 + $0x60] ss:$12 sps:$4 sm:$0xff]  }
  0x23   : > { %911 = vmatprep.subr.bf16.mxu0 %v4133_v27  ;;  %3926 = vmatpush3.bf16.msra.mxu1 %v4221_v29  ;;  %v4252_v35 = vld [vmem:[%s5558_s1 + $0x1e0] ss:$12 sps:$4 sm:$0xff]   ;;  %v3979_v36 = vld [vmem:[%s5558_s1 + $0x48] ss:$12 sps:$4 sm:$0xff]   ;;  %v3984_v38 = vld [vmem:[%s5558_s1 + $0x30] ss:$12 sps:$4 sm:$0xff]  }
  0x24   : > { %3919 = vmatprep.subr.bf16.mxu1 %v4231_v31  ;;  %v4263_v37 = vld [vmem:[%s5558_s1 + $0x1c8] ss:$12 sps:$4 sm:$0xff]   ;;  %v4274_v39 = vld [vmem:[%s5558_s1 + $0x1b0] ss:$12 sps:$4 sm:$0xff]   ;;  %v4276_v40 = vld [vmem:[#allocation2 + $0x58] sm:$0xf] }
  0x25   : > { %v428_v41 = vld [vmem:[#allocation2 + $0x5c] sm:$0xf]  ;;  %v429_v43 = vld [vmem:[#allocation2 + $0x60] sm:$0xf]  ;;  %v3989_v44 = vld [vmem:[%s5558_s1 + $0x18] ss:$12 sps:$4 sm:$0xff]  }
  0x26   : > { %912 = vmatpush1.bf16.msra.mxu0 %v3964_v30  ;;  %v4280_v42 = vcombine.low %v4276_v40, %v428_v41  ;;  %v4286_v45 = vcombine.low %v428_v41, %v429_v43  ;;  %v4292_v46 = vld [vmem:[%s5558_s1 + $0x198] ss:$12 sps:$4 sm:$0xff]   ;;  %v431_v48 = vld [vmem:[#allocation2 + $0x68] sm:$0xf]  ;;  %v3994_v50 = vld [vmem:[%s5558_s1] ss:$12 sps:$4 sm:$0xff]  }
  0x27   : > { %913 = vmatprep.subr.bf16.mxu0 %v4133_v27  ;;  %3927 = vmatpush3.bf16.msra.mxu1 %v4231_v31  ;;  %v430_v47 = vld [vmem:[#allocation2 + $0x64] sm:$0xf]  ;;  %v4306_v51 = vld [vmem:[%s5558_s1 + $0x180] ss:$12 sps:$4 sm:$0xff]   ;;  %v433_v53 = vld [vmem:[#allocation2 + $0x70] sm:$0xf] }
  0x28   : > { %3920 = vmatprep.subr.bf16.mxu1 %v4241_v33  ;;  %3758 = vmatprep.mubr.bf16.mxu1 %v4280_v42  ;;  %v4296_v49 = vcombine.low %v430_v47, %v431_v48  ;;  %v432_v52 = vld [vmem:[#allocation2 + $0x6c] sm:$0xf]  ;;  %v4000_v55 = vld [vmem:[%s5558_s1 + $0x168] ss:$12 sps:$4 sm:$0xff]   ;;  %v4320_v57 = vcombine.low %v429_v43, %v430_v47  ;;  %v4004_v58 = vld [vmem:[%s5558_s1 + $0x150] ss:$12 sps:$4 sm:$0xff]  }
  0x29   : > { %v4309_v54 = vcombine.low %v432_v52, %v433_v53  ;;  %v3961_v56 = vld [vmem:[%s5558_s1 + $0xac] ss:$12 sps:$4 sm:$0xff]   ;;  %v4326_v59 = vcombine.low %v431_v48, %v432_v52  ;;  %v434_v60 = vld [vmem:[#allocation2 + $0x74] sm:$0xf]  ;;  %v4332_v63 = vld [vmem:[#allocation2 + $0x10] sm:$0xf] }
  0x2a   : > { %914 = vmatpush1.bf16.msra.mxu0 %v3969_v32  ;;  %v435_v61 = vld [vmem:[#allocation2 + $0x78] sm:$0xf]  ;;  %v4329_v62 = vld [vmem:[#allocation2 + $0xc] sm:$0xf]  ;;  %v3966_v2 = vld [vmem:[%s5558_s1 + $0x94] ss:$12 sps:$4 sm:$0xff]   ;;  %v4351_v5 = vcombine.low %v433_v53, %v434_v60 }
  0x2b   : > { %915 = vmatprep.subr.bf16.mxu0 %v4133_v27  ;;  %3928 = vmatpush3.bf16.msra.mxu1 %v4241_v33  ;;  %v4337_v0 = vcombine.low %v4329_v62, %v4332_v63  ;;  %v4339_v1 = vcombine.low %v434_v60, %v435_v61  ;;  %v4008_v3 = vld [vmem:[%s5558_s1 + $0x138] ss:$12 sps:$4 sm:$0xff]   ;;  %v436_v4 = vld [vmem:[#allocation2 + $0x7c] sm:$0xf]  ;;  %v4012_v8 = vld [vmem:[%s5558_s1 + $0x120] ss:$12 sps:$4 sm:$0xff]  }
  0x2c   : > { %3921 = vmatprep.subr.bf16.mxu1 %v4252_v35  ;;  %v3971_v6 = vld [vmem:[%s5558_s1 + $0x7c] ss:$12 sps:$4 sm:$0xff]   ;;  %v4356_v7 = vcombine.low %v435_v61, %v436_v4  ;;  %v437_v9 = vld [vmem:[#allocation2 + $0x80] sm:$0xf]  ;;  %v3976_v10 = vld [vmem:[%s5558_s1 + $0x64] ss:$12 sps:$4 sm:$0xff]  }
  0x2d   : > { %941 = vmatprep.mubr.bf16.mxu0 %v4337_v0  ;;  %v4367_v11 = vcombine.low %v436_v4, %v437_v9  ;;  %v438_v12 = vld [vmem:[#allocation2 + $0x84] sm:$0xf]  ;;  %v4016_v13 = vld [vmem:[%s5558_s1 + $0x108] ss:$12 sps:$4 sm:$0xff]   ;;  %v440_v15 = vld [vmem:[#allocation2 + $0x8c] sm:$0xf] }
  0x2e   : > { %916 = vmatpush1.bf16.msra.mxu0 %v3974_v34  ;;  %v439_v14 = vld [vmem:[#allocation2 + $0x88] sm:$0xf]  ;;  %v4375_v16 = vcombine.low %v437_v9, %v438_v12  ;;  %v3981_v17 = vld [vmem:[%s5558_s1 + $0x4c] ss:$12 sps:$4 sm:$0xff]   ;;  %v4020_v19 = vld [vmem:[%s5558_s1 + $0xf0] ss:$12 sps:$4 sm:$0xff]  }
  0x2f   : > { %917 = vmatprep.subr.bf16.mxu0 %v4133_v27  ;;  %3929 = vmatpush3.bf16.msra.mxu1 %v4252_v35  ;;  %v4380_v18 = vcombine.low %v439_v14, %v440_v15  ;;  %v3986_v20 = vld [vmem:[%s5558_s1 + $0x34] ss:$12 sps:$4 sm:$0xff]   ;;  %v441_v21 = vld [vmem:[#allocation2 + $0x90] sm:$0xf]  ;;  %v4024_v22 = vld [vmem:[%s5558_s1 + $0xd8] ss:$12 sps:$4 sm:$0xff]   ;;  %v4394_v24 = vcombine.low %v438_v12, %v439_v14 }
  0x30   : > { %3922 = vmatprep.subr.bf16.mxu1 %v4263_v37  ;;  %v442_v23 = vld [vmem:[#allocation2 + $0x94] sm:$0xf]  ;;  %v443_v25 = vld [vmem:[#allocation2 + $0x98] sm:$0xf]  ;;  %v4398_v26 = vld [vmem:[#allocation2 + $0x9c] sm:$0xf]  ;;  %v4428_v52 = vcombine.low %v440_v15, %v441_v21 }
  0x31   : > { %v3991_v28 = vld [vmem:[%s5558_s1 + $0x1c] ss:$12 sps:$4 sm:$0xff]   ;;  %v4404_v30 = vcombine.low %v441_v21, %v442_v23  ;;  %v4028_v32 = vld [vmem:[%s5558_s1 + $0xc0] ss:$12 sps:$4 sm:$0xff]   ;;  %v4410_v34 = vcombine.low %v443_v25, %v4398_v26  ;;  %v3996_v41 = vld [vmem:[%s5558_s1 + $0x4] ss:$12 sps:$4 sm:$0xff]  }
  0x32   : > { %918 = vmatpush1.bf16.msra.mxu0 %v3979_v36  ;;  %v410_v36 = vld [vmem:[#allocation2 + $0x14] sm:$0xf]  ;;  %v4419_v43 = vld [vmem:[#allocation2] sm:$0xff]   ;;  %v4424_v48 = vld [vmem:[#allocation2 + $0xa8] sm:$0xf]  ;;  %vm2708_vm1 = vcmask 1045504  }
  0x33   : > { %919 = vmatprep.subr.bf16.mxu0 %v4133_v27  ;;  %3930 = vmatpush3.bf16.msra.mxu1 %v4263_v37  ;;  %v4421_v47 = vld [vmem:[#allocation2 + $0xa4] sm:$0xf]  ;;  %v4002_v53 = vld [vmem:[%s5558_s1 + $0x16c] ss:$12 sps:$4 sm:$0xff]   ;;  %v407_v60 = vld [vmem:[#allocation2 + $0x8] sm:$0xf] }
  0x34   : > { %3923 = vmatprep.subr.bf16.mxu1 %v4274_v39  ;;  %v412_v61 = vld [vmem:[#allocation2 + $0x1c] sm:$0xf]  ;;  %v4006_v4 = vld [vmem:[%s5558_s1 + $0x154] ss:$12 sps:$4 sm:$0xff]   ;;  %v4491_v15 = vld [vmem:[#allocation2 + $0x28] sm:$0xf] }
  0x35   : > { %v4473_v12 = vld [vmem:[#allocation2 + $0xbc] sm:$0xf]  ;;  %v4506_v21 = vld [vmem:[#allocation2 + $0xc0] sm:$0xf]  ;;  %vm3119_vm2 = vcmask 1040384  }
  0x36   : > { %920 = vmatpush1.bf16.msra.mxu0 %v3984_v38  ;;  %v4413_v38 = vld [vmem:[#allocation2 + $0x18] sm:$0xf] }
  0x37   : > { %921 = vmatprep.subr.bf16.mxu0 %v4133_v27  ;;  %3931 = vmatpush3.bf16.msra.mxu1 %v4274_v39 }
  0x38   : > { %3924 = vmatprep.subr.bf16.mxu1 %v4292_v46 }
  0x3a   : > { %922 = vmatpush1.bf16.msra.mxu0 %v3989_v44  ;;  %v445_v44 = vld [vmem:[#allocation2 + $0xa0] sm:$0xf] }
  0x3b   : > { %923 = vmatprep.subr.bf16.mxu0 %v4133_v27  ;;  %3932 = vmatpush3.bf16.msra.mxu1 %v4292_v46 }
  0x3c   : > { %3925 = vmatprep.subr.bf16.mxu1 %v4306_v51 }
  0x3e   : > { %924 = vmatpush1.bf16.msra.mxu0 %v3994_v50  ;;  %v4426_v50 = vld [vmem:[#allocation2 + $0xac] sm:$0xf] }
  0x3f   : > { %925 = vmatprep.subr.bf16.mxu0 %v4133_v27  ;;  %3933 = vmatpush3.bf16.msra.mxu1 %v4306_v51 }
  0x40   : > { %1423 = vmatprep.subr.bf16.mxu1 %v4133_v27 }
  0x42   : > { %926 = vmatpush2.bf16.msra.mxu0 %v4000_v55  ;;  %3759 = vmatmul.mubr.bf16.vlgmr.msra.gmra.mxu1 %v4320_v57  ;;  %v4437_v55 = vcombine.low %v410_v36, %v4413_v38 }
  0x43   : > { %927 = vmatprep.subr.bf16.mxu0 %v4133_v27  ;;  %1424 = vmatpush1.bf16.msra.mxu1 %v3961_v56  ;;  %v4440_v56 = vcombine.low %v445_v44, %v4421_v47 }
  0x44   : > { %3762 = vmatprep.mubr.bf16.mxu1 %v4326_v59  ;;  %1425 = vmatprep.subr.bf16.mxu1 %v4133_v27 }
  0x46   : > { %928 = vmatpush2.bf16.msra.mxu0 %v4004_v58  ;;  %v4445_v58 = vcombine.low %v4424_v48, %v4426_v50 }
  0x47   : > { %929 = vmatprep.subr.bf16.mxu0 %v4133_v27  ;;  %1426 = vmatpush1.bf16.msra.mxu1 %v3966_v2  ;;  %v4450_v2 = vld [vmem:[#allocation2 + $0x20] sm:$0xf] }
  0x48   : > { %1427 = vmatprep.subr.bf16.mxu1 %v4133_v27  ;;  %v4469_v9 = vcombine.low %v412_v61, %v4450_v2 }
  0x4a   : > { %930 = vmatpush2.bf16.msra.mxu0 %v4008_v3  ;;  %3763 = vmatmul.mubr.bf16.gmra.mxu1 %v4351_v5  ;;  %v4454_v3 = vcombine.low %v442_v23, %v443_v25  ;;  %v4514_v23 = vld [vmem:[#allocation2 + $0xc8] sm:$0xf]  ;;  %v456_v25 = vld [vmem:[#allocation2 + $0xcc] sm:$0xf] }
  0x4b   : > { %931 = vmatprep.subr.bf16.mxu0 %v4133_v27  ;;  %1428 = vmatpush1.bf16.msra.mxu1 %v3971_v6  ;;  %v4463_v6 = vld [vmem:[#allocation2 + $0xb0] sm:$0xf] }
  0x4c   : > { %3766 = vmatprep.mubr.bf16.mxu1 %v4356_v7  ;;  %1429 = vmatprep.subr.bf16.mxu1 %v4133_v27 }
  0x4e   : > { %932 = vmatpush2.bf16.msra.mxu0 %v4012_v8  ;;  %v4465_v8 = vld [vmem:[#allocation2 + $0xb4] sm:$0xf] }
  0x4f   : > { %933 = vmatprep.subr.bf16.mxu0 %v4133_v27  ;;  %1430 = vmatpush1.bf16.msra.mxu1 %v3976_v10  ;;  %v4471_v10 = vld [vmem:[#allocation2 + $0xb8] sm:$0xf] }
  0x50   : > { %1431 = vmatprep.subr.bf16.mxu1 %v4133_v27  ;;  %v4487_v14 = vcombine.low %v4471_v10, %v4473_v12 }
  0x52   : > { %934 = vmatpush2.bf16.msra.mxu0 %v4016_v13  ;;  %3767 = vmatmul.mubr.bf16.gmra.mxu1 %v4375_v16  ;;  %v4010_v13 = vld [vmem:[%s5558_s1 + $0x13c] ss:$12 sps:$4 sm:$0xff]  }
  0x53   : > { %935 = vmatprep.subr.bf16.mxu0 %v4133_v27  ;;  %1432 = vmatpush1.bf16.msra.mxu1 %v3981_v17  ;;  %v4497_v17 = vcombine.low %v4398_v26, %v445_v44  ;;  %v4018_v26 = vld [vmem:[%s5558_s1 + $0x10c] ss:$12 sps:$4 sm:$0xff]   ;;  %v4542_v44 = vcombine.low %v4413_v38, %v412_v61  ;;  %v418_v38 = vld [vmem:[#allocation2 + $0x34] sm:$0xf] }
  0x54   : > { %3770 = vmatprep.mubr.bf16.mxu1 %v4380_v18  ;;  %1433 = vmatprep.subr.bf16.mxu1 %v4133_v27 }
  0x56   : > { %936 = vmatpush2.bf16.msra.mxu0 %v4020_v19  ;;  %v4014_v19 = vld [vmem:[%s5558_s1 + $0x124] ss:$12 sps:$4 sm:$0xff]  }
  0x57   : > { %937 = vmatprep.subr.bf16.mxu0 %v4133_v27  ;;  %1434 = vmatpush1.bf16.msra.mxu1 %v3986_v20  ;;  %v4503_v20 = vcombine.low %v4332_v63, %v410_v36  ;;  %v4536_v36 = vcombine.low %v4421_v47, %v4424_v48  ;;  %v4026_v47 = vld [vmem:[%s5558_s1 + $0xdc] ss:$12 sps:$4 sm:$0xff]   ;;  %v419_v48 = vld [vmem:[#allocation2 + $0x38] sm:$0xf] }
  0x58   : > { %1435 = vmatprep.subr.bf16.mxu1 %v4133_v27 }
  0x5a   : > { %938 = vmatpush2.bf16.msra.mxu0 %v4024_v22  ;;  %3771 = vmatmul.mubr.bf16.gmra.mxu1 %v4404_v30 }
  0x5b   : > { %939 = vmatprep.subr.bf16.mxu0 %v4133_v27  ;;  %1436 = vmatpush1.bf16.msra.mxu1 %v3991_v28  ;;  %v4527_v28 = vcombine.low %v4514_v23, %v456_v25  ;;  %v423_v25 = vld [vmem:[#allocation2 + $0x48] sm:$0xf] }
  0x5c   : > { %3774 = vmatprep.mubr.bf16.mxu1 %v4410_v34  ;;  %1437 = vmatprep.subr.bf16.mxu1 %v4133_v27 }
  0x5e   : > { %940 = vmatpush2.bf16.msra.mxu0 %v4028_v32  ;;  %v417_v32 = vld [vmem:[#allocation2 + $0x30] sm:$0xf] }
  0x5f   : > { %3726 = vmatprep.subr.bf16.mxu0 %v4221_v29  ;;  %1438 = vmatpush1.bf16.msra.mxu1 %v3996_v41  ;;  %v4022_v41 = vld [vmem:[%s5558_s1 + $0xf4] ss:$12 sps:$4 sm:$0xff]  }
  0x60   : > { %1439 = vmatprep.subr.bf16.mxu1 %v4133_v27 }
  0x61   : > { %942 = vmatmul.mubr.bf16.vlgmr.msra.gmra.mxu0 %v4419_v43 }
  0x62   : > { %3727 = vmatpush3.bf16.msra.mxu0 %v4221_v29  ;;  %949 = vmatprep.mubr.bf16.mxu0 %v4437_v55  ;;  %v4460_v29 = vcombine.low %v407_v60, %v4329_v62  ;;  %v4479_v62 = vcombine.low %v4463_v6, %v4465_v8  ;;  %v4030_v60 = vld [vmem:[%s5558_s1 + $0xc4] ss:$12 sps:$4 sm:$0xff]  }
  0x63   : > { %3728 = vmatprep.subr.bf16.mxu0 %v4231_v31  ;;  %3775 = vmatmul.mubr.bf16.gmra.mxu1 %v4440_v56 }
  0x64   : > { %1440 = vmatpush2.bf16.msra.mxu1 %v4002_v53  ;;  %3778 = vmatprep.mubr.bf16.mxu1 %v4445_v58  ;;  %v4549_v53 = vld [vmem:[#allocation2 + $0xd0] sm:$0xff]  }
  0x65   : > { %1441 = vmatprep.subr.bf16.mxu1 %v4133_v27 }
  0x66   : > { %3729 = vmatpush3.bf16.msra.mxu0 %v4231_v31  ;;  %v414_v31 = vld [vmem:[#allocation2 + $0x24] sm:$0xf] }
  0x67   : > { %3730 = vmatprep.subr.bf16.mxu0 %v4241_v33  ;;  %v4512_v22 = vcombine.low %v414_v31, %v4491_v15  ;;  %v4569_v61 = vcombine.low %v4450_v2, %v414_v31  ;;  %v420_v2 = vld [vmem:[#allocation2 + $0x3c] sm:$0xf]  ;;  %v4595_v31 = vcombine.low %v4465_v8, %v4471_v10  ;;  %v4063_v8 = vld [vmem:[%s5558_s1 + $0x68] ss:$12 sps:$4 sm:$0xff]  }
  0x68   : > { %1442 = vmatpush2.bf16.msra.mxu1 %v4006_v4  ;;  %v421_v4 = vld [vmem:[#allocation2 + $0x40] sm:$0xf] }
  0x69   : > { %950 = vmatmul.mubr.bf16.gmra.mxu0 %v4460_v29  ;;  %1443 = vmatprep.subr.bf16.mxu1 %v4133_v27 }
  0x6a   : > { %956 = vmatprep.mubr.bf16.mxu0 %v4469_v9  ;;  %3731 = vmatpush3.bf16.msra.mxu0 %v4241_v33  ;;  %v4508_v33 = vld [vmem:[#allocation2 + $0xc4] sm:$0xf] }
  0x6b   : > { %3779 = vmatmul.mubr.bf16.gmra.mxu1 %v4479_v62  ;;  %3732 = vmatprep.subr.bf16.mxu0 %v4252_v35  ;;  %v4519_v63 = vcombine.low %v4506_v21, %v4508_v33 }
  0x6c   : > { %1444 = vmatpush2.bf16.msra.mxu1 %v4010_v13  ;;  %3782 = vmatprep.mubr.bf16.mxu1 %v4487_v14  ;;  %v4590_v13 = vcombine.low %v420_v2, %v421_v4 }
  0x6d   : > { %1445 = vmatprep.subr.bf16.mxu1 %v4133_v27 }
  0x6e   : > { %3733 = vmatpush3.bf16.msra.mxu0 %v4252_v35  ;;  %v416_v35 = vld [vmem:[#allocation2 + $0x2c] sm:$0xf] }
  0x6f   : > { %3734 = vmatprep.subr.bf16.mxu0 %v4263_v37 }
  0x70   : > { %1446 = vmatpush2.bf16.msra.mxu1 %v4014_v19  ;;  %v422_v19 = vld [vmem:[#allocation2 + $0x44] sm:$0xf] }
  0x71   : > { %957 = vmatmul.mubr.bf16.gmra.mxu0 %v4503_v20  ;;  %1447 = vmatprep.subr.bf16.mxu1 %v4133_v27  ;;  %v4610_v10 = vcombine.low %v422_v19, %v423_v25 }
  0x72   : > { %963 = vmatprep.mubr.bf16.mxu0 %v4512_v22  ;;  %3735 = vmatpush3.bf16.msra.mxu0 %v4263_v37  ;;  %v4546_v37 = vcombine.low %v416_v35, %v417_v32 }
  0x73   : > { %3783 = vmatmul.mubr.bf16.gmra.mxu1 %v4519_v63  ;;  %3736 = vmatprep.subr.bf16.mxu0 %v4274_v39 }
  0x74   : > { %1448 = vmatpush2.bf16.msra.mxu1 %v4018_v26  ;;  %3786 = vmatprep.mubr.bf16.mxu1 %v4527_v28  ;;  %v4604_v26 = vcombine.low %v417_v32, %v418_v38  ;;  %v424_v32 = vld [vmem:[#allocation2 + $0x4c] sm:$0xf] }
  0x75   : > { %1449 = vmatprep.subr.bf16.mxu1 %v4133_v27 }
  0x76   : > { %3737 = vmatpush3.bf16.msra.mxu0 %v4274_v39  ;;  %v4562_v39 = vcombine.low %v4426_v50, %v4463_v6  ;;  %v4050_v50 = vld [vmem:[%s5558_s1 + $0xb0] ss:$12 sps:$4 sm:$0xff]   ;;  %v4584_v6 = vcombine.low %v4491_v15, %v416_v35  ;;  %v4058_v15 = vld [vmem:[%s5558_s1 + $0x80] ss:$12 sps:$4 sm:$0xff]  }
  0x77   : > { %3738 = vmatprep.subr.bf16.mxu0 %v4292_v46  ;;  %v4065_v35 = vld [vmem:[%s5558_s1 + $0x50] ss:$12 sps:$4 sm:$0xff]  }
  0x78   : > { %1450 = vmatpush2.bf16.msra.mxu1 %v4022_v41  ;;  %v425_v41 = vld [vmem:[#allocation2 + $0x50] sm:$0xf] }
  0x79   : > { %964 = vmatmul.mubr.bf16.gmra.mxu0 %v4542_v44  ;;  %1451 = vmatprep.subr.bf16.mxu1 %v4133_v27 }
  0x7a   : > { %971 = vmatprep.mubr.bf16.mxu0 %v4546_v37  ;;  %3739 = vmatpush3.bf16.msra.mxu0 %v4292_v46  ;;  %v4573_v46 = vcombine.low %v418_v38, %v419_v48  ;;  %v4068_v38 = vld [vmem:[%s5558_s1 + $0x38] ss:$12 sps:$4 sm:$0xff]  }
  0x7b   : > { %3787 = vmatmul.mubr.bf16.gmra.mxu1 %v4549_v53  ;;  %3740 = vmatprep.subr.bf16.mxu0 %v4306_v51 }
  0x7c   : > { %1452 = vmatpush2.bf16.msra.mxu1 %v4026_v47  ;;  %1455 = vmatprep.mubr.bf16.mxu1 %v4337_v0  ;;  %v4620_v47 = vcombine.low %v419_v48, %v420_v2  ;;  %v426_v48 = vld [vmem:[#allocation2 + $0x54] sm:$0xf]  ;;  %v4636_v2 = vcombine.low %v421_v4, %v422_v19  ;;  %v4075_v4 = vld [vmem:[%s5558_s1 + $0x170] ss:$12 sps:$4 sm:$0xff]   ;;  %v4653_v19 = vld [vmem:[%s5558_s1 + $0x22c] ss:$12 sps:$4 sm:$0xff]  }
  0x7d   : > { %1453 = vmatprep.subr.bf16.mxu1 %v4133_v27 }
  0x7e   : > { %3741 = vmatpush3.bf16.msra.mxu0 %v4306_v51  ;;  %v4055_v51 = vld [vmem:[%s5558_s1 + $0x98] ss:$12 sps:$4 sm:$0xff]  }
  0x7f   : > { %3790 = vmatprep.subr.bf16.mxu0 %v4653_v19 }
  0x80   : > { %1454 = vmatpush2.bf16.msra.mxu1 %v4030_v60  ;;  %v4626_v60 = vcombine.low %v424_v32, %v425_v41 }
  0x81   : > { %972 = vmatmul.mubr.bf16.gmra.mxu0 %v4569_v61  ;;  %2210 = vmatprep.subr.bf16.mxu1 %v4133_v27 }
  0x82   : > { %978 = vmatprep.mubr.bf16.mxu0 %v4573_v46 }
  0x83   : > { %1456 = vmatmul.mubr.bf16.vlgmr.msra.gmra.mxu1 %v4419_v43 }
  0x84   : > { %2211 = vmatpush1.bf16.msra.mxu1 %v4050_v50  ;;  %1463 = vmatprep.mubr.bf16.mxu1 %v4437_v55  ;;  %v4070_v50 = vld [vmem:[%s5558_s1 + $0x20] ss:$12 sps:$4 sm:$0xff]  }
  0x85   : > { %2212 = vmatprep.subr.bf16.mxu1 %v4133_v27 }
  0x88   : > { %2213 = vmatpush1.bf16.msra.mxu1 %v4055_v51  ;;  %v4073_v51 = vld [vmem:[%s5558_s1 + $0x8] ss:$12 sps:$4 sm:$0xff]  }
  0x89   : > { %979 = vmatmul.mubr.bf16.gmra.mxu0 %v4584_v6  ;;  %2214 = vmatprep.subr.bf16.mxu1 %v4133_v27 }
  0x8a   : > { %985 = vmatprep.mubr.bf16.mxu0 %v4590_v13 }
  0x8b   : > { %1464 = vmatmul.mubr.bf16.gmra.mxu1 %v4460_v29 }
  0x8c   : > { %1471 = vmatprep.mubr.bf16.mxu1 %v4469_v9  ;;  %2215 = vmatpush1.bf16.msra.mxu1 %v4058_v15  ;;  %v4643_v15 = vcombine.low %v426_v48, %v4276_v40  ;;  %v4659_v40 = vcombine.low %v423_v25, %v424_v32  ;;  %v4673_v25 = vcombine.low %v425_v41, %v426_v48  ;;  %v4083_v32 = vld [vmem:[%s5558_s1 + $0x128] ss:$12 sps:$4 sm:$0xff]   ;;  %v4088_v41 = vld [vmem:[%s5558_s1 + $0xf8] ss:$12 sps:$4 sm:$0xff]  }
  0x8d   : > { %2216 = vmatprep.subr.bf16.mxu1 %v4133_v27  ;;  %v4096_v48 = vld [vmem:[%s5558_s1 + $0xc8] ss:$12 sps:$4 sm:$0xff]  }
  0x90   : > { %2217 = vmatpush1.bf16.msra.mxu1 %v4063_v8  ;;  %v4078_v8 = vld [vmem:[%s5558_s1 + $0x158] ss:$12 sps:$4 sm:$0xff]  }
  0x91   : > { %986 = vmatmul.mubr.bf16.gmra.mxu0 %v4604_v26  ;;  %2218 = vmatprep.subr.bf16.mxu1 %v4133_v27 }
  0x92   : > { %993 = vmatprep.mubr.bf16.mxu0 %v4610_v10 }
  0x93   : > { %1472 = vmatmul.mubr.bf16.gmra.mxu1 %v4503_v20 }
  0x94   : > { %1479 = vmatprep.mubr.bf16.mxu1 %v4512_v22  ;;  %2219 = vmatpush1.bf16.msra.mxu1 %v4065_v35  ;;  %v4080_v35 = vld [vmem:[%s5558_s1 + $0x140] ss:$12 sps:$4 sm:$0xff]  }
  0x95   : > { %2220 = vmatprep.subr.bf16.mxu1 %v4133_v27 }
  0x98   : > { %2221 = vmatpush1.bf16.msra.mxu1 %v4068_v38  ;;  %v4085_v38 = vld [vmem:[%s5558_s1 + $0x110] ss:$12 sps:$4 sm:$0xff]  }
  0x99   : > { %994 = vmatmul.mubr.bf16.gmra.mxu0 %v4620_v47  ;;  %2222 = vmatprep.subr.bf16.mxu1 %v4133_v27 }
  0x9a   : > { %1000 = vmatprep.mubr.bf16.mxu0 %v4626_v60 }
  0x9b   : > { %1480 = vmatmul.mubr.bf16.gmra.mxu1 %v4542_v44 }
  0x9c   : > { %1487 = vmatprep.mubr.bf16.mxu1 %v4546_v37  ;;  %2223 = vmatpush1.bf16.msra.mxu1 %v4070_v50  ;;  %v4092_v50 = vld [vmem:[%s5558_s1 + $0xe0] ss:$12 sps:$4 sm:$0xff]  }
  0x9d   : > { %2224 = vmatprep.subr.bf16.mxu1 %v4133_v27 }
  0xa0   : > { %2225 = vmatpush1.bf16.msra.mxu1 %v4073_v51 }
  0xa1   : > { %1001 = vmatmul.mubr.bf16.gmra.mxu0 %v4636_v2  ;;  %2226 = vmatprep.subr.bf16.mxu1 %v4133_v27 }
  0xa2   : > { %1007 = vmatprep.mubr.bf16.mxu0 %v4643_v15 }
  0xa3   : > { %1488 = vmatmul.mubr.bf16.gmra.mxu1 %v4569_v61 }
  0xa4   : > { %1495 = vmatprep.mubr.bf16.mxu1 %v4573_v46  ;;  %2227 = vmatpush2.bf16.msra.mxu1 %v4075_v4  ;;  %v4746_v4 = vcombine.low %v4473_v12, %v4506_v21 }
  0xa5   : > { %2228 = vmatprep.subr.bf16.mxu1 %v4133_v27 }
  0xa8   : > { %2229 = vmatpush2.bf16.msra.mxu1 %v4078_v8 }
  0xa9   : > { %1008 = vmatmul.mubr.bf16.gmra.mxu0 %v4659_v40  ;;  %2230 = vmatprep.subr.bf16.mxu1 %v4133_v27 }
  0xaa   : > { %1015 = vmatprep.mubr.bf16.mxu0 %v4286_v45 }
  0xab   : > { %1496 = vmatmul.mubr.bf16.gmra.mxu1 %v4584_v6 }
  0xac   : > { %1503 = vmatprep.mubr.bf16.mxu1 %v4590_v13  ;;  %2231 = vmatpush2.bf16.msra.mxu1 %v4080_v35 }
  0xad   : > { %2232 = vmatprep.subr.bf16.mxu1 %v4133_v27 }
  0xb0   : > { %2233 = vmatpush2.bf16.msra.mxu1 %v4083_v32 }
  0xb1   : > { %1016 = vmatmul.mubr.bf16.gmra.mxu0 %v4673_v25  ;;  %2234 = vmatprep.subr.bf16.mxu1 %v4133_v27 }
  0xb2   : > { %1022 = vmatprep.mubr.bf16.mxu0 %v4296_v49 }
  0xb3   : > { %1504 = vmatmul.mubr.bf16.gmra.mxu1 %v4604_v26 }
  0xb4   : > { %1511 = vmatprep.mubr.bf16.mxu1 %v4610_v10  ;;  %2235 = vmatpush2.bf16.msra.mxu1 %v4085_v38 }
  0xb5   : > { %2236 = vmatprep.subr.bf16.mxu1 %v4133_v27 }
  0xb8   : > { %2237 = vmatpush2.bf16.msra.mxu1 %v4088_v41  ;;  %v4758_v41 = vcombine.low %v4508_v33, %v4514_v23 }
  0xb9   : > { %1023 = vmatmul.mubr.bf16.gmra.mxu0 %v4280_v42  ;;  %2238 = vmatprep.subr.bf16.mxu1 %v4133_v27 }
  0xba   : > { %1029 = vmatprep.mubr.bf16.mxu0 %v4309_v54 }
  0xbb   : > { %1512 = vmatmul.mubr.bf16.gmra.mxu1 %v4620_v47 }
  0xbc   : > { %1519 = vmatprep.mubr.bf16.mxu1 %v4626_v60  ;;  %2239 = vmatpush2.bf16.msra.mxu1 %v4092_v50 }
  0xbd   : > { %2240 = vmatprep.subr.bf16.mxu1 %v4133_v27 }
  0xc0   : > { %2241 = vmatpush2.bf16.msra.mxu1 %v4096_v48 }
  0xc1   : > { %1030 = vmatmul.mubr.bf16.gmra.mxu0 %v4320_v57 }
  0xc2   : > { %1037 = vmatprep.mubr.bf16.mxu0 %v4339_v1 }
  0xc3   : > { %1520 = vmatmul.mubr.bf16.gmra.mxu1 %v4636_v2 }
  0xc4   : > { %1527 = vmatprep.mubr.bf16.mxu1 %v4643_v15 }
  0xc9   : > { %1038 = vmatmul.mubr.bf16.gmra.mxu0 %v4326_v59 }
  0xca   : > { %1044 = vmatprep.mubr.bf16.mxu0 %v4367_v11 }
  0xcb   : > { %1528 = vmatmul.mubr.bf16.gmra.mxu1 %v4659_v40 }
  0xcc   : > { %1535 = vmatprep.mubr.bf16.mxu1 %v4286_v45 }
  0xd1   : > { %1045 = vmatmul.mubr.bf16.gmra.mxu0 %v4351_v5 }
  0xd2   : > { %1051 = vmatprep.mubr.bf16.mxu0 %v4394_v24 }
  0xd3   : > { %1536 = vmatmul.mubr.bf16.gmra.mxu1 %v4673_v25 }
  0xd4   : > { %1543 = vmatprep.mubr.bf16.mxu1 %v4296_v49 }
  0xd9   : > { %1052 = vmatmul.mubr.bf16.gmra.mxu0 %v4356_v7 }
  0xda   : > { %1059 = vmatprep.mubr.bf16.mxu0 %v4428_v52 }
  0xdb   : > { %1544 = vmatmul.mubr.bf16.gmra.mxu1 %v4280_v42 }
  0xdc   : > { %1551 = vmatprep.mubr.bf16.mxu1 %v4309_v54 }
  0xe1   : > { %1060 = vmatmul.mubr.bf16.gmra.mxu0 %v4375_v16 }
  0xe2   : > { %1066 = vmatprep.mubr.bf16.mxu0 %v4454_v3 }
  0xe3   : > { %1552 = vmatmul.mubr.bf16.gmra.mxu1 %v4320_v57 }
  0xe4   : > { %1559 = vmatprep.mubr.bf16.mxu1 %v4339_v1 }
  0xe9   : > { %1067 = vmatmul.mubr.bf16.gmra.mxu0 %v4380_v18 }
  0xea   : > { %1073 = vmatprep.mubr.bf16.mxu0 %v4497_v17 }
  0xeb   : > { %1560 = vmatmul.mubr.bf16.gmra.mxu1 %v4326_v59 }
  0xec   : > { %1567 = vmatprep.mubr.bf16.mxu1 %v4367_v11 }
  0xf1   : > { %1074 = vmatmul.mubr.bf16.gmra.mxu0 %v4404_v30 }
  0xf2   : > { %1081 = vmatprep.mubr.bf16.mxu0 %v4536_v36 }
  0xf3   : > { %1568 = vmatmul.mubr.bf16.gmra.mxu1 %v4351_v5 }
  0xf4   : > { %1575 = vmatprep.mubr.bf16.mxu1 %v4394_v24 }
  0xf9   : > { %1082 = vmatmul.mubr.bf16.gmra.mxu0 %v4410_v34 }
  0xfa   : > { %1088 = vmatprep.mubr.bf16.mxu0 %v4562_v39 }
  0xfb   : > { %1576 = vmatmul.mubr.bf16.gmra.mxu1 %v4356_v7 }
  0xfc   : > { %1583 = vmatprep.mubr.bf16.mxu1 %v4428_v52 }
 0x101   : > { %1089 = vmatmul.mubr.bf16.gmra.mxu0 %v4440_v56 }
 0x102   : > { %1095 = vmatprep.mubr.bf16.mxu0 %v4595_v31  ;;  %v4738_v27 = vpop.f32.mrf.mxu1 }
 0x103   : > { %5561 = vst [vmem:[#allocation7_spill] sm:$0xff] %v4738_v27  ;;  %1584 = vmatmul.mubr.bf16.gmra.mxu1 %v4375_v16 }
 0x104   : > { %1591 = vmatprep.mubr.bf16.mxu1 %v4454_v3  ;;  %v4742_v51 = vpop.f32.mrf.mxu1 }
 0x105   : > { %5562 = vst [vmem:[#allocation8_spill] sm:$0xff] %v4742_v51 }
 0x106   : > { %v4748_v8 = vpop.f32.mrf.mxu1 }
 0x107   : > { %5563 = vst [vmem:[#allocation9_spill] sm:$0xff] %v4748_v8 }
 0x108   : > { %v1214_v35 = vpop.f32.mrf.mxu1 }
 0x109   : > { %1096 = vmatmul.mubr.bf16.gmra.mxu0 %v4445_v58 }
 0x10a   : > { %1103 = vmatprep.mubr.bf16.mxu0 %v4746_v4  ;;  %v4752_v32 = vpop.f32.mrf.mxu1 }
 0x10b   : > { %5564 = vst [vmem:[#allocation10_spill] sm:$0xff] %v4752_v32  ;;  %1592 = vmatmul.mubr.bf16.gmra.mxu1 %v4380_v18 }
 0x10c   : > { %1599 = vmatprep.mubr.bf16.mxu1 %v4497_v17  ;;  %v1226_v38 = vpop.f32.mrf.mxu1 }
 0x10e   : > { %v3765_v12 = vpop.f32.mrf.mxu1 }
 0x10f   : > { %v4089_v12 = vld [vmem:[%s5558_s1 + $0x214] ss:$12 sps:$4 sm:$0xff]  }
 0x110   : > { %v4761_v21 = vpop.f32.mrf.mxu1 }
 0x111   : > { %1104 = vmatmul.mubr.bf16.gmra.mxu0 %v4479_v62  ;;  %5565 = vst [vmem:[#allocation11_spill] sm:$0xff] %v4761_v21 }
 0x112   : > { %1110 = vmatprep.mubr.bf16.mxu0 %v4758_v41  ;;  %v3768_v50 = vpop.f32.mrf.mxu1 }
 0x113   : > { %1600 = vmatmul.mubr.bf16.gmra.mxu1 %v4404_v30 }
 0x114   : > { %1607 = vmatprep.mubr.bf16.mxu1 %v4536_v36  ;;  %v4766_v48 = vpop.f32.mrf.mxu1 }
 0x115   : > { %5566 = vst [vmem:[#allocation12_spill] sm:$0xff] %v4766_v48 }
 0x116   : > { %v4768_v35 = vpop.f32.mrf.mxu1 }
 0x117   : > { %5567 = vst [vmem:[#allocation13_spill] sm:$0xff] %v4768_v35 }
 0x118   : > { %v4771_v33 = vpop.f32.mrf.mxu1 }
 0x119   : > { %1111 = vmatmul.mubr.bf16.gmra.mxu0 %v4487_v14  ;;  %5568 = vst [vmem:[#allocation14_spill] sm:$0xff] %v4771_v33 }
 0x11a   : > { %3742 = vmatprep.mubr.bf16.mxu0 %v4542_v44  ;;  %v4774_v23 = vpop.f32.mrf.mxu1 }
 0x11b   : > { %5569 = vst [vmem:[#allocation15_spill] sm:$0xff] %v4774_v23  ;;  %1608 = vmatmul.mubr.bf16.gmra.mxu1 %v4410_v34 }
 0x11c   : > { %1615 = vmatprep.mubr.bf16.mxu1 %v4562_v39  ;;  %v4778_v38 = vpop.f32.mrf.mxu1 }
 0x11d   : > { %5570 = vst [vmem:[#allocation16_spill] sm:$0xff] %v4778_v38  ;;  %v4090_v38 = vld [vmem:[%s5558_s1 + $0x1fc] ss:$12 sps:$4 sm:$0xff]  }
 0x11e   : > { %v4783_v50 = vpop.f32.mrf.mxu1 }
 0x11f   : > { %5571 = vst [vmem:[#allocation17_spill] sm:$0xff] %v4783_v50 }
 0x120   : > { %v1258_v33 = vpop.f32.mrf.mxu1 }
 0x121   : > { %v4785_v35 = vpop.f32.mrf.mxu0  ;;  %3743 = vmatmul.mubr.bf16.vlgmr.msra.gmra.mxu0 %v4569_v61 }
 0x122   : > { %3791 = vmatpush3.bf16.msra.mxu0 %v4653_v19  ;;  %3746 = vmatprep.mubr.bf16.mxu0 %v4584_v6  ;;  %v4091_v19 = vld [vmem:[%s5558_s1 + $0x1e4] ss:$12 sps:$4 sm:$0xff]  }
 0x123   : > { %v945_v23 = vpop.f32.mrf.mxu0  ;;  %3792 = vmatprep.subr.bf16.mxu0 %v4089_v12  ;;  %v4793_v48 = vpop.f32.mrf.mxu1  ;;  %1616 = vmatmul.mubr.bf16.gmra.mxu1 %v4440_v56 }
 0x124   : > { %5572 = vst [vmem:[#allocation18_spill] sm:$0xff] %v4793_v48  ;;  %1623 = vmatprep.mubr.bf16.mxu1 %v4595_v31 }
 0x125   : > { %v4796_v50 = vpop.f32.mrf.mxu0  ;;  %v1270_v21 = vpop.f32.mrf.mxu1 }
 0x126   : > { %3793 = vmatpush3.bf16.msra.mxu0 %v4089_v12  ;;  %v4093_v21 = vld [vmem:[%s5558_s1 + $0x1cc] ss:$12 sps:$4 sm:$0xff]  }
 0x127   : > { %v948_v33 = vpop.f32.mrf.mxu0  ;;  %3794 = vmatprep.subr.bf16.mxu0 %v4090_v38  ;;  %v3777_v23 = vpop.f32.mrf.mxu1 }
 0x129   : > { %v951_v32 = vpop.f32.mrf.mxu0  ;;  %3747 = vmatmul.mubr.bf16.gmra.mxu0 %v4604_v26  ;;  %v4803_v8 = vpop.f32.mrf.mxu1 }
 0x12a   : > { %5573 = vst [vmem:[#allocation19_spill] sm:$0xff] %v4803_v8  ;;  %3795 = vmatpush3.bf16.msra.mxu0 %v4090_v38  ;;  %3750 = vmatprep.mubr.bf16.mxu0 %v4620_v47 }
 0x12b   : > { %v952_v48 = vpop.f32.mrf.mxu0  ;;  %3796 = vmatprep.subr.bf16.mxu0 %v4091_v19  ;;  %v3780_v12 = vpop.f32.mrf.mxu1  ;;  %1624 = vmatmul.mubr.bf16.gmra.mxu1 %v4445_v58 }
 0x12c   : > { %1631 = vmatprep.mubr.bf16.mxu1 %v4746_v4  ;;  %v4094_v48 = vld [vmem:[%s5558_s1 + $0x1b4] ss:$12 sps:$4 sm:$0xff]  }
 0x12d   : > { %v4810_v33 = vpop.f32.mrf.mxu0  ;;  %v4813_v32 = vpop.f32.mrf.mxu1 }
 0x12e   : > { %5574 = vst [vmem:[#allocation20_spill] sm:$0xff] %v4813_v32  ;;  %3797 = vmatpush3.bf16.msra.mxu0 %v4091_v19  ;;  %v4095_v19 = vld [vmem:[%s5558_s1 + $0x19c] ss:$12 sps:$4 sm:$0xff]  }
 0x12f   : > { %v955_v23 = vpop.f32.mrf.mxu0  ;;  %3798 = vmatprep.subr.bf16.mxu0 %v4093_v21  ;;  %v4818_v38 = vpop.f32.mrf.mxu1 }
 0x130   : > { %5575 = vst [vmem:[#allocation21_spill] sm:$0xff] %v4818_v38 }
 0x131   : > { %v4820_v8 = vpop.f32.mrf.mxu0  ;;  %3751 = vmatmul.mubr.bf16.gmra.mxu0 %v4636_v2  ;;  %v4823_v12 = vpop.f32.mrf.mxu1 }
 0x132   : > { %5576 = vst [vmem:[#allocation22_spill] sm:$0xff] %v4820_v8  ;;  %5577 = vst [vmem:[#allocation23_spill] sm:$0xff] %v4823_v12  ;;  %3799 = vmatpush3.bf16.msra.mxu0 %v4093_v21  ;;  %3754 = vmatprep.mubr.bf16.mxu0 %v4659_v40 }
 0x133   : > { %v960_v51 = vpop.f32.mrf.mxu0  ;;  %3800 = vmatprep.subr.bf16.mxu0 %v4094_v48  ;;  %v4829_v23 = vpop.f32.mrf.mxu1  ;;  %1632 = vmatmul.mubr.bf16.gmra.mxu1 %v4479_v62 }
 0x134   : > { %5578 = vst [vmem:[#allocation24_spill] sm:$0xff] %v4829_v23  ;;  %1639 = vmatprep.mubr.bf16.mxu1 %v4758_v41  ;;  %v4097_v51 = vld [vmem:[%s5558_s1 + $0x184] ss:$12 sps:$4 sm:$0xff]  }
 0x135   : > { %v961_v38 = vpop.f32.mrf.mxu0  ;;  %v4833_v32 = vpop.f32.mrf.mxu1 }
 0x136   : > { %5579 = vst [vmem:[#allocation25_spill] sm:$0xff] %v4833_v32  ;;  %3801 = vmatpush3.bf16.msra.mxu0 %v4094_v48  ;;  %v4098_v48 = vld [vmem:[%s5558_s1 + $0x230] ss:$12 sps:$4 sm:$0xff]  }
 0x137   : > { %v962_v12 = vpop.f32.mrf.mxu0  ;;  %3802 = vmatprep.subr.bf16.mxu0 %v4095_v19  ;;  %v4838_v21 = vpop.f32.mrf.mxu1 }
 0x138   : > { %5580 = vst [vmem:[#allocation26_spill] sm:$0xff] %v4838_v21 }
 0x139   : > { %v4840_v27 = vpop.f32.mrf.mxu0  ;;  %3755 = vmatmul.mubr.bf16.gmra.mxu0 %v4673_v25  ;;  %v1302_v23 = vpop.f32.mrf.mxu1 }
 0x13a   : > { %5581 = vst [vmem:[#allocation27_spill] sm:$0xff] %v4840_v27  ;;  %3803 = vmatpush3.bf16.msra.mxu0 %v4095_v19  ;;  %3806 = vmatprep.mubr.bf16.mxu0 %v4542_v44  ;;  %v4099_v19 = vld [vmem:[%s5558_s1 + $0x218] ss:$12 sps:$4 sm:$0xff]  }
 0x13b   : > { %v967_v38 = vpop.f32.mrf.mxu0  ;;  %3804 = vmatprep.subr.bf16.mxu0 %v4097_v51  ;;  %v4847_v12 = vpop.f32.mrf.mxu1  ;;  %1640 = vmatmul.mubr.bf16.gmra.mxu1 %v4487_v14 }
 0x13c   : > { %5582 = vst [vmem:[#allocation28_spill] sm:$0xff] %v4847_v12  ;;  %2242 = vmatprep.mubr.bf16.mxu1 %v4337_v0  ;;  %v4100_v0 = vld [vmem:[%s5558_s1 + $0x200] ss:$12 sps:$4 sm:$0xff]  }
 0x13d   : > { %v4850_v32 = vpop.f32.mrf.mxu0  ;;  %v1314_v21 = vpop.f32.mrf.mxu1 }
 0x13e   : > { %5583 = vst [vmem:[#allocation29_spill] sm:$0xff] %v4850_v32  ;;  %3805 = vmatpush3.bf16.msra.mxu0 %v4097_v51 }
 0x13f   : > { %v970_v23 = vpop.f32.mrf.mxu0  ;;  %3854 = vmatprep.subr.bf16.mxu0 %v4098_v48  ;;  %v3789_v38 = vpop.f32.mrf.mxu1 }
 0x141   : > { %v973_v8 = vpop.f32.mrf.mxu0  ;;  %3807 = vmatmul.mubr.bf16.vlgmr.msra.gmra.mxu0 %v4569_v61  ;;  %v4857_v27 = vpop.f32.mrf.mxu1 }
 0x142   : > { %5584 = vst [vmem:[#allocation30_spill] sm:$0xff] %v4857_v27  ;;  %3855 = vmatpush3.bf16.msra.mxu0 %v4098_v48  ;;  %3810 = vmatprep.mubr.bf16.mxu0 %v4584_v6  ;;  %v4101_v48 = vld [vmem:[%s5558_s1 + $0x1e8] ss:$12 sps:$4 sm:$0xff]  }
 0x143   : > { %v974_v12 = vpop.f32.mrf.mxu0  ;;  %3856 = vmatprep.subr.bf16.mxu0 %v4099_v19  ;;  %v4863_v51 = vpop.f32.mrf.mxu1  ;;  %2243 = vmatmul.mubr.bf16.vlgmr.msra.gmra.mxu1 %v4419_v43 }
 0x144   : > { %2250 = vmatprep.mubr.bf16.mxu1 %v4437_v55  ;;  %v4102_v55 = vld [vmem:[%s5558_s1 + $0x1d0] ss:$12 sps:$4 sm:$0xff]  }
 0x145   : > { %v4866_v21 = vpop.f32.mrf.mxu0  ;;  %v1459_v8 = vpop.f32.mrf.mxu1 }
 0x146   : > { %5585 = vst [vmem:[#allocation31_spill] sm:$0xff] %v4866_v21  ;;  %3857 = vmatpush3.bf16.msra.mxu0 %v4099_v19 }
 0x147   : > { %v977_v23 = vpop.f32.mrf.mxu0  ;;  %3858 = vmatprep.subr.bf16.mxu0 %v4100_v0  ;;  %v4872_v12 = vpop.f32.mrf.mxu1 }
 0x149   : > { %v4874_v38 = vpop.f32.mrf.mxu0  ;;  %3811 = vmatmul.mubr.bf16.gmra.mxu0 %v4604_v26  ;;  %v1462_v27 = vpop.f32.mrf.mxu1 }
 0x14a   : > { %5586 = vst [vmem:[#allocation32_spill] sm:$0xff] %v4874_v38  ;;  %3814 = vmatprep.mubr.bf16.mxu0 %v4620_v47  ;;  %3859 = vmatpush3.bf16.msra.mxu0 %v4100_v0  ;;  %v4103_v27 = vld [vmem:[%s5558_s1 + $0x1b8] ss:$12 sps:$4 sm:$0xff]  }
 0x14b   : > { %v982_v43 = vpop.f32.mrf.mxu0  ;;  %3860 = vmatprep.subr.bf16.mxu0 %v4101_v48  ;;  %v4881_v19 = vpop.f32.mrf.mxu1  ;;  %2251 = vmatmul.mubr.bf16.gmra.mxu1 %v4460_v29 }
 0x14c   : > { %2258 = vmatprep.mubr.bf16.mxu1 %v4469_v9  ;;  %v4104_v9 = vld [vmem:[%s5558_s1 + $0x1a0] ss:$12 sps:$4 sm:$0xff]  }
 0x14d   : > { %v983_v8 = vpop.f32.mrf.mxu0  ;;  %v1467_v23 = vpop.f32.mrf.mxu1 }
 0x14e   : > { %3861 = vmatpush3.bf16.msra.mxu0 %v4101_v48 }
 0x14f   : > { %v984_v21 = vpop.f32.mrf.mxu0  ;;  %3862 = vmatprep.subr.bf16.mxu0 %v4102_v55  ;;  %v4888_v0 = vpop.f32.mrf.mxu1 }
 0x151   : > { %v4890_v43 = vpop.f32.mrf.mxu0  ;;  %3815 = vmatmul.mubr.bf16.gmra.mxu0 %v4636_v2  ;;  %v1470_v38 = vpop.f32.mrf.mxu1 }
 0x152   : > { %5587 = vst [vmem:[#allocation33_spill] sm:$0xff] %v4890_v43  ;;  %3818 = vmatprep.mubr.bf16.mxu0 %v4659_v40  ;;  %3863 = vmatpush3.bf16.msra.mxu0 %v4102_v55  ;;  %v4105_v55 = vld [vmem:[%s5558_s1 + $0x188] ss:$12 sps:$4 sm:$0xff]  }
 0x153   : > { %v989_v29 = vpop.f32.mrf.mxu0  ;;  %3864 = vmatprep.subr.bf16.mxu0 %v4103_v27  ;;  %v4897_v21 = vpop.f32.mrf.mxu1  ;;  %2259 = vmatmul.mubr.bf16.gmra.mxu1 %v4503_v20 }
 0x154   : > { %2266 = vmatprep.mubr.bf16.mxu1 %v4512_v22 }
 0x155   : > { %v4900_v48 = vpop.f32.mrf.mxu0  ;;  %v1475_v8 = vpop.f32.mrf.mxu1 }
 0x156   : > { %5588 = vst [vmem:[#allocation34_spill] sm:$0xff] %v4900_v48  ;;  %3865 = vmatpush3.bf16.msra.mxu0 %v4103_v27 }
 0x157   : > { %v992_v38 = vpop.f32.mrf.mxu0  ;;  %3866 = vmatprep.subr.bf16.mxu0 %v4104_v9  ;;  %v4906_v23 = vpop.f32.mrf.mxu1 }
 0x159   : > { %v995_v29 = vpop.f32.mrf.mxu0  ;;  %3819 = vmatmul.mubr.bf16.gmra.mxu0 %v4673_v25  ;;  %v1478_v43 = vpop.f32.mrf.mxu1 }
 0x15a   : > { %3822 = vmatprep.mubr.bf16.mxu0 %v4280_v42  ;;  %3867 = vmatpush3.bf16.msra.mxu0 %v4104_v9 }
 0x15b   : > { %v996_v20 = vpop.f32.mrf.mxu0  ;;  %3868 = vmatprep.subr.bf16.mxu0 %v4105_v55  ;;  %v4910_v22 = vpop.f32.mrf.mxu1  ;;  %2267 = vmatmul.mubr.bf16.gmra.mxu1 %v4542_v44 }
 0x15c   : > { %2274 = vmatprep.mubr.bf16.mxu1 %v4546_v37 }
 0x15d   : > { %v4913_v27 = vpop.f32.mrf.mxu0  ;;  %v1483_v8 = vpop.f32.mrf.mxu1 }
 0x15e   : > { %5589 = vst [vmem:[#allocation35_spill] sm:$0xff] %v4913_v27  ;;  %3869 = vmatpush3.bf16.msra.mxu0 %v4105_v55 }
 0x15f   : > { %v999_v38 = vpop.f32.mrf.mxu0  ;;  %v4916_v29 = vpop.f32.mrf.mxu1 }
 0x161   : > { %v4918_v48 = vpop.f32.mrf.mxu0  ;;  %3823 = vmatmul.mubr.bf16.gmra.mxu0 %v4320_v57  ;;  %v1486_v43 = vpop.f32.mrf.mxu1 }
 0x162   : > { %5590 = vst [vmem:[#allocation36_spill] sm:$0xff] %v4918_v48  ;;  %3826 = vmatprep.mubr.bf16.mxu0 %v4326_v59 }
 0x163   : > { %v1004_v9 = vpop.f32.mrf.mxu0  ;;  %v4922_v20 = vpop.f32.mrf.mxu1  ;;  %2275 = vmatmul.mubr.bf16.gmra.mxu1 %v4569_v61 }
 0x164   : > { %2282 = vmatprep.mubr.bf16.mxu1 %v4573_v46 }
 0x165   : > { %v1005_v27 = vpop.f32.mrf.mxu0  ;;  %v1491_v37 = vpop.f32.mrf.mxu1 }
 0x167   : > { %v1006_v55 = vpop.f32.mrf.mxu0  ;;  %v4926_v8 = vpop.f32.mrf.mxu1 }
 0x168   : > { %5591 = vst [vmem:[#allocation37_spill] sm:$0xff] %v4926_v8 }
 0x169   : > { %v4928_v38 = vpop.f32.mrf.mxu0  ;;  %3827 = vmatmul.mubr.bf16.gmra.mxu0 %v4351_v5  ;;  %v1494_v48 = vpop.f32.mrf.mxu1 }
 0x16a   : > { %5592 = vst [vmem:[#allocation38_spill] sm:$0xff] %v4928_v38  ;;  %3830 = vmatprep.mubr.bf16.mxu0 %v4356_v7 }
 0x16b   : > { %v1011_v43 = vpop.f32.mrf.mxu0  ;;  %v4932_v9 = vpop.f32.mrf.mxu1  ;;  %2283 = vmatmul.mubr.bf16.gmra.mxu1 %v4584_v6 }
 0x16c   : > { %2290 = vmatprep.mubr.bf16.mxu1 %v4590_v13 }
 0x16d   : > { %v4935_v32 = vpop.f32.mrf.mxu0  ;;  %v1499_v46 = vpop.f32.mrf.mxu1 }
 0x16e   : > { %5593 = vst [vmem:[#allocation39_spill] sm:$0xff] %v4935_v32 }
 0x16f   : > { %v1014_v27 = vpop.f32.mrf.mxu0  ;;  %v4938_v37 = vpop.f32.mrf.mxu1 }
 0x171   : > { %v1017_v55 = vpop.f32.mrf.mxu0  ;;  %3831 = vmatmul.mubr.bf16.gmra.mxu0 %v4375_v16  ;;  %v1502_v38 = vpop.f32.mrf.mxu1 }
 0x172   : > { %3834 = vmatprep.mubr.bf16.mxu0 %v4380_v18 }
 0x173   : > { %v1018_v48 = vpop.f32.mrf.mxu0  ;;  %v4942_v43 = vpop.f32.mrf.mxu1  ;;  %2291 = vmatmul.mubr.bf16.gmra.mxu1 %v4604_v26 }
 0x174   : > { %5594 = vst [vmem:[#allocation40_spill] sm:$0xff] %v4942_v43  ;;  %2298 = vmatprep.mubr.bf16.mxu1 %v4610_v10 }
 0x175   : > { %v4945_v8 = vpop.f32.mrf.mxu0  ;;  %v1507_v13 = vpop.f32.mrf.mxu1 }
 0x176   : > { %5595 = vst [vmem:[#allocation41_spill] sm:$0xff] %v4945_v8 }
 0x177   : > { %v1021_v46 = vpop.f32.mrf.mxu0  ;;  %v4948_v27 = vpop.f32.mrf.mxu1 }
 0x178   : > { %5596 = vst [vmem:[#allocation42_spill] sm:$0xff] %v4948_v27 }
 0x179   : > { %v4950_v32 = vpop.f32.mrf.mxu0  ;;  %3835 = vmatmul.mubr.bf16.gmra.mxu0 %v4404_v30  ;;  %v1510_v38 = vpop.f32.mrf.mxu1 }
 0x17a   : > { %5597 = vst [vmem:[#allocation43_spill] sm:$0xff] %v4950_v32  ;;  %3838 = vmatprep.mubr.bf16.mxu0 %v4410_v34 }
 0x17b   : > { %v1026_v55 = vpop.f32.mrf.mxu0  ;;  %v4954_v48 = vpop.f32.mrf.mxu1  ;;  %2299 = vmatmul.mubr.bf16.gmra.mxu1 %v4620_v47 }
 0x17c   : > { %2306 = vmatprep.mubr.bf16.mxu1 %v4626_v60 }
 0x17d   : > { %v1027_v43 = vpop.f32.mrf.mxu0  ;;  %v1515_v10 = vpop.f32.mrf.mxu1 }
 0x17f   : > { %v1028_v13 = vpop.f32.mrf.mxu0  ;;  %v4958_v46 = vpop.f32.mrf.mxu1 }
 0x181   : > { %v4960_v8 = vpop.f32.mrf.mxu0  ;;  %3839 = vmatmul.mubr.bf16.gmra.mxu0 %v4440_v56  ;;  %v1518_v32 = vpop.f32.mrf.mxu1 }
 0x182   : > { %5598 = vst [vmem:[#allocation44_spill] sm:$0xff] %v4960_v8  ;;  %3842 = vmatprep.mubr.bf16.mxu0 %v4445_v58 }
 0x183   : > { %v1033_v38 = vpop.f32.mrf.mxu0  ;;  %v4964_v55 = vpop.f32.mrf.mxu1  ;;  %2307 = vmatmul.mubr.bf16.gmra.mxu1 %v4636_v2 }
 0x184   : > { %5599 = vst [vmem:[#allocation45_spill] sm:$0xff] %v4964_v55  ;;  %2314 = vmatprep.mubr.bf16.mxu1 %v4643_v15 }
 0x185   : > { %v4967_v27 = vpop.f32.mrf.mxu0  ;;  %v1523_v60 = vpop.f32.mrf.mxu1 }
 0x186   : > { %5600 = vst [vmem:[#allocation46_spill] sm:$0xff] %v4967_v27 }
 0x187   : > { %v1036_v43 = vpop.f32.mrf.mxu0  ;;  %v4970_v10 = vpop.f32.mrf.mxu1 }
 0x188   : > { %5601 = vst [vmem:[#allocation47_spill] sm:$0xff] %v4970_v10 }
 0x189   : > { %v1039_v13 = vpop.f32.mrf.mxu0  ;;  %3843 = vmatmul.mubr.bf16.gmra.mxu0 %v4479_v62  ;;  %v1526_v8 = vpop.f32.mrf.mxu1 }
 0x18a   : > { %3846 = vmatprep.mubr.bf16.mxu0 %v4487_v14 }
 0x18b   : > { %v1040_v32 = vpop.f32.mrf.mxu0  ;;  %v4974_v38 = vpop.f32.mrf.mxu1  ;;  %2315 = vmatmul.mubr.bf16.gmra.mxu1 %v4659_v40 }
 0x18c   : > { %2322 = vmatprep.mubr.bf16.mxu1 %v4286_v45 }
 0x18d   : > { %v4977_v55 = vpop.f32.mrf.mxu0  ;;  %v1531_v15 = vpop.f32.mrf.mxu1 }
 0x18e   : > { %5602 = vst [vmem:[#allocation48_spill] sm:$0xff] %v4977_v55 }
 0x18f   : > { %v1043_v60 = vpop.f32.mrf.mxu0  ;;  %v4980_v43 = vpop.f32.mrf.mxu1 }
 0x191   : > { %v4982_v27 = vpop.f32.mrf.mxu0  ;;  %3847 = vmatmul.mubr.bf16.gmra.mxu0 %v4519_v63  ;;  %v1534_v8 = vpop.f32.mrf.mxu1 }
 0x192   : > { %5603 = vst [vmem:[#allocation49_spill] sm:$0xff] %v4982_v27  ;;  %3850 = vmatprep.mubr.bf16.mxu0 %v4527_v28 }
 0x193   : > { %v1048_v13 = vpop.f32.mrf.mxu0  ;;  %v4986_v32 = vpop.f32.mrf.mxu1  ;;  %2323 = vmatmul.mubr.bf16.gmra.mxu1 %v4673_v25 }
 0x194   : > { %5604 = vst [vmem:[#allocation50_spill] sm:$0xff] %v4986_v32  ;;  %2330 = vmatprep.mubr.bf16.mxu1 %v4296_v49 }
 0x195   : > { %v1049_v10 = vpop.f32.mrf.mxu0  ;;  %v1539_v45 = vpop.f32.mrf.mxu1 }
 0x197   : > { %v1050_v15 = vpop.f32.mrf.mxu0  ;;  %v4990_v60 = vpop.f32.mrf.mxu1 }
 0x199   : > { %v4992_v55 = vpop.f32.mrf.mxu0  ;;  %3851 = vmatmul.mubr.bf16.gmra.mxu0 %v4549_v53  ;;  %v1542_v27 = vpop.f32.mrf.mxu1 }
 0x19a   : > { %3870 = vmatprep.mubr.bf16.mxu0 %v4542_v44 }
 0x19b   : > { %v1055_v8 = vpop.f32.mrf.mxu0  ;;  %v4996_v13 = vpop.f32.mrf.mxu1  ;;  %2331 = vmatmul.mubr.bf16.gmra.mxu1 %v4280_v42 }
 0x19c   : > { %2338 = vmatprep.mubr.bf16.mxu1 %v4309_v54 }
 0x19d   : > { %v4999_v32 = vpop.f32.mrf.mxu0  ;;  %v1547_v49 = vpop.f32.mrf.mxu1 }
 0x19e   : > { %5605 = vst [vmem:[#allocation51_spill] sm:$0xff] %v4999_v32 }
 0x19f   : > { %v1058_v10 = vpop.f32.mrf.mxu0  ;;  %v5002_v45 = vpop.f32.mrf.mxu1 }
 0x1a1   : > { %v1061_v15 = vpop.f32.mrf.mxu0  ;;  %3871 = vmatmul.mubr.bf16.vlgmr.msra.gmra.mxu0 %v4569_v61  ;;  %v1550_v53 = vpop.f32.mrf.mxu1 }
 0x1a2   : > { %3874 = vmatprep.mubr.bf16.mxu0 %v4584_v6 }
 0x1a3   : > { %v1062_v44 = vpop.f32.mrf.mxu0  ;;  %v5006_v27 = vpop.f32.mrf.mxu1  ;;  %2339 = vmatmul.mubr.bf16.gmra.mxu1 %v4320_v57 }
 0x1a4   : > { %2346 = vmatprep.mubr.bf16.mxu1 %v4339_v1 }
 0x1a5   : > { %v5009_v8 = vpop.f32.mrf.mxu0  ;;  %v1555_v54 = vpop.f32.mrf.mxu1 }
 0x1a7   : > { %v1065_v49 = vpop.f32.mrf.mxu0  ;;  %v5012_v10 = vpop.f32.mrf.mxu1 }
 0x1a9   : > { %v5014_v32 = vpop.f32.mrf.mxu0  ;;  %3875 = vmatmul.mubr.bf16.gmra.mxu0 %v4604_v26  ;;  %v1558_v61 = vpop.f32.mrf.mxu1 }
 0x1aa   : > { %3878 = vmatprep.mubr.bf16.mxu0 %v4620_v47 }
 0x1ab   : > { %v1070_v6 = vpop.f32.mrf.mxu0  ;;  %v5018_v15 = vpop.f32.mrf.mxu1  ;;  %2347 = vmatmul.mubr.bf16.gmra.mxu1 %v4326_v59 }
 0x1ac   : > { %2354 = vmatprep.mubr.bf16.mxu1 %v4367_v11 }
 0x1ad   : > { %v1071_v53 = vpop.f32.mrf.mxu0  ;;  %v1563_v1 = vpop.f32.mrf.mxu1 }
 0x1af   : > { %v1072_v44 = vpop.f32.mrf.mxu0  ;;  %v5022_v54 = vpop.f32.mrf.mxu1 }
 0x1b1   : > { %v5024_v49 = vpop.f32.mrf.mxu0  ;;  %3879 = vmatmul.mubr.bf16.gmra.mxu0 %v4636_v2  ;;  %v1566_v26 = vpop.f32.mrf.mxu1 }
 0x1b2   : > { %5606 = vst [vmem:[#allocation52_spill] sm:$0xff] %v5024_v49  ;;  %3882 = vmatprep.mubr.bf16.mxu0 %v4659_v40 }
 0x1b3   : > { %v1077_v47 = vpop.f32.mrf.mxu0  ;;  %v5028_v61 = vpop.f32.mrf.mxu1  ;;  %2355 = vmatmul.mubr.bf16.gmra.mxu1 %v4351_v5 }
 0x1b4   : > { %2362 = vmatprep.mubr.bf16.mxu1 %v4394_v24 }
 0x1b5   : > { %v5031_v6 = vpop.f32.mrf.mxu0  ;;  %v1571_v11 = vpop.f32.mrf.mxu1 }
 0x1b6   : > { %5607 = vst [vmem:[#allocation53_spill] sm:$0xff] %v5031_v6 }
 0x1b7   : > { %v1080_v53 = vpop.f32.mrf.mxu0  ;;  %v5034_v1 = vpop.f32.mrf.mxu1 }
 0x1b9   : > { %v1083_v44 = vpop.f32.mrf.mxu0  ;;  %3883 = vmatmul.mubr.bf16.gmra.mxu0 %v4673_v25  ;;  %v1574_v2 = vpop.f32.mrf.mxu1 }
 0x1ba   : > { %3886 = vmatprep.mubr.bf16.mxu0 %v4280_v42 }
 0x1bb   : > { %v1084_v40 = vpop.f32.mrf.mxu0  ;;  %v5038_v26 = vpop.f32.mrf.mxu1  ;;  %2363 = vmatmul.mubr.bf16.gmra.mxu1 %v4356_v7 }
 0x1bc   : > { %2370 = vmatprep.mubr.bf16.mxu1 %v4428_v52 }
 0x1bd   : > { %v5041_v47 = vpop.f32.mrf.mxu0  ;;  %v1579_v24 = vpop.f32.mrf.mxu1 }
 0x1be   : > { %5608 = vst [vmem:[#allocation54_spill] sm:$0xff] %v5041_v47 }
 0x1bf   : > { %v1087_v11 = vpop.f32.mrf.mxu0  ;;  %v5044_v53 = vpop.f32.mrf.mxu1 }
 0x1c1   : > { %v5046_v6 = vpop.f32.mrf.mxu0  ;;  %3887 = vmatmul.mubr.bf16.gmra.mxu0 %v4320_v57  ;;  %v1582_v25 = vpop.f32.mrf.mxu1 }
 0x1c2   : > { %5609 = vst [vmem:[#allocation55_spill] sm:$0xff] %v5046_v6  ;;  %3890 = vmatprep.mubr.bf16.mxu0 %v4326_v59 }
 0x1c3   : > { %v1092_v42 = vpop.f32.mrf.mxu0  ;;  %v5050_v44 = vpop.f32.mrf.mxu1  ;;  %2371 = vmatmul.mubr.bf16.gmra.mxu1 %v4375_v16 }
 0x1c4   : > { %2378 = vmatprep.mubr.bf16.mxu1 %v4454_v3 }
 0x1c5   : > { %v1093_v2 = vpop.f32.mrf.mxu0  ;;  %v1587_v52 = vpop.f32.mrf.mxu1 }
 0x1c7   : > { %v1094_v40 = vpop.f32.mrf.mxu0  ;;  %v5054_v24 = vpop.f32.mrf.mxu1 }
 0x1c9   : > { %v5056_v11 = vpop.f32.mrf.mxu0  ;;  %3891 = vmatmul.mubr.bf16.gmra.mxu0 %v4351_v5  ;;  %v1590_v57 = vpop.f32.mrf.mxu1 }
 0x1ca   : > { %5610 = vst [vmem:[#allocation56_spill] sm:$0xff] %v5056_v11  ;;  %3894 = vmatprep.mubr.bf16.mxu0 %v4356_v7 }
 0x1cb   : > { %v1099_v59 = vpop.f32.mrf.mxu0  ;;  %v5060_v25 = vpop.f32.mrf.mxu1  ;;  %2379 = vmatmul.mubr.bf16.gmra.mxu1 %v4380_v18 }
 0x1cc   : > { %2386 = vmatprep.mubr.bf16.mxu1 %v4497_v17 }
 0x1cd   : > { %v5063_v42 = vpop.f32.mrf.mxu0  ;;  %v1595_v3 = vpop.f32.mrf.mxu1 }
 0x1ce   : > { %5611 = vst [vmem:[#allocation57_spill] sm:$0xff] %v5063_v42 }
 0x1cf   : > { %v1102_v2 = vpop.f32.mrf.mxu0  ;;  %v5066_v52 = vpop.f32.mrf.mxu1 }
 0x1d1   : > { %v1105_v40 = vpop.f32.mrf.mxu0  ;;  %3895 = vmatmul.mubr.bf16.gmra.mxu0 %v4375_v16  ;;  %v1598_v5 = vpop.f32.mrf.mxu1 }
 0x1d2   : > { %3898 = vmatprep.mubr.bf16.mxu0 %v4380_v18 }
 0x1d3   : > { %v1106_v7 = vpop.f32.mrf.mxu0  ;;  %v5070_v57 = vpop.f32.mrf.mxu1  ;;  %2387 = vmatmul.mubr.bf16.gmra.mxu1 %v4404_v30 }
 0x1d4   : > { %5612 = vst [vmem:[#allocation58_spill] sm:$0xff] %v5070_v57  ;;  %2394 = vmatprep.mubr.bf16.mxu1 %v4536_v36 }
 0x1d5   : > { %v5073_v59 = vpop.f32.mrf.mxu0  ;;  %v1603_v17 = vpop.f32.mrf.mxu1 }
 0x1d6   : > { %5613 = vst [vmem:[#allocation59_spill] sm:$0xff] %v5073_v59 }
 0x1d7   : > { %v1109_v3 = vpop.f32.mrf.mxu0  ;;  %v5076_v2 = vpop.f32.mrf.mxu1 }
 0x1d8   : > { %5614 = vst [vmem:[#allocation60_spill] sm:$0xff] %v5076_v2 }
 0x1d9   : > { %v5078_v42 = vpop.f32.mrf.mxu0  ;;  %3899 = vmatmul.mubr.bf16.gmra.mxu0 %v4404_v30  ;;  %v1606_v16 = vpop.f32.mrf.mxu1 }
 0x1da   : > { %5615 = vst [vmem:[#allocation61_spill] sm:$0xff] %v5078_v42  ;;  %3902 = vmatprep.mubr.bf16.mxu0 %v4410_v34 }
 0x1db   : > { %v1114_v18 = vpop.f32.mrf.mxu0  ;;  %v5082_v40 = vpop.f32.mrf.mxu1  ;;  %2395 = vmatmul.mubr.bf16.gmra.mxu1 %v4410_v34 }
 0x1dc   : > { %2402 = vmatprep.mubr.bf16.mxu1 %v4562_v39 }
 0x1dd   : > { %v1115_v5 = vpop.f32.mrf.mxu0  ;;  %v1611_v36 = vpop.f32.mrf.mxu1 }
 0x1df   : > { %v1116_v7 = vpop.f32.mrf.mxu0  ;;  %v5086_v17 = vpop.f32.mrf.mxu1 }
 0x1e0   : > { %5616 = vst [vmem:[#allocation62_spill] sm:$0xff] %v5086_v17 }
 0x1e1   : > { %v3744_v3 = vpop.f32.mrf.mxu0  ;;  %3903 = vmatmul.mubr.bf16.gmra.mxu0 %v4440_v56  ;;  %v1614_v59 = vpop.f32.mrf.mxu1 }
 0x1e2   : > { %3906 = vmatprep.mubr.bf16.mxu0 %v4445_v58 }
 0x1e3   : > { %v1152_v30 = vpop.f32.mrf.mxu0  ;;  %v5090_v16 = vpop.f32.mrf.mxu1  ;;  %2403 = vmatmul.mubr.bf16.gmra.mxu1 %v4440_v56 }
 0x1e4   : > { %5617 = vst [vmem:[#allocation63_spill] sm:$0xff] %v5090_v16  ;;  %2410 = vmatprep.mubr.bf16.mxu1 %v4595_v31 }
 0x1e5   : > { %v5093_v18 = vpop.f32.mrf.mxu0  ;;  %v1619_v34 = vpop.f32.mrf.mxu1 }
 0x1e7   : > { %v1155_v39 = vpop.f32.mrf.mxu0  ;;  %v5096_v5 = vpop.f32.mrf.mxu1 }
 0x1e8   : > { %5618 = vst [vmem:[#allocation64_spill] sm:$0xff] %v5096_v5 }
 0x1e9   : > { %v5098_v36 = vpop.f32.mrf.mxu0  ;;  %3907 = vmatmul.mubr.bf16.gmra.mxu0 %v4479_v62  ;;  %v1622_v59 = vpop.f32.mrf.mxu1 }
 0x1ea   : > { %3910 = vmatprep.mubr.bf16.mxu0 %v4487_v14 }
 0x1eb   : > { %v5102_v7 = vpop.f32.mrf.mxu0  ;;  %v5104_v3 = vpop.f32.mrf.mxu1  ;;  %2411 = vmatmul.mubr.bf16.gmra.mxu1 %v4445_v58 }
 0x1ec   : > { %5619 = vst [vmem:[#allocation65_spill] sm:$0xff] %v5104_v3  ;;  %2418 = vmatprep.mubr.bf16.mxu1 %v4746_v4 }
 0x1ed   : > { %v5107_v56 = vpop.f32.mrf.mxu0  ;;  %v1627_v31 = vpop.f32.mrf.mxu1 }
 0x1ef   : > { %v1170_v34 = vpop.f32.mrf.mxu0  ;;  %v5110_v42 = vpop.f32.mrf.mxu1 }
 0x1f0   : > { %5620 = vst [vmem:[#allocation66_spill] sm:$0xff] %v5110_v42  ;;  %v4106_v42 = vld [vmem:[#allocation2 + $0xd0] sm:$0xff]  }
 0x1f1   : > { %v5112_v6 = vpop.f32.mrf.mxu0  ;;  %3911 = vmatmul.mubr.bf16.gmra.mxu0 %v4519_v63  ;;  %v1630_v59 = vpop.f32.mrf.mxu1 }
 0x1f2   : > { %3914 = vmatprep.mubr.bf16.mxu0 %v4527_v28 }
 0x1f3   : > { %v1182_v11 = vpop.f32.mrf.mxu0  ;;  %v5116_v5 = vpop.f32.mrf.mxu1  ;;  %2419 = vmatmul.mubr.bf16.gmra.mxu1 %v4479_v62 }
 0x1f4   : > { %5621 = vst [vmem:[#allocation67_spill] sm:$0xff] %v5116_v5  ;;  %2426 = vmatprep.mubr.bf16.mxu1 %v4758_v41 }
 0x1f5   : > { %v3753_v58 = vpop.f32.mrf.mxu0  ;;  %v1635_v4 = vpop.f32.mrf.mxu1 }
 0x1f7   : > { %v5120_v31 = vpop.f32.mrf.mxu0  ;;  %v5122_v34 = vpop.f32.mrf.mxu1 }
 0x1f8   : > { %5622 = vst [vmem:[#allocation68_spill] sm:$0xff] %v5122_v34 }
 0x1f9   : > { %v3756_v47 = vpop.f32.mrf.mxu0  ;;  %3915 = vmatmul.mubr.bf16.gmra.mxu0 %v4106_v42  ;;  %v1638_v63 = vpop.f32.mrf.mxu1 }
 0x1fb   : > { %v5124_v59 = vpop.f32.mrf.mxu0  ;;  %v5126_v28 = vpop.f32.mrf.mxu1  ;;  %2427 = vmatmul.mubr.bf16.gmra.mxu1 %v4487_v14 }
 0x1fc   : > { %5623 = vst [vmem:[#allocation69_spill] sm:$0xff] %v5126_v28 }
 0x1fd   : > { %v5129_v11 = vpop.f32.mrf.mxu0  ;;  %v1643_v62 = vpop.f32.mrf.mxu1 }
 0x1ff   : > { %v5131_v58 = vpop.f32.mrf.mxu0  ;;  %v5133_v41 = vpop.f32.mrf.mxu1 }
 0x200   : > { %5624 = vst [vmem:[#allocation70_spill] sm:$0xff] %v5133_v41 }
 0x201   : > { %v3808_v4 = vpop.f32.mrf.mxu0  ;;  %v1646_v5 = vpop.f32.mrf.mxu1 }
 0x202   : > { %v1691_v63 = vadd.f32 %v3808_v4, %v4881_v19  ;;  %v1156_v19 = vadd.f32 %v1155_v39, %v4796_v50  ;;  %v1163_v39 = vadd.f32 %v5093_v18, %v4810_v33  ;;  %v5627_v33 = vld [vmem:[#allocation22_spill] sm:$0xff] }
 0x203   : > { %v1682_v34 = vpop.f32.mrf.mxu0  ;;  %v5135_v47 = vpop.f32.mrf.mxu1  ;;  %v1168_v18 = vadd.f32 %v5102_v7, %v5627_v33 }
 0x204   : > { %5625 = vst [vmem:[#allocation71_spill] sm:$0xff] %v5135_v47  ;;  %v1683_v16 = vadd.f32 %v1682_v34, %v4863_v51  ;;  %v1925_v17 = vrot.slane %v1691_v63, 1  ;;  %v1153_v47 = vadd.f32 %v1152_v30, %v4785_v35 }
 0x205   : > { %v3809_v42 = vpop.f32.mrf.mxu0  ;;  %v2246_v28 = vpop.f32.mrf.mxu1 }
 0x206   : > { %v1922_v41 = vrot.slane %v1683_v16, 1  ;;  %v1694_v5 = vadd.f32 %v3809_v42, %v4888_v0 }
 0x207   : > { %v1685_v3 = vpop.f32.mrf.mxu0  ;;  %v5139_v14 = vpop.f32.mrf.mxu1 }
 0x208   : > { %v1686_v62 = vadd.f32 %v1685_v3, %v4872_v12  ;;  %v1927_v42 = vrot.slane %v1694_v5, 1 }
 0x209   : > { %v3812_v49 = vpop.f32.mrf.mxu0  ;;  %v2249_v57 = vpop.f32.mrf.mxu1 }
 0x20a   : > { %v1923_v2 = vrot.slane %v1686_v62, 1  ;;  %v1707_v28 = vadd.f32 %v3812_v49, %v4910_v22 }
 0x20b   : > { %v1698_v4 = vpop.f32.mrf.mxu0  ;;  %v5148_v12 = vpop.f32.mrf.mxu1 }
 0x20c   : > { %v1924_v51 = vsel %vm1921_vm0, %v1922_v41, %v1923_v2  ;;  %v1926_v34 = vsel %vm1921_vm0, %v1923_v2, %v1925_v17  ;;  %v1699_v3 = vadd.f32 %v1698_v4, %v4897_v21  ;;  %v1932_v17 = vrot.slane %v1707_v28, 1 }
 0x20d   : > { %v5151_v16 = vadd.f32 %v1924_v51, %v1153_v47  ;;  %v5153_v0 = vadd.f32 %v1926_v34, %v1156_v19  ;;  %v3813_v57 = vpop.f32.mrf.mxu0  ;;  %v2254_v30 = vpop.f32.mrf.mxu1  ;;  %v5626_v47 = vld [vmem:[#allocation27_spill] sm:$0xff] }
 0x20e   : > { %v1928_v35 = vrot.slane %v1699_v3, 1  ;;  %v1710_v50 = vadd.f32 %v3813_v57, %v4916_v29  ;;  %v1175_v63 = vadd.f32 %v5098_v36, %v5626_v47  ;;  %v5629_v47 = vld [vmem:[#allocation37_spill] sm:$0xff] }
 0x20f   : > { %v1701_v2 = vpop.f32.mrf.mxu0  ;;  %v5159_v41 = vpop.f32.mrf.mxu1 }
 0x210   : > { %v1929_v22 = vsel %vm1921_vm0, %v1927_v42, %v1928_v35  ;;  %v1933_v49 = vrot.slane %v1710_v50, 1  ;;  %v1702_v21 = vadd.f32 %v1701_v2, %v4906_v23  ;;  %v5628_v2 = vld [vmem:[#allocation29_spill] sm:$0xff] }
 0x211   : > { %v5164_v62 = vadd.f32 %v1929_v22, %v1163_v39  ;;  %v3816_v5 = vpop.f32.mrf.mxu0  ;;  %v2257_v4 = vpop.f32.mrf.mxu1  ;;  %v1178_v7 = vadd.f32 %v5107_v56, %v5628_v2  ;;  %v5631_v56 = vld [vmem:[#allocation31_spill] sm:$0xff] }
 0x212   : > { %v1934_v29 = vsel %vm1921_vm0, %v1932_v17, %v1933_v49  ;;  %v1930_v19 = vrot.slane %v1702_v21, 1  ;;  %v1723_v23 = vadd.f32 %v3816_v5, %v4932_v9 }
 0x213   : > { %v5169_v51 = vadd.f32 %v1934_v29, %v1175_v63  ;;  %v1714_v34 = vpop.f32.mrf.mxu0  ;;  %v5173_v3 = vpop.f32.mrf.mxu1 }
 0x214   : > { %v1931_v28 = vsel %vm1921_vm0, %v1928_v35, %v1930_v19  ;;  %v1715_v36 = vadd.f32 %v1714_v34, %v4922_v20  ;;  %v1938_v22 = vrot.slane %v1723_v23, 1  ;;  %v5630_v20 = vld [vmem:[#allocation32_spill] sm:$0xff] }
 0x215   : > { %v5176_v57 = vadd.f32 %v1931_v28, %v1168_v18  ;;  %v3817_v42 = vpop.f32.mrf.mxu0  ;;  %v2262_v50 = vpop.f32.mrf.mxu1  ;;  %v1190_v5 = vadd.f32 %v5112_v6, %v5630_v20  ;;  %v1185_v18 = vadd.f32 %v5120_v31, %v5631_v56 }
 0x216   : > { %v1935_v30 = vrot.slane %v1715_v36, 1  ;;  %v1726_v39 = vadd.f32 %v3817_v42, %v4938_v37 }
 0x217   : > { %v1717_v17 = vpop.f32.mrf.mxu0  ;;  %v5182_v9 = vpop.f32.mrf.mxu1 }
 0x218   : > { %v1936_v35 = vsel %vm1921_vm0, %v1933_v49, %v1935_v30  ;;  %v1940_v21 = vrot.slane %v1726_v39, 1  ;;  %v1718_v63 = vadd.f32 %v1717_v17, %v5629_v47  ;;  %v5632_v30 = vld [vmem:[#allocation40_spill] sm:$0xff]  ;;  %v5633_v17 = vld [vmem:[#allocation42_spill] sm:$0xff] }
 0x219   : > { %v5187_v29 = vadd.f32 %v1936_v35, %v1178_v7  ;;  %v3820_v19 = vpop.f32.mrf.mxu0  ;;  %v2265_v33 = vpop.f32.mrf.mxu1 }
 0x21a   : > { %v1941_v37 = vsel %vm1921_vm0, %v1938_v22, %v1940_v21  ;;  %v1937_v4 = vrot.slane %v1718_v63, 1  ;;  %v1739_v42 = vadd.f32 %v3820_v19, %v4954_v48 }
 0x21b   : > { %v5192_v34 = vadd.f32 %v1941_v37, %v1190_v5  ;;  %v1730_v49 = vpop.f32.mrf.mxu0  ;;  %v5195_v23 = vpop.f32.mrf.mxu1  ;;  %v5634_v5 = vld [vmem:[#allocation33_spill] sm:$0xff] }
 0x21c   : > { %v1939_v28 = vsel %vm1921_vm0, %v1937_v4, %v1938_v22  ;;  %v1731_v50 = vadd.f32 %v1730_v49, %v5632_v30  ;;  %v1945_v21 = vrot.slane %v1739_v42, 1  ;;  %v1197_v37 = vadd.f32 %v5124_v59, %v5634_v5  ;;  %v5635_v4 = vld [vmem:[#allocation34_spill] sm:$0xff] }
 0x21d   : > { %v5197_v36 = vadd.f32 %v1939_v28, %v1185_v18  ;;  %v3821_v6 = vpop.f32.mrf.mxu0  ;;  %v2270_v39 = vpop.f32.mrf.mxu1  ;;  %v1200_v48 = vadd.f32 %v5131_v58, %v5635_v4  ;;  %v5636_v28 = vld [vmem:[#allocation45_spill] sm:$0xff]  ;;  %v5639_v5 = vld [vmem:[#allocation38_spill] sm:$0xff] }
 0x21e   : > { %v1942_v47 = vrot.slane %v1731_v50, 1  ;;  %v1742_v22 = vadd.f32 %v3821_v6, %v4958_v46 }
 0x21f   : > { %v1733_v2 = vpop.f32.mrf.mxu0  ;;  %v5201_v7 = vpop.f32.mrf.mxu1 }
 0x220   : > { %v1734_v31 = vadd.f32 %v1733_v2, %v5633_v17  ;;  %v1947_v59 = vrot.slane %v1742_v22, 1  ;;  %v5637_v2 = vld [vmem:[#allocation35_spill] sm:$0xff] }
 0x221   : > { %v3824_v35 = vpop.f32.mrf.mxu0  ;;  %v2273_v20 = vpop.f32.mrf.mxu1  ;;  %v1207_v17 = vadd.f32 %v5129_v11, %v5637_v2  ;;  %v5641_v11 = vld [vmem:[#allocation36_spill] sm:$0xff] }
 0x222   : > { %v1943_v63 = vrot.slane %v1734_v31, 1  ;;  %v1755_v18 = vadd.f32 %v3824_v35, %v4974_v38 }
 0x223   : > { %v1746_v19 = vpop.f32.mrf.mxu0  ;;  %v5212_v49 = vpop.f32.mrf.mxu1 }
 0x224   : > { %v1944_v33 = vsel %vm1921_vm0, %v1942_v47, %v1943_v63  ;;  %v1946_v56 = vsel %vm1921_vm0, %v1943_v63, %v1945_v21  ;;  %v1747_v42 = vadd.f32 %v1746_v19, %v5636_v28  ;;  %v1952_v21 = vrot.slane %v1755_v18, 1  ;;  %v5638_v63 = vld [vmem:[#allocation47_spill] sm:$0xff] }
 0x225   : > { %v5215_v46 = vadd.f32 %v1944_v33, %v1197_v37  ;;  %v5217_v6 = vadd.f32 %v1946_v56, %v1200_v48  ;;  %v3825_v30 = vpop.f32.mrf.mxu0  ;;  %v2278_v39 = vpop.f32.mrf.mxu1  ;;  %v5640_v37 = vld [vmem:[#allocation7_spill] sm:$0xff]  ;;  %v5642_v56 = vld [vmem:[#allocation8_spill] sm:$0xff] }
 0x226   : > { %v1948_v50 = vrot.slane %v1747_v42, 1  ;;  %v1758_v58 = vadd.f32 %v3825_v30, %v4980_v43  ;;  %v1219_v4 = vadd.f32 %v5640_v37, %v5639_v5  ;;  %v1212_v18 = vadd.f32 %v5642_v56, %v5641_v11  ;;  %v5645_v5 = vld [vmem:[#allocation9_spill] sm:$0xff]  ;;  %v5647_v11 = vld [vmem:[#allocation10_spill] sm:$0xff] }
 0x227   : > { %v1749_v31 = vpop.f32.mrf.mxu0  ;;  %v5223_v47 = vpop.f32.mrf.mxu1 }
 0x228   : > { %v1949_v38 = vsel %vm1921_vm0, %v1947_v59, %v1948_v50  ;;  %v1953_v35 = vrot.slane %v1758_v58, 1  ;;  %v1750_v20 = vadd.f32 %v1749_v31, %v5638_v63  ;;  %v5643_v58 = vld [vmem:[#allocation50_spill] sm:$0xff] }
 0x229   : > { %v5228_v22 = vadd.f32 %v1949_v38, %v1207_v17  ;;  %v3828_v48 = vpop.f32.mrf.mxu0  ;;  %v2281_v33 = vpop.f32.mrf.mxu1 }
 0x22a   : > { %v1954_v43 = vsel %vm1921_vm0, %v1952_v21, %v1953_v35  ;;  %v1950_v19 = vrot.slane %v1750_v20, 1  ;;  %v1771_v59 = vadd.f32 %v3828_v48, %v4996_v13  ;;  %v5644_v20 = vld [vmem:[#allocation39_spill] sm:$0xff] }
 0x22b   : > { %v5233_v28 = vadd.f32 %v1954_v43, %v1219_v4  ;;  %v1762_v42 = vpop.f32.mrf.mxu0  ;;  %v5237_v39 = vpop.f32.mrf.mxu1  ;;  %v1222_v37 = vadd.f32 %v5645_v5, %v5644_v20  ;;  %v5646_v33 = vld [vmem:[#allocation43_spill] sm:$0xff] }
 0x22c   : > { %v1951_v30 = vsel %vm1921_vm0, %v1948_v50, %v1950_v19  ;;  %v1763_v2 = vadd.f32 %v1762_v42, %v5643_v58  ;;  %v1958_v43 = vrot.slane %v1771_v59, 1  ;;  %v1234_v56 = vadd.f32 %v5647_v11, %v5646_v33 }
 0x22d   : > { %v5240_v17 = vadd.f32 %v1951_v30, %v1212_v18  ;;  %v3829_v31 = vpop.f32.mrf.mxu0  ;;  %v2286_v38 = vpop.f32.mrf.mxu1 }
 0x22e   : > { %v1955_v21 = vrot.slane %v1763_v2, 1  ;;  %v1774_v63 = vadd.f32 %v3829_v31, %v5002_v45  ;;  %v5648_v2 = vld [vmem:[#allocation41_spill] sm:$0xff]  ;;  %v5649_v31 = vld [vmem:[#allocation11_spill] sm:$0xff] }
 0x22f   : > { %v1765_v4 = vpop.f32.mrf.mxu0  ;;  %v5246_v13 = vpop.f32.mrf.mxu1  ;;  %v1229_v59 = vadd.f32 %v5649_v31, %v5648_v2  ;;  %v5651_v2 = vld [vmem:[#allocation12_spill] sm:$0xff] }
 0x230   : > { %v1956_v50 = vsel %vm1921_vm0, %v1953_v35, %v1955_v21  ;;  %v1960_v19 = vrot.slane %v1774_v63, 1  ;;  %v1766_v48 = vadd.f32 %v1765_v4, %v4990_v60 }
 0x231   : > { %v5251_v18 = vadd.f32 %v1956_v50, %v1222_v37  ;;  %v3832_v42 = vpop.f32.mrf.mxu0  ;;  %v2289_v58 = vpop.f32.mrf.mxu1 }
 0x232   : > { %v1961_v45 = vsel %vm1921_vm0, %v1958_v43, %v1960_v19  ;;  %v1957_v30 = vrot.slane %v1766_v48, 1  ;;  %v1787_v5 = vadd.f32 %v3832_v42, %v5018_v15  ;;  %v5650_v58 = vld [vmem:[#allocation44_spill] sm:$0xff]  ;;  %v5653_v15 = vld [vmem:[#allocation14_spill] sm:$0xff] }
 0x233   : > { %v5256_v38 = vadd.f32 %v1961_v45, %v1234_v56  ;;  %v1778_v35 = vpop.f32.mrf.mxu0  ;;  %v5259_v63 = vpop.f32.mrf.mxu1  ;;  %v1241_v31 = vadd.f32 %v5651_v2, %v5650_v58  ;;  %v5654_v2 = vld [vmem:[#allocation48_spill] sm:$0xff] }
 0x234   : > { %v1959_v21 = vsel %vm1921_vm0, %v1957_v30, %v1958_v43  ;;  %v1779_v37 = vadd.f32 %v1778_v35, %v5006_v27  ;;  %v1965_v11 = vrot.slane %v1787_v5, 1 }
 0x235   : > { %v5261_v60 = vadd.f32 %v1959_v21, %v1229_v59  ;;  %v3833_v20 = vpop.f32.mrf.mxu0  ;;  %v2294_v4 = vpop.f32.mrf.mxu1  ;;  %v5652_v59 = vld [vmem:[#allocation46_spill] sm:$0xff] }
 0x236   : > { %v1962_v56 = vrot.slane %v1779_v37, 1  ;;  %v1790_v43 = vadd.f32 %v3833_v20, %v5022_v54  ;;  %v1244_v42 = vadd.f32 %v5653_v15, %v5652_v59 }
 0x237   : > { %v1781_v50 = vpop.f32.mrf.mxu0  ;;  %v5265_v19 = vpop.f32.mrf.mxu1 }
 0x238   : > { %v1782_v48 = vadd.f32 %v1781_v50, %v5012_v10  ;;  %v1967_v50 = vrot.slane %v1790_v43, 1 }
 0x239   : > { %v3836_v33 = vpop.f32.mrf.mxu0  ;;  %v2297_v30 = vpop.f32.mrf.mxu1 }
 0x23a   : > { %v1963_v45 = vrot.slane %v1782_v48, 1  ;;  %v1803_v10 = vadd.f32 %v3836_v33, %v5038_v26 }
 0x23b   : > { %v1794_v27 = vpop.f32.mrf.mxu0  ;;  %v5276_v4 = vpop.f32.mrf.mxu1 }
 0x23c   : > { %v1964_v35 = vsel %vm1921_vm0, %v1962_v56, %v1963_v45  ;;  %v1966_v21 = vsel %vm1921_vm0, %v1963_v45, %v1965_v11  ;;  %v1795_v5 = vadd.f32 %v1794_v27, %v5028_v61  ;;  %v5655_v56 = vld [vmem:[#allocation13_spill] sm:$0xff]  ;;  %v1972_v45 = vrot.slane %v1803_v10, 1 }
 0x23d   : > { %v5279_v54 = vadd.f32 %v1964_v35, %v1241_v31  ;;  %v5281_v20 = vadd.f32 %v1966_v21, %v1244_v42  ;;  %v3837_v37 = vpop.f32.mrf.mxu0  ;;  %v2302_v30 = vpop.f32.mrf.mxu1  ;;  %v1251_v59 = vadd.f32 %v5655_v56, %v5654_v2  ;;  %v5656_v31 = vld [vmem:[#allocation15_spill] sm:$0xff] }
 0x23e   : > { %v1968_v48 = vrot.slane %v1795_v5, 1  ;;  %v1806_v58 = vadd.f32 %v3837_v37, %v5044_v53  ;;  %v1263_v42 = vadd.f32 %v5656_v31, %v4992_v55  ;;  %v5657_v5 = vld [vmem:[#allocation49_spill] sm:$0xff]  ;;  %v5658_v37 = vld [vmem:[#allocation16_spill] sm:$0xff] }
 0x23f   : > { %v1797_v11 = vpop.f32.mrf.mxu0  ;;  %v5287_v15 = vpop.f32.mrf.mxu1  ;;  %v1256_v10 = vadd.f32 %v5658_v37, %v5657_v5  ;;  %v5662_v31 = vld [vmem:[#allocation17_spill] sm:$0xff] }
 0x240   : > { %v1969_v26 = vsel %vm1921_vm0, %v1967_v50, %v1968_v48  ;;  %v1973_v33 = vrot.slane %v1806_v58, 1  ;;  %v1798_v61 = vadd.f32 %v1797_v11, %v5034_v1 }
 0x241   : > { %v5292_v43 = vadd.f32 %v1969_v26, %v1251_v59  ;;  %v3840_v27 = vpop.f32.mrf.mxu0  ;;  %v2305_v21 = vpop.f32.mrf.mxu1 }
 0x242   : > { %v1974_v53 = vsel %vm1921_vm0, %v1972_v45, %v1973_v33  ;;  %v1970_v35 = vrot.slane %v1798_v61, 1  ;;  %v1819_v1 = vadd.f32 %v3840_v27, %v5060_v25  ;;  %v5661_v61 = vld [vmem:[#allocation51_spill] sm:$0xff] }
 0x243   : > { %v5297_v30 = vadd.f32 %v1974_v53, %v1263_v42  ;;  %v1810_v50 = vpop.f32.mrf.mxu0  ;;  %v5301_v2 = vpop.f32.mrf.mxu1  ;;  %v1266_v42 = vadd.f32 %v5662_v31, %v5661_v61  ;;  %v5668_v61 = vld [vmem:[#allocation58_spill] sm:$0xff] }
 0x244   : > { %v1971_v58 = vsel %vm1921_vm0, %v1968_v48, %v1970_v35  ;;  %v1811_v55 = vadd.f32 %v1810_v50, %v5050_v44  ;;  %v1978_v21 = vrot.slane %v1819_v1, 1  ;;  %v5663_v44 = vld [vmem:[#allocation18_spill] sm:$0xff] }
 0x245   : > { %5659 = vst [vmem:[#allocation27_spill] sm:$0xff] %v5297_v30  ;;  %v5304_v56 = vadd.f32 %v1971_v58, %v1256_v10  ;;  %v3841_v59 = vpop.f32.mrf.mxu0  ;;  %v2310_v45 = vpop.f32.mrf.mxu1  ;;  %v1278_v5 = vadd.f32 %v5663_v44, %v5014_v32 }
 0x246   : > { %v1975_v11 = vrot.slane %v1811_v55, 1  ;;  %v1822_v26 = vadd.f32 %v3841_v59, %v5066_v52  ;;  %v5665_v55 = vld [vmem:[#allocation19_spill] sm:$0xff] }
 0x247   : > { %5660 = vst [vmem:[#allocation22_spill] sm:$0xff] %v5304_v56  ;;  %v1813_v53 = vpop.f32.mrf.mxu0  ;;  %v5310_v25 = vpop.f32.mrf.mxu1  ;;  %v1273_v1 = vadd.f32 %v5665_v55, %v5009_v8  ;;  %v5671_v55 = vld [vmem:[#allocation52_spill] sm:$0xff] }
 0x248   : > { %v1976_v48 = vsel %vm1921_vm0, %v1973_v33, %v1975_v11  ;;  %v1980_v35 = vrot.slane %v1822_v26, 1  ;;  %v1814_v27 = vadd.f32 %v1813_v53, %v5054_v24 }
 0x249   : > { %v5315_v37 = vadd.f32 %v1976_v48, %v1266_v42  ;;  %v3844_v10 = vpop.f32.mrf.mxu0  ;;  %v2313_v58 = vpop.f32.mrf.mxu1 }
 0x24a   : > { %v1981_v52 = vsel %vm1921_vm0, %v1978_v21, %v1980_v35  ;;  %v1977_v50 = vrot.slane %v1814_v27, 1  ;;  %v1835_v26 = vadd.f32 %v3844_v10, %v5082_v40  ;;  %v5669_v35 = vld [vmem:[#allocation60_spill] sm:$0xff]  ;;  %v5674_v40 = vld [vmem:[#allocation23_spill] sm:$0xff] }
 0x24b   : > { %5664 = vst [vmem:[#allocation29_spill] sm:$0xff] %v5315_v37  ;;  %v5320_v59 = vadd.f32 %v1981_v52, %v1278_v5  ;;  %v1826_v33 = vpop.f32.mrf.mxu0  ;;  %v5323_v45 = vpop.f32.mrf.mxu1  ;;  %v5670_v52 = vld [vmem:[#allocation62_spill] sm:$0xff] }
 0x24c   : > { %v1979_v11 = vsel %vm1921_vm0, %v1977_v50, %v1978_v21  ;;  %v1827_v31 = vadd.f32 %v1826_v33, %v5668_v61  ;;  %v1985_v44 = vrot.slane %v1835_v26, 1  ;;  %v5676_v26 = vld [vmem:[#allocation63_spill] sm:$0xff]  ;;  %v5680_v37 = vld [vmem:[#allocation54_spill] sm:$0xff] }
 0x24d   : > { %5666 = vst [vmem:[#allocation37_spill] sm:$0xff] %v5320_v59  ;;  %v5325_v24 = vadd.f32 %v1979_v11, %v1273_v1  ;;  %v3845_v32 = vpop.f32.mrf.mxu0  ;;  %v2318_v42 = vpop.f32.mrf.mxu1  ;;  %v5672_v1 = vld [vmem:[#allocation20_spill] sm:$0xff]  ;;  %v5675_v59 = vld [vmem:[#allocation65_spill] sm:$0xff] }
 0x24e   : > { %v1982_v5 = vrot.slane %v1827_v31, 1  ;;  %v1838_v21 = vadd.f32 %v3845_v32, %v5670_v52  ;;  %v1285_v11 = vadd.f32 %v5672_v1, %v5671_v55 }
 0x24f   : > { %5667 = vst [vmem:[#allocation32_spill] sm:$0xff] %v5325_v24  ;;  %v1829_v53 = vpop.f32.mrf.mxu0  ;;  %v5329_v48 = vpop.f32.mrf.mxu1  ;;  %v5673_v24 = vld [vmem:[#allocation53_spill] sm:$0xff] }
 0x250   : > { %v1830_v8 = vadd.f32 %v1829_v53, %v5669_v35  ;;  %v1288_v10 = vadd.f32 %v5674_v40, %v5673_v24  ;;  %v5679_v24 = vld [vmem:[#allocation66_spill] sm:$0xff] }
 0x251   : > { %v3848_v27 = vpop.f32.mrf.mxu0  ;;  %v2321_v58 = vpop.f32.mrf.mxu1 }
 0x252   : > { %v1983_v50 = vrot.slane %v1830_v8, 1  ;;  %v1851_v53 = vadd.f32 %v3848_v27, %v5675_v59  ;;  %v1987_v58 = vrot.slane %v1838_v21, 1 }
 0x253   : > { %v1842_v33 = vpop.f32.mrf.mxu0  ;;  %v5340_v35 = vpop.f32.mrf.mxu1 }
 0x254   : > { %v1984_v61 = vsel %vm1921_vm0, %v1982_v5, %v1983_v50  ;;  %v1986_v42 = vsel %vm1921_vm0, %v1983_v50, %v1985_v44  ;;  %v1843_v31 = vadd.f32 %v1842_v33, %v5676_v26  ;;  %v5681_v5 = vld [vmem:[#allocation21_spill] sm:$0xff]  ;;  %v1992_v50 = vrot.slane %v1851_v53, 1 }
 0x255   : > { %v5343_v32 = vadd.f32 %v1984_v61, %v1285_v11  ;;  %v5345_v8 = vadd.f32 %v1986_v42, %v1288_v10  ;;  %v3849_v52 = vpop.f32.mrf.mxu0  ;;  %v2326_v1 = vpop.f32.mrf.mxu1  ;;  %v1295_v56 = vadd.f32 %v5681_v5, %v5680_v37  ;;  %v5682_v11 = vld [vmem:[#allocation64_spill] sm:$0xff]  ;;  %v5686_v37 = vld [vmem:[#allocation55_spill] sm:$0xff] }
 0x256   : > { %v1988_v55 = vrot.slane %v1843_v31, 1  ;;  %v1854_v40 = vadd.f32 %v3849_v52, %v5679_v24  ;;  %v5683_v10 = vld [vmem:[#allocation56_spill] sm:$0xff]  ;;  %v5687_v24 = vld [vmem:[#allocation25_spill] sm:$0xff] }
 0x257   : > { %5677 = vst [vmem:[#allocation31_spill] sm:$0xff] %v5343_v32  ;;  %5678 = vst [vmem:[#allocation40_spill] sm:$0xff] %v5345_v8  ;;  %v1845_v44 = vpop.f32.mrf.mxu0  ;;  %v5351_v30 = vpop.f32.mrf.mxu1  ;;  %v5684_v61 = vld [vmem:[#allocation24_spill] sm:$0xff]  ;;  %v1300_v53 = vadd.f32 %v5687_v24, %v5686_v37  ;;  %v5689_v8 = vld [vmem:[#allocation69_spill] sm:$0xff] }
 0x258   : > { %v1989_v59 = vsel %vm1921_vm0, %v1987_v58, %v1988_v55  ;;  %v1993_v27 = vrot.slane %v1854_v40, 1  ;;  %v1846_v33 = vadd.f32 %v1845_v44, %v5682_v11  ;;  %v1307_v42 = vadd.f32 %v5684_v61, %v5683_v10  ;;  %v5690_v10 = vld [vmem:[#allocation67_spill] sm:$0xff]  ;;  %v5693_v32 = vld [vmem:[#allocation57_spill] sm:$0xff]  ;;  %v5694_v37 = vld [vmem:[#allocation26_spill] sm:$0xff] }
 0x259   : > { %v5356_v21 = vadd.f32 %v1989_v59, %v1295_v56  ;;  %v3852_v26 = vpop.f32.mrf.mxu0  ;;  %v2329_v1 = vpop.f32.mrf.mxu1 }
 0x25a   : > { %v1994_v31 = vsel %vm1921_vm0, %v1992_v50, %v1993_v27  ;;  %v1990_v52 = vrot.slane %v1846_v33, 1  ;;  %v1867_v44 = vadd.f32 %v3852_v26, %v5689_v8  ;;  %v5692_v1 = vld [vmem:[#allocation70_spill] sm:$0xff]  ;;  %v5695_v26 = vld [vmem:[#allocation68_spill] sm:$0xff] }
 0x25b   : > { %5685 = vst [vmem:[#allocation42_spill] sm:$0xff] %v5356_v21  ;;  %v5361_v5 = vadd.f32 %v1994_v31, %v1307_v42  ;;  %v1858_v58 = vpop.f32.mrf.mxu0  ;;  %v5365_v11 = vpop.f32.mrf.mxu1  ;;  %v1310_v42 = vadd.f32 %v5694_v37, %v5693_v32  ;;  %v5698_v32 = vld [vmem:[#allocation59_spill] sm:$0xff]  ;;  %v5699_v37 = vld [vmem:[#allocation30_spill] sm:$0xff] }
 0x25c   : > { %v1991_v40 = vsel %vm1921_vm0, %v1988_v55, %v1990_v52  ;;  %v1859_v56 = vadd.f32 %v1858_v58, %v5690_v10  ;;  %v1998_v24 = vrot.slane %v1867_v44, 1  ;;  %v5696_v58 = vld [vmem:[#allocation61_spill] sm:$0xff]  ;;  %v1317_v44 = vadd.f32 %v5699_v37, %v5698_v32 }
 0x25d   : > { %5688 = vst [vmem:[#allocation33_spill] sm:$0xff] %v5361_v5  ;;  %v5368_v59 = vadd.f32 %v1991_v40, %v1300_v53  ;;  %v3853_v61 = vpop.f32.mrf.mxu0  ;;  %v2334_v33 = vpop.f32.mrf.mxu1  ;;  %v5697_v53 = vld [vmem:[#allocation28_spill] sm:$0xff] }
 0x25e   : > { %v1995_v50 = vrot.slane %v1859_v56, 1  ;;  %v1870_v21 = vadd.f32 %v3853_v61, %v5692_v1  ;;  %v1322_v40 = vadd.f32 %v5697_v53, %v5696_v58 }
 0x25f   : > { %5691 = vst [vmem:[#allocation34_spill] sm:$0xff] %v5368_v59  ;;  %v1861_v31 = vpop.f32.mrf.mxu0  ;;  %v5374_v8 = vpop.f32.mrf.mxu1 }
 0x260   : > { %v1996_v55 = vsel %vm1921_vm0, %v1993_v27, %v1995_v50  ;;  %v2000_v52 = vrot.slane %v1870_v21, 1  ;;  %v1862_v5 = vadd.f32 %v1861_v31, %v5695_v26 }
 0x261   : > { %v5379_v10 = vadd.f32 %v1996_v55, %v1310_v42  ;;  %v3872_v56 = vpop.f32.mrf.mxu0  ;;  %v2337_v1 = vpop.f32.mrf.mxu1  ;;  %v5700_v55 = vld [vmem:[#allocation71_spill] sm:$0xff] }
 0x262   : > { %v2001_v61 = vsel %vm1921_vm0, %v1998_v24, %v2000_v52  ;;  %v1997_v33 = vrot.slane %v1862_v5, 1  ;;  %v2478_v42 = vadd.f32 %v3872_v56, %v5148_v12 }
 0x263   : > { %v5384_v59 = vadd.f32 %v2001_v61, %v1322_v40  ;;  %v2469_v27 = vpop.f32.mrf.mxu0  ;;  %v5387_v50 = vpop.f32.mrf.mxu1 }
 0x264   : > { %v1999_v21 = vsel %vm1921_vm0, %v1997_v33, %v1998_v24  ;;  %v2470_v58 = vadd.f32 %v2469_v27, %v5700_v55  ;;  %v2712_v61 = vrot.slane %v2478_v42, 2 }
 0x265   : > { %v5389_v31 = vadd.f32 %v1999_v21, %v1317_v44  ;;  %v3873_v26 = vpop.f32.mrf.mxu0  ;;  %v2342_v52 = vpop.f32.mrf.mxu1 }
 0x266   : > { %v2709_v32 = vrot.slane %v2470_v58, 2  ;;  %v2481_v24 = vadd.f32 %v3873_v26, %v5159_v41 }
 0x267   : > { %v2472_v5 = vpop.f32.mrf.mxu0  ;;  %v5393_v53 = vpop.f32.mrf.mxu1 }
 0x268   : > { %v2473_v1 = vadd.f32 %v2472_v5, %v5139_v14  ;;  %v2714_v41 = vrot.slane %v2481_v24, 2 }
 0x269   : > { %v3876_v40 = vpop.f32.mrf.mxu0  ;;  %v2345_v37 = vpop.f32.mrf.mxu1 }
 0x26a   : > { %v2710_v33 = vrot.slane %v2473_v1, 2  ;;  %v2494_v56 = vadd.f32 %v3876_v40, %v5195_v23 }
 0x26b   : > { %v2485_v44 = vpop.f32.mrf.mxu0  ;;  %v5400_v27 = vpop.f32.mrf.mxu1 }
 0x26c   : > { %v2711_v21 = vsel %vm2708_vm1, %v2709_v32, %v2710_v33  ;;  %v2713_v12 = vsel %vm2708_vm1, %v2710_v33, %v2712_v61  ;;  %v2486_v55 = vadd.f32 %v2485_v44, %v5173_v3  ;;  %v2719_v40 = vrot.slane %v2494_v56, 2 }
 0x26d   : > { %v2821_v14 = vadd.f32 %v2711_v21, %v5151_v16  ;;  %v2822_v42 = vadd.f32 %v2713_v12, %v5153_v0  ;;  %v3877_v58 = vpop.f32.mrf.mxu0  ;;  %v2350_v52 = vpop.f32.mrf.mxu1 }
 0x26e   : > { %v2715_v26 = vrot.slane %v2486_v55, 2  ;;  %v2497_v5 = vadd.f32 %v3877_v58, %v5201_v7 }
 0x26f   : > { %v3538_v1 = vpack.c.bf16 %v2822_v42, %v2821_v14  ;;  %v3013_v32 = vadd.f32 %v2822_v42, %v2821_v14  ;;  %v3050_v61 = vmul.f32 %v2821_v14, %v2821_v14  ;;  %v3051_v33 = vmul.f32 %v2822_v42, %v2822_v42  ;;  %v2488_v23 = vpop.f32.mrf.mxu0  ;;  %v5407_v44 = vpop.f32.mrf.mxu1 }
 0x270   : > { %v2716_v37 = vsel %vm2708_vm1, %v2714_v41, %v2715_v26  ;;  %v2720_v3 = vrot.slane %v2497_v5, 2  ;;  %v2489_v16 = vadd.f32 %v2488_v23, %v5182_v9 }
 0x271   : > { %3539 = vst [vmem:[%s4183_s24] sm:$0xff] %v3538_v1   ;;  %v3082_v0 = vadd.f32 %v3051_v33, %v3050_v61  ;;  %v2823_v24 = vadd.f32 %v2716_v37, %v5164_v62  ;;  %v3880_v21 = vpop.f32.mrf.mxu0  ;;  %v2353_v55 = vpop.f32.mrf.mxu1 }
 0x272   : > { %v2721_v7 = vsel %vm2708_vm1, %v2719_v40, %v2720_v3  ;;  %v2717_v12 = vrot.slane %v2489_v16, 2  ;;  %v2510_v41 = vadd.f32 %v3880_v21, %v5237_v39 }
 0x273   : > { %v3014_v14 = vadd.f32 %v3013_v32, %v2823_v24  ;;  %v3052_v42 = vmul.f32 %v2823_v24, %v2823_v24  ;;  %v2501_v58 = vpop.f32.mrf.mxu0  ;;  %v5415_v52 = vpop.f32.mrf.mxu1  ;;  %v2825_v1 = vadd.f32 %v2721_v7, %v5169_v51 }
 0x274   : > { %v2718_v56 = vsel %vm2708_vm1, %v2715_v26, %v2717_v12  ;;  %v2502_v9 = vadd.f32 %v2501_v58, %v5212_v49  ;;  %v2725_v39 = vrot.slane %v2510_v41, 2 }
 0x275   : > { %v3083_v5 = vadd.f32 %v3082_v0, %v3052_v42  ;;  %v2824_v62 = vadd.f32 %v2718_v56, %v5176_v57  ;;  %v3881_v61 = vpop.f32.mrf.mxu0  ;;  %v2358_v23 = vpop.f32.mrf.mxu1  ;;  %v3054_v0 = vmul.f32 %v2825_v1, %v2825_v1 }
 0x276   : > { %v2722_v33 = vrot.slane %v2502_v9, 2  ;;  %v2513_v32 = vadd.f32 %v3881_v61, %v5246_v13 }
 0x277   : > { %v3543_v40 = vpack.c.bf16 %v2824_v62, %v2823_v24  ;;  %v3015_v37 = vadd.f32 %v3014_v14, %v2824_v62  ;;  %v3053_v26 = vmul.f32 %v2824_v62, %v2824_v62  ;;  %v2504_v16 = vpop.f32.mrf.mxu0  ;;  %v5422_v49 = vpop.f32.mrf.mxu1 }
 0x278   : > { %v2723_v21 = vsel %vm2708_vm1, %v2720_v3, %v2722_v33  ;;  %v2727_v12 = vrot.slane %v2513_v32, 2  ;;  %v2505_v51 = vadd.f32 %v2504_v16, %v5223_v47 }
 0x279   : > { %3615 = vst [vmem:[%s4183_s24 + $0x8] sm:$0xff] %v3543_v40   ;;  %v3084_v57 = vadd.f32 %v3083_v5, %v3053_v26  ;;  %v2826_v7 = vadd.f32 %v2723_v21, %v5187_v29  ;;  %v3016_v55 = vadd.f32 %v3015_v37, %v2825_v1  ;;  %v3884_v13 = vpop.f32.mrf.mxu0  ;;  %v2361_v42 = vpop.f32.mrf.mxu1 }
 0x27a   : > { %v2728_v24 = vsel %vm2708_vm1, %v2725_v39, %v2727_v12  ;;  %v2724_v14 = vrot.slane %v2505_v51, 2  ;;  %v2526_v23 = vadd.f32 %v3884_v13, %v5276_v4 }
 0x27b   : > { %v3548_v58 = vpack.c.bf16 %v2826_v7, %v2825_v1  ;;  %v3017_v56 = vadd.f32 %v3016_v55, %v2826_v7  ;;  %v3055_v3 = vmul.f32 %v2826_v7, %v2826_v7  ;;  %v3085_v41 = vadd.f32 %v3084_v57, %v3054_v0  ;;  %v2517_v9 = vpop.f32.mrf.mxu0  ;;  %v5429_v47 = vpop.f32.mrf.mxu1 }
 0x27c   : > { %v2726_v62 = vsel %vm2708_vm1, %v2724_v14, %v2725_v39  ;;  %v2828_v29 = vadd.f32 %v2728_v24, %v5192_v34  ;;  %v2518_v1 = vadd.f32 %v2517_v9, %v5259_v63 }
 0x27d   : > { %3616 = vst [vmem:[%s4183_s24 + $0x10] sm:$0xff] %v3548_v58   ;;  %v3086_v5 = vadd.f32 %v3085_v41, %v3055_v3  ;;  %v2827_v61 = vadd.f32 %v2726_v62, %v5197_v36  ;;  %v3885_v33 = vpop.f32.mrf.mxu0  ;;  %v2366_v32 = vpop.f32.mrf.mxu1  ;;  %v2732_v36 = vrot.slane %v2526_v23, 2 }
 0x27e   : > { %v3057_v12 = vmul.f32 %v2828_v29, %v2828_v29  ;;  %v2729_v57 = vrot.slane %v2518_v1, 2  ;;  %v2529_v4 = vadd.f32 %v3885_v33, %v5287_v15 }
 0x27f   : > { %v3553_v40 = vpack.c.bf16 %v2828_v29, %v2827_v61  ;;  %v3018_v37 = vadd.f32 %v3017_v56, %v2827_v61  ;;  %v3056_v26 = vmul.f32 %v2827_v61, %v2827_v61  ;;  %v2520_v16 = vpop.f32.mrf.mxu0  ;;  %v5436_v39 = vpop.f32.mrf.mxu1 }
 0x280   : > { %v2521_v21 = vadd.f32 %v2520_v16, %v5265_v19  ;;  %v2734_v41 = vrot.slane %v2529_v4, 2 }
 0x281   : > { %3617 = vst [vmem:[%s4183_s24 + $0x18] sm:$0xff] %v3553_v40   ;;  %v3087_v51 = vadd.f32 %v3086_v5, %v3056_v26  ;;  %v3019_v34 = vadd.f32 %v3018_v37, %v2828_v29  ;;  %v3888_v0 = vpop.f32.mrf.mxu0  ;;  %v2369_v63 = vpop.f32.mrf.mxu1 }
 0x282   : > { %v2730_v7 = vrot.slane %v2521_v21, 2  ;;  %v2542_v42 = vadd.f32 %v3888_v0, %v5323_v45 }
 0x283   : > { %v3088_v55 = vadd.f32 %v3087_v51, %v3057_v12  ;;  %v2533_v13 = vpop.f32.mrf.mxu0  ;;  %v5444_v19 = vpop.f32.mrf.mxu1 }
 0x284   : > { %v2731_v24 = vsel %vm2708_vm1, %v2729_v57, %v2730_v7  ;;  %v2733_v14 = vsel %vm2708_vm1, %v2730_v7, %v2732_v36  ;;  %v2534_v58 = vadd.f32 %v2533_v13, %v5301_v2  ;;  %v2739_v45 = vrot.slane %v2542_v42, 2 }
 0x285   : > { %v2829_v56 = vadd.f32 %v2731_v24, %v5215_v46  ;;  %v2830_v3 = vadd.f32 %v2733_v14, %v5217_v6  ;;  %v3889_v15 = vpop.f32.mrf.mxu0  ;;  %v2374_v62 = vpop.f32.mrf.mxu1 }
 0x286   : > { %v2735_v9 = vrot.slane %v2534_v58, 2  ;;  %v2545_v5 = vadd.f32 %v3889_v15, %v5329_v48 }
 0x287   : > { %v3558_v29 = vpack.c.bf16 %v2830_v3, %v2829_v56  ;;  %v3020_v61 = vadd.f32 %v3019_v34, %v2829_v56  ;;  %v3058_v33 = vmul.f32 %v2829_v56, %v2829_v56  ;;  %v2536_v23 = vpop.f32.mrf.mxu0  ;;  %v5451_v2 = vpop.f32.mrf.mxu1  ;;  %v3059_v40 = vmul.f32 %v2830_v3, %v2830_v3 }
 0x288   : > { %v2736_v1 = vsel %vm2708_vm1, %v2734_v41, %v2735_v9  ;;  %v2740_v32 = vrot.slane %v2545_v5, 2  ;;  %v2537_v46 = vadd.f32 %v2536_v23, %v5310_v25 }
 0x289   : > { %3618 = vst [vmem:[%s4183_s24 + $0x20] sm:$0xff] %v3558_v29   ;;  %v3021_v6 = vadd.f32 %v3020_v61, %v2830_v3  ;;  %v3089_v37 = vadd.f32 %v3088_v55, %v3058_v33  ;;  %v2831_v26 = vadd.f32 %v2736_v1, %v5228_v22  ;;  %v3892_v16 = vpop.f32.mrf.mxu0  ;;  %v2377_v12 = vpop.f32.mrf.mxu1 }
 0x28a   : > { %v2741_v48 = vsel %vm2708_vm1, %v2739_v45, %v2740_v32  ;;  %v2737_v21 = vrot.slane %v2537_v46, 2  ;;  %v2558_v4 = vadd.f32 %v3892_v16, %v5365_v11 }
 0x28b   : > { %v3090_v51 = vadd.f32 %v3089_v37, %v3059_v40  ;;  %v3022_v34 = vadd.f32 %v3021_v6, %v2831_v26  ;;  %v3060_v0 = vmul.f32 %v2831_v26, %v2831_v26  ;;  %v2549_v36 = vpop.f32.mrf.mxu0  ;;  %v5459_v25 = vpop.f32.mrf.mxu1  ;;  %v2833_v22 = vadd.f32 %v2741_v48, %v5233_v28 }
 0x28c   : > { %v2738_v57 = vsel %vm2708_vm1, %v2735_v9, %v2737_v21  ;;  %v2550_v7 = vadd.f32 %v2549_v36, %v5340_v35  ;;  %v2745_v11 = vrot.slane %v2558_v4, 2 }
 0x28d   : > { %v3091_v63 = vadd.f32 %v3090_v51, %v3060_v0  ;;  %v2832_v55 = vadd.f32 %v2738_v57, %v5240_v17  ;;  %v3893_v13 = vpop.f32.mrf.mxu0  ;;  %v2382_v14 = vpop.f32.mrf.mxu1  ;;  %v3062_v62 = vmul.f32 %v2833_v22, %v2833_v22 }
 0x28e   : > { %v2742_v24 = vrot.slane %v2550_v7, 2  ;;  %v2561_v42 = vadd.f32 %v3893_v13, %v5374_v8 }
 0x28f   : > { %v3563_v58 = vpack.c.bf16 %v2832_v55, %v2831_v26  ;;  %v3023_v56 = vadd.f32 %v3022_v34, %v2832_v55  ;;  %v3061_v3 = vmul.f32 %v2832_v55, %v2832_v55  ;;  %v2552_v15 = vpop.f32.mrf.mxu0  ;;  %v5466_v35 = vpop.f32.mrf.mxu1 }
 0x290   : > { %v2743_v41 = vsel %vm2708_vm1, %v2740_v32, %v2742_v24  ;;  %v2747_v9 = vrot.slane %v2561_v42, 2  ;;  %v2553_v28 = vadd.f32 %v2552_v15, %v5351_v30 }
 0x291   : > { %3619 = vst [vmem:[%s4183_s24 + $0x28] sm:$0xff] %v3563_v58   ;;  %v3092_v17 = vadd.f32 %v3091_v63, %v3061_v3  ;;  %v2834_v5 = vadd.f32 %v2743_v41, %v5251_v18  ;;  %v3024_v29 = vadd.f32 %v3023_v56, %v2833_v22  ;;  %v3896_v8 = vpop.f32.mrf.mxu0  ;;  %v2385_v23 = vpop.f32.mrf.mxu1 }
 0x292   : > { %v2748_v61 = vsel %vm2708_vm1, %v2745_v11, %v2747_v9  ;;  %v2744_v33 = vrot.slane %v2553_v28, 2  ;;  %v2574_v48 = vadd.f32 %v3896_v8, %v5400_v27 }
 0x293   : > { %v3568_v45 = vpack.c.bf16 %v2834_v5, %v2833_v22  ;;  %v3025_v1 = vadd.f32 %v3024_v29, %v2834_v5  ;;  %v3063_v32 = vmul.f32 %v2834_v5, %v2834_v5  ;;  %v3093_v46 = vadd.f32 %v3092_v17, %v3062_v62  ;;  %v2565_v6 = vpop.f32.mrf.mxu0  ;;  %v5473_v30 = vpop.f32.mrf.mxu1 }
 0x294   : > { %v2746_v40 = vsel %vm2708_vm1, %v2744_v33, %v2745_v11  ;;  %v2836_v18 = vadd.f32 %v2748_v61, %v5256_v38  ;;  %v2566_v21 = vadd.f32 %v2565_v6, %v5387_v50 }
 0x295   : > { %3620 = vst [vmem:[%s4183_s24 + $0x30] sm:$0xff] %v3568_v45   ;;  %v3094_v37 = vadd.f32 %v3093_v46, %v3063_v32  ;;  %v2835_v26 = vadd.f32 %v2746_v40, %v5261_v60  ;;  %v3897_v16 = vpop.f32.mrf.mxu0  ;;  %v2390_v12 = vpop.f32.mrf.mxu1  ;;  %v2752_v60 = vrot.slane %v2574_v48, 2 }
 0x296   : > { %v3065_v7 = vmul.f32 %v2836_v18, %v2836_v18  ;;  %v2749_v55 = vrot.slane %v2566_v21, 2  ;;  %v2577_v27 = vadd.f32 %v3897_v16, %v5407_v44 }
 0x297   : > { %v3573_v51 = vpack.c.bf16 %v2836_v18, %v2835_v26  ;;  %v3026_v34 = vadd.f32 %v3025_v1, %v2835_v26  ;;  %v3064_v0 = vmul.f32 %v2835_v26, %v2835_v26  ;;  %v2568_v36 = vpop.f32.mrf.mxu0  ;;  %v5480_v57 = vpop.f32.mrf.mxu1 }
 0x298   : > { %v2569_v4 = vadd.f32 %v2568_v36, %v5393_v53  ;;  %v2754_v41 = vrot.slane %v2577_v27, 2 }
 0x299   : > { %3621 = vst [vmem:[%s4183_s24 + $0x38] sm:$0xff] %v3573_v51   ;;  %v3095_v63 = vadd.f32 %v3094_v37, %v3064_v0  ;;  %v3027_v38 = vadd.f32 %v3026_v34, %v2836_v18  ;;  %v3900_v22 = vpop.f32.mrf.mxu0  ;;  %v2393_v50 = vpop.f32.mrf.mxu1  ;;  %v5701_v51 = vld [vmem:[#allocation27_spill] sm:$0xff]  ;;  %v5702_v34 = vld [vmem:[#allocation22_spill] sm:$0xff] }
 0x29a   : > { %v2750_v13 = vrot.slane %v2569_v4, 2  ;;  %v2590_v56 = vadd.f32 %v3900_v22, %v5429_v47 }
 0x29b   : > { %v3096_v24 = vadd.f32 %v3095_v63, %v3065_v7  ;;  %v2581_v14 = vpop.f32.mrf.mxu0  ;;  %v5488_v53 = vpop.f32.mrf.mxu1 }
 0x29c   : > { %v2751_v42 = vsel %vm2708_vm1, %v2749_v55, %v2750_v13  ;;  %v2753_v58 = vsel %vm2708_vm1, %v2750_v13, %v2752_v60  ;;  %v2582_v3 = vadd.f32 %v2581_v14, %v5415_v52  ;;  %v2759_v47 = vrot.slane %v2590_v56, 2 }
 0x29d   : > { %v2837_v15 = vadd.f32 %v2751_v42, %v5279_v54  ;;  %v2838_v11 = vadd.f32 %v2753_v58, %v5281_v20  ;;  %v3901_v44 = vpop.f32.mrf.mxu0  ;;  %v2398_v28 = vpop.f32.mrf.mxu1  ;;  %v5703_v42 = vld [vmem:[#allocation29_spill] sm:$0xff] }
 0x29e   : > { %v2755_v9 = vrot.slane %v2582_v3, 2  ;;  %v2593_v62 = vadd.f32 %v3901_v44, %v5436_v39 }
 0x29f   : > { %v3578_v17 = vpack.c.bf16 %v2838_v11, %v2837_v15  ;;  %v3028_v5 = vadd.f32 %v3027_v38, %v2837_v15  ;;  %v3066_v29 = vmul.f32 %v2837_v15, %v2837_v15  ;;  %v2584_v8 = vpop.f32.mrf.mxu0  ;;  %v5495_v52 = vpop.f32.mrf.mxu1  ;;  %v3067_v23 = vmul.f32 %v2838_v11, %v2838_v11 }
 0x2a0   : > { %v2756_v61 = vsel %vm2708_vm1, %v2754_v41, %v2755_v9  ;;  %v2760_v33 = vrot.slane %v2593_v62, 2  ;;  %v2585_v54 = vadd.f32 %v2584_v8, %v5422_v49 }
 0x2a1   : > { %3622 = vst [vmem:[%s4183_s24 + $0x40] sm:$0xff] %v3578_v17   ;;  %v3029_v20 = vadd.f32 %v3028_v5, %v2838_v11  ;;  %v3097_v45 = vadd.f32 %v3096_v24, %v3066_v29  ;;  %v2839_v1 = vadd.f32 %v2756_v61, %v5292_v43  ;;  %v3904_v32 = vpop.f32.mrf.mxu0  ;;  %v2401_v6 = vpop.f32.mrf.mxu1  ;;  %v5704_v29 = vld [vmem:[#allocation37_spill] sm:$0xff] }
 0x2a2   : > { %v2761_v39 = vsel %vm2708_vm1, %v2759_v47, %v2760_v33  ;;  %v2757_v46 = vrot.slane %v2585_v54, 2  ;;  %v2606_v48 = vadd.f32 %v3904_v32, %v5459_v25  ;;  %v5705_v47 = vld [vmem:[#allocation32_spill] sm:$0xff] }
 0x2a3   : > { %v3098_v40 = vadd.f32 %v3097_v45, %v3067_v23  ;;  %v3030_v37 = vadd.f32 %v3029_v20, %v2839_v1  ;;  %v3068_v18 = vmul.f32 %v2839_v1, %v2839_v1  ;;  %v2597_v26 = vpop.f32.mrf.mxu0  ;;  %v5503_v49 = vpop.f32.mrf.mxu1  ;;  %v2841_v43 = vadd.f32 %v2761_v39, %v5701_v51 }
 0x2a4   : > { %v2758_v16 = vsel %vm2708_vm1, %v2755_v9, %v2757_v46  ;;  %v2598_v21 = vadd.f32 %v2597_v26, %v5444_v19  ;;  %v2765_v25 = vrot.slane %v2606_v48, 2 }
 0x2a5   : > { %v3099_v12 = vadd.f32 %v3098_v40, %v3068_v18  ;;  %v2840_v0 = vadd.f32 %v2758_v16, %v5702_v34  ;;  %v3905_v36 = vpop.f32.mrf.mxu0  ;;  %v2406_v7 = vpop.f32.mrf.mxu1  ;;  %v3070_v24 = vmul.f32 %v2841_v43, %v2841_v43 }
 0x2a6   : > { %v2762_v4 = vrot.slane %v2598_v21, 2  ;;  %v2609_v63 = vadd.f32 %v3905_v36, %v5466_v35 }
 0x2a7   : > { %v3583_v38 = vpack.c.bf16 %v2840_v0, %v2839_v1  ;;  %v3031_v22 = vadd.f32 %v3030_v37, %v2840_v0  ;;  %v3069_v60 = vmul.f32 %v2840_v0, %v2840_v0  ;;  %v2600_v55 = vpop.f32.mrf.mxu0  ;;  %v5510_v19 = vpop.f32.mrf.mxu1 }
 0x2a8   : > { %v2763_v27 = vsel %vm2708_vm1, %v2760_v33, %v2762_v4  ;;  %v2767_v13 = vrot.slane %v2609_v63, 2  ;;  %v2601_v50 = vadd.f32 %v2600_v55, %v5451_v2  ;;  %v5706_v4 = vld [vmem:[#allocation31_spill] sm:$0xff]  ;;  %v5707_v63 = vld [vmem:[#allocation40_spill] sm:$0xff] }
 0x2a9   : > { %3623 = vst [vmem:[%s4183_s24 + $0x48] sm:$0xff] %v3583_v38   ;;  %v3100_v14 = vadd.f32 %v3099_v12, %v3069_v60  ;;  %v2842_v58 = vadd.f32 %v2763_v27, %v5703_v42  ;;  %v3032_v56 = vadd.f32 %v3031_v22, %v2841_v43  ;;  %v3908_v35 = vpop.f32.mrf.mxu0  ;;  %v2409_v11 = vpop.f32.mrf.mxu1 }
 0x2aa   : > { %v2768_v3 = vsel %vm2708_vm1, %v2765_v25, %v2767_v13  ;;  %v2764_v15 = vrot.slane %v2601_v50, 2  ;;  %v2622_v54 = vadd.f32 %v3908_v35, %v5488_v53  ;;  %v5708_v11 = vld [vmem:[#allocation42_spill] sm:$0xff] }
 0x2ab   : > { %v3588_v44 = vpack.c.bf16 %v2842_v58, %v2841_v43  ;;  %v3033_v41 = vadd.f32 %v3032_v56, %v2842_v58  ;;  %v3071_v9 = vmul.f32 %v2842_v58, %v2842_v58  ;;  %v3101_v28 = vadd.f32 %v3100_v14, %v3070_v24  ;;  %v2613_v62 = vpop.f32.mrf.mxu0  ;;  %v2412_v2 = vpop.f32.mrf.mxu1 }
 0x2ac   : > { %v2766_v17 = vsel %vm2708_vm1, %v2764_v15, %v2765_v25  ;;  %v2844_v8 = vadd.f32 %v2768_v3, %v5704_v29  ;;  %v2614_v20 = vadd.f32 %v2613_v62, %v5473_v30  ;;  %v2772_v16 = vrot.slane %v2622_v54, 2 }
 0x2ad   : > { %3624 = vst [vmem:[%s4183_s24 + $0x50] sm:$0xff] %v3588_v44   ;;  %v3102_v5 = vadd.f32 %v3101_v28, %v3071_v9  ;;  %v2843_v61 = vadd.f32 %v2766_v17, %v5705_v47  ;;  %v3909_v33 = vpop.f32.mrf.mxu0  ;;  %v2414_v23 = vpop.f32.mrf.mxu1 }
 0x2ae   : > { %v3073_v40 = vmul.f32 %v2844_v8, %v2844_v8  ;;  %v2769_v48 = vrot.slane %v2614_v20, 2  ;;  %v2625_v21 = vadd.f32 %v3909_v33, %v5495_v52  ;;  %v5710_v20 = vld [vmem:[#allocation34_spill] sm:$0xff] }
 0x2af   : > { %v3593_v45 = vpack.c.bf16 %v2844_v8, %v2843_v61  ;;  %v3034_v1 = vadd.f32 %v3033_v41, %v2843_v61  ;;  %v3072_v32 = vmul.f32 %v2843_v61, %v2843_v61  ;;  %v2616_v39 = vpop.f32.mrf.mxu0  ;;  %v2415_v46 = vpop.f32.mrf.mxu1 }
 0x2b0   : > { %v2617_v6 = vadd.f32 %v2616_v39, %v5480_v57  ;;  %v2774_v60 = vrot.slane %v2625_v21, 2 }
 0x2b1   : > { %3625 = vst [vmem:[%s4183_s24 + $0x58] sm:$0xff] %v3593_v45   ;;  %v3103_v37 = vadd.f32 %v3102_v5, %v3072_v32  ;;  %v3035_v18 = vadd.f32 %v3034_v1, %v2844_v8  ;;  %v3912_v26 = vpop.f32.mrf.mxu0  ;;  %v2417_v12 = vpop.f32.mrf.mxu1  ;;  %v5709_v8 = vld [vmem:[#allocation33_spill] sm:$0xff] }
 0x2b2   : > { %v2770_v53 = vrot.slane %v2617_v6, 2  ;;  %v2638_v0 = vadd.f32 %v3912_v26, %v2412_v2 }
 0x2b3   : > { %v3104_v30 = vadd.f32 %v3103_v37, %v3073_v40  ;;  %v2629_v51 = vpop.f32.mrf.mxu0  ;;  %v2420_v36 = vpop.f32.mrf.mxu1 }
 0x2b4   : > { %v2771_v43 = vsel %vm2708_vm1, %v2769_v48, %v2770_v53  ;;  %v2773_v34 = vsel %vm2708_vm1, %v2770_v53, %v2772_v16  ;;  %v2630_v57 = vadd.f32 %v2629_v51, %v5503_v49  ;;  %v2779_v14 = vrot.slane %v2638_v0, 2 }
 0x2b5   : > { %v2845_v7 = vadd.f32 %v2771_v43, %v5706_v4  ;;  %v2846_v38 = vadd.f32 %v2773_v34, %v5707_v63  ;;  %v3913_v22 = vpop.f32.mrf.mxu0  ;;  %v2422_v55 = vpop.f32.mrf.mxu1 }
 0x2b6   : > { %v2775_v52 = vrot.slane %v2630_v57, 2  ;;  %v2641_v25 = vadd.f32 %v3913_v22, %v2415_v46 }
 0x2b7   : > { %v3598_v27 = vpack.c.bf16 %v2846_v38, %v2845_v7  ;;  %v3036_v13 = vadd.f32 %v3035_v18, %v2845_v7  ;;  %v3074_v50 = vmul.f32 %v2845_v7, %v2845_v7  ;;  %v2632_v24 = vpop.f32.mrf.mxu0  ;;  %v2423_v56 = vpop.f32.mrf.mxu1  ;;  %v3075_v3 = vmul.f32 %v2846_v38, %v2846_v38 }
 0x2b8   : > { %v2776_v42 = vsel %vm2708_vm1, %v2774_v60, %v2775_v52  ;;  %v2780_v58 = vrot.slane %v2641_v25, 2  ;;  %v2633_v49 = vadd.f32 %v2632_v24, %v5510_v19 }
 0x2b9   : > { %3626 = vst [vmem:[%s4183_s24 + $0x60] sm:$0xff] %v3598_v27   ;;  %v3037_v35 = vadd.f32 %v3036_v13, %v2846_v38  ;;  %v3105_v15 = vadd.f32 %v3104_v30, %v3074_v50  ;;  %v2847_v44 = vadd.f32 %v2776_v42, %v5708_v11  ;;  %v3916_v41 = vpop.f32.mrf.mxu0  ;;  %v2425_v62 = vpop.f32.mrf.mxu1 }
 0x2ba   : > { %v2781_v9 = vsel %vm2708_vm1, %v2779_v14, %v2780_v58  ;;  %v2777_v28 = vrot.slane %v2633_v49, 2 }
 0x2bb   : > { %v3106_v17 = vadd.f32 %v3105_v15, %v3075_v3  ;;  %v3038_v2 = vadd.f32 %v3037_v35, %v2847_v44  ;;  %v3076_v5 = vmul.f32 %v2847_v44, %v2847_v44  ;;  %v2645_v29 = vpop.f32.mrf.mxu0  ;;  %v2849_v47 = vadd.f32 %v2781_v9, %v5709_v8  ;;  %v2428_v19 = vpop.f32.mrf.mxu1 }
 0x2bc   : > { %v2778_v61 = vsel %vm2708_vm1, %v2775_v52, %v2777_v28  ;;  %v2646_v33 = vadd.f32 %v2645_v29, %v2420_v36  ;;  %v2654_v1 = vadd.f32 %v3916_v41, %v2428_v19 }
 0x2bd   : > { %v3107_v54 = vadd.f32 %v3106_v17, %v3076_v5  ;;  %v2848_v23 = vadd.f32 %v2778_v61, %v5710_v20  ;;  %v3917_v45 = vpop.f32.mrf.mxu0  ;;  %v2430_v39 = vpop.f32.mrf.mxu1  ;;  %v3078_v18 = vmul.f32 %v2849_v47, %v2849_v47 }
 0x2be   : > { %v2782_v32 = vrot.slane %v2646_v33, 2  ;;  %v2785_v51 = vrot.slane %v2654_v1, 2 }
 0x2bf   : > { %v3603_v46 = vpack.c.bf16 %v2848_v23, %v2847_v44  ;;  %v3039_v6 = vadd.f32 %v3038_v2, %v2848_v23  ;;  %v3077_v40 = vmul.f32 %v2848_v23, %v2848_v23  ;;  %v2648_v37 = vpop.f32.mrf.mxu0  ;;  %v2431_v16 = vpop.f32.mrf.mxu1 }
 0x2c0   : > { %v2783_v26 = vsel %vm2708_vm1, %v2780_v58, %v2782_v32  ;;  %v2649_v48 = vadd.f32 %v2648_v37, %v2423_v56  ;;  %v2657_v30 = vadd.f32 %v3917_v45, %v2431_v16 }
 0x2c1   : > { %3627 = vst [vmem:[%s4183_s24 + $0x68] sm:$0xff] %v3603_v46   ;;  %v3108_v21 = vadd.f32 %v3107_v54, %v3077_v40  ;;  %v2850_v53 = vadd.f32 %v2783_v26, %v5379_v10  ;;  %v3040_v12 = vadd.f32 %v3039_v6, %v2849_v47  ;;  %v2433_v34 = vpop.f32.mrf.mxu1 }
 0x2c2   : > { %v2784_v43 = vrot.slane %v2649_v48, 2  ;;  %v2787_v7 = vrot.slane %v2657_v30, 2 }
 0x2c3   : > { %v3608_v0 = vpack.c.bf16 %v2850_v53, %v2849_v47  ;;  %v3041_v36 = vadd.f32 %v3040_v12, %v2850_v53  ;;  %v3079_v57 = vmul.f32 %v2850_v53, %v2850_v53  ;;  %v3109_v4 = vadd.f32 %v3108_v21, %v3078_v18 }
 0x2c4   : > { %v2786_v63 = vsel %vm2708_vm1, %v2784_v43, %v2785_v51  ;;  %v2788_v60 = vsel %vm2708_vm1, %v2785_v51, %v2787_v7 }
 0x2c5   : > { %3628 = vst [vmem:[%s4183_s24 + $0x70] sm:$0xff] %v3608_v0   ;;  %v3110_v38 = vadd.f32 %v3109_v4, %v3079_v57  ;;  %v2851_v22 = vadd.f32 %v2786_v63, %v5389_v31  ;;  %v2852_v10 = vadd.f32 %v2788_v60, %v5384_v59 }
 0x2c7   : > { %v3042_v52 = vadd.f32 %v3041_v36, %v2851_v22  ;;  %v3080_v55 = vmul.f32 %v2851_v22, %v2851_v22  ;;  %v3081_v25 = vmul.f32 %v2852_v10, %v2852_v10  ;;  %v3613_v27 = vpack.c.bf16 %v2852_v10, %v2851_v22 }
 0x2c9   : > { %v3043_v13 = vadd.f32 %v3042_v52, %v2852_v10  ;;  %v3111_v50 = vadd.f32 %v3110_v38, %v3080_v55  ;;  %3629 = vst [vmem:[%s4183_s24 + $0x78] sm:$0xff] %v3613_v27  }
 0x2cb   : > { %v3044_v24 = vrot.slane %v3043_v13, 4  ;;  %v3112_v14 = vadd.f32 %v3111_v50, %v3081_v25 }
 0x2cd   : > { %v3045_v42 = vadd.f32 %v3044_v24, %v3043_v13  ;;  %v3113_v58 = vrot.slane %v3112_v14, 4 }
 0x2cf   : > { %v3046_v56 = vrot.slane %v3045_v42, 2  ;;  %v3114_v49 = vadd.f32 %v3113_v58, %v3112_v14 }
 0x2d1   : > { %v3047_v35 = vadd.f32 %v3046_v56, %v3045_v42  ;;  %v3115_v31 = vrot.slane %v3114_v49, 2 }
 0x2d3   : > { %v3048_v3 = vrot.slane %v3047_v35, 1  ;;  %v3116_v15 = vadd.f32 %v3115_v31, %v3114_v49 }
 0x2d5   : > { %v3117_v11 = vrot.slane %v3116_v15, 1  ;;  %v3049_v59 = vadd.f32 %v3048_v3, %v3047_v35 }
 0x2d7   : > { %v3118_v44 = vadd.f32 %v3117_v11, %v3116_v15 }
 0x2d9   : > { %v3120_v41 = vsel %vm3119_vm2, %v3049_v59, %v3118_v44 }
 0x2da   : > { %3121 = vst [vmem:[%s4188_s27] sm:$0x3] %v3120_v41 }
 0x2db PF: > { %s14_s14 = sadd.s32 1, %s4131_s14   ;;  %s5711_s12 = smov %s4127_s13 }
 0x2dc   : > { %p11_p5 = scmp.ge.s32.totalorder %s14_s14, 4   ;;  %s5712_s13 = smov %s5714_s15 }
 0x2de   :  { %13 = sbr.rel (!%p11_p5) target bundleno = 2 (0x2), region = 164 }
 0x2e3   :  { %3171 = vsyncmov [#allocation3] }
 0x2e6   :  { %s3172_s24 = vpop.sfrf %3171 }
 0x2e7   :  { %p3499_p6 = scmp.ne.s32.totalorder %s3172_s24, 0 }
 0x2e9   :  { %3176 = shalt.err (%p3499_p6)  }
 0x2ea   :  { %3178 = vsyncmov [#allocation3 + $0x1] }
 0x2ed   :  { %s3179_s16 = vpop.sfrf %3178 }
 0x2ee   :  { %p3500_p7 = scmp.ne.s32.totalorder %s3179_s16, 0 }
 0x2f0   :  { %3183 = shalt.err (%p3500_p7)  }

// kernel: unet_block.4
= control target key start
LH: loop header
LB: loop body
LE: loop exit
PB: predicated region body
PF: predicated region fallthrough
CT: control target
= control target key end

     0   :  { %s5305_s18 = smov 0   ;;  %s5307_s19 = smov 0   ;;  %s7184_s0 = inlined_call_operand.vmem [shape: bf16[2,18,24,128], index: 0, kind: input, shape index: {}]   ;;  %s7185_s1 = inlined_call_operand.vmem [shape: bf16[384,384], index: 1, kind: input, shape index: {}]   ;;  %s7186_s2 = inlined_call_operand.vmem [shape: f32[1,128], index: 2, kind: input, shape index: {}]   ;;  %s7187_s3 = inlined_call_operand.vmem [shape: f32[1,128], index: 3, kind: input, shape index: {}]   ;;  %s7188_s4 = inlined_call_operand.vmem [shape: bf16[2,16,16,128], index: 4, kind: output, shape index: {0}]   ;;  %s7189_s5 = inlined_call_operand.vmem [shape: f32[2,2,128], index: 5, kind: output, shape index: {1}]  }
   0x1   :  { %s5309_s20 = smov 0  }
   0x2 LB: > { %s28_s21 = sadd.s32 1, %s5268_s19  ;;  %p4030_p0 = scmp.ge.s32.totalorder %s5272_s20, 1  ;;  %s5272_s20 = sphi %s5309_s20, %s16_s20   ;;  %s5268_s19 = sphi %s5307_s19, %s7366_s19   ;;  %s5264_s18 = sphi %s5305_s18, %s7365_s18  }
   0x3   : > { %p30_p1 = scmp.ge.s32.totalorder %s28_s21, 2  ;;  %p172_p2 = scmp.lt.s32.totalorder %s5272_s20, 3 }
   0x5   : > { %s7368_s21 = smov (%p30_p1, %s28_s21), 0  ;;  %p173_p3 = pnand %p4030_p0, %p172_p2 }
   0x7   : > { %176 = sbr.rel (%p173_p3) target bundleno = 739 (0x2e3), region = 32 }
   0xc   : > { %p204_p4 = scmp.lt.s32.totalorder %s5264_s18, 1  ;;  %s4308_s22 = smul.u32 216, %s5264_s18 }
   0xe   : > { %s7370_s18 = smov (!%p204_p4, %s5264_s18), 1  ;;  %s5326_s25 = scalar_lea.vmem %s7184_s0, %s4308_s22 }
   0xf   : > { %s4307_s26 = sshll.u32 %s7370_s18, 7  ;;  %s4033_s27 = sshll.u32 %s7370_s18, 1  ;;  %v5329_v0 = vld [vmem:[%s5326_s25] sm:$0xff]  ;;  %v5332_v1 = vld [vmem:[%s5326_s25 + $0x8] sm:$0xff]  ;;  %v5335_v2 = vld [vmem:[%s5326_s25 + $0x10] sm:$0xff] }
  0x10   : > { %s5340_s30 = scalar_lea.vmem %s7188_s4, %s4307_s26  ;;  %s5345_s8 = scalar_lea.vmem %s7189_s5, %s4033_s27  ;;  %v5348_v3 = vld [vmem:[%s5326_s25 + $0x18] sm:$0xff]  ;;  %v5351_v4 = vld [vmem:[%s5326_s25 + $0x20] sm:$0xff]  ;;  %v5354_v5 = vld [vmem:[%s5326_s25 + $0x28] sm:$0xff] }
  0x11   : > { %v5357_v6 = vld [vmem:[%s5326_s25 + $0x30] sm:$0xff]  ;;  %v5360_v7 = vld [vmem:[%s5326_s25 + $0x38] sm:$0xff]  ;;  %v5363_v8 = vld [vmem:[%s5326_s25 + $0x40] sm:$0xff] }
  0x12   : > { %v5366_v9 = vld [vmem:[%s5326_s25 + $0x48] sm:$0xff]  ;;  %v5369_v10 = vld [vmem:[%s5326_s25 + $0x50] sm:$0xff]  ;;  %v5372_v11 = vld [vmem:[%s5326_s25 + $0x58] sm:$0xff] }
  0x13   : > { %v5375_v12 = vld [vmem:[%s5326_s25 + $0x60] sm:$0xff]  ;;  %v5378_v13 = vld [vmem:[%s5326_s25 + $0x68] sm:$0xff]  ;;  %v5381_v14 = vld [vmem:[%s5326_s25 + $0x70] sm:$0xff] }
  0x14   : > { %v5384_v15 = vld [vmem:[%s5326_s25 + $0x78] sm:$0xff]  ;;  %v5387_v16 = vld [vmem:[%s5326_s25 + $0x80] sm:$0xff]  ;;  %v5390_v17 = vld [vmem:[%s5326_s25 + $0x88] sm:$0xff] }
  0x15   : > { %v5393_v18 = vld [vmem:[%s5326_s25 + $0x90] sm:$0xff]  ;;  %v5396_v19 = vld [vmem:[%s5326_s25 + $0x98] sm:$0xff]  ;;  %v5399_v20 = vld [vmem:[%s5326_s25 + $0xa0] sm:$0xff] }
  0x16   : > { %v5402_v21 = vld [vmem:[%s5326_s25 + $0xa8] sm:$0xff]  ;;  %v5405_v22 = vld [vmem:[%s5326_s25 + $0xb0] sm:$0xff]  ;;  %v5408_v23 = vld [vmem:[%s5326_s25 + $0xb8] sm:$0xff] }
  0x17   : > { %v5411_v24 = vld [vmem:[%s5326_s25 + $0xc0] sm:$0xff]  ;;  %v5414_v25 = vld [vmem:[%s5326_s25 + $0xc8] sm:$0xff]  ;;  %v5417_v26 = vld [vmem:[%s5326_s25 + $0xd0] sm:$0xff] }
  0x18   : > { %338 = vsyncadd [#allocation4], 3456 }
  0x19   : > { %5260 = dma.done.wait [#allocation4], 3456 }
  0x1a   : > { %5261 = vsyncadd [#allocation4], 4294963840  ;;  %v5274_v27 = vmov 0   ;;  %v5114_v28 = vld [vmem:[%s7185_s1 + $0xa8] ss:$12 sps:$4 sm:$0xff]   ;;  %v4441_v34 = vunpack.c.l.bf16 %v5372_v11  ;;  %v4442_v35 = vunpack.c.h.bf16 %v5372_v11  ;;  %v4445_v36 = vunpack.c.l.bf16 %v5375_v12 }
  0x1b   : > { %1659 = vmatprep.subr.bf16.mxu0 %v5274_v27  ;;  %v5426_v29 = vld [vmem:[%s7185_s1 + $0x228] ss:$12 sps:$4 sm:$0xff]   ;;  %v5119_v30 = vld [vmem:[%s7185_s1 + $0x90] ss:$12 sps:$4 sm:$0xff]   ;;  %v5124_v32 = vld [vmem:[%s7185_s1 + $0x78] ss:$12 sps:$4 sm:$0xff]   ;;  %v4446_v37 = vunpack.c.h.bf16 %v5375_v12  ;;  %v4449_v38 = vunpack.c.l.bf16 %v5378_v13  ;;  %v4450_v39 = vunpack.c.h.bf16 %v5378_v13  ;;  %v4453_v40 = vunpack.c.l.bf16 %v5381_v14 }
  0x1c   : > { %1660 = vmatpush1.bf16.msra.mxu0 %v5114_v28  ;;  %5073 = vmatprep.subr.bf16.mxu1 %v5426_v29  ;;  %v5436_v31 = vld [vmem:[%s7185_s1 + $0x210] ss:$12 sps:$4 sm:$0xff]   ;;  %v5127_v33 = vld [vmem:[%s7185_s1 + $0x1f8] ss:$12 sps:$4 sm:$0xff]   ;;  %v4454_v41 = vunpack.c.h.bf16 %v5381_v14  ;;  %v4457_v42 = vunpack.c.l.bf16 %v5384_v15  ;;  %v5129_v43 = vld [vmem:[%s7185_s1 + $0x60] ss:$12 sps:$4 sm:$0xff]   ;;  %v4458_v45 = vunpack.c.h.bf16 %v5384_v15  ;;  %v4461_v46 = vunpack.c.l.bf16 %v5387_v16 }
  0x1d   : > { %1661 = vmatprep.subr.bf16.mxu0 %v5274_v27  ;;  %5081 = vmatpush3.bf16.msra.mxu1 %v5426_v29  ;;  %v5132_v44 = vld [vmem:[%s7185_s1 + $0x1e0] ss:$12 sps:$4 sm:$0xff]   ;;  %v4462_v47 = vunpack.c.h.bf16 %v5387_v16  ;;  %v4465_v48 = vunpack.c.l.bf16 %v5390_v17  ;;  %v4466_v49 = vunpack.c.h.bf16 %v5390_v17  ;;  %v4469_v50 = vunpack.c.l.bf16 %v5393_v18  ;;  %v5134_v57 = vld [vmem:[%s7185_s1 + $0x48] ss:$12 sps:$4 sm:$0xff]   ;;  %v5142_v28 = vld [vmem:[%s7185_s1 + $0x1b0] ss:$12 sps:$4 sm:$0xff]  }
  0x1e   : > { %5074 = vmatprep.subr.bf16.mxu1 %v5436_v31  ;;  %v4470_v51 = vunpack.c.h.bf16 %v5393_v18  ;;  %v4401_v52 = vunpack.c.l.bf16 %v5332_v1  ;;  %v4402_v53 = vunpack.c.h.bf16 %v5332_v1  ;;  %v4405_v54 = vunpack.c.l.bf16 %v5335_v2  ;;  %v5137_v62 = vld [vmem:[%s7185_s1 + $0x1c8] ss:$12 sps:$4 sm:$0xff]   ;;  %v5144_v12 = vld [vmem:[%s7185_s1 + $0x18] ss:$12 sps:$4 sm:$0xff]  }
  0x1f   : > { %v4406_v55 = vunpack.c.h.bf16 %v5335_v2  ;;  %vm1088_vm0 = vcmask 1043456   ;;  %vm1089_vm1 = vsmask.f32 7938  ;;  %vm1031_vm2 = vcmask 1040384   ;;  %v5147_v14 = vld [vmem:[%s7185_s1 + $0x198] ss:$12 sps:$4 sm:$0xff]  }
  0x20   : > { %1662 = vmatpush1.bf16.msra.mxu0 %v5119_v30  ;;  %v5528_v30 = vld [vmem:[%s7187_s3] ss:$0 sm:$0xff]  ;;  %vm1032_vm3 = vsmask.f32 256  ;;  %v5155_v17 = vld [vmem:[%s7185_s1 + $0x168] ss:$12 sps:$4 sm:$0xff]   ;;  %vm5608_vm4 = vmand %vm1088_vm0, %vm1089_vm1 }
  0x21   : > { %1663 = vmatprep.subr.bf16.mxu0 %v5274_v27  ;;  %5082 = vmatpush3.bf16.msra.mxu1 %v5436_v31  ;;  %vm5617_vm5 = vmand %vm1031_vm2, %vm1032_vm3  ;;  %vm2671_vm6 = vcmask 1046528   ;;  %vm3458_vm7 = vcmask 1045504  }
  0x22   : > { %5075 = vmatprep.subr.bf16.mxu1 %v5127_v33 }
  0x24   : > { %1664 = vmatpush1.bf16.msra.mxu0 %v5124_v32  ;;  %v5139_v32 = vld [vmem:[%s7185_s1 + $0x30] ss:$12 sps:$4 sm:$0xff]  }
  0x25   : > { %1665 = vmatprep.subr.bf16.mxu0 %v5274_v27  ;;  %5083 = vmatpush3.bf16.msra.mxu1 %v5127_v33 }
  0x26   : > { %5076 = vmatprep.subr.bf16.mxu1 %v5132_v44 }
  0x28   : > { %1666 = vmatpush1.bf16.msra.mxu0 %v5129_v43 }
  0x29   : > { %1667 = vmatprep.subr.bf16.mxu0 %v5274_v27  ;;  %5084 = vmatpush3.bf16.msra.mxu1 %v5132_v44  ;;  %v5512_v44 = vld [vmem:[%s7186_s2] ss:$0 sm:$0xff] }
  0x2a   : > { %5077 = vmatprep.subr.bf16.mxu1 %v5137_v62  ;;  %v597_v60 = vmul.f32 %v4442_v35, %v5512_v44  ;;  %v598_v61 = vmul.f32 %v4445_v36, %v5512_v44  ;;  %v599_v43 = vmul.f32 %v4446_v37, %v5512_v44  ;;  %v600_v11 = vmul.f32 %v4449_v38, %v5512_v44 }
  0x2b   : > { %v602_v35 = vmul.f32 %v4453_v40, %v5512_v44  ;;  %v603_v36 = vmul.f32 %v4454_v41, %v5512_v44  ;;  %v607_v15 = vmul.f32 %v4462_v47, %v5512_v44 }
  0x2c   : > { %1668 = vmatpush1.bf16.msra.mxu0 %v5134_v57  ;;  %v596_v57 = vmul.f32 %v4441_v34, %v5512_v44  ;;  %v601_v34 = vmul.f32 %v4450_v39, %v5512_v44  ;;  %v658_v38 = vadd.f32 %v5528_v30, %v597_v60  ;;  %v659_v13 = vadd.f32 %v5528_v30, %v598_v61 }
  0x2d   : > { %1669 = vmatprep.subr.bf16.mxu0 %v5274_v27  ;;  %5085 = vmatpush3.bf16.msra.mxu1 %v5137_v62  ;;  %v660_v39 = vadd.f32 %v5528_v30, %v599_v43  ;;  %v661_v40 = vadd.f32 %v5528_v30, %v600_v11  ;;  %v663_v62 = vadd.f32 %v5528_v30, %v602_v35  ;;  %v4422_v60 = vunpack.c.h.bf16 %v5357_v6 }
  0x2e   : > { %v657_v37 = vadd.f32 %v5528_v30, %v596_v57  ;;  %5078 = vmatprep.subr.bf16.mxu1 %v5142_v28  ;;  %v662_v41 = vadd.f32 %v5528_v30, %v601_v34  ;;  %v712_v43 = vmax.f32 %v658_v38, 0.0  ;;  %v713_v57 = vmax.f32 %v659_v13, 0.0 }
  0x2f   : > { %v714_v33 = vmax.f32 %v660_v39, 0.0  ;;  %v664_v59 = vadd.f32 %v5528_v30, %v603_v36  ;;  %v717_v58 = vmax.f32 %v663_v62, 0.0  ;;  %v604_v34 = vmul.f32 %v4457_v42, %v5512_v44 }
  0x30   : > { %1670 = vmatpush1.bf16.msra.mxu0 %v5139_v32  ;;  %v711_v61 = vmax.f32 %v657_v37, 0.0  ;;  %v715_v32 = vmax.f32 %v661_v40, 0.0  ;;  %v716_v63 = vmax.f32 %v662_v41, 0.0  ;;  %v605_v35 = vmul.f32 %v4458_v45, %v5512_v44  ;;  %v5149_v37 = vld [vmem:[%s7185_s1] ss:$12 sps:$4 sm:$0xff]  }
  0x31   : > { %1671 = vmatprep.subr.bf16.mxu0 %v5274_v27  ;;  %5086 = vmatpush3.bf16.msra.mxu1 %v5142_v28  ;;  %v4566_v11 = vpack.c.bf16 %v714_v33, %v713_v57  ;;  %v5152_v28 = vld [vmem:[%s7185_s1 + $0x180] ss:$12 sps:$4 sm:$0xff]   ;;  %v718_v33 = vmax.f32 %v664_v59, 0.0  ;;  %v606_v42 = vmul.f32 %v4461_v46, %v5512_v44  ;;  %v665_v45 = vadd.f32 %v5528_v30, %v604_v34 }
  0x32   : > { %v4561_v56 = vpack.c.bf16 %v712_v43, %v711_v61  ;;  %5079 = vmatprep.subr.bf16.mxu1 %v5147_v14  ;;  %v4571_v36 = vpack.c.bf16 %v716_v63, %v715_v32  ;;  %v608_v59 = vmul.f32 %v4465_v48, %v5512_v44  ;;  %v609_v46 = vmul.f32 %v4466_v49, %v5512_v44  ;;  %v5177_v40 = vld [vmem:[%s7185_s1 + $0xf4] ss:$12 sps:$4 sm:$0xff]  }
  0x33   : > { %4755 = vst [vmem:[#allocation3 + $0x60] sm:$0xff] %v4566_v11   ;;  %v4576_v63 = vpack.c.bf16 %v718_v33, %v717_v58  ;;  %v667_v16 = vadd.f32 %v5528_v30, %v606_v42  ;;  %v668_v47 = vadd.f32 %v5528_v30, %v607_v15  ;;  %v719_v38 = vmax.f32 %v665_v45, 0.0 }
  0x34   : > { %1672 = vmatpush1.bf16.msra.mxu0 %v5144_v12  ;;  %4754 = vst [vmem:[#allocation3 + $0x58] sm:$0xff] %v4561_v56   ;;  %v666_v12 = vadd.f32 %v5528_v30, %v605_v35  ;;  %4756 = vst [vmem:[#allocation3 + $0x68] sm:$0xff] %v4571_v36   ;;  %v610_v56 = vmul.f32 %v4469_v50, %v5512_v44  ;;  %v669_v39 = vadd.f32 %v5528_v30, %v608_v59 }
  0x35   : > { %1673 = vmatprep.subr.bf16.mxu0 %v5274_v27  ;;  %5087 = vmatpush3.bf16.msra.mxu1 %v5147_v14  ;;  %v670_v48 = vadd.f32 %v5528_v30, %v609_v46  ;;  %4757 = vst [vmem:[#allocation3 + $0x70] sm:$0xff] %v4576_v63   ;;  %v721_v49 = vmax.f32 %v667_v16, 0.0  ;;  %v722_v58 = vmax.f32 %v668_v47, 0.0  ;;  %v611_v50 = vmul.f32 %v4470_v51, %v5512_v44 }
  0x36   : > { %v720_v13 = vmax.f32 %v666_v12, 0.0  ;;  %5080 = vmatprep.subr.bf16.mxu1 %v5152_v28  ;;  %v671_v14 = vadd.f32 %v5528_v30, %v610_v56  ;;  %v723_v62 = vmax.f32 %v669_v39, 0.0  ;;  %v576_v43 = vmul.f32 %v4401_v52, %v5512_v44  ;;  %v5159_v52 = vld [vmem:[%s7185_s1 + $0x150] ss:$12 sps:$4 sm:$0xff]  }
  0x37   : > { %v724_v61 = vmax.f32 %v670_v48, 0.0  ;;  %v4586_v51 = vpack.c.bf16 %v722_v58, %v721_v49  ;;  %v672_v57 = vadd.f32 %v5528_v30, %v611_v50  ;;  %v577_v32 = vmul.f32 %v4402_v53, %v5512_v44  ;;  %v5163_v49 = vld [vmem:[%s7185_s1 + $0x138] ss:$12 sps:$4 sm:$0xff]  }
  0x38   : > { %1674 = vmatpush1.bf16.msra.mxu0 %v5149_v37  ;;  %v4581_v41 = vpack.c.bf16 %v720_v13, %v719_v38  ;;  %v4425_v11 = vunpack.c.l.bf16 %v5360_v7  ;;  %v578_v35 = vmul.f32 %v4405_v54, %v5512_v44  ;;  %v579_v37 = vmul.f32 %v4406_v55, %v5512_v44 }
  0x39   : > { %1675 = vmatprep.subr.bf16.mxu0 %v5274_v27  ;;  %5088 = vmatpush3.bf16.msra.mxu1 %v5152_v28  ;;  %v4591_v34 = vpack.c.bf16 %v724_v61, %v723_v62  ;;  %v637_v1 = vadd.f32 %v5528_v30, %v576_v43  ;;  %4759 = vst [vmem:[#allocation3 + $0x80] sm:$0xff] %v4586_v51   ;;  %v725_v28 = vmax.f32 %v671_v14, 0.0  ;;  %v7194_v42 = vunpack.c.l.bf16 %v5329_v0 }
  0x3a   : > { %4758 = vst [vmem:[#allocation3 + $0x78] sm:$0xff] %v4581_v41   ;;  %v1058_v36 = vld [vmem:[#allocation3 + $0x60] sm:$0x1]  ;;  %2173 = vmatprep.subr.bf16.mxu1 %v5274_v27  ;;  %v638_v33 = vadd.f32 %v5528_v30, %v577_v32  ;;  %v7195_v54 = vunpack.c.h.bf16 %v5329_v0  ;;  %v639_v59 = vadd.f32 %v5528_v30, %v578_v35  ;;  %v640_v46 = vadd.f32 %v5528_v30, %v579_v37 }
  0x3b   : > { %v1112_v53 = vld [vmem:[#allocation3 + $0x5c] sm:$0xf]  ;;  %v574_v15 = vmul.f32 %v7194_v42, %v5512_v44  ;;  %v1059_v45 = vsel %vm5617_vm5, 0, %v1058_v36  ;;  %v1061_v12 = vld [vmem:[#allocation3 + $0x6c] sm:$0x1]  ;;  %4760 = vst [vmem:[#allocation3 + $0x88] sm:$0xff] %v4591_v34   ;;  %v7196_v43 = vunpack.c.l.bf16 %v5396_v19  ;;  %v7199_v36 = vunpack.c.h.bf16 %v5399_v20 }
  0x3c   : > { %1676 = vmatpush2.bf16.msra.mxu0 %v5155_v17  ;;  %v575_v2 = vmul.f32 %v7195_v54, %v5512_v44  ;;  %v1113_v55 = vsel %vm5608_vm4, 0, %v1112_v53  ;;  %1060 = vst [vmem:[#allocation3 + $0x60] sm:$0x1] %v1059_v45  ;;  %v1062_v0 = vsel %vm5617_vm5, 0, %v1061_v12  ;;  %v1115_v63 = vld [vmem:[#allocation3 + $0x68] sm:$0xf] }
  0x3d   : > { %1677 = vmatprep.subr.bf16.mxu0 %v5274_v27  ;;  %1114 = vst [vmem:[#allocation3 + $0x5c] sm:$0xf] %v1113_v55  ;;  %v726_v16 = vmax.f32 %v672_v57, 0.0  ;;  %v691_v47 = vmax.f32 %v637_v1, 0.0  ;;  %v692_v56 = vmax.f32 %v638_v33, 0.0  ;;  %v1116_v38 = vsel %vm5608_vm4, 0, %v1115_v63 }
  0x3e   : > { %1063 = vst [vmem:[#allocation3 + $0x6c] sm:$0x1] %v1062_v0  ;;  %v1118_v13 = vld [vmem:[#allocation3 + $0x74] sm:$0xf]  ;;  %v693_v39 = vmax.f32 %v639_v59, 0.0  ;;  %v635_v48 = vadd.f32 %v5528_v30, %v574_v15  ;;  %v636_v17 = vadd.f32 %v5528_v30, %v575_v2  ;;  %v694_v14 = vmax.f32 %v640_v46, 0.0 }
  0x3f   : > { %1117 = vst [vmem:[#allocation3 + $0x68] sm:$0xf] %v1116_v38  ;;  %v1119_v58 = vsel %vm5608_vm4, 0, %v1118_v13  ;;  %v4596_v50 = vpack.c.bf16 %v726_v16, %v725_v28  ;;  %v4511_v41 = vpack.c.bf16 %v692_v56, %v691_v47  ;;  %v612_v51 = vmul.f32 %v7196_v43, %v5512_v44  ;;  %v5671_v34 = vld [vmem:[#allocation3 + $0x64] sm:$0xf] }
  0x40   : > { %1678 = vmatpush2.bf16.msra.mxu0 %v5159_v52  ;;  %1120 = vst [vmem:[#allocation3 + $0x74] sm:$0xf] %v1119_v58  ;;  %v689_v62 = vmax.f32 %v635_v48, 0.0  ;;  %v690_v61 = vmax.f32 %v636_v17, 0.0  ;;  %v7197_v57 = vunpack.c.h.bf16 %v5396_v19  ;;  %v5669_v52 = vld [vmem:[#allocation3 + $0x58] sm:$0xf]  ;;  %v4516_v37 = vpack.c.bf16 %v694_v14, %v693_v39 }
  0x41   : > { %1679 = vmatprep.subr.bf16.mxu0 %v5274_v27  ;;  %v1064_v35 = vld [vmem:[#allocation3 + $0x78] sm:$0x1]  ;;  %4761 = vst [vmem:[#allocation3 + $0x90] sm:$0xff] %v4596_v50   ;;  %4744 = vst [vmem:[#allocation3 + $0x8] sm:$0xff] %v4511_v41   ;;  %v7198_v1 = vunpack.c.l.bf16 %v5399_v20  ;;  %v615_v28 = vmul.f32 %v7199_v36, %v5512_v44  ;;  %v7200_v19 = vunpack.c.l.bf16 %v5348_v3  ;;  %v1067_v15 = vld [vmem:[#allocation3 + $0x84] sm:$0x1]  ;;  %v673_v55 = vadd.f32 %v5528_v30, %v612_v51 }
  0x42   : > { %v613_v32 = vmul.f32 %v7197_v57, %v5512_v44  ;;  %v1065_v42 = vsel %vm5617_vm5, 0, %v1064_v35  ;;  %v1121_v54 = vld [vmem:[#allocation3 + $0x80] sm:$0xf]  ;;  %v4506_v2 = vpack.c.bf16 %v690_v61, %v689_v62  ;;  %v5116_v12 = vld [vmem:[%s7185_s1 + $0xac] ss:$12 sps:$4 sm:$0xff]   ;;  %v1068_v59 = vsel %vm5617_vm5, 0, %v1067_v15 }
  0x43   : > { %v614_v53 = vmul.f32 %v7198_v1, %v5512_v44  ;;  %v580_v33 = vmul.f32 %v7200_v19, %v5512_v44  ;;  %v5167_v20 = vld [vmem:[%s7185_s1 + $0x120] ss:$12 sps:$4 sm:$0xff]   ;;  %1066 = vst [vmem:[#allocation3 + $0x78] sm:$0x1] %v1065_v42  ;;  %v1122_v46 = vsel %vm5608_vm4, 0, %v1121_v54  ;;  %4745 = vst [vmem:[#allocation3 + $0x10] sm:$0xff] %v4516_v37   ;;  %v676_v16 = vadd.f32 %v5528_v30, %v615_v28 }
  0x44   : > { %v674_v45 = vadd.f32 %v5528_v30, %v613_v32  ;;  %1680 = vmatpush2.bf16.msra.mxu0 %v5163_v49  ;;  %v1124_v0 = vld [vmem:[#allocation3 + $0x8c] sm:$0xf]  ;;  %v5698_v47 = vld [vmem:[#allocation3 + $0x5c] sm:$0xf]  ;;  %v5700_v56 = vld [vmem:[#allocation3 + $0x60] sm:$0xf]  ;;  %v7201_v39 = vunpack.c.h.bf16 %v5348_v3  ;;  %v7202_v51 = vunpack.c.l.bf16 %v5402_v21  ;;  %v4426_v32 = vunpack.c.h.bf16 %v5360_v7 }
  0x45   : > { %v675_v63 = vadd.f32 %v5528_v30, %v614_v53  ;;  %1681 = vmatprep.subr.bf16.mxu0 %v5274_v27  ;;  %1069 = vst [vmem:[#allocation3 + $0x84] sm:$0x1] %v1068_v59  ;;  %1123 = vst [vmem:[#allocation3 + $0x80] sm:$0xf] %v1122_v46  ;;  %v1125_v38 = vsel %vm5608_vm4, 0, %v1124_v0  ;;  %v727_v13 = vmax.f32 %v673_v55, 0.0  ;;  %v641_v17 = vadd.f32 %v5528_v30, %v580_v33 }
  0x46   : > { %4507 = vst [vmem:[#allocation3] sm:$0xff] %v4506_v2   ;;  %v581_v48 = vmul.f32 %v7201_v39, %v5512_v44  ;;  %v5711_v49 = vcombine.low %v5669_v52, %v5698_v47  ;;  %v5715_v58 = vcombine.low %v5700_v56, %v5671_v34  ;;  %v5717_v50 = vld [vmem:[#allocation3 + $0x6c] sm:$0xf]  ;;  %v5171_v14 = vld [vmem:[%s7185_s1 + $0x108] ss:$12 sps:$4 sm:$0xff]   ;;  %v728_v3 = vmax.f32 %v674_v45, 0.0 }
  0x47   : > { %1126 = vst [vmem:[#allocation3 + $0x8c] sm:$0xf] %v1125_v38  ;;  %1149 = vst [vmem:[#allocation3 + $0x4] sm:$0xf] %v5274_v27  ;;  %v729_v41 = vmax.f32 %v675_v63, 0.0  ;;  %v730_v61 = vmax.f32 %v676_v16, 0.0  ;;  %v616_v57 = vmul.f32 %v7202_v51, %v5512_v44  ;;  %v7203_v28 = vunpack.c.h.bf16 %v5402_v21 }
  0x48   : > { %v5723_v62 = vld [vmem:[#allocation3 + $0x68] sm:$0xf]  ;;  %v642_v43 = vadd.f32 %v5528_v30, %v581_v48  ;;  %v5121_v35 = vld [vmem:[%s7185_s1 + $0x94] ss:$12 sps:$4 sm:$0xff]   ;;  %4913 = vmatprep.mubr.bf16.mxu1 %v5711_v49  ;;  %v5738_v1 = vld [vmem:[#allocation3 + $0x70] sm:$0xf]  ;;  %1682 = vmatpush2.bf16.msra.mxu0 %v5167_v20  ;;  %v4601_v53 = vpack.c.bf16 %v728_v3, %v727_v13  ;;  %v7204_v38 = vunpack.c.l.bf16 %v5405_v22  ;;  %v7205_v39 = vunpack.c.h.bf16 %v5405_v22 }
  0x49   : > { %v5736_v37 = vcombine.low %v5723_v62, %v5717_v50  ;;  %v695_v36 = vmax.f32 %v641_v17, 0.0  ;;  %v617_v19 = vmul.f32 %v7203_v28, %v5512_v44  ;;  %4914 = vmatmul.mubr.bf16.vlgmr.msra.gmra.mxu1 %v5715_v58  ;;  %1683 = vmatprep.subr.bf16.mxu0 %v5274_v27  ;;  %v5745_v33 = vld [vmem:[#allocation3 + $0x7c] sm:$0xf]  ;;  %v1070_v42 = vld [vmem:[#allocation3 + $0x90] sm:$0x1]  ;;  %v4606_v54 = vpack.c.bf16 %v730_v61, %v729_v41 }
  0x4a   : > { %v1037_v15 = vld [vmem:[#allocation3 + $0xc] sm:$0x1]  ;;  %v677_v2 = vadd.f32 %v5528_v30, %v616_v57  ;;  %2174 = vmatpush1.bf16.msra.mxu1 %v5116_v12  ;;  %v5751_v21 = vld [vmem:[#allocation3 + $0x74] sm:$0xf]  ;;  %v1071_v20 = vsel %vm5617_vm5, 0, %v1070_v42  ;;  %4762 = vst [vmem:[#allocation3 + $0x98] sm:$0xff] %v4601_v53   ;;  %v618_v13 = vmul.f32 %v7204_v38, %v5512_v44  ;;  %v619_v48 = vmul.f32 %v7205_v39, %v5512_v44 }
  0x4b   : > { %4917 = vmatprep.mubr.bf16.mxu1 %v5736_v37  ;;  %v1038_v59 = vsel %vm5617_vm5, 0, %v1037_v15  ;;  %v696_v46 = vmax.f32 %v642_v43, 0.0  ;;  %v678_v0 = vadd.f32 %v5528_v30, %v617_v19  ;;  %2175 = vmatprep.subr.bf16.mxu1 %v5274_v27  ;;  %v5759_v63 = vld [vmem:[#allocation3 + $0x78] sm:$0xf]  ;;  %1072 = vst [vmem:[#allocation3 + $0x90] sm:$0x1] %v1071_v20  ;;  %v7206_v17 = vunpack.c.l.bf16 %v5351_v4 }
  0x4c   : > { %1039 = vst [vmem:[#allocation3 + $0xc] sm:$0x1] %v1038_v59  ;;  %4763 = vst [vmem:[#allocation3 + $0xa0] sm:$0xff] %v4606_v54   ;;  %v1094_v12 = vld [vmem:[#allocation3 + $0x14] sm:$0xf]  ;;  %v7207_v41 = vunpack.c.h.bf16 %v5351_v4  ;;  %1684 = vmatpush2.bf16.msra.mxu0 %v5171_v14  ;;  %v7208_v53 = vunpack.c.l.bf16 %v5408_v23  ;;  %v7209_v28 = vunpack.c.h.bf16 %v5408_v23  ;;  %v5788_v14 = vcombine.low %v5738_v1, %v5751_v21 }
  0x4d   : > { %v1091_v16 = vld [vmem:[#allocation3 + $0x8] sm:$0xf]  ;;  %v582_v3 = vmul.f32 %v7206_v17, %v5512_v44  ;;  %v5175_v43 = vld [vmem:[%s7185_s1 + $0xf0] ss:$12 sps:$4 sm:$0xff]   ;;  %v1034_v51 = vld [vmem:[#allocation3] sm:$0x1]  ;;  %v4521_v57 = vpack.c.bf16 %v696_v46, %v695_v36  ;;  %1685 = vmatprep.subr.bf16.mxu0 %v5274_v27  ;;  %v679_v23 = vadd.f32 %v5528_v30, %v618_v13  ;;  %v5798_v54 = vcombine.low %v5759_v63, %v5745_v33 }
  0x4e   : > { %v583_v61 = vmul.f32 %v7207_v41, %v5512_v44  ;;  %v620_v22 = vmul.f32 %v7208_v53, %v5512_v44  ;;  %v621_v19 = vmul.f32 %v7209_v28, %v5512_v44  ;;  %v5126_v4 = vld [vmem:[%s7185_s1 + $0x7c] ss:$12 sps:$4 sm:$0xff]   ;;  %v1035_v36 = vsel %vm5617_vm5, 0, %v1034_v51  ;;  %2176 = vmatpush1.bf16.msra.mxu1 %v5121_v35  ;;  %v5800_v20 = vld [vmem:[#allocation3 + $0x80] sm:$0xf] }
  0x4f   : > { %v1095_v15 = vsel %vm5608_vm4, 0, %v1094_v12  ;;  %v5179_v59 = vld [vmem:[%s7185_s1 + $0xd8] ss:$12 sps:$4 sm:$0xff]   ;;  %v5805_v46 = vld [vmem:[#allocation3 + $0x10] sm:$0xf]  ;;  %4746 = vst [vmem:[#allocation3 + $0x18] sm:$0xff] %v4521_v57   ;;  %2177 = vmatprep.subr.bf16.mxu1 %v5274_v27  ;;  %v680_v39 = vadd.f32 %v5528_v30, %v619_v48  ;;  %v643_v41 = vadd.f32 %v5528_v30, %v582_v3  ;;  %v7210_v48 = vunpack.c.l.bf16 %v5411_v24 }
  0x50   : > { %1036 = vst [vmem:[#allocation3] sm:$0x1] %v1035_v36  ;;  %1096 = vst [vmem:[#allocation3 + $0x14] sm:$0xf] %v1095_v15  ;;  %v1092_v12 = vsel %vm5608_vm4, 0, %v1091_v16  ;;  %v731_v38 = vmax.f32 %v677_v2, 0.0  ;;  %v644_v51 = vadd.f32 %v5528_v30, %v583_v61  ;;  %1686 = vmatpush2.bf16.msra.mxu0 %v5175_v43  ;;  %v682_v57 = vadd.f32 %v5528_v30, %v621_v19 }
  0x51   : > { %v732_v35 = vmax.f32 %v678_v0, 0.0  ;;  %v5810_v13 = vld [vmem:[#allocation3 + $0x84] sm:$0xf]  ;;  %1148 = vst [vmem:[#allocation3] sm:$0xf] %v5274_v27  ;;  %v733_v17 = vmax.f32 %v679_v23, 0.0  ;;  %v681_v0 = vadd.f32 %v5528_v30, %v620_v22  ;;  %v622_v53 = vmul.f32 %v7210_v48, %v5512_v44  ;;  %4918 = vmatmul.mubr.bf16.gmra.mxu1 %v5788_v14  ;;  %1687 = vmatprep.subr.bf16.mxu0 %v5274_v27 }
  0x52   : > { %1093 = vst [vmem:[#allocation3 + $0x8] sm:$0xf] %v1092_v12  ;;  %v5131_v16 = vld [vmem:[%s7185_s1 + $0x64] ss:$12 sps:$4 sm:$0xff]   ;;  %v1073_v3 = vld [vmem:[#allocation3 + $0x9c] sm:$0x1]  ;;  %v7211_v43 = vunpack.c.h.bf16 %v5411_v24  ;;  %v7212_v22 = vunpack.c.l.bf16 %v5354_v5  ;;  %2178 = vmatpush1.bf16.msra.mxu1 %v5126_v4  ;;  %4921 = vmatprep.mubr.bf16.mxu1 %v5798_v54  ;;  %v5849_v4 = vcombine.low %v5800_v20, %v5810_v13 }
  0x53   : > { %1150 = vst [vmem:[#allocation3 + $0x8] sm:$0xf] %v5274_v27  ;;  %v4611_v2 = vpack.c.bf16 %v732_v35, %v731_v38  ;;  %v1127_v61 = vld [vmem:[#allocation3 + $0x98] sm:$0xf]  ;;  %v734_v28 = vmax.f32 %v680_v39, 0.0  ;;  %v697_v36 = vmax.f32 %v643_v41, 0.0  ;;  %v683_v24 = vadd.f32 %v5528_v30, %v622_v53  ;;  %2179 = vmatprep.subr.bf16.mxu1 %v5274_v27 }
  0x54   : > { %v623_v15 = vmul.f32 %v7211_v43, %v5512_v44  ;;  %v584_v19 = vmul.f32 %v7212_v22, %v5512_v44  ;;  %v5834_v23 = vld [vmem:[#allocation3 + $0x88] sm:$0xf]  ;;  %v5836_v12 = vld [vmem:[#allocation3 + $0xc] sm:$0xf]  ;;  %v1074_v38 = vsel %vm5617_vm5, 0, %v1073_v3  ;;  %v1128_v35 = vsel %vm5608_vm4, 0, %v1127_v61  ;;  %1688 = vmatpush2.bf16.msra.mxu0 %v5179_v59 }
  0x55   : > { %4764 = vst [vmem:[#allocation3 + $0xa8] sm:$0xff] %v4611_v2   ;;  %v7213_v39 = vunpack.c.h.bf16 %v5354_v5  ;;  %v5851_v48 = vld [vmem:[#allocation3 + $0x8c] sm:$0xf]  ;;  %v5855_v3 = vcombine.low %v5836_v12, %v5805_v46  ;;  %1075 = vst [vmem:[#allocation3 + $0x9c] sm:$0x1] %v1074_v38  ;;  %v4616_v53 = vpack.c.bf16 %v734_v28, %v733_v17  ;;  %v698_v61 = vmax.f32 %v644_v51, 0.0  ;;  %1689 = vmatprep.subr.bf16.mxu0 %v5274_v27 }
  0x56   : > { %1129 = vst [vmem:[#allocation3 + $0x98] sm:$0xf] %v1128_v35  ;;  %v1130_v2 = vld [vmem:[#allocation3 + $0xa4] sm:$0xf]  ;;  %v5183_v5 = vld [vmem:[%s7185_s1 + $0xc0] ss:$12 sps:$4 sm:$0xff]   ;;  %v684_v42 = vadd.f32 %v5528_v30, %v623_v15  ;;  %v645_v51 = vadd.f32 %v5528_v30, %v584_v19  ;;  %2180 = vmatpush1.bf16.msra.mxu1 %v5131_v16  ;;  %v5877_v15 = vcombine.low %v5834_v23, %v5851_v48  ;;  %v7214_v16 = vunpack.c.l.bf16 %v5414_v25 }
  0x57   : > { %v585_v41 = vmul.f32 %v7213_v39, %v5512_v44  ;;  %v1131_v43 = vsel %vm5608_vm4, 0, %v1130_v2  ;;  %v735_v22 = vmax.f32 %v681_v0, 0.0  ;;  %v736_v39 = vmax.f32 %v682_v57, 0.0  ;;  %v5863_v45 = vld [vmem:[#allocation3 + $0x90] sm:$0xf]  ;;  %1691 = vmatprep.mubr.bf16.mxu0 %v5855_v3  ;;  %4765 = vst [vmem:[#allocation3 + $0xb0] sm:$0xff] %v4616_v53   ;;  %2181 = vmatprep.subr.bf16.mxu1 %v5274_v27 }
  0x58   : > { %v5865_v55 = vld [vmem:[#allocation3 + $0x94] sm:$0xf]  ;;  %1132 = vst [vmem:[#allocation3 + $0xa4] sm:$0xf] %v1131_v43  ;;  %v1040_v59 = vld [vmem:[#allocation3 + $0x18] sm:$0x1]  ;;  %v4526_v17 = vpack.c.bf16 %v698_v61, %v697_v36  ;;  %v624_v61 = vmul.f32 %v7214_v16, %v5512_v44  ;;  %1690 = vmatpush2.bf16.msra.mxu0 %v5183_v5 }
  0x59   : > { %v646_v28 = vadd.f32 %v5528_v30, %v585_v41  ;;  %v5136_v57 = vld [vmem:[%s7185_s1 + $0x4c] ss:$12 sps:$4 sm:$0xff]   ;;  %v1041_v38 = vsel %vm5617_vm5, 0, %v1040_v59  ;;  %v4621_v35 = vpack.c.bf16 %v736_v39, %v735_v22  ;;  %v737_v36 = vmax.f32 %v683_v24, 0.0  ;;  %v5882_v19 = vld [vmem:[#allocation3] sm:$0xff]   ;;  %4922 = vmatmul.mubr.bf16.gmra.mxu1 %v5849_v4  ;;  %4881 = vmatprep.subr.bf16.mxu0 %v5426_v29 }
  0x5a   : > { %1042 = vst [vmem:[#allocation3 + $0x18] sm:$0x1] %v1041_v38  ;;  %4747 = vst [vmem:[#allocation3 + $0x20] sm:$0xff] %v4526_v17   ;;  %v738_v41 = vmax.f32 %v684_v42, 0.0  ;;  %v699_v2 = vmax.f32 %v645_v51, 0.0  ;;  %v5889_v43 = vcombine.low %v5863_v45, %v5865_v55  ;;  %v7215_v24 = vunpack.c.h.bf16 %v5414_v25  ;;  %2182 = vmatpush1.bf16.msra.mxu1 %v5136_v57  ;;  %4925 = vmatprep.mubr.bf16.mxu1 %v5877_v15 }
  0x5b   : > { %v700_v53 = vmax.f32 %v646_v28, 0.0  ;;  %4766 = vst [vmem:[#allocation3 + $0xb8] sm:$0xff] %v4621_v35   ;;  %v7216_v39 = vunpack.c.l.bf16 %v5417_v26  ;;  %v7217_v59 = vunpack.c.h.bf16 %v5417_v26  ;;  %v5141_v51 = vld [vmem:[%s7185_s1 + $0x34] ss:$12 sps:$4 sm:$0xff]   ;;  %v685_v38 = vadd.f32 %v5528_v30, %v624_v61  ;;  %2183 = vmatprep.subr.bf16.mxu1 %v5274_v27  ;;  %1692 = vmatmul.mubr.bf16.vlgmr.msra.gmra.mxu0 %v5882_v19 }
  0x5c   : > { %v625_v22 = vmul.f32 %v7215_v24, %v5512_v44  ;;  %v1076_v5 = vld [vmem:[#allocation3 + $0xa8] sm:$0x1]  ;;  %v4626_v28 = vpack.c.bf16 %v738_v41, %v737_v36  ;;  %v5910_v16 = vld [vmem:[#allocation3 + $0x9c] sm:$0xf]  ;;  %v5912_v24 = vld [vmem:[#allocation3 + $0x14] sm:$0xf]  ;;  %4882 = vmatpush3.bf16.msra.mxu0 %v5426_v29 }
  0x5d   : > { %v626_v42 = vmul.f32 %v7216_v39, %v5512_v44  ;;  %v627_v17 = vmul.f32 %v7217_v59, %v5512_v44  ;;  %v4531_v25 = vpack.c.bf16 %v700_v53, %v699_v2  ;;  %v5908_v26 = vld [vmem:[#allocation3 + $0x98] sm:$0xf]  ;;  %v1077_v39 = vsel %vm5617_vm5, 0, %v1076_v5  ;;  %v1157_v2 = vld [vmem:[#allocation3 + $0x8] sm:$0xf]  ;;  %4883 = vmatprep.subr.bf16.mxu0 %v5436_v31 }
  0x5e   : > { %v686_v59 = vadd.f32 %v5528_v30, %v625_v22  ;;  %v5927_v57 = vcombine.low %v5908_v26, %v5910_v16  ;;  %1078 = vst [vmem:[#allocation3 + $0xa8] sm:$0x1] %v1077_v39  ;;  %4767 = vst [vmem:[#allocation3 + $0xc0] sm:$0xff] %v4626_v28   ;;  %v7218_v53 = vunpack.c.l.bf16 %v5357_v6  ;;  %v587_v22 = vmul.f32 %v4422_v60, %v5512_v44  ;;  %v1079_v5 = vld [vmem:[#allocation3 + $0xb4] sm:$0x1] }
  0x5f   : > { %v5918_v36 = vadd.f32 %v5528_v30, %v626_v42  ;;  %v5921_v41 = vadd.f32 %v5528_v30, %v627_v17  ;;  %4748 = vst [vmem:[#allocation3 + $0x28] sm:$0xff] %v4531_v25   ;;  %v5146_v17 = vld [vmem:[%s7185_s1 + $0x1c] ss:$12 sps:$4 sm:$0xff]   ;;  %v1133_v39 = vld [vmem:[#allocation3 + $0xb0] sm:$0xf]  ;;  %v739_v28 = vmax.f32 %v685_v38, 0.0  ;;  %v588_v25 = vmul.f32 %v4425_v11, %v5512_v44  ;;  %2184 = vmatpush1.bf16.msra.mxu1 %v5141_v51 }
  0x60   : > { %v586_v61 = vmul.f32 %v7218_v53, %v5512_v44  ;;  %v589_v6 = vmul.f32 %v4426_v32, %v5512_v44  ;;  %v7219_v60 = vunpack.c.l.bf16 %v5363_v8  ;;  %v1080_v42 = vsel %vm5617_vm5, 0, %v1079_v5  ;;  %v5957_v7 = vld [vmem:[#allocation3 + $0xa0] sm:$0xf]  ;;  %2185 = vmatprep.subr.bf16.mxu1 %v5274_v27 }
  0x61   : > { %v1134_v29 = vsel %vm5608_vm4, 0, %v1133_v39  ;;  %v740_v38 = vmax.f32 %v686_v59, 0.0  ;;  %v7220_v11 = vunpack.c.h.bf16 %v5363_v8  ;;  %v5959_v32 = vld [vmem:[#allocation3 + $0x18] sm:$0xf]  ;;  %1081 = vst [vmem:[#allocation3 + $0xb4] sm:$0x1] %v1080_v42  ;;  %v648_v39 = vadd.f32 %v5528_v30, %v587_v22  ;;  %4926 = vmatmul.mubr.bf16.gmra.mxu1 %v5889_v43 }
  0x62   : > { %v590_v53 = vmul.f32 %v7219_v60, %v5512_v44  ;;  %1135 = vst [vmem:[#allocation3 + $0xb0] sm:$0xf] %v1134_v29  ;;  %v1097_v60 = vld [vmem:[#allocation3 + $0x20] sm:$0xf]  ;;  %v1043_v0 = vld [vmem:[#allocation3 + $0x24] sm:$0x1]  ;;  %v647_v5 = vadd.f32 %v5528_v30, %v586_v61  ;;  %v649_v31 = vadd.f32 %v5528_v30, %v588_v25  ;;  %v650_v59 = vadd.f32 %v5528_v30, %v589_v6 }
  0x63   : > { %v591_v35 = vmul.f32 %v7220_v11, %v5512_v44  ;;  %v5966_v8 = vld [vmem:[#allocation3 + $0xa4] sm:$0xf]  ;;  %v5970_v51 = vcombine.low %v5912_v24, %v5959_v32  ;;  %v5973_v42 = vcombine.low %v1157_v2, %v5836_v12  ;;  %v1098_v61 = vsel %vm5608_vm4, 0, %v1097_v60  ;;  %v1136_v29 = vld [vmem:[#allocation3 + $0xbc] sm:$0xf]  ;;  %2186 = vmatpush1.bf16.msra.mxu1 %v5146_v17  ;;  %4929 = vmatprep.mubr.bf16.mxu1 %v5927_v57 }
  0x64   : > { %v1044_v22 = vsel %vm5617_vm5, 0, %v1043_v0  ;;  %1099 = vst [vmem:[#allocation3 + $0x20] sm:$0xf] %v1098_v61  ;;  %v1137_v25 = vsel %vm5608_vm4, 0, %v1136_v29  ;;  %v4631_v6 = vpack.c.bf16 %v740_v38, %v739_v28  ;;  %v5239_v11 = vld [vmem:[%s7185_s1 + $0x210] ss:$12 sps:$4 sm:$0xff]   ;;  %2187 = vmatprep.subr.bf16.mxu1 %v5274_v27 }
  0x65   : > { %1045 = vst [vmem:[#allocation3 + $0x24] sm:$0x1] %v1044_v22  ;;  %4884 = vmatpush3.bf16.msra.mxu0 %v5239_v11  ;;  %v741_v12 = vmax.f32 %v5918_v36, 0.0  ;;  %v742_v2 = vmax.f32 %v5921_v41, 0.0  ;;  %1699 = vmatprep.mubr.bf16.mxu0 %v5970_v51  ;;  %1138 = vst [vmem:[#allocation3 + $0xbc] sm:$0xf] %v1137_v25  ;;  %v651_v22 = vadd.f32 %v5528_v30, %v590_v53 }
  0x66   : > { %v701_v0 = vmax.f32 %v647_v5, 0.0  ;;  %v702_v60 = vmax.f32 %v648_v39, 0.0  ;;  %v703_v61 = vmax.f32 %v649_v31, 0.0  ;;  %v704_v29 = vmax.f32 %v650_v59, 0.0  ;;  %v5151_v28 = vld [vmem:[%s7185_s1 + $0x4] ss:$12 sps:$4 sm:$0xff]   ;;  %1700 = vmatmul.mubr.bf16.gmra.mxu0 %v5973_v42 }
  0x67   : > { %v5992_v38 = vld [vmem:[#allocation3 + $0xac] sm:$0xf]  ;;  %v1082_v36 = vld [vmem:[#allocation3 + $0xc0] sm:$0x1]  ;;  %4768 = vst [vmem:[#allocation3 + $0xc8] sm:$0xff] %v4631_v6   ;;  %v4636_v41 = vpack.c.bf16 %v742_v2, %v741_v12  ;;  %v652_v25 = vadd.f32 %v5528_v30, %v591_v35  ;;  %v5999_v5 = vcombine.low %v5957_v7, %v5966_v8  ;;  %v705_v11 = vmax.f32 %v651_v22, 0.0  ;;  %2188 = vmatpush1.bf16.msra.mxu1 %v5151_v28 }
  0x68   : > { %v6002_v17 = vld [vmem:[#allocation3 + $0xa8] sm:$0xf]  ;;  %v1083_v39 = vsel %vm5617_vm5, 0, %v1082_v36  ;;  %v4536_v31 = vpack.c.bf16 %v702_v60, %v701_v0  ;;  %v1100_v59 = vld [vmem:[#allocation3 + $0x2c] sm:$0xf]  ;;  %v4541_v6 = vpack.c.bf16 %v704_v29, %v703_v61  ;;  %v7221_v0 = vunpack.c.l.bf16 %v5366_v9  ;;  %2189 = vmatprep.subr.bf16.mxu1 %v5274_v27 }
  0x69   : > { %v5157_v35 = vld [vmem:[%s7185_s1 + $0x16c] ss:$12 sps:$4 sm:$0xff]   ;;  %1084 = vst [vmem:[#allocation3 + $0xc0] sm:$0x1] %v1083_v39  ;;  %4769 = vst [vmem:[#allocation3 + $0xd0] sm:$0xff] %v4636_v41   ;;  %v1101_v53 = vsel %vm5608_vm4, 0, %v1100_v59  ;;  %v7222_v36 = vunpack.c.h.bf16 %v5366_v9  ;;  %v7223_v22 = vunpack.c.l.bf16 %v5369_v10  ;;  %v7224_v39 = vunpack.c.h.bf16 %v5369_v10  ;;  %4930 = vmatmul.mubr.bf16.gmra.mxu1 %v5999_v5 }
  0x6a   : > { %v706_v12 = vmax.f32 %v652_v25, 0.0  ;;  %v5240_v2 = vld [vmem:[%s7185_s1 + $0x1f8] ss:$12 sps:$4 sm:$0xff]   ;;  %v592_v60 = vmul.f32 %v7221_v0, %v5512_v44  ;;  %v6017_v61 = vld [vmem:[#allocation3 + $0x1c] sm:$0xf]  ;;  %4749 = vst [vmem:[#allocation3 + $0x30] sm:$0xff] %v4536_v31   ;;  %v6033_v0 = vcombine.low %v5698_v47, %v5700_v56  ;;  %v6037_v31 = vcombine.low %v6002_v17, %v5992_v38 }
  0x6b   : > { %4885 = vmatprep.subr.bf16.mxu0 %v5240_v2  ;;  %v6019_v29 = vld [vmem:[#allocation3 + $0x28] sm:$0xf]  ;;  %1153 = vst [vmem:[#allocation3 + $0xd0] sm:$0xf] %v5274_v27  ;;  %1102 = vst [vmem:[#allocation3 + $0x2c] sm:$0xf] %v1101_v53  ;;  %v593_v41 = vmul.f32 %v7222_v36, %v5512_v44  ;;  %v594_v25 = vmul.f32 %v7223_v22, %v5512_v44  ;;  %v595_v59 = vmul.f32 %v7224_v39, %v5512_v44 }
  0x6c   : > { %4750 = vst [vmem:[#allocation3 + $0x38] sm:$0xff] %v4541_v6   ;;  %4886 = vmatpush3.bf16.msra.mxu0 %v5240_v2  ;;  %v4546_v6 = vpack.c.bf16 %v706_v12, %v705_v11  ;;  %v653_v9 = vadd.f32 %v5528_v30, %v592_v60  ;;  %v5241_v53 = vld [vmem:[%s7185_s1 + $0x1e0] ss:$12 sps:$4 sm:$0xff]   ;;  %v6046_v44 = vld [vmem:[#allocation3 + $0x24] sm:$0xf]  ;;  %v6053_v11 = vcombine.low %v5671_v34, %v5723_v62 }
  0x6d   : > { %4887 = vmatprep.subr.bf16.mxu0 %v5241_v53  ;;  %v6044_v10 = vld [vmem:[#allocation3 + $0x20] sm:$0xf]  ;;  %v654_v47 = vadd.f32 %v5528_v30, %v593_v41  ;;  %v655_v56 = vadd.f32 %v5528_v30, %v594_v25  ;;  %v656_v28 = vadd.f32 %v5528_v30, %v595_v59  ;;  %v6058_v2 = vld [vmem:[#allocation3 + $0xb0] sm:$0xf]  ;;  %v6066_v36 = vcombine.low %v5805_v46, %v5912_v24  ;;  %v6069_v34 = vld [vmem:[#allocation3 + $0xb8] sm:$0xf] }
  0x6e   : > { %v5161_v12 = vld [vmem:[%s7185_s1 + $0x154] ss:$12 sps:$4 sm:$0xff]   ;;  %v6062_v60 = vcombine.low %v6017_v61, %v6044_v10  ;;  %4751 = vst [vmem:[#allocation3 + $0x40] sm:$0xff] %v4546_v6   ;;  %v707_v30 = vmax.f32 %v653_v9, 0.0  ;;  %v6073_v62 = vcombine.low %v6046_v44, %v6019_v29  ;;  %v1085_v41 = vld [vmem:[#allocation3 + $0xcc] sm:$0x1]  ;;  %v6077_v59 = vcombine.low %v5717_v50, %v5738_v1  ;;  %2190 = vmatpush2.bf16.msra.mxu1 %v5157_v35 }
  0x6f   : > { %v1139_v22 = vld [vmem:[#allocation3 + $0xc8] sm:$0xf]  ;;  %v708_v25 = vmax.f32 %v654_v47, 0.0  ;;  %v709_v39 = vmax.f32 %v655_v56, 0.0  ;;  %4933 = vmatprep.mubr.bf16.mxu1 %v6037_v31  ;;  %v6080_v46 = vld [vmem:[#allocation3 + $0xb4] sm:$0xf]  ;;  %v6088_v47 = vcombine.low %v5751_v21, %v5759_v63  ;;  %2191 = vmatprep.subr.bf16.mxu1 %v5274_v27  ;;  %v6100_v56 = vcombine.low %v5810_v13, %v5834_v23 }
  0x70   : > { %4888 = vmatpush3.bf16.msra.mxu0 %v5241_v53  ;;  %v1086_v24 = vsel %vm5617_vm5, 0, %v1085_v41  ;;  %v1140_v6 = vsel %vm5608_vm4, 0, %v1139_v22  ;;  %v710_v9 = vmax.f32 %v656_v28, 0.0  ;;  %1706 = vmatprep.mubr.bf16.mxu0 %v6062_v60  ;;  %v6092_v50 = vld [vmem:[#allocation3 + $0xbc] sm:$0xf]  ;;  %v6096_v53 = vcombine.low %v5745_v33, %v5800_v20 }
  0x71   : > { %1087 = vst [vmem:[#allocation3 + $0xcc] sm:$0x1] %v1086_v24  ;;  %1141 = vst [vmem:[#allocation3 + $0xc8] sm:$0xf] %v1140_v6  ;;  %v1142_v1 = vld [vmem:[#allocation3 + $0xd4] sm:$0xf]  ;;  %v4551_v35 = vpack.c.bf16 %v708_v25, %v707_v30  ;;  %1707 = vmatmul.mubr.bf16.gmra.mxu0 %v6066_v36  ;;  %v6111_v33 = vcombine.low %v5851_v48, %v5863_v45  ;;  %v6115_v20 = vcombine.low %v6058_v2, %v6080_v46 }
  0x72   : > { %1152 = vst [vmem:[#allocation3 + $0xcc] sm:$0xf] %v5274_v27  ;;  %v1143_v21 = vsel %vm5608_vm4, 0, %v1142_v1  ;;  %v1046_v63 = vld [vmem:[#allocation3 + $0x30] sm:$0x1]  ;;  %v4556_v28 = vpack.c.bf16 %v710_v9, %v709_v39  ;;  %1713 = vmatprep.mubr.bf16.mxu0 %v6073_v62  ;;  %v6122_v41 = vcombine.low %v5865_v55, %v5908_v26  ;;  %2192 = vmatpush2.bf16.msra.mxu1 %v5161_v12 }
  0x73   : > { %v5242_v30 = vld [vmem:[%s7185_s1 + $0x1c8] ss:$12 sps:$4 sm:$0xff]   ;;  %1144 = vst [vmem:[#allocation3 + $0xd4] sm:$0xf] %v1143_v21  ;;  %v1047_v13 = vsel %vm5617_vm5, 0, %v1046_v63  ;;  %4752 = vst [vmem:[#allocation3 + $0x48] sm:$0xff] %v4551_v35   ;;  %v6129_v48 = vcombine.low %v6069_v34, %v6092_v50  ;;  %2193 = vmatprep.subr.bf16.mxu1 %v5274_v27  ;;  %v6145_v24 = vcombine.low %v5959_v32, %v6017_v61  ;;  %4934 = vmatmul.mubr.bf16.gmra.mxu1 %v6115_v20 }
  0x74   : > { %4889 = vmatprep.subr.bf16.mxu0 %v5242_v30  ;;  %v1103_v23 = vld [vmem:[#allocation3 + $0x38] sm:$0xf]  ;;  %v5165_v45 = vld [vmem:[%s7185_s1 + $0x13c] ss:$12 sps:$4 sm:$0xff]   ;;  %1154 = vst [vmem:[#allocation3 + $0xd4] sm:$0xf] %v5274_v27  ;;  %v6156_v21 = vcombine.low %v5910_v16, %v5957_v7 }
  0x75   : > { %4890 = vmatpush3.bf16.msra.mxu0 %v5242_v30  ;;  %1048 = vst [vmem:[#allocation3 + $0x30] sm:$0x1] %v1047_v13  ;;  %v1104_v22 = vsel %vm5608_vm4, 0, %v1103_v23  ;;  %v1049_v25 = vld [vmem:[#allocation3 + $0x3c] sm:$0x1]  ;;  %4753 = vst [vmem:[#allocation3 + $0x50] sm:$0xff] %v4556_v28   ;;  %4937 = vmatprep.mubr.bf16.mxu1 %v6129_v48 }
  0x76   : > { %v5243_v55 = vld [vmem:[%s7185_s1 + $0x1b0] ss:$12 sps:$4 sm:$0xff]   ;;  %1105 = vst [vmem:[#allocation3 + $0x38] sm:$0xf] %v1104_v22  ;;  %v1050_v26 = vsel %vm5617_vm5, 0, %v1049_v25  ;;  %2194 = vmatpush2.bf16.msra.mxu1 %v5165_v45 }
  0x77   : > { %4891 = vmatprep.subr.bf16.mxu0 %v5243_v55  ;;  %v1106_v12 = vld [vmem:[#allocation3 + $0x44] sm:$0xf]  ;;  %v6147_v6 = vld [vmem:[#allocation3 + $0xc0] sm:$0xf]  ;;  %1051 = vst [vmem:[#allocation3 + $0x3c] sm:$0x1] %v1050_v26  ;;  %2195 = vmatprep.subr.bf16.mxu1 %v5274_v27 }
  0x78   : > { %v5169_v39 = vld [vmem:[%s7185_s1 + $0x124] ss:$12 sps:$4 sm:$0xff]   ;;  %v1107_v1 = vsel %vm5608_vm4, 0, %v1106_v12  ;;  %v1166_v35 = vld [vmem:[#allocation3 + $0x2c] sm:$0xf] }
  0x79   : > { %v6149_v9 = vld [vmem:[#allocation3 + $0xc4] sm:$0xf]  ;;  %1108 = vst [vmem:[#allocation3 + $0x44] sm:$0xf] %v1107_v1  ;;  %4892 = vmatpush3.bf16.msra.mxu0 %v5243_v55  ;;  %v6159_v32 = vld [vmem:[#allocation3 + $0xc8] sm:$0xf] }
  0x7a   : > { %v1206_v61 = vld [vmem:[#allocation3 + $0xcc] sm:$0xf]  ;;  %v5244_v63 = vld [vmem:[%s7185_s1 + $0x198] ss:$12 sps:$4 sm:$0xff]   ;;  %1714 = vmatmul.mubr.bf16.gmra.mxu0 %v6145_v24  ;;  %v1168_v16 = vld [vmem:[#allocation3 + $0x34] sm:$0xf]  ;;  %v6171_v30 = vcombine.low %v6147_v6, %v6149_v9  ;;  %2196 = vmatpush2.bf16.msra.mxu1 %v5169_v39 }
  0x7b   : > { %4893 = vmatprep.subr.bf16.mxu0 %v5244_v63  ;;  %v5173_v28 = vld [vmem:[%s7185_s1 + $0x10c] ss:$12 sps:$4 sm:$0xff]   ;;  %v1052_v7 = vld [vmem:[#allocation3 + $0x48] sm:$0x1]  ;;  %v6176_v45 = vcombine.low %v6159_v32, %v1206_v61  ;;  %2197 = vmatprep.subr.bf16.mxu1 %v5274_v27  ;;  %v6190_v61 = vcombine.low %v6044_v10, %v6046_v44  ;;  %v6206_v18 = vld [vmem:[#allocation3 + $0xd0] sm:$0xff]   ;;  %v6214_v44 = vcombine.low %v6019_v29, %v1166_v35 }
  0x7c   : > { %v1167_v13 = vld [vmem:[#allocation3 + $0x30] sm:$0xf]  ;;  %v1053_v23 = vsel %vm5617_vm5, 0, %v1052_v7  ;;  %v1055_v26 = vld [vmem:[#allocation3 + $0x54] sm:$0x1]  ;;  %4938 = vmatmul.mubr.bf16.gmra.mxu1 %v6171_v30  ;;  %v6198_v7 = vcombine.low %v5966_v8, %v6002_v17 }
  0x7d   : > { %4894 = vmatpush3.bf16.msra.mxu0 %v5244_v63  ;;  %v6178_v22 = vcombine.low %v1166_v35, %v1167_v13  ;;  %v1169_v25 = vld [vmem:[#allocation3 + $0x38] sm:$0xf]  ;;  %1054 = vst [vmem:[#allocation3 + $0x48] sm:$0x1] %v1053_v23  ;;  %v1109_v55 = vld [vmem:[#allocation3 + $0x50] sm:$0xf]  ;;  %4941 = vmatprep.mubr.bf16.mxu1 %v6176_v45  ;;  %v6221_v23 = vcombine.low %v5992_v38, %v6058_v2 }
  0x7e   : > { %v5245_v12 = vld [vmem:[%s7185_s1 + $0x180] ss:$12 sps:$4 sm:$0xff]   ;;  %v1110_v1 = vsel %vm5608_vm4, 0, %v1109_v55  ;;  %v1056_v39 = vsel %vm5617_vm5, 0, %v1055_v26  ;;  %v6194_v63 = vcombine.low %v1168_v16, %v1169_v25  ;;  %2198 = vmatpush2.bf16.msra.mxu1 %v5173_v28  ;;  %v5181_v8 = vld [vmem:[%s7185_s1 + $0xdc] ss:$12 sps:$4 sm:$0xff]   ;;  %v6234_v35 = vcombine.low %v1167_v13, %v1168_v16 }
  0x7f   : > { %4895 = vmatprep.subr.bf16.mxu0 %v5245_v12  ;;  %1721 = vmatprep.mubr.bf16.mxu0 %v6178_v22  ;;  %1111 = vst [vmem:[#allocation3 + $0x50] sm:$0xf] %v1110_v1  ;;  %1057 = vst [vmem:[#allocation3 + $0x54] sm:$0x1] %v1056_v39  ;;  %v1170_v17 = vld [vmem:[#allocation3 + $0x3c] sm:$0xf]  ;;  %v6248_v16 = vcombine.low %v6080_v46, %v6069_v34  ;;  %v6268_v46 = vcombine.low %v6092_v50, %v6147_v6 }
  0x80   : > { %2199 = vmatprep.subr.bf16.mxu1 %v5274_v27  ;;  %v1171_v10 = vld [vmem:[#allocation3 + $0x40] sm:$0xf]  ;;  %v5185_v55 = vld [vmem:[%s7185_s1 + $0xc4] ss:$12 sps:$4 sm:$0xff]   ;;  %v1174_v13 = vld [vmem:[#allocation3 + $0x4c] sm:$0xf]  ;;  %v6254_v39 = vcombine.low %v1169_v25, %v1170_v17  ;;  %v6289_v6 = vcombine.low %v6149_v9, %v6159_v32 }
  0x81   : > { %4896 = vmatpush3.bf16.msra.mxu0 %v5245_v12  ;;  %v6217_v28 = vcombine.low %v1170_v17, %v1171_v10  ;;  %v5201_v29 = vld [vmem:[%s7185_s1 + $0xb0] ss:$12 sps:$4 sm:$0xff]   ;;  %v1172_v38 = vld [vmem:[#allocation3 + $0x44] sm:$0xf]  ;;  %v5210_v34 = vld [vmem:[%s7185_s1 + $0x68] ss:$12 sps:$4 sm:$0xff]  }
  0x82   : > { %1722 = vmatmul.mubr.bf16.gmra.mxu0 %v6190_v61  ;;  %2200 = vmatpush2.bf16.msra.mxu1 %v5177_v40  ;;  %v5205_v12 = vld [vmem:[%s7185_s1 + $0x98] ss:$12 sps:$4 sm:$0xff]   ;;  %v6274_v17 = vcombine.low %v1171_v10, %v1172_v38  ;;  %v5215_v9 = vld [vmem:[%s7185_s1 + $0x170] ss:$12 sps:$4 sm:$0xff]  }
  0x83   : > { %1728 = vmatprep.mubr.bf16.mxu0 %v6194_v63  ;;  %2201 = vmatprep.subr.bf16.mxu1 %v5274_v27  ;;  %v5212_v50 = vld [vmem:[%s7185_s1 + $0x38] ss:$12 sps:$4 sm:$0xff]  }
  0x84   : > { %4942 = vmatmul.mubr.bf16.gmra.mxu1 %v6206_v18  ;;  %v1173_v2 = vld [vmem:[#allocation3 + $0x48] sm:$0xf]  ;;  %v6311_v32 = vld [vmem:[%s7185_s1 + $0x22c] ss:$12 sps:$4 sm:$0xff]  }
  0x85   : > { %2205 = vmatprep.mubr.bf16.mxu1 %v5855_v3  ;;  %v6237_v26 = vcombine.low %v1172_v38, %v1173_v2  ;;  %v6295_v10 = vcombine.low %v1173_v2, %v1174_v13  ;;  %4945 = vmatprep.subr.bf16.mxu0 %v6311_v32  ;;  %v5216_v2 = vld [vmem:[%s7185_s1 + $0x158] ss:$12 sps:$4 sm:$0xff]  }
  0x86   : > { %2202 = vmatpush2.bf16.msra.mxu1 %v5181_v8  ;;  %v1175_v1 = vld [vmem:[#allocation3 + $0x50] sm:$0xf]  ;;  %v1176_v25 = vld [vmem:[#allocation3 + $0x54] sm:$0xf] }
  0x87   : > { %2203 = vmatprep.subr.bf16.mxu1 %v5274_v27  ;;  %v6257_v40 = vcombine.low %v1174_v13, %v1175_v1  ;;  %v5211_v8 = vld [vmem:[%s7185_s1 + $0x50] ss:$12 sps:$4 sm:$0xff]   ;;  %v6314_v38 = vcombine.low %v1175_v1, %v1176_v25  ;;  %v5221_v1 = vld [vmem:[%s7185_s1 + $0xf8] ss:$12 sps:$4 sm:$0xff]  }
  0x88   : > { %v5219_v13 = vld [vmem:[%s7185_s1 + $0x110] ss:$12 sps:$4 sm:$0xff]  }
  0x8a   : > { %1729 = vmatmul.mubr.bf16.gmra.mxu0 %v6214_v44  ;;  %2204 = vmatpush2.bf16.msra.mxu1 %v5185_v55  ;;  %v6278_v55 = vcombine.low %v1176_v25, %v5669_v52  ;;  %v5213_v52 = vld [vmem:[%s7185_s1 + $0x20] ss:$12 sps:$4 sm:$0xff]   ;;  %v5229_v25 = vld [vmem:[%s7185_s1 + $0xc8] ss:$12 sps:$4 sm:$0xff]  }
  0x8b   : > { %1735 = vmatprep.mubr.bf16.mxu0 %v6217_v28  ;;  %2960 = vmatprep.subr.bf16.mxu1 %v5274_v27 }
  0x8d   : > { %2206 = vmatmul.mubr.bf16.vlgmr.msra.gmra.mxu1 %v5882_v19  ;;  %v5207_v19 = vld [vmem:[%s7185_s1 + $0x80] ss:$12 sps:$4 sm:$0xff]  }
  0x8e   : > { %2961 = vmatpush1.bf16.msra.mxu1 %v5201_v29  ;;  %2213 = vmatprep.mubr.bf16.mxu1 %v5970_v51  ;;  %v5214_v29 = vld [vmem:[%s7185_s1 + $0x8] ss:$12 sps:$4 sm:$0xff]  }
  0x8f   : > { %2962 = vmatprep.subr.bf16.mxu1 %v5274_v27 }
  0x92   : > { %1736 = vmatmul.mubr.bf16.gmra.mxu0 %v6234_v35  ;;  %2963 = vmatpush1.bf16.msra.mxu1 %v5205_v12  ;;  %v5217_v12 = vld [vmem:[%s7185_s1 + $0x140] ss:$12 sps:$4 sm:$0xff]  }
  0x93   : > { %1743 = vmatprep.mubr.bf16.mxu0 %v6237_v26  ;;  %2964 = vmatprep.subr.bf16.mxu1 %v5274_v27 }
  0x95   : > { %2214 = vmatmul.mubr.bf16.gmra.mxu1 %v5973_v42 }
  0x96   : > { %2221 = vmatprep.mubr.bf16.mxu1 %v6062_v60  ;;  %2965 = vmatpush1.bf16.msra.mxu1 %v5207_v19  ;;  %v5218_v19 = vld [vmem:[%s7185_s1 + $0x128] ss:$12 sps:$4 sm:$0xff]  }
  0x97   : > { %2966 = vmatprep.subr.bf16.mxu1 %v5274_v27 }
  0x9a   : > { %1744 = vmatmul.mubr.bf16.gmra.mxu0 %v6254_v39  ;;  %2967 = vmatpush1.bf16.msra.mxu1 %v5210_v34  ;;  %v5225_v34 = vld [vmem:[%s7185_s1 + $0xe0] ss:$12 sps:$4 sm:$0xff]  }
  0x9b   : > { %1750 = vmatprep.mubr.bf16.mxu0 %v6257_v40  ;;  %2968 = vmatprep.subr.bf16.mxu1 %v5274_v27 }
  0x9d   : > { %2222 = vmatmul.mubr.bf16.gmra.mxu1 %v6066_v36 }
  0x9e   : > { %2229 = vmatprep.mubr.bf16.mxu1 %v6073_v62  ;;  %2969 = vmatpush1.bf16.msra.mxu1 %v5211_v8 }
  0x9f   : > { %2970 = vmatprep.subr.bf16.mxu1 %v5274_v27 }
  0xa2   : > { %1751 = vmatmul.mubr.bf16.gmra.mxu0 %v6274_v17  ;;  %2971 = vmatpush1.bf16.msra.mxu1 %v5212_v50 }
  0xa3   : > { %1757 = vmatprep.mubr.bf16.mxu0 %v6278_v55  ;;  %2972 = vmatprep.subr.bf16.mxu1 %v5274_v27 }
  0xa5   : > { %2230 = vmatmul.mubr.bf16.gmra.mxu1 %v6145_v24 }
  0xa6   : > { %2237 = vmatprep.mubr.bf16.mxu1 %v6178_v22  ;;  %2973 = vmatpush1.bf16.msra.mxu1 %v5213_v52 }
  0xa7   : > { %2974 = vmatprep.subr.bf16.mxu1 %v5274_v27 }
  0xaa   : > { %1758 = vmatmul.mubr.bf16.gmra.mxu0 %v6295_v10  ;;  %2975 = vmatpush1.bf16.msra.mxu1 %v5214_v29 }
  0xab   : > { %1765 = vmatprep.mubr.bf16.mxu0 %v6033_v0  ;;  %2976 = vmatprep.subr.bf16.mxu1 %v5274_v27 }
  0xad   : > { %2238 = vmatmul.mubr.bf16.gmra.mxu1 %v6190_v61 }
  0xae   : > { %2245 = vmatprep.mubr.bf16.mxu1 %v6194_v63  ;;  %2977 = vmatpush2.bf16.msra.mxu1 %v5215_v9 }
  0xaf   : > { %2978 = vmatprep.subr.bf16.mxu1 %v5274_v27 }
  0xb2   : > { %1766 = vmatmul.mubr.bf16.gmra.mxu0 %v6314_v38  ;;  %2979 = vmatpush2.bf16.msra.mxu1 %v5216_v2 }
  0xb3   : > { %1772 = vmatprep.mubr.bf16.mxu0 %v6053_v11  ;;  %2980 = vmatprep.subr.bf16.mxu1 %v5274_v27 }
  0xb5   : > { %2246 = vmatmul.mubr.bf16.gmra.mxu1 %v6214_v44 }
  0xb6   : > { %2253 = vmatprep.mubr.bf16.mxu1 %v6217_v28  ;;  %2981 = vmatpush2.bf16.msra.mxu1 %v5217_v12 }
  0xb7   : > { %2982 = vmatprep.subr.bf16.mxu1 %v5274_v27 }
  0xba   : > { %1773 = vmatmul.mubr.bf16.gmra.mxu0 %v5711_v49  ;;  %2983 = vmatpush2.bf16.msra.mxu1 %v5218_v19 }
  0xbb   : > { %1779 = vmatprep.mubr.bf16.mxu0 %v6077_v59  ;;  %2984 = vmatprep.subr.bf16.mxu1 %v5274_v27 }
  0xbd   : > { %2254 = vmatmul.mubr.bf16.gmra.mxu1 %v6234_v35 }
  0xbe   : > { %2261 = vmatprep.mubr.bf16.mxu1 %v6237_v26  ;;  %2985 = vmatpush2.bf16.msra.mxu1 %v5219_v13  ;;  %v5222_v13 = vld [vmem:[%s7185_s1 + $0x214] ss:$12 sps:$4 sm:$0xff]  }
  0xbf   : > { %2986 = vmatprep.subr.bf16.mxu1 %v5274_v27 }
  0xc2   : > { %1780 = vmatmul.mubr.bf16.gmra.mxu0 %v5715_v58  ;;  %2987 = vmatpush2.bf16.msra.mxu1 %v5221_v1 }
  0xc3   : > { %1787 = vmatprep.mubr.bf16.mxu0 %v6088_v47  ;;  %2988 = vmatprep.subr.bf16.mxu1 %v5274_v27 }
  0xc5   : > { %2262 = vmatmul.mubr.bf16.gmra.mxu1 %v6254_v39 }
  0xc6   : > { %2269 = vmatprep.mubr.bf16.mxu1 %v6257_v40  ;;  %2989 = vmatpush2.bf16.msra.mxu1 %v5225_v34 }
  0xc7   : > { %2990 = vmatprep.subr.bf16.mxu1 %v5274_v27 }
  0xca   : > { %1788 = vmatmul.mubr.bf16.gmra.mxu0 %v5736_v37  ;;  %2991 = vmatpush2.bf16.msra.mxu1 %v5229_v25 }
  0xcb   : > { %1794 = vmatprep.mubr.bf16.mxu0 %v6096_v53 }
  0xcd   : > { %2270 = vmatmul.mubr.bf16.gmra.mxu1 %v6274_v17 }
  0xce   : > { %2277 = vmatprep.mubr.bf16.mxu1 %v6278_v55 }
  0xd2   : > { %1795 = vmatmul.mubr.bf16.gmra.mxu0 %v5788_v14 }
  0xd3   : > { %1801 = vmatprep.mubr.bf16.mxu0 %v6100_v56 }
  0xd5   : > { %2278 = vmatmul.mubr.bf16.gmra.mxu1 %v6295_v10 }
  0xd6   : > { %2285 = vmatprep.mubr.bf16.mxu1 %v6033_v0 }
  0xda   : > { %1802 = vmatmul.mubr.bf16.gmra.mxu0 %v5798_v54 }
  0xdb   : > { %1809 = vmatprep.mubr.bf16.mxu0 %v6111_v33 }
  0xdd   : > { %2286 = vmatmul.mubr.bf16.gmra.mxu1 %v6314_v38 }
  0xde   : > { %2293 = vmatprep.mubr.bf16.mxu1 %v6053_v11 }
  0xe2   : > { %1810 = vmatmul.mubr.bf16.gmra.mxu0 %v5849_v4 }
  0xe3   : > { %1816 = vmatprep.mubr.bf16.mxu0 %v6122_v41 }
  0xe5   : > { %2294 = vmatmul.mubr.bf16.gmra.mxu1 %v5711_v49 }
  0xe6   : > { %2301 = vmatprep.mubr.bf16.mxu1 %v6077_v59 }
  0xea   : > { %1817 = vmatmul.mubr.bf16.gmra.mxu0 %v5877_v15 }
  0xeb   : > { %1823 = vmatprep.mubr.bf16.mxu0 %v6156_v21 }
  0xed   : > { %2302 = vmatmul.mubr.bf16.gmra.mxu1 %v5715_v58 }
  0xee   : > { %2309 = vmatprep.mubr.bf16.mxu1 %v6088_v47 }
  0xf2   : > { %1824 = vmatmul.mubr.bf16.gmra.mxu0 %v5889_v43 }
  0xf3   : > { %1831 = vmatprep.mubr.bf16.mxu0 %v6198_v7 }
  0xf5   : > { %2310 = vmatmul.mubr.bf16.gmra.mxu1 %v5736_v37 }
  0xf6   : > { %2317 = vmatprep.mubr.bf16.mxu1 %v6096_v53 }
  0xfa   : > { %1832 = vmatmul.mubr.bf16.gmra.mxu0 %v5927_v57 }
  0xfb   : > { %1838 = vmatprep.mubr.bf16.mxu0 %v6221_v23 }
  0xfd   : > { %2318 = vmatmul.mubr.bf16.gmra.mxu1 %v5788_v14 }
  0xfe   : > { %2325 = vmatprep.mubr.bf16.mxu1 %v6100_v56 }
 0x102   : > { %1839 = vmatmul.mubr.bf16.gmra.mxu0 %v5999_v5 }
 0x103   : > { %1845 = vmatprep.mubr.bf16.mxu0 %v6248_v16 }
 0x105   : > { %2326 = vmatmul.mubr.bf16.gmra.mxu1 %v5798_v54 }
 0x106   : > { %2333 = vmatprep.mubr.bf16.mxu1 %v6111_v33 }
 0x109   : > { %v6393_v27 = vpop.f32.mrf.mxu1 }
 0x10a   : > { %1846 = vmatmul.mubr.bf16.gmra.mxu0 %v6037_v31  ;;  %7225 = vst [vmem:[#allocation8_spill] sm:$0xff] %v6393_v27 }
 0x10b   : > { %1853 = vmatprep.mubr.bf16.mxu0 %v6268_v46  ;;  %v6397_v8 = vpop.f32.mrf.mxu1 }
 0x10c   : > { %7226 = vst [vmem:[#allocation9_spill] sm:$0xff] %v6397_v8 }
 0x10d   : > { %2334 = vmatmul.mubr.bf16.gmra.mxu1 %v5849_v4  ;;  %v6400_v50 = vpop.f32.mrf.mxu1 }
 0x10e   : > { %2341 = vmatprep.mubr.bf16.mxu1 %v6122_v41  ;;  %7227 = vst [vmem:[#allocation10_spill] sm:$0xff] %v6400_v50 }
 0x10f   : > { %v1964_v52 = vpop.f32.mrf.mxu1 }
 0x111   : > { %v6403_v29 = vpop.f32.mrf.mxu1 }
 0x112   : > { %1854 = vmatmul.mubr.bf16.gmra.mxu0 %v6115_v20  ;;  %7228 = vst [vmem:[#allocation11_spill] sm:$0xff] %v6403_v29 }
 0x113   : > { %1860 = vmatprep.mubr.bf16.mxu0 %v6289_v6  ;;  %v1976_v9 = vpop.f32.mrf.mxu1 }
 0x114   : > { %v5223_v9 = vld [vmem:[%s7185_s1 + $0x1fc] ss:$12 sps:$4 sm:$0xff]  }
 0x115   : > { %2342 = vmatmul.mubr.bf16.gmra.mxu1 %v5877_v15  ;;  %v4920_v2 = vpop.f32.mrf.mxu1 }
 0x116   : > { %2349 = vmatprep.mubr.bf16.mxu1 %v6156_v21 }
 0x117   : > { %v6409_v12 = vpop.f32.mrf.mxu1 }
 0x118   : > { %7229 = vst [vmem:[#allocation12_spill] sm:$0xff] %v6409_v12 }
 0x119   : > { %v4923_v19 = vpop.f32.mrf.mxu1 }
 0x11a   : > { %1861 = vmatmul.mubr.bf16.gmra.mxu0 %v6129_v48 }
 0x11b   : > { %4897 = vmatprep.mubr.bf16.mxu0 %v6145_v24  ;;  %v6416_v1 = vpop.f32.mrf.mxu1  ;;  %v6418_v34 = vpop.f32.mrf.mxu0 }
 0x11c   : > { %7230 = vst [vmem:[#allocation13_spill] sm:$0xff] %v6416_v1 }
 0x11d   : > { %2350 = vmatmul.mubr.bf16.gmra.mxu1 %v5889_v43  ;;  %v6421_v25 = vpop.f32.mrf.mxu1  ;;  %v1695_v52 = vpop.f32.mrf.mxu0 }
 0x11e   : > { %2357 = vmatprep.mubr.bf16.mxu1 %v6198_v7  ;;  %7231 = vst [vmem:[#allocation14_spill] sm:$0xff] %v6421_v25 }
 0x11f   : > { %v6428_v2 = vpop.f32.mrf.mxu1  ;;  %v6430_v19 = vpop.f32.mrf.mxu0 }
 0x120   : > { %7232 = vst [vmem:[#allocation15_spill] sm:$0xff] %v6428_v2 }
 0x121   : > { %v6432_v1 = vpop.f32.mrf.mxu1  ;;  %v1698_v25 = vpop.f32.mrf.mxu0 }
 0x122   : > { %4898 = vmatmul.mubr.bf16.vlgmr.msra.gmra.mxu0 %v6190_v61  ;;  %7233 = vst [vmem:[#allocation16_spill] sm:$0xff] %v6432_v1 }
 0x123   : > { %4946 = vmatpush3.bf16.msra.mxu0 %v6311_v32  ;;  %4901 = vmatprep.mubr.bf16.mxu0 %v6214_v44  ;;  %v5224_v32 = vld [vmem:[%s7185_s1 + $0x1e4] ss:$12 sps:$4 sm:$0xff]   ;;  %v6439_v52 = vpop.f32.mrf.mxu1 }
 0x124   : > { %4947 = vmatprep.subr.bf16.mxu0 %v5222_v13  ;;  %7234 = vst [vmem:[#allocation17_spill] sm:$0xff] %v6439_v52 }
 0x125   : > { %2358 = vmatmul.mubr.bf16.gmra.mxu1 %v5927_v57  ;;  %v6442_v2 = vpop.f32.mrf.mxu1 }
 0x126   : > { %2365 = vmatprep.mubr.bf16.mxu1 %v6221_v23  ;;  %v1701_v12 = vpop.f32.mrf.mxu0  ;;  %7235 = vst [vmem:[#allocation18_spill] sm:$0xff] %v6442_v2 }
 0x127   : > { %4948 = vmatpush3.bf16.msra.mxu0 %v5222_v13  ;;  %v5226_v13 = vld [vmem:[%s7185_s1 + $0x1cc] ss:$12 sps:$4 sm:$0xff]   ;;  %v2008_v25 = vpop.f32.mrf.mxu1 }
 0x128   : > { %4949 = vmatprep.subr.bf16.mxu0 %v5223_v9  ;;  %v1702_v1 = vpop.f32.mrf.mxu0 }
 0x129   : > { %v6450_v50 = vpop.f32.mrf.mxu1  ;;  %v5227_v1 = vld [vmem:[%s7185_s1 + $0x1b4] ss:$12 sps:$4 sm:$0xff]  }
 0x12a   : > { %4902 = vmatmul.mubr.bf16.gmra.mxu0 %v6234_v35  ;;  %v6448_v29 = vpop.f32.mrf.mxu0  ;;  %7236 = vst [vmem:[#allocation19_spill] sm:$0xff] %v6450_v50 }
 0x12b   : > { %4950 = vmatpush3.bf16.msra.mxu0 %v5223_v9  ;;  %4905 = vmatprep.mubr.bf16.mxu0 %v6254_v39  ;;  %v2020_v9 = vpop.f32.mrf.mxu1 }
 0x12c   : > { %4951 = vmatprep.subr.bf16.mxu0 %v5224_v32  ;;  %v1705_v12 = vpop.f32.mrf.mxu0 }
 0x12d   : > { %2366 = vmatmul.mubr.bf16.gmra.mxu1 %v5999_v5  ;;  %v4932_v25 = vpop.f32.mrf.mxu1 }
 0x12e   : > { %2373 = vmatprep.mubr.bf16.mxu1 %v6248_v16 }
 0x12f   : > { %4952 = vmatpush3.bf16.msra.mxu0 %v5224_v32  ;;  %v5228_v32 = vld [vmem:[%s7185_s1 + $0x19c] ss:$12 sps:$4 sm:$0xff]   ;;  %v6464_v12 = vpop.f32.mrf.mxu1 }
 0x130   : > { %4953 = vmatprep.subr.bf16.mxu0 %v5226_v13  ;;  %7238 = vst [vmem:[#allocation21_spill] sm:$0xff] %v6464_v12 }
 0x131   : > { %v6457_v2 = vpop.f32.mrf.mxu0 }
 0x132   : > { %7237 = vst [vmem:[#allocation20_spill] sm:$0xff] %v6457_v2  ;;  %4906 = vmatmul.mubr.bf16.gmra.mxu0 %v6274_v17 }
 0x133   : > { %4954 = vmatpush3.bf16.msra.mxu0 %v5226_v13  ;;  %4909 = vmatprep.mubr.bf16.mxu0 %v6295_v10  ;;  %v1710_v50 = vpop.f32.mrf.mxu0  ;;  %v4935_v8 = vpop.f32.mrf.mxu1 }
 0x134   : > { %4955 = vmatprep.subr.bf16.mxu0 %v5227_v1  ;;  %v5230_v50 = vld [vmem:[%s7185_s1 + $0x184] ss:$12 sps:$4 sm:$0xff]  }
 0x135   : > { %v1711_v52 = vpop.f32.mrf.mxu0  ;;  %2374 = vmatmul.mubr.bf16.gmra.mxu1 %v6037_v31  ;;  %v6471_v13 = vpop.f32.mrf.mxu1 }
 0x136   : > { %2381 = vmatprep.mubr.bf16.mxu1 %v6268_v46  ;;  %7239 = vst [vmem:[#allocation22_spill] sm:$0xff] %v6471_v13  ;;  %v5231_v52 = vld [vmem:[%s7185_s1 + $0x230] ss:$12 sps:$4 sm:$0xff]  }
 0x137   : > { %4956 = vmatpush3.bf16.msra.mxu0 %v5227_v1  ;;  %v1712_v9 = vpop.f32.mrf.mxu0  ;;  %v6476_v12 = vpop.f32.mrf.mxu1 }
 0x138   : > { %4957 = vmatprep.subr.bf16.mxu0 %v5228_v32  ;;  %7240 = vst [vmem:[#allocation23_spill] sm:$0xff] %v6476_v12 }
 0x139   : > { %v6482_v1 = vpop.f32.mrf.mxu1 }
 0x13a   : > { %v6473_v25 = vpop.f32.mrf.mxu0  ;;  %4910 = vmatmul.mubr.bf16.gmra.mxu0 %v6314_v38  ;;  %7241 = vst [vmem:[#allocation24_spill] sm:$0xff] %v6482_v1 }
 0x13b   : > { %4958 = vmatpush3.bf16.msra.mxu0 %v5228_v32  ;;  %4961 = vmatprep.mubr.bf16.mxu0 %v6145_v24 }
 0x13c   : > { %v1717_v8 = vpop.f32.mrf.mxu0  ;;  %4959 = vmatprep.subr.bf16.mxu0 %v5230_v50  ;;  %v6486_v13 = vpop.f32.mrf.mxu1 }
 0x13d   : > { %7243 = vst [vmem:[#allocation26_spill] sm:$0xff] %v6486_v13  ;;  %2382 = vmatmul.mubr.bf16.gmra.mxu1 %v6115_v20  ;;  %v5232_v8 = vld [vmem:[%s7185_s1 + $0x218] ss:$12 sps:$4 sm:$0xff]  }
 0x13e   : > { %v6484_v9 = vpop.f32.mrf.mxu0  ;;  %2389 = vmatprep.mubr.bf16.mxu1 %v6289_v6  ;;  %v6493_v12 = vpop.f32.mrf.mxu1 }
 0x13f   : > { %7242 = vst [vmem:[#allocation25_spill] sm:$0xff] %v6484_v9  ;;  %4960 = vmatpush3.bf16.msra.mxu0 %v5230_v50  ;;  %7244 = vst [vmem:[#allocation27_spill] sm:$0xff] %v6493_v12  ;;  %v5233_v50 = vld [vmem:[%s7185_s1 + $0x200] ss:$12 sps:$4 sm:$0xff]  }
 0x140   : > { %v1720_v32 = vpop.f32.mrf.mxu0  ;;  %5009 = vmatprep.subr.bf16.mxu0 %v5231_v52  ;;  %v6496_v1 = vpop.f32.mrf.mxu1 }
 0x141   : > { %7245 = vst [vmem:[#allocation28_spill] sm:$0xff] %v6496_v1 }
 0x142   : > { %v1723_v27 = vpop.f32.mrf.mxu0  ;;  %4962 = vmatmul.mubr.bf16.vlgmr.msra.gmra.mxu0 %v6190_v61  ;;  %v2052_v32 = vpop.f32.mrf.mxu1 }
 0x143   : > { %5010 = vmatpush3.bf16.msra.mxu0 %v5231_v52  ;;  %4965 = vmatprep.mubr.bf16.mxu0 %v6214_v44 }
 0x144   : > { %v1724_v13 = vpop.f32.mrf.mxu0  ;;  %5011 = vmatprep.subr.bf16.mxu0 %v5232_v8  ;;  %v6504_v2 = vpop.f32.mrf.mxu1 }
 0x145   : > { %7247 = vst [vmem:[#allocation30_spill] sm:$0xff] %v6504_v2  ;;  %2390 = vmatmul.mubr.bf16.gmra.mxu1 %v6129_v48  ;;  %v5234_v13 = vld [vmem:[%s7185_s1 + $0x1e8] ss:$12 sps:$4 sm:$0xff]  }
 0x146   : > { %v6502_v9 = vpop.f32.mrf.mxu0  ;;  %2992 = vmatprep.mubr.bf16.mxu1 %v5855_v3  ;;  %v2064_v52 = vpop.f32.mrf.mxu1  ;;  %v5235_v3 = vld [vmem:[%s7185_s1 + $0x1d0] ss:$12 sps:$4 sm:$0xff]  }
 0x147   : > { %7246 = vst [vmem:[#allocation29_spill] sm:$0xff] %v6502_v9  ;;  %5012 = vmatpush3.bf16.msra.mxu0 %v5232_v8  ;;  %v5246_v52 = vld [vmem:[#allocation3] sm:$0xff]  }
 0x148   : > { %v1727_v27 = vpop.f32.mrf.mxu0  ;;  %5013 = vmatprep.subr.bf16.mxu0 %v5233_v50  ;;  %v4944_v32 = vpop.f32.mrf.mxu1 }
 0x14a   : > { %v6511_v1 = vpop.f32.mrf.mxu0  ;;  %4966 = vmatmul.mubr.bf16.gmra.mxu0 %v6234_v35  ;;  %v6518_v8 = vpop.f32.mrf.mxu1 }
 0x14b   : > { %7248 = vst [vmem:[#allocation31_spill] sm:$0xff] %v6511_v1  ;;  %4969 = vmatprep.mubr.bf16.mxu0 %v6254_v39  ;;  %5014 = vmatpush3.bf16.msra.mxu0 %v5233_v50  ;;  %7249 = vst [vmem:[#allocation32_spill] sm:$0xff] %v6518_v8 }
 0x14c   : > { %v1732_v2 = vpop.f32.mrf.mxu0  ;;  %5015 = vmatprep.subr.bf16.mxu0 %v5234_v13 }
 0x14d   : > { %v6520_v12 = vpop.f32.mrf.mxu1  ;;  %2993 = vmatmul.mubr.bf16.vlgmr.msra.gmra.mxu1 %v5246_v52  ;;  %v5236_v2 = vld [vmem:[%s7185_s1 + $0x1b8] ss:$12 sps:$4 sm:$0xff]  }
 0x14e   : > { %v1733_v27 = vpop.f32.mrf.mxu0  ;;  %3000 = vmatprep.mubr.bf16.mxu1 %v5970_v51  ;;  %v5237_v51 = vld [vmem:[%s7185_s1 + $0x1a0] ss:$12 sps:$4 sm:$0xff]  }
 0x14f   : > { %5016 = vmatpush3.bf16.msra.mxu0 %v5234_v13  ;;  %v2209_v50 = vpop.f32.mrf.mxu1 }
 0x150   : > { %v1734_v32 = vpop.f32.mrf.mxu0  ;;  %5017 = vmatprep.subr.bf16.mxu0 %v5235_v3 }
 0x151   : > { %v6529_v8 = vpop.f32.mrf.mxu1 }
 0x152   : > { %v6526_v9 = vpop.f32.mrf.mxu0  ;;  %4970 = vmatmul.mubr.bf16.gmra.mxu0 %v6274_v17 }
 0x153   : > { %7250 = vst [vmem:[#allocation33_spill] sm:$0xff] %v6526_v9  ;;  %4973 = vmatprep.mubr.bf16.mxu0 %v6295_v10  ;;  %5018 = vmatpush3.bf16.msra.mxu0 %v5235_v3  ;;  %v2212_v13 = vpop.f32.mrf.mxu1  ;;  %v5238_v3 = vld [vmem:[%s7185_s1 + $0x188] ss:$12 sps:$4 sm:$0xff]  }
 0x154   : > { %v1739_v27 = vpop.f32.mrf.mxu0  ;;  %5019 = vmatprep.subr.bf16.mxu0 %v5236_v2 }
 0x155   : > { %v6537_v32 = vpop.f32.mrf.mxu1  ;;  %3001 = vmatmul.mubr.bf16.gmra.mxu1 %v5973_v42 }
 0x156   : > { %v6535_v52 = vpop.f32.mrf.mxu0  ;;  %3008 = vmatprep.mubr.bf16.mxu1 %v6062_v60 }
 0x157   : > { %7251 = vst [vmem:[#allocation34_spill] sm:$0xff] %v6535_v52  ;;  %5020 = vmatpush3.bf16.msra.mxu0 %v5236_v2  ;;  %v2217_v27 = vpop.f32.mrf.mxu1 }
 0x158   : > { %v1742_v50 = vpop.f32.mrf.mxu0  ;;  %5021 = vmatprep.subr.bf16.mxu0 %v5237_v51 }
 0x159   : > { %v6545_v13 = vpop.f32.mrf.mxu1 }
 0x15a   : > { %v1745_v9 = vpop.f32.mrf.mxu0  ;;  %4974 = vmatmul.mubr.bf16.gmra.mxu0 %v6314_v38 }
 0x15b   : > { %4977 = vmatprep.mubr.bf16.mxu0 %v5711_v49  ;;  %5022 = vmatpush3.bf16.msra.mxu0 %v5237_v51  ;;  %v2220_v42 = vpop.f32.mrf.mxu1 }
 0x15c   : > { %v1746_v52 = vpop.f32.mrf.mxu0  ;;  %5023 = vmatprep.subr.bf16.mxu0 %v5238_v3 }
 0x15d   : > { %v6550_v60 = vpop.f32.mrf.mxu1  ;;  %3009 = vmatmul.mubr.bf16.gmra.mxu1 %v6066_v36 }
 0x15e   : > { %v6548_v2 = vpop.f32.mrf.mxu0  ;;  %3016 = vmatprep.mubr.bf16.mxu1 %v6073_v62 }
 0x15f   : > { %7252 = vst [vmem:[#allocation35_spill] sm:$0xff] %v6548_v2  ;;  %5024 = vmatpush3.bf16.msra.mxu0 %v5238_v3  ;;  %v2225_v50 = vpop.f32.mrf.mxu1 }
 0x160   : > { %v1749_v9 = vpop.f32.mrf.mxu0 }
 0x161   : > { %v6557_v1 = vpop.f32.mrf.mxu1 }
 0x162   : > { %v6554_v27 = vpop.f32.mrf.mxu0  ;;  %4978 = vmatmul.mubr.bf16.gmra.mxu0 %v5715_v58 }
 0x163   : > { %7253 = vst [vmem:[#allocation36_spill] sm:$0xff] %v6554_v27  ;;  %4981 = vmatprep.mubr.bf16.mxu0 %v5736_v37  ;;  %v2228_v52 = vpop.f32.mrf.mxu1 }
 0x164   : > { %v1754_v51 = vpop.f32.mrf.mxu0 }
 0x165   : > { %v6560_v2 = vpop.f32.mrf.mxu1  ;;  %3017 = vmatmul.mubr.bf16.gmra.mxu1 %v6145_v24 }
 0x166   : > { %v1755_v42 = vpop.f32.mrf.mxu0  ;;  %3024 = vmatprep.mubr.bf16.mxu1 %v6178_v22 }
 0x167   : > { %v2233_v62 = vpop.f32.mrf.mxu1 }
 0x168   : > { %v1756_v36 = vpop.f32.mrf.mxu0 }
 0x169   : > { %v6567_v9 = vpop.f32.mrf.mxu1 }
 0x16a   : > { %v6564_v3 = vpop.f32.mrf.mxu0  ;;  %4982 = vmatmul.mubr.bf16.gmra.mxu0 %v5788_v14 }
 0x16b   : > { %7254 = vst [vmem:[#allocation37_spill] sm:$0xff] %v6564_v3  ;;  %4985 = vmatprep.mubr.bf16.mxu0 %v5798_v54  ;;  %v2236_v51 = vpop.f32.mrf.mxu1 }
 0x16c   : > { %v1761_v50 = vpop.f32.mrf.mxu0 }
 0x16d   : > { %v6572_v42 = vpop.f32.mrf.mxu1  ;;  %3025 = vmatmul.mubr.bf16.gmra.mxu1 %v6190_v61 }
 0x16e   : > { %v6570_v52 = vpop.f32.mrf.mxu0  ;;  %3032 = vmatprep.mubr.bf16.mxu1 %v6194_v63 }
 0x16f   : > { %7255 = vst [vmem:[#allocation38_spill] sm:$0xff] %v6570_v52  ;;  %v2241_v36 = vpop.f32.mrf.mxu1 }
 0x170   : > { %v1764_v22 = vpop.f32.mrf.mxu0 }
 0x171   : > { %v6577_v27 = vpop.f32.mrf.mxu1 }
 0x172   : > { %v1767_v62 = vpop.f32.mrf.mxu0  ;;  %4986 = vmatmul.mubr.bf16.gmra.mxu0 %v5849_v4  ;;  %7256 = vst [vmem:[#allocation39_spill] sm:$0xff] %v6577_v27 }
 0x173   : > { %4989 = vmatprep.mubr.bf16.mxu0 %v5877_v15  ;;  %v2244_v50 = vpop.f32.mrf.mxu1 }
 0x174   : > { %v1768_v3 = vpop.f32.mrf.mxu0 }
 0x175   : > { %v6582_v52 = vpop.f32.mrf.mxu1  ;;  %3033 = vmatmul.mubr.bf16.gmra.mxu1 %v6214_v44 }
 0x176   : > { %v6580_v51 = vpop.f32.mrf.mxu0  ;;  %3040 = vmatprep.mubr.bf16.mxu1 %v6217_v28 }
 0x177   : > { %7257 = vst [vmem:[#allocation40_spill] sm:$0xff] %v6580_v51  ;;  %v2249_v22 = vpop.f32.mrf.mxu1 }
 0x178   : > { %v1771_v63 = vpop.f32.mrf.mxu0 }
 0x179   : > { %v6589_v62 = vpop.f32.mrf.mxu1 }
 0x17a   : > { %v6586_v36 = vpop.f32.mrf.mxu0  ;;  %4990 = vmatmul.mubr.bf16.gmra.mxu0 %v5889_v43  ;;  %7259 = vst [vmem:[#allocation42_spill] sm:$0xff] %v6589_v62 }
 0x17b   : > { %7258 = vst [vmem:[#allocation41_spill] sm:$0xff] %v6586_v36  ;;  %4993 = vmatprep.mubr.bf16.mxu0 %v5927_v57  ;;  %v2252_v50 = vpop.f32.mrf.mxu1 }
 0x17c   : > { %v1776_v3 = vpop.f32.mrf.mxu0 }
 0x17d   : > { %v6592_v51 = vpop.f32.mrf.mxu1  ;;  %3041 = vmatmul.mubr.bf16.gmra.mxu1 %v6234_v35 }
 0x17e   : > { %v1777_v27 = vpop.f32.mrf.mxu0  ;;  %3048 = vmatprep.mubr.bf16.mxu1 %v6237_v26 }
 0x17f   : > { %v2257_v63 = vpop.f32.mrf.mxu1 }
 0x180   : > { %v1778_v28 = vpop.f32.mrf.mxu0 }
 0x181   : > { %v6599_v36 = vpop.f32.mrf.mxu1 }
 0x182   : > { %v6596_v22 = vpop.f32.mrf.mxu0  ;;  %4994 = vmatmul.mubr.bf16.gmra.mxu0 %v5999_v5  ;;  %7261 = vst [vmem:[#allocation44_spill] sm:$0xff] %v6599_v36 }
 0x183   : > { %7260 = vst [vmem:[#allocation43_spill] sm:$0xff] %v6596_v22  ;;  %4997 = vmatprep.mubr.bf16.mxu0 %v6037_v31  ;;  %v2260_v3 = vpop.f32.mrf.mxu1 }
 0x184   : > { %v1783_v62 = vpop.f32.mrf.mxu0 }
 0x185   : > { %v6604_v27 = vpop.f32.mrf.mxu1  ;;  %3049 = vmatmul.mubr.bf16.gmra.mxu1 %v6254_v39 }
 0x186   : > { %v6602_v50 = vpop.f32.mrf.mxu0  ;;  %3056 = vmatprep.mubr.bf16.mxu1 %v6257_v40 }
 0x187   : > { %7262 = vst [vmem:[#allocation45_spill] sm:$0xff] %v6602_v50  ;;  %v2265_v28 = vpop.f32.mrf.mxu1 }
 0x188   : > { %v1786_v26 = vpop.f32.mrf.mxu0 }
 0x189   : > { %v6609_v22 = vpop.f32.mrf.mxu1 }
 0x18a   : > { %v1789_v63 = vpop.f32.mrf.mxu0  ;;  %4998 = vmatmul.mubr.bf16.gmra.mxu0 %v6115_v20  ;;  %7263 = vst [vmem:[#allocation46_spill] sm:$0xff] %v6609_v22 }
 0x18b   : > { %5001 = vmatprep.mubr.bf16.mxu0 %v6129_v48  ;;  %v2268_v62 = vpop.f32.mrf.mxu1 }
 0x18c   : > { %v1790_v36 = vpop.f32.mrf.mxu0 }
 0x18d   : > { %v6614_v50 = vpop.f32.mrf.mxu1  ;;  %3057 = vmatmul.mubr.bf16.gmra.mxu1 %v6274_v17 }
 0x18e   : > { %v6612_v3 = vpop.f32.mrf.mxu0  ;;  %3064 = vmatprep.mubr.bf16.mxu1 %v6278_v55 }
 0x18f   : > { %7264 = vst [vmem:[#allocation47_spill] sm:$0xff] %v6612_v3  ;;  %v2273_v26 = vpop.f32.mrf.mxu1 }
 0x190   : > { %v1793_v40 = vpop.f32.mrf.mxu0 }
 0x191   : > { %v6621_v63 = vpop.f32.mrf.mxu1 }
 0x192   : > { %v6618_v28 = vpop.f32.mrf.mxu0  ;;  %5002 = vmatmul.mubr.bf16.gmra.mxu0 %v6171_v30  ;;  %7266 = vst [vmem:[#allocation49_spill] sm:$0xff] %v6621_v63 }
 0x193   : > { %7265 = vst [vmem:[#allocation48_spill] sm:$0xff] %v6618_v28  ;;  %5005 = vmatprep.mubr.bf16.mxu0 %v6176_v45  ;;  %v2276_v62 = vpop.f32.mrf.mxu1 }
 0x194   : > { %v1798_v36 = vpop.f32.mrf.mxu0 }
 0x195   : > { %v6624_v3 = vpop.f32.mrf.mxu1  ;;  %3065 = vmatmul.mubr.bf16.gmra.mxu1 %v6295_v10 }
 0x196   : > { %v1799_v22 = vpop.f32.mrf.mxu0  ;;  %3072 = vmatprep.mubr.bf16.mxu1 %v6033_v0 }
 0x197   : > { %v2281_v40 = vpop.f32.mrf.mxu1 }
 0x198   : > { %v1800_v55 = vpop.f32.mrf.mxu0 }
 0x199   : > { %v6631_v28 = vpop.f32.mrf.mxu1 }
 0x19a   : > { %v6628_v26 = vpop.f32.mrf.mxu0  ;;  %5006 = vmatmul.mubr.bf16.gmra.mxu0 %v6206_v18 }
 0x19b   : > { %5025 = vmatprep.mubr.bf16.mxu0 %v6145_v24  ;;  %v2284_v36 = vpop.f32.mrf.mxu1 }
 0x19c   : > { %v1805_v63 = vpop.f32.mrf.mxu0 }
 0x19d   : > { %v6636_v22 = vpop.f32.mrf.mxu1  ;;  %3073 = vmatmul.mubr.bf16.gmra.mxu1 %v6314_v38 }
 0x19e   : > { %v6634_v62 = vpop.f32.mrf.mxu0  ;;  %3080 = vmatprep.mubr.bf16.mxu1 %v6053_v11 }
 0x19f   : > { %7267 = vst [vmem:[#allocation50_spill] sm:$0xff] %v6634_v62  ;;  %v2289_v55 = vpop.f32.mrf.mxu1 }
 0x1a0   : > { %v1808_v0 = vpop.f32.mrf.mxu0 }
 0x1a1   : > { %v6641_v18 = vpop.f32.mrf.mxu1 }
 0x1a2   : > { %v1811_v40 = vpop.f32.mrf.mxu0  ;;  %5026 = vmatmul.mubr.bf16.vlgmr.msra.gmra.mxu0 %v6190_v61 }
 0x1a3   : > { %5029 = vmatprep.mubr.bf16.mxu0 %v6214_v44  ;;  %v2292_v63 = vpop.f32.mrf.mxu1 }
 0x1a4   : > { %v1812_v24 = vpop.f32.mrf.mxu0 }
 0x1a5   : > { %v6646_v62 = vpop.f32.mrf.mxu1  ;;  %3081 = vmatmul.mubr.bf16.gmra.mxu1 %v5711_v49 }
 0x1a6   : > { %v6644_v36 = vpop.f32.mrf.mxu0  ;;  %3088 = vmatprep.mubr.bf16.mxu1 %v6077_v59 }
 0x1a7   : > { %7268 = vst [vmem:[#allocation51_spill] sm:$0xff] %v6644_v36  ;;  %v2297_v0 = vpop.f32.mrf.mxu1 }
 0x1a8   : > { %v1815_v11 = vpop.f32.mrf.mxu0 }
 0x1a9   : > { %v6653_v61 = vpop.f32.mrf.mxu1 }
 0x1aa   : > { %v6650_v55 = vpop.f32.mrf.mxu0  ;;  %5030 = vmatmul.mubr.bf16.gmra.mxu0 %v6234_v35 }
 0x1ab   : > { %5033 = vmatprep.mubr.bf16.mxu0 %v6254_v39  ;;  %v2300_v40 = vpop.f32.mrf.mxu1 }
 0x1ac   : > { %v1820_v44 = vpop.f32.mrf.mxu0 }
 0x1ad   : > { %v6656_v63 = vpop.f32.mrf.mxu1  ;;  %3089 = vmatmul.mubr.bf16.gmra.mxu1 %v5715_v58 }
 0x1ae   : > { %v1821_v24 = vpop.f32.mrf.mxu0  ;;  %3096 = vmatprep.mubr.bf16.mxu1 %v6088_v47 }
 0x1af   : > { %v2305_v11 = vpop.f32.mrf.mxu1 }
 0x1b0   : > { %v1822_v59 = vpop.f32.mrf.mxu0 }
 0x1b1   : > { %v6663_v35 = vpop.f32.mrf.mxu1 }
 0x1b2   : > { %v6660_v0 = vpop.f32.mrf.mxu0  ;;  %5034 = vmatmul.mubr.bf16.gmra.mxu0 %v6274_v17 }
 0x1b3   : > { %7269 = vst [vmem:[#allocation52_spill] sm:$0xff] %v6660_v0  ;;  %5037 = vmatprep.mubr.bf16.mxu0 %v6295_v10  ;;  %v2308_v44 = vpop.f32.mrf.mxu1 }
 0x1b4   : > { %v1827_v39 = vpop.f32.mrf.mxu0 }
 0x1b5   : > { %v6668_v24 = vpop.f32.mrf.mxu1  ;;  %3097 = vmatmul.mubr.bf16.gmra.mxu1 %v5736_v37 }
 0x1b6   : > { %v6666_v40 = vpop.f32.mrf.mxu0  ;;  %3104 = vmatprep.mubr.bf16.mxu1 %v6096_v53 }
 0x1b7   : > { %7270 = vst [vmem:[#allocation53_spill] sm:$0xff] %v6666_v40  ;;  %v2313_v59 = vpop.f32.mrf.mxu1 }
 0x1b8   : > { %v1830_v47 = vpop.f32.mrf.mxu0 }
 0x1b9   : > { %v6673_v17 = vpop.f32.mrf.mxu1 }
 0x1ba   : > { %v1833_v11 = vpop.f32.mrf.mxu0  ;;  %5038 = vmatmul.mubr.bf16.gmra.mxu0 %v6314_v38 }
 0x1bb   : > { %5041 = vmatprep.mubr.bf16.mxu0 %v5711_v49  ;;  %v2316_v39 = vpop.f32.mrf.mxu1 }
 0x1bc   : > { %v1834_v10 = vpop.f32.mrf.mxu0 }
 0x1bd   : > { %v6678_v40 = vpop.f32.mrf.mxu1  ;;  %3105 = vmatmul.mubr.bf16.gmra.mxu1 %v5788_v14 }
 0x1be   : > { %v6676_v44 = vpop.f32.mrf.mxu0  ;;  %3112 = vmatprep.mubr.bf16.mxu1 %v6100_v56 }
 0x1bf   : > { %7271 = vst [vmem:[#allocation54_spill] sm:$0xff] %v6676_v44  ;;  %v2321_v47 = vpop.f32.mrf.mxu1 }
 0x1c0   : > { %v1837_v53 = vpop.f32.mrf.mxu0 }
 0x1c1   : > { %v6685_v38 = vpop.f32.mrf.mxu1 }
 0x1c2   : > { %v6682_v59 = vpop.f32.mrf.mxu0  ;;  %5042 = vmatmul.mubr.bf16.gmra.mxu0 %v5715_v58 }
 0x1c3   : > { %7272 = vst [vmem:[#allocation55_spill] sm:$0xff] %v6682_v59  ;;  %5045 = vmatprep.mubr.bf16.mxu0 %v5736_v37  ;;  %v2324_v11 = vpop.f32.mrf.mxu1 }
 0x1c4   : > { %v1842_v49 = vpop.f32.mrf.mxu0 }
 0x1c5   : > { %v6688_v39 = vpop.f32.mrf.mxu1  ;;  %3113 = vmatmul.mubr.bf16.gmra.mxu1 %v5798_v54 }
 0x1c6   : > { %v1843_v10 = vpop.f32.mrf.mxu0  ;;  %3120 = vmatprep.mubr.bf16.mxu1 %v6111_v33 }
 0x1c7   : > { %v2329_v53 = vpop.f32.mrf.mxu1 }
 0x1c8   : > { %v1844_v56 = vpop.f32.mrf.mxu0 }
 0x1c9   : > { %v6695_v58 = vpop.f32.mrf.mxu1 }
 0x1ca   : > { %v6692_v47 = vpop.f32.mrf.mxu0  ;;  %5046 = vmatmul.mubr.bf16.gmra.mxu0 %v5788_v14 }
 0x1cb   : > { %7273 = vst [vmem:[#allocation56_spill] sm:$0xff] %v6692_v47  ;;  %5049 = vmatprep.mubr.bf16.mxu0 %v5798_v54  ;;  %v2332_v49 = vpop.f32.mrf.mxu1 }
 0x1cc   : > { %v1849_v37 = vpop.f32.mrf.mxu0 }
 0x1cd   : > { %v6700_v10 = vpop.f32.mrf.mxu1  ;;  %3121 = vmatmul.mubr.bf16.gmra.mxu1 %v5849_v4 }
 0x1ce   : > { %v6698_v11 = vpop.f32.mrf.mxu0  ;;  %3128 = vmatprep.mubr.bf16.mxu1 %v6122_v41 }
 0x1cf   : > { %7274 = vst [vmem:[#allocation57_spill] sm:$0xff] %v6698_v11  ;;  %v2337_v56 = vpop.f32.mrf.mxu1 }
 0x1d0   : > { %v1852_v33 = vpop.f32.mrf.mxu0 }
 0x1d1   : > { %v6705_v14 = vpop.f32.mrf.mxu1 }
 0x1d2   : > { %v1855_v53 = vpop.f32.mrf.mxu0  ;;  %5050 = vmatmul.mubr.bf16.gmra.mxu0 %v5849_v4 }
 0x1d3   : > { %5053 = vmatprep.mubr.bf16.mxu0 %v5877_v15  ;;  %v2340_v37 = vpop.f32.mrf.mxu1 }
 0x1d4   : > { %v1856_v54 = vpop.f32.mrf.mxu0 }
 0x1d5   : > { %v6710_v11 = vpop.f32.mrf.mxu1  ;;  %3129 = vmatmul.mubr.bf16.gmra.mxu1 %v5877_v15 }
 0x1d6   : > { %v6708_v49 = vpop.f32.mrf.mxu0  ;;  %3136 = vmatprep.mubr.bf16.mxu1 %v6156_v21 }
 0x1d7   : > { %7275 = vst [vmem:[#allocation58_spill] sm:$0xff] %v6708_v49  ;;  %v2345_v33 = vpop.f32.mrf.mxu1 }
 0x1d8   : > { %v1859_v41 = vpop.f32.mrf.mxu0 }
 0x1d9   : > { %v6717_v4 = vpop.f32.mrf.mxu1 }
 0x1da   : > { %v6714_v56 = vpop.f32.mrf.mxu0  ;;  %5054 = vmatmul.mubr.bf16.gmra.mxu0 %v5889_v43 }
 0x1db   : > { %7276 = vst [vmem:[#allocation59_spill] sm:$0xff] %v6714_v56  ;;  %5057 = vmatprep.mubr.bf16.mxu0 %v5927_v57  ;;  %v2348_v54 = vpop.f32.mrf.mxu1 }
 0x1dc   : > { %v1864_v53 = vpop.f32.mrf.mxu0 }
 0x1dd   : > { %v6720_v49 = vpop.f32.mrf.mxu1  ;;  %3137 = vmatmul.mubr.bf16.gmra.mxu1 %v5889_v43 }
 0x1de   : > { %v1865_v37 = vpop.f32.mrf.mxu0  ;;  %7277 = vst [vmem:[#allocation60_spill] sm:$0xff] %v6720_v49  ;;  %3144 = vmatprep.mubr.bf16.mxu1 %v6198_v7 }
 0x1df   : > { %v2353_v21 = vpop.f32.mrf.mxu1 }
 0x1e0   : > { %v1866_v15 = vpop.f32.mrf.mxu0 }
 0x1e1   : > { %v6725_v33 = vpop.f32.mrf.mxu1 }
 0x1e2   : > { %v4899_v41 = vpop.f32.mrf.mxu0  ;;  %5058 = vmatmul.mubr.bf16.gmra.mxu0 %v5999_v5  ;;  %7278 = vst [vmem:[#allocation61_spill] sm:$0xff] %v6725_v33 }
 0x1e3   : > { %5061 = vmatprep.mubr.bf16.mxu0 %v6037_v31  ;;  %v2356_v53 = vpop.f32.mrf.mxu1 }
 0x1e4   : > { %v6728_v56 = vpop.f32.mrf.mxu0 }
 0x1e5   : > { %v6732_v37 = vpop.f32.mrf.mxu1  ;;  %3145 = vmatmul.mubr.bf16.gmra.mxu1 %v5927_v57 }
 0x1e6   : > { %v6730_v54 = vpop.f32.mrf.mxu0  ;;  %7279 = vst [vmem:[#allocation62_spill] sm:$0xff] %v6732_v37  ;;  %3152 = vmatprep.mubr.bf16.mxu1 %v6221_v23 }
 0x1e7   : > { %v2361_v7 = vpop.f32.mrf.mxu1 }
 0x1e8   : > { %v1905_v43 = vpop.f32.mrf.mxu0 }
 0x1e9   : > { %v6739_v21 = vpop.f32.mrf.mxu1 }
 0x1ea   : > { %v6736_v15 = vpop.f32.mrf.mxu0  ;;  %5062 = vmatmul.mubr.bf16.gmra.mxu0 %v6115_v20  ;;  %7280 = vst [vmem:[#allocation63_spill] sm:$0xff] %v6739_v21 }
 0x1eb   : > { %5065 = vmatprep.mubr.bf16.mxu0 %v6129_v48  ;;  %v2364_v53 = vpop.f32.mrf.mxu1 }
 0x1ec   : > { %v6742_v41 = vpop.f32.mrf.mxu0 }
 0x1ed   : > { %v6746_v47 = vpop.f32.mrf.mxu1  ;;  %3153 = vmatmul.mubr.bf16.gmra.mxu1 %v5999_v5 }
 0x1ee   : > { %v6744_v59 = vpop.f32.mrf.mxu0  ;;  %7281 = vst [vmem:[#allocation64_spill] sm:$0xff] %v6746_v47  ;;  %3160 = vmatprep.mubr.bf16.mxu1 %v6248_v16 }
 0x1ef   : > { %v2369_v23 = vpop.f32.mrf.mxu1 }
 0x1f0   : > { %v1920_v57 = vpop.f32.mrf.mxu0  ;;  %v5247_v23 = vld [vmem:[#allocation3 + $0xd0] sm:$0xff]  }
 0x1f1   : > { %v6753_v44 = vpop.f32.mrf.mxu1 }
 0x1f2   : > { %v6750_v7 = vpop.f32.mrf.mxu0  ;;  %5066 = vmatmul.mubr.bf16.gmra.mxu0 %v6171_v30  ;;  %7282 = vst [vmem:[#allocation65_spill] sm:$0xff] %v6753_v44 }
 0x1f3   : > { %5069 = vmatprep.mubr.bf16.mxu0 %v6176_v45  ;;  %v2372_v53 = vpop.f32.mrf.mxu1 }
 0x1f4   : > { %v1932_v0 = vpop.f32.mrf.mxu0 }
 0x1f5   : > { %v6756_v33 = vpop.f32.mrf.mxu1  ;;  %3161 = vmatmul.mubr.bf16.gmra.mxu1 %v6037_v31 }
 0x1f6   : > { %v4908_v21 = vpop.f32.mrf.mxu0  ;;  %7283 = vst [vmem:[#allocation66_spill] sm:$0xff] %v6756_v33  ;;  %3168 = vmatprep.mubr.bf16.mxu1 %v6268_v46 }
 0x1f7   : > { %v2377_v16 = vpop.f32.mrf.mxu1 }
 0x1f8   : > { %v6760_v5 = vpop.f32.mrf.mxu0 }
 0x1f9   : > { %v6762_v30 = vpop.f32.mrf.mxu1 }
 0x1fa   : > { %v4911_v57 = vpop.f32.mrf.mxu0  ;;  %5070 = vmatmul.mubr.bf16.gmra.mxu0 %v5247_v23  ;;  %7284 = vst [vmem:[#allocation67_spill] sm:$0xff] %v6762_v30 }
 0x1fb   : > { %v2380_v45 = vpop.f32.mrf.mxu1 }
 0x1fc   : > { %v6764_v44 = vpop.f32.mrf.mxu0 }
 0x1fd   : > { %v6768_v21 = vpop.f32.mrf.mxu1  ;;  %3169 = vmatmul.mubr.bf16.gmra.mxu1 %v6115_v20 }
 0x1fe   : > { %v6766_v0 = vpop.f32.mrf.mxu0  ;;  %7285 = vst [vmem:[#allocation68_spill] sm:$0xff] %v6768_v21  ;;  %3176 = vmatprep.mubr.bf16.mxu1 %v6289_v6 }
 0x1ff   : > { %v2385_v46 = vpop.f32.mrf.mxu1 }
 0x200   : > { %v6772_v31 = vpop.f32.mrf.mxu0 }
 0x201   : > { %v6774_v16 = vpop.f32.mrf.mxu1 }
 0x202   : > { %v4963_v53 = vpop.f32.mrf.mxu0  ;;  %7286 = vst [vmem:[#allocation69_spill] sm:$0xff] %v6774_v16 }
 0x203   : > { %v2388_v23 = vpop.f32.mrf.mxu1  ;;  %v2441_v45 = vadd.f32 %v4963_v53, %v6537_v32  ;;  %v1906_v32 = vadd.f32 %v1905_v43, %v6430_v19 }
 0x204   : > { %v2432_v57 = vpop.f32.mrf.mxu0 }
 0x205   : > { %v6776_v47 = vpop.f32.mrf.mxu1  ;;  %3177 = vmatmul.mubr.bf16.gmra.mxu1 %v6129_v48  ;;  %v2433_v21 = vadd.f32 %v2432_v57, %v6520_v12  ;;  %v2675_v16 = vrot.slane %v2441_v45, 1  ;;  %v1903_v48 = vadd.f32 %v6728_v56, %v6418_v34 }
 0x206   : > { %v4964_v30 = vpop.f32.mrf.mxu0 }
 0x207   : > { %v2393_v33 = vpop.f32.mrf.mxu1  ;;  %v2672_v37 = vrot.slane %v2433_v21, 1  ;;  %v2444_v23 = vadd.f32 %v4964_v30, %v6545_v13 }
 0x208   : > { %v2435_v20 = vpop.f32.mrf.mxu0 }
 0x209   : > { %v2436_v6 = vadd.f32 %v2435_v20, %v6529_v8  ;;  %v6782_v49 = vpop.f32.mrf.mxu1  ;;  %v2677_v34 = vrot.slane %v2444_v23, 1 }
 0x20a   : > { %v4967_v46 = vpop.f32.mrf.mxu0 }
 0x20b   : > { %v2673_v36 = vrot.slane %v2436_v6, 1  ;;  %v2396_v12 = vpop.f32.mrf.mxu1  ;;  %v2457_v57 = vadd.f32 %v4967_v46, %v6560_v2  ;;  %v1925_v46 = vadd.f32 %v6736_v15, %v6473_v25 }
 0x20c   : > { %v2448_v53 = vpop.f32.mrf.mxu0 }
 0x20d   : > { %v2674_v33 = vsel %vm2671_vm6, %v2672_v37, %v2673_v36  ;;  %v2676_v8 = vsel %vm2671_vm6, %v2673_v36, %v2675_v16  ;;  %v2449_v20 = vadd.f32 %v2448_v53, %v6550_v60  ;;  %v6796_v30 = vpop.f32.mrf.mxu1  ;;  %v1913_v37 = vadd.f32 %v6730_v54, %v6448_v29  ;;  %v7287_v29 = vld [vmem:[#allocation20_spill] sm:$0xff] }
 0x20e   : > { %v6792_v45 = vadd.f32 %v2674_v33, %v1903_v48  ;;  %v6794_v21 = vadd.f32 %v2676_v8, %v1906_v32  ;;  %v4968_v13 = vpop.f32.mrf.mxu0  ;;  %v2682_v16 = vrot.slane %v2457_v57, 1  ;;  %v1918_v54 = vadd.f32 %v6742_v41, %v7287_v29 }
 0x20f   : > { %v2678_v56 = vrot.slane %v2449_v20, 1  ;;  %v2460_v19 = vadd.f32 %v4968_v13, %v6567_v9  ;;  %v2996_v36 = vpop.f32.mrf.mxu1 }
 0x210   : > { %v2451_v43 = vpop.f32.mrf.mxu0 }
 0x211   : > { %v2679_v2 = vsel %vm2671_vm6, %v2677_v34, %v2678_v56  ;;  %v2683_v60 = vrot.slane %v2460_v19, 1  ;;  %v2452_v6 = vadd.f32 %v2451_v43, %v6557_v1  ;;  %v6807_v32 = vpop.f32.mrf.mxu1  ;;  %v7288_v19 = vld [vmem:[#allocation42_spill] sm:$0xff]  ;;  %v7289_v43 = vld [vmem:[#allocation25_spill] sm:$0xff] }
 0x212   : > { %v6805_v48 = vadd.f32 %v2679_v2, %v1913_v37  ;;  %v4971_v23 = vpop.f32.mrf.mxu0  ;;  %v1928_v41 = vadd.f32 %v6744_v59, %v7289_v43  ;;  %v7292_v59 = vld [vmem:[#allocation29_spill] sm:$0xff] }
 0x213   : > { %v2684_v9 = vsel %vm2671_vm6, %v2682_v16, %v2683_v60  ;;  %v2680_v53 = vrot.slane %v2452_v6, 1  ;;  %v2999_v8 = vpop.f32.mrf.mxu1  ;;  %v2473_v57 = vadd.f32 %v4971_v23, %v6582_v52  ;;  %v7290_v52 = vld [vmem:[#allocation39_spill] sm:$0xff] }
 0x214   : > { %v6812_v12 = vadd.f32 %v2684_v9, %v1925_v46  ;;  %v2464_v33 = vpop.f32.mrf.mxu0  ;;  %v1935_v8 = vadd.f32 %v6760_v5, %v7292_v59 }
 0x215   : > { %v2681_v1 = vsel %vm2671_vm6, %v2678_v56, %v2680_v53  ;;  %v2465_v25 = vadd.f32 %v2464_v33, %v6572_v42  ;;  %v6819_v13 = vpop.f32.mrf.mxu1  ;;  %v2688_v2 = vrot.slane %v2473_v57, 1  ;;  %v7291_v42 = vld [vmem:[#allocation31_spill] sm:$0xff] }
 0x216   : > { %v6817_v15 = vadd.f32 %v2681_v1, %v1918_v54  ;;  %v4972_v20 = vpop.f32.mrf.mxu0  ;;  %v1940_v23 = vadd.f32 %v6750_v7, %v7291_v42 }
 0x217   : > { %v2685_v34 = vrot.slane %v2465_v25, 1  ;;  %v2476_v37 = vadd.f32 %v4972_v20, %v7288_v19  ;;  %v3004_v16 = vpop.f32.mrf.mxu1 }
 0x218   : > { %v2467_v36 = vpop.f32.mrf.mxu0 }
 0x219   : > { %v2686_v56 = vsel %vm2671_vm6, %v2683_v60, %v2685_v34  ;;  %v2690_v6 = vrot.slane %v2476_v37, 1  ;;  %v2468_v46 = vadd.f32 %v2467_v36, %v7290_v52  ;;  %v6830_v29 = vpop.f32.mrf.mxu1  ;;  %v7293_v36 = vld [vmem:[#allocation44_spill] sm:$0xff] }
 0x21a   : > { %v6828_v9 = vadd.f32 %v2686_v56, %v1928_v41  ;;  %v4975_v53 = vpop.f32.mrf.mxu0 }
 0x21b   : > { %v2691_v54 = vsel %vm2671_vm6, %v2688_v2, %v2690_v6  ;;  %v2687_v33 = vrot.slane %v2468_v46, 1  ;;  %v3007_v57 = vpop.f32.mrf.mxu1  ;;  %v2489_v19 = vadd.f32 %v4975_v53, %v6604_v27  ;;  %v7294_v46 = vld [vmem:[#allocation46_spill] sm:$0xff] }
 0x21c   : > { %v6835_v1 = vadd.f32 %v2691_v54, %v1940_v23  ;;  %v2480_v60 = vpop.f32.mrf.mxu0  ;;  %v7295_v23 = vld [vmem:[#allocation33_spill] sm:$0xff] }
 0x21d   : > { %v2689_v25 = vsel %vm2671_vm6, %v2687_v33, %v2688_v2  ;;  %v6840_v34 = vpop.f32.mrf.mxu1  ;;  %v2481_v37 = vadd.f32 %v2480_v60, %v6592_v51  ;;  %v2695_v6 = vrot.slane %v2489_v19, 1  ;;  %v1947_v54 = vadd.f32 %v6764_v44, %v7295_v23  ;;  %v7296_v33 = vld [vmem:[#allocation34_spill] sm:$0xff]  ;;  %v7300_v23 = vld [vmem:[#allocation8_spill] sm:$0xff] }
 0x21e   : > { %v6838_v20 = vadd.f32 %v2689_v25, %v1935_v8  ;;  %v4976_v7 = vpop.f32.mrf.mxu0  ;;  %v1950_v27 = vadd.f32 %v6772_v31, %v7296_v33 }
 0x21f   : > { %v3012_v41 = vpop.f32.mrf.mxu1  ;;  %v2692_v52 = vrot.slane %v2481_v37, 1  ;;  %v2492_v2 = vadd.f32 %v4976_v7, %v7294_v46 }
 0x220   : > { %v2483_v43 = vpop.f32.mrf.mxu0  ;;  %v7297_v41 = vld [vmem:[#allocation35_spill] sm:$0xff] }
 0x221   : > { %v2484_v16 = vadd.f32 %v2483_v43, %v7293_v36  ;;  %v6845_v56 = vpop.f32.mrf.mxu1  ;;  %v2697_v44 = vrot.slane %v2492_v2, 1  ;;  %v1957_v36 = vadd.f32 %v6766_v0, %v7297_v41  ;;  %v7301_v0 = vld [vmem:[#allocation36_spill] sm:$0xff] }
 0x222   : > { %v4979_v5 = vpop.f32.mrf.mxu0 }
 0x223   : > { %v2693_v42 = vrot.slane %v2484_v16, 1  ;;  %v3015_v51 = vpop.f32.mrf.mxu1  ;;  %v2505_v60 = vadd.f32 %v4979_v5, %v6624_v3  ;;  %v7298_v5 = vld [vmem:[#allocation49_spill] sm:$0xff] }
 0x224   : > { %v2496_v53 = vpop.f32.mrf.mxu0  ;;  %v7302_v51 = vld [vmem:[#allocation9_spill] sm:$0xff] }
 0x225   : > { %v2694_v59 = vsel %vm2671_vm6, %v2692_v52, %v2693_v42  ;;  %v2696_v8 = vsel %vm2671_vm6, %v2693_v42, %v2695_v6  ;;  %v2497_v57 = vadd.f32 %v2496_v53, %v6614_v50  ;;  %v6860_v37 = vpop.f32.mrf.mxu1  ;;  %v2702_v52 = vrot.slane %v2505_v60, 1  ;;  %v7299_v42 = vld [vmem:[#allocation37_spill] sm:$0xff] }
 0x226   : > { %v6856_v25 = vadd.f32 %v2694_v59, %v1947_v54  ;;  %v6858_v7 = vadd.f32 %v2696_v8, %v1950_v27  ;;  %v4980_v19 = vpop.f32.mrf.mxu0  ;;  %v1969_v54 = vadd.f32 %v7300_v23, %v7299_v42  ;;  %v1962_v59 = vadd.f32 %v7302_v51, %v7301_v0 }
 0x227   : > { %v2698_v43 = vrot.slane %v2497_v57, 1  ;;  %v2508_v31 = vadd.f32 %v4980_v19, %v6631_v28  ;;  %v3020_v6 = vpop.f32.mrf.mxu1 }
 0x228   : > { %v2499_v16 = vpop.f32.mrf.mxu0 }
 0x229   : > { %v2699_v3 = vsel %vm2671_vm6, %v2697_v44, %v2698_v43  ;;  %v2703_v50 = vrot.slane %v2508_v31, 1  ;;  %v2500_v46 = vadd.f32 %v2499_v16, %v7298_v5  ;;  %v6871_v27 = vpop.f32.mrf.mxu1  ;;  %v7304_v5 = vld [vmem:[#allocation10_spill] sm:$0xff] }
 0x22a   : > { %v6869_v33 = vadd.f32 %v2699_v3, %v1957_v36  ;;  %v4983_v2 = vpop.f32.mrf.mxu0  ;;  %v7303_v3 = vld [vmem:[#allocation38_spill] sm:$0xff] }
 0x22b   : > { %v2704_v28 = vsel %vm2671_vm6, %v2702_v52, %v2703_v50  ;;  %v2700_v53 = vrot.slane %v2500_v46, 1  ;;  %v3023_v57 = vpop.f32.mrf.mxu1  ;;  %v2521_v44 = vadd.f32 %v4983_v2, %v6646_v62  ;;  %v1972_v46 = vadd.f32 %v7304_v5, %v7303_v3  ;;  %v7306_v2 = vld [vmem:[#allocation11_spill] sm:$0xff] }
 0x22c   : > { %v6876_v8 = vadd.f32 %v2704_v28, %v1969_v54  ;;  %v2512_v60 = vpop.f32.mrf.mxu0  ;;  %v7307_v57 = vld [vmem:[#allocation40_spill] sm:$0xff] }
 0x22d   : > { %v2701_v19 = vsel %vm2671_vm6, %v2698_v43, %v2700_v53  ;;  %v2513_v31 = vadd.f32 %v2512_v60, %v6636_v22  ;;  %v6883_v16 = vpop.f32.mrf.mxu1  ;;  %v2708_v54 = vrot.slane %v2521_v44, 1  ;;  %v7305_v22 = vld [vmem:[#allocation41_spill] sm:$0xff] }
 0x22e   : > { %v6881_v41 = vadd.f32 %v2701_v19, %v1962_v59  ;;  %v4984_v36 = vpop.f32.mrf.mxu0  ;;  %v1984_v53 = vadd.f32 %v7306_v2, %v7305_v22  ;;  %v7308_v19 = vld [vmem:[#allocation12_spill] sm:$0xff] }
 0x22f   : > { %v2705_v6 = vrot.slane %v2513_v31, 1  ;;  %v2524_v52 = vadd.f32 %v4984_v36, %v6653_v61  ;;  %v3028_v23 = vpop.f32.mrf.mxu1  ;;  %v1979_v31 = vadd.f32 %v7308_v19, %v7307_v57  ;;  %v7311_v19 = vld [vmem:[#allocation45_spill] sm:$0xff] }
 0x230   : > { %v2515_v42 = vpop.f32.mrf.mxu0 }
 0x231   : > { %v2706_v43 = vsel %vm2671_vm6, %v2703_v50, %v2705_v6  ;;  %v2710_v28 = vrot.slane %v2524_v52, 1  ;;  %v2516_v62 = vadd.f32 %v2515_v42, %v6641_v18  ;;  %v6894_v59 = vpop.f32.mrf.mxu1 }
 0x232   : > { %v6892_v0 = vadd.f32 %v2706_v43, %v1972_v46  ;;  %v4987_v51 = vpop.f32.mrf.mxu0 }
 0x233   : > { %v2711_v61 = vsel %vm2671_vm6, %v2708_v54, %v2710_v28  ;;  %v2707_v60 = vrot.slane %v2516_v62, 1  ;;  %v3031_v36 = vpop.f32.mrf.mxu1  ;;  %v2537_v5 = vadd.f32 %v4987_v51, %v6668_v24 }
 0x234   : > { %v6899_v44 = vadd.f32 %v2711_v61, %v1984_v53  ;;  %v2528_v50 = vpop.f32.mrf.mxu0  ;;  %v7309_v61 = vld [vmem:[#allocation43_spill] sm:$0xff] }
 0x235   : > { %v2709_v18 = vsel %vm2671_vm6, %v2707_v60, %v2708_v54  ;;  %v6904_v3 = vpop.f32.mrf.mxu1  ;;  %v2529_v46 = vadd.f32 %v2528_v50, %v6656_v63  ;;  %v2715_v22 = vrot.slane %v2537_v5, 1  ;;  %v7310_v60 = vld [vmem:[#allocation13_spill] sm:$0xff] }
 0x236   : > { %v6902_v6 = vadd.f32 %v2709_v18, %v1979_v31  ;;  %v4988_v52 = vpop.f32.mrf.mxu0  ;;  %v1991_v57 = vadd.f32 %v7310_v60, %v7309_v61  ;;  %v7312_v31 = vld [vmem:[#allocation15_spill] sm:$0xff]  ;;  %v7314_v60 = vld [vmem:[#allocation14_spill] sm:$0xff] }
 0x237   : > { %v3036_v23 = vpop.f32.mrf.mxu1  ;;  %v2712_v2 = vrot.slane %v2529_v46, 1  ;;  %v2540_v54 = vadd.f32 %v4988_v52, %v6673_v17  ;;  %v1994_v24 = vadd.f32 %v7312_v31, %v7311_v19  ;;  %v7313_v61 = vld [vmem:[#allocation47_spill] sm:$0xff] }
 0x238   : > { %v2531_v42 = vpop.f32.mrf.mxu0 }
 0x239   : > { %v2532_v43 = vadd.f32 %v2531_v42, %v6663_v35  ;;  %v6909_v62 = vpop.f32.mrf.mxu1  ;;  %v2717_v42 = vrot.slane %v2540_v54, 1 }
 0x23a   : > { %v4991_v28 = vpop.f32.mrf.mxu0 }
 0x23b   : > { %v2713_v53 = vrot.slane %v2532_v43, 1  ;;  %v3039_v63 = vpop.f32.mrf.mxu1  ;;  %v2553_v36 = vadd.f32 %v4991_v28, %v6688_v39 }
 0x23c   : > { %v2544_v51 = vpop.f32.mrf.mxu0 }
 0x23d   : > { %v2714_v50 = vsel %vm2671_vm6, %v2712_v2, %v2713_v53  ;;  %v2716_v35 = vsel %vm2671_vm6, %v2713_v53, %v2715_v22  ;;  %v2545_v18 = vadd.f32 %v2544_v51, %v6678_v40  ;;  %v6924_v46 = vpop.f32.mrf.mxu1  ;;  %v2001_v2 = vadd.f32 %v7314_v60, %v7313_v61 }
 0x23e   : > { %v6920_v5 = vadd.f32 %v2714_v50, %v1991_v57  ;;  %v6922_v17 = vadd.f32 %v2716_v35, %v1994_v24  ;;  %v4992_v52 = vpop.f32.mrf.mxu0  ;;  %v2722_v53 = vrot.slane %v2553_v36, 1  ;;  %v7315_v57 = vld [vmem:[#allocation16_spill] sm:$0xff]  ;;  %v7317_v35 = vld [vmem:[#allocation17_spill] sm:$0xff] }
 0x23f   : > { %v2718_v23 = vrot.slane %v2545_v18, 1  ;;  %v2556_v43 = vadd.f32 %v4992_v52, %v6695_v58  ;;  %v3044_v22 = vpop.f32.mrf.mxu1  ;;  %v2013_v31 = vadd.f32 %v7315_v57, %v6628_v26  ;;  %v7316_v50 = vld [vmem:[#allocation48_spill] sm:$0xff] }
 0x240   : > { %v2547_v19 = vpop.f32.mrf.mxu0  ;;  %v2006_v18 = vadd.f32 %v7317_v35, %v7316_v50 }
 0x241   : > { %v2719_v39 = vsel %vm2671_vm6, %v2717_v42, %v2718_v23  ;;  %v2723_v40 = vrot.slane %v2556_v43, 1  ;;  %v2548_v28 = vadd.f32 %v2547_v19, %v6685_v38  ;;  %v6935_v51 = vpop.f32.mrf.mxu1 }
 0x242   : > { %v6933_v24 = vadd.f32 %v2719_v39, %v2001_v2  ;;  %v4995_v54 = vpop.f32.mrf.mxu0  ;;  %v7321_v39 = vld [vmem:[#allocation18_spill] sm:$0xff] }
 0x243   : > { %v2724_v58 = vsel %vm2671_vm6, %v2722_v53, %v2723_v40  ;;  %v2720_v63 = vrot.slane %v2548_v28, 1  ;;  %v3047_v42 = vpop.f32.mrf.mxu1  ;;  %v2569_v43 = vadd.f32 %v4995_v54, %v6710_v11  ;;  %v7320_v53 = vld [vmem:[#allocation50_spill] sm:$0xff] }
 0x244   : > { %v6940_v36 = vadd.f32 %v2724_v58, %v2013_v31  ;;  %v2560_v52 = vpop.f32.mrf.mxu0  ;;  %v2016_v28 = vadd.f32 %v7321_v39, %v7320_v53  ;;  %v7324_v42 = vld [vmem:[#allocation51_spill] sm:$0xff]  ;;  %v7328_v53 = vld [vmem:[#allocation62_spill] sm:$0xff] }
 0x245   : > { %v2721_v38 = vsel %vm2671_vm6, %v2718_v23, %v2720_v63  ;;  %v2561_v26 = vadd.f32 %v2560_v52, %v6700_v10  ;;  %v6947_v2 = vpop.f32.mrf.mxu1  ;;  %v2728_v58 = vrot.slane %v2569_v43, 1  ;;  %v7322_v10 = vld [vmem:[#allocation19_spill] sm:$0xff] }
 0x246   : > { %7318 = vst [vmem:[#allocation20_spill] sm:$0xff] %v6940_v36  ;;  %v6945_v61 = vadd.f32 %v2721_v38, %v2006_v18  ;;  %v4996_v60 = vpop.f32.mrf.mxu0  ;;  %v2028_v54 = vadd.f32 %v7322_v10, %v6650_v55  ;;  %v7325_v38 = vld [vmem:[#allocation21_spill] sm:$0xff] }
 0x247   : > { %v2725_v19 = vrot.slane %v2561_v26, 1  ;;  %v2572_v22 = vadd.f32 %v4996_v60, %v6717_v4  ;;  %v3052_v31 = vpop.f32.mrf.mxu1  ;;  %v2023_v26 = vadd.f32 %v7325_v38, %v7324_v42  ;;  %v7331_v38 = vld [vmem:[#allocation63_spill] sm:$0xff] }
 0x248   : > { %7319 = vst [vmem:[#allocation42_spill] sm:$0xff] %v6945_v61  ;;  %v2563_v57 = vpop.f32.mrf.mxu0  ;;  %v7341_v61 = vld [vmem:[#allocation23_spill] sm:$0xff] }
 0x249   : > { %v2726_v23 = vsel %vm2671_vm6, %v2723_v40, %v2725_v19  ;;  %v2730_v63 = vrot.slane %v2572_v22, 1  ;;  %v2564_v11 = vadd.f32 %v2563_v57, %v6705_v14  ;;  %v6958_v18 = vpop.f32.mrf.mxu1 }
 0x24a   : > { %v6956_v50 = vadd.f32 %v2726_v23, %v2016_v28  ;;  %v4999_v35 = vpop.f32.mrf.mxu0  ;;  %v7329_v28 = vld [vmem:[#allocation60_spill] sm:$0xff] }
 0x24b   : > { %v2731_v4 = vsel %vm2671_vm6, %v2728_v58, %v2730_v63  ;;  %v2727_v52 = vrot.slane %v2564_v11, 1  ;;  %v3055_v60 = vpop.f32.mrf.mxu1  ;;  %v2585_v39 = vadd.f32 %v4999_v35, %v7328_v53  ;;  %v7330_v63 = vld [vmem:[#allocation61_spill] sm:$0xff] }
 0x24c   : > { %7323 = vst [vmem:[#allocation25_spill] sm:$0xff] %v6956_v50  ;;  %v6963_v43 = vadd.f32 %v2731_v4, %v2028_v54  ;;  %v2576_v40 = vpop.f32.mrf.mxu0  ;;  %v7333_v60 = vld [vmem:[#allocation22_spill] sm:$0xff]  ;;  %v7337_v50 = vld [vmem:[#allocation64_spill] sm:$0xff] }
 0x24d   : > { %v2729_v14 = vsel %vm2671_vm6, %v2727_v52, %v2728_v58  ;;  %v6968_v22 = vpop.f32.mrf.mxu1  ;;  %v2577_v57 = vadd.f32 %v2576_v40, %v7329_v28  ;;  %v2735_v4 = vrot.slane %v2585_v39, 1 }
 0x24e   : > { %7326 = vst [vmem:[#allocation39_spill] sm:$0xff] %v6963_v43  ;;  %v6966_v19 = vadd.f32 %v2729_v14, %v2023_v26  ;;  %v5000_v55 = vpop.f32.mrf.mxu0  ;;  %v7332_v26 = vld [vmem:[#allocation52_spill] sm:$0xff] }
 0x24f   : > { %v3060_v23 = vpop.f32.mrf.mxu1  ;;  %v2732_v42 = vrot.slane %v2577_v57, 1  ;;  %v2588_v58 = vadd.f32 %v5000_v55, %v7331_v38  ;;  %v2035_v14 = vadd.f32 %v7333_v60, %v7332_v26  ;;  %v7335_v43 = vld [vmem:[#allocation24_spill] sm:$0xff] }
 0x250   : > { %7327 = vst [vmem:[#allocation31_spill] sm:$0xff] %v6966_v19  ;;  %v2579_v31 = vpop.f32.mrf.mxu0  ;;  %v7334_v19 = vld [vmem:[#allocation53_spill] sm:$0xff]  ;;  %v7336_v23 = vld [vmem:[#allocation66_spill] sm:$0xff] }
 0x251   : > { %v2580_v11 = vadd.f32 %v2579_v31, %v7330_v63  ;;  %v6973_v54 = vpop.f32.mrf.mxu1  ;;  %v2038_v35 = vadd.f32 %v7335_v43, %v7334_v19  ;;  %v2737_v26 = vrot.slane %v2588_v58, 1  ;;  %v7339_v43 = vld [vmem:[#allocation67_spill] sm:$0xff] }
 0x252   : > { %v5003_v10 = vpop.f32.mrf.mxu0 }
 0x253   : > { %v2733_v52 = vrot.slane %v2580_v11, 1  ;;  %v3063_v40 = vpop.f32.mrf.mxu1  ;;  %v2601_v63 = vadd.f32 %v5003_v10, %v7336_v23 }
 0x254   : > { %v2592_v53 = vpop.f32.mrf.mxu0  ;;  %v7340_v40 = vld [vmem:[#allocation54_spill] sm:$0xff] }
 0x255   : > { %v2734_v28 = vsel %vm2671_vm6, %v2732_v42, %v2733_v52  ;;  %v2736_v31 = vsel %vm2671_vm6, %v2733_v52, %v2735_v4  ;;  %v2593_v39 = vadd.f32 %v2592_v53, %v7337_v50  ;;  %v6988_v38 = vpop.f32.mrf.mxu1  ;;  %v2045_v42 = vadd.f32 %v7341_v61, %v7340_v40  ;;  %v7346_v61 = vld [vmem:[#allocation55_spill] sm:$0xff] }
 0x256   : > { %v6984_v57 = vadd.f32 %v2734_v28, %v2035_v14  ;;  %v6986_v55 = vadd.f32 %v2736_v31, %v2038_v35  ;;  %v5004_v11 = vpop.f32.mrf.mxu0  ;;  %v2742_v52 = vrot.slane %v2601_v63, 1  ;;  %v7342_v14 = vld [vmem:[#allocation65_spill] sm:$0xff]  ;;  %v7343_v35 = vld [vmem:[#allocation56_spill] sm:$0xff]  ;;  %v7344_v28 = vld [vmem:[#allocation26_spill] sm:$0xff] }
 0x257   : > { %v2738_v60 = vrot.slane %v2593_v39, 1  ;;  %v2604_v19 = vadd.f32 %v5004_v11, %v7339_v43  ;;  %v3068_v4 = vpop.f32.mrf.mxu1  ;;  %v2057_v31 = vadd.f32 %v7344_v28, %v7343_v35  ;;  %v7347_v40 = vld [vmem:[#allocation27_spill] sm:$0xff]  ;;  %v7349_v35 = vld [vmem:[#allocation68_spill] sm:$0xff] }
 0x258   : > { %7338 = vst [vmem:[#allocation29_spill] sm:$0xff] %v6986_v55  ;;  %v2595_v36 = vpop.f32.mrf.mxu0  ;;  %v2050_v4 = vadd.f32 %v7347_v40, %v7346_v61  ;;  %v7350_v55 = vld [vmem:[#allocation57_spill] sm:$0xff]  ;;  %v7351_v61 = vld [vmem:[#allocation28_spill] sm:$0xff] }
 0x259   : > { %v2739_v10 = vsel %vm2671_vm6, %v2737_v26, %v2738_v60  ;;  %v2743_v50 = vrot.slane %v2604_v19, 1  ;;  %v2596_v53 = vadd.f32 %v2595_v36, %v7342_v14  ;;  %v6999_v39 = vpop.f32.mrf.mxu1 }
 0x25a   : > { %v6997_v23 = vadd.f32 %v2739_v10, %v2045_v42  ;;  %v5007_v58 = vpop.f32.mrf.mxu0 }
 0x25b   : > { %v2744_v11 = vsel %vm2671_vm6, %v2742_v52, %v2743_v50  ;;  %v2740_v43 = vrot.slane %v2596_v53, 1  ;;  %v3071_v19 = vpop.f32.mrf.mxu1  ;;  %v2617_v14 = vadd.f32 %v5007_v58, %v6776_v47  ;;  %v7352_v47 = vld [vmem:[#allocation69_spill] sm:$0xff] }
 0x25c   : > { %7345 = vst [vmem:[#allocation44_spill] sm:$0xff] %v6997_v23  ;;  %v7004_v63 = vadd.f32 %v2744_v11, %v2057_v31  ;;  %v2608_v26 = vpop.f32.mrf.mxu0  ;;  %v2060_v31 = vadd.f32 %v7351_v61, %v7350_v55  ;;  %v7355_v55 = vld [vmem:[#allocation58_spill] sm:$0xff]  ;;  %v7356_v61 = vld [vmem:[#allocation32_spill] sm:$0xff] }
 0x25d   : > { %v2741_v36 = vsel %vm2671_vm6, %v2738_v60, %v2740_v43  ;;  %v2609_v42 = vadd.f32 %v2608_v26, %v7349_v35  ;;  %v7011_v23 = vpop.f32.mrf.mxu1  ;;  %v2748_v19 = vrot.slane %v2617_v14, 1  ;;  %v7353_v26 = vld [vmem:[#allocation59_spill] sm:$0xff] }
 0x25e   : > { %7348 = vst [vmem:[#allocation46_spill] sm:$0xff] %v7004_v63  ;;  %v7009_v10 = vadd.f32 %v2741_v36, %v2050_v4  ;;  %v5008_v28 = vpop.f32.mrf.mxu0  ;;  %v7354_v4 = vld [vmem:[#allocation30_spill] sm:$0xff] }
 0x25f   : > { %v2745_v52 = vrot.slane %v2609_v42, 1  ;;  %v2620_v53 = vadd.f32 %v5008_v28, %v6782_v49  ;;  %v3076_v40 = vpop.f32.mrf.mxu1  ;;  %v2072_v36 = vadd.f32 %v7354_v4, %v7353_v26 }
 0x260   : > { %v2611_v11 = vpop.f32.mrf.mxu0  ;;  %v2067_v40 = vadd.f32 %v7356_v61, %v7355_v55 }
 0x261   : > { %v2746_v60 = vsel %vm2671_vm6, %v2743_v50, %v2745_v52  ;;  %v2750_v43 = vrot.slane %v2620_v53, 1  ;;  %v2612_v58 = vadd.f32 %v2611_v11, %v7352_v47  ;;  %v7022_v42 = vpop.f32.mrf.mxu1 }
 0x262   : > { %v7020_v35 = vadd.f32 %v2746_v60, %v2060_v31  ;;  %v5027_v63 = vpop.f32.mrf.mxu0 }
 0x263   : > { %v2751_v49 = vsel %vm2671_vm6, %v2748_v19, %v2750_v43  ;;  %v2747_v28 = vrot.slane %v2612_v58, 1  ;;  %v3079_v52 = vpop.f32.mrf.mxu1  ;;  %v3228_v60 = vadd.f32 %v5027_v63, %v6819_v13 }
 0x264   : > { %v7027_v14 = vadd.f32 %v2751_v49, %v2072_v36  ;;  %v3219_v50 = vpop.f32.mrf.mxu0 }
 0x265   : > { %v2749_v53 = vsel %vm2671_vm6, %v2747_v28, %v2748_v19  ;;  %v7032_v31 = vpop.f32.mrf.mxu1  ;;  %v3220_v26 = vadd.f32 %v3219_v50, %v6796_v30  ;;  %v3462_v55 = vrot.slane %v3228_v60, 2 }
 0x266   : > { %v7030_v11 = vadd.f32 %v2749_v53, %v2067_v40  ;;  %v5028_v47 = vpop.f32.mrf.mxu0 }
 0x267   : > { %v3084_v58 = vpop.f32.mrf.mxu1  ;;  %v3459_v61 = vrot.slane %v3220_v26, 2  ;;  %v3231_v19 = vadd.f32 %v5028_v47, %v6830_v29 }
 0x268   : > { %v3222_v43 = vpop.f32.mrf.mxu0 }
 0x269   : > { %v3223_v4 = vadd.f32 %v3222_v43, %v6807_v32  ;;  %v7037_v49 = vpop.f32.mrf.mxu1  ;;  %v3464_v29 = vrot.slane %v3231_v19, 2 }
 0x26a   : > { %v5031_v36 = vpop.f32.mrf.mxu0 }
 0x26b   : > { %v3460_v28 = vrot.slane %v3223_v4, 2  ;;  %v3087_v52 = vpop.f32.mrf.mxu1  ;;  %v3244_v30 = vadd.f32 %v5031_v36, %v6860_v37 }
 0x26c   : > { %v3235_v40 = vpop.f32.mrf.mxu0 }
 0x26d   : > { %v3461_v53 = vsel %vm3458_vm7, %v3459_v61, %v3460_v28  ;;  %v3463_v13 = vsel %vm3458_vm7, %v3460_v28, %v3462_v55  ;;  %v3236_v63 = vadd.f32 %v3235_v40, %v6840_v34  ;;  %v7046_v26 = vpop.f32.mrf.mxu1  ;;  %v3469_v36 = vrot.slane %v3244_v30, 2 }
 0x26e   : > { %v3571_v32 = vadd.f32 %v3461_v53, %v6792_v45  ;;  %v3572_v50 = vadd.f32 %v3463_v13, %v6794_v21  ;;  %v5032_v60 = vpop.f32.mrf.mxu0 }
 0x26f   : > { %v3465_v47 = vrot.slane %v3236_v63, 2  ;;  %v3247_v43 = vadd.f32 %v5032_v60, %v6871_v27  ;;  %v3092_v37 = vpop.f32.mrf.mxu1 }
 0x270   : > { %v4641_v58 = vpack.c.bf16 %v3572_v50, %v3571_v32  ;;  %v3763_v4 = vadd.f32 %v3572_v50, %v3571_v32  ;;  %v3800_v61 = vmul.f32 %v3571_v32, %v3571_v32  ;;  %v3801_v55 = vmul.f32 %v3572_v50, %v3572_v50  ;;  %v3238_v28 = vpop.f32.mrf.mxu0 }
 0x271   : > { %v3466_v34 = vsel %vm3458_vm7, %v3464_v29, %v3465_v47  ;;  %v3470_v45 = vrot.slane %v3247_v43, 2  ;;  %v3239_v21 = vadd.f32 %v3238_v28, %v6845_v56  ;;  %v7053_v53 = vpop.f32.mrf.mxu1 }
 0x272   : > { %4642 = vst [vmem:[%s5340_s30] sm:$0xff] %v4641_v58   ;;  %v3832_v40 = vadd.f32 %v3801_v55, %v3800_v61  ;;  %v3573_v52 = vadd.f32 %v3466_v34, %v6805_v48  ;;  %v5035_v19 = vpop.f32.mrf.mxu0 }
 0x273   : > { %v3471_v27 = vsel %vm3458_vm7, %v3469_v36, %v3470_v45  ;;  %v3467_v13 = vrot.slane %v3239_v21, 2  ;;  %v3095_v60 = vpop.f32.mrf.mxu1  ;;  %v3260_v29 = vadd.f32 %v5035_v19, %v6904_v3 }
 0x274   : > { %v3764_v63 = vadd.f32 %v3763_v4, %v3573_v52  ;;  %v3802_v32 = vmul.f32 %v3573_v52, %v3573_v52  ;;  %v3251_v50 = vpop.f32.mrf.mxu0  ;;  %v3575_v58 = vadd.f32 %v3471_v27, %v6812_v12 }
 0x275   : > { %v3468_v30 = vsel %vm3458_vm7, %v3465_v47, %v3467_v13  ;;  %v3252_v56 = vadd.f32 %v3251_v50, %v6883_v16  ;;  %v7061_v55 = vpop.f32.mrf.mxu1  ;;  %v3475_v3 = vrot.slane %v3260_v29, 2 }
 0x276   : > { %v3833_v43 = vadd.f32 %v3832_v40, %v3802_v32  ;;  %v3574_v48 = vadd.f32 %v3468_v30, %v6817_v15  ;;  %v5036_v61 = vpop.f32.mrf.mxu0  ;;  %v3804_v19 = vmul.f32 %v3575_v58, %v3575_v58 }
 0x277   : > { %v3472_v28 = vrot.slane %v3252_v56, 2  ;;  %v3263_v4 = vadd.f32 %v5036_v61, %v6909_v62  ;;  %v3100_v21 = vpop.f32.mrf.mxu1 }
 0x278   : > { %v4646_v37 = vpack.c.bf16 %v3574_v48, %v3573_v52  ;;  %v3765_v36 = vadd.f32 %v3764_v63, %v3574_v48  ;;  %v3803_v34 = vmul.f32 %v3574_v48, %v3574_v48  ;;  %v3254_v47 = vpop.f32.mrf.mxu0 }
 0x279   : > { %v3473_v16 = vsel %vm3458_vm7, %v3470_v45, %v3472_v28  ;;  %v3477_v40 = vrot.slane %v3263_v4, 2  ;;  %v3255_v12 = vadd.f32 %v3254_v47, %v6894_v59  ;;  %v7068_v62 = vpop.f32.mrf.mxu1 }
 0x27a   : > { %4770 = vst [vmem:[%s5340_s30 + $0x8] sm:$0xff] %v4646_v37   ;;  %v3834_v15 = vadd.f32 %v3833_v43, %v3803_v34  ;;  %v3576_v27 = vadd.f32 %v3473_v16, %v6828_v9  ;;  %v3766_v13 = vadd.f32 %v3765_v36, %v3575_v58  ;;  %v5039_v32 = vpop.f32.mrf.mxu0 }
 0x27b   : > { %v3478_v52 = vsel %vm3458_vm7, %v3475_v3, %v3477_v40  ;;  %v3474_v63 = vrot.slane %v3255_v12, 2  ;;  %v3103_v56 = vpop.f32.mrf.mxu1  ;;  %v3276_v4 = vadd.f32 %v5039_v32, %v6947_v2 }
 0x27c   : > { %v4651_v50 = vpack.c.bf16 %v3576_v27, %v3575_v58  ;;  %v3767_v60 = vadd.f32 %v3766_v13, %v3576_v27  ;;  %v3805_v30 = vmul.f32 %v3576_v27, %v3576_v27  ;;  %v3835_v45 = vadd.f32 %v3834_v15, %v3804_v19  ;;  %v3267_v29 = vpop.f32.mrf.mxu0 }
 0x27d   : > { %v3578_v59 = vadd.f32 %v3478_v52, %v6835_v1  ;;  %v3476_v43 = vsel %vm3458_vm7, %v3474_v63, %v3475_v3  ;;  %v7075_v28 = vpop.f32.mrf.mxu1  ;;  %v3268_v58 = vadd.f32 %v3267_v29, %v6924_v46  ;;  %v3482_v19 = vrot.slane %v3276_v4, 2 }
 0x27e   : > { %4771 = vst [vmem:[%s5340_s30 + $0x10] sm:$0xff] %v4651_v50   ;;  %v3836_v9 = vadd.f32 %v3835_v45, %v3805_v30  ;;  %v3577_v48 = vadd.f32 %v3476_v43, %v6838_v20  ;;  %v5040_v61 = vpop.f32.mrf.mxu0 }
 0x27f   : > { %v3108_v21 = vpop.f32.mrf.mxu1  ;;  %v3807_v16 = vmul.f32 %v3578_v59, %v3578_v59  ;;  %v3479_v15 = vrot.slane %v3268_v58, 2  ;;  %v3279_v2 = vadd.f32 %v5040_v61, %v6958_v18 }
 0x280   : > { %v4656_v37 = vpack.c.bf16 %v3578_v59, %v3577_v48  ;;  %v3768_v36 = vadd.f32 %v3767_v60, %v3577_v48  ;;  %v3806_v34 = vmul.f32 %v3577_v48, %v3577_v48  ;;  %v3270_v47 = vpop.f32.mrf.mxu0 }
 0x281   : > { %v3271_v1 = vadd.f32 %v3270_v47, %v6935_v51  ;;  %v7081_v20 = vpop.f32.mrf.mxu1  ;;  %v3484_v18 = vrot.slane %v3279_v2, 2 }
 0x282   : > { %4772 = vst [vmem:[%s5340_s30 + $0x18] sm:$0xff] %v4656_v37   ;;  %v3837_v3 = vadd.f32 %v3836_v9, %v3806_v34  ;;  %v3769_v40 = vadd.f32 %v3768_v36, %v3578_v59  ;;  %v5043_v12 = vpop.f32.mrf.mxu0 }
 0x283   : > { %v3480_v27 = vrot.slane %v3271_v1, 2  ;;  %v3111_v32 = vpop.f32.mrf.mxu1  ;;  %v3292_v51 = vadd.f32 %v5043_v12, %v6988_v38 }
 0x284   : > { %v3838_v46 = vadd.f32 %v3837_v3, %v3807_v16  ;;  %v3283_v13 = vpop.f32.mrf.mxu0 }
 0x285   : > { %v3481_v52 = vsel %vm3458_vm7, %v3479_v15, %v3480_v27  ;;  %v3483_v63 = vsel %vm3458_vm7, %v3480_v27, %v3482_v19  ;;  %v3284_v50 = vadd.f32 %v3283_v13, %v6968_v22  ;;  %v7090_v29 = vpop.f32.mrf.mxu1  ;;  %v3489_v38 = vrot.slane %v3292_v51, 2 }
 0x286   : > { %v3579_v60 = vadd.f32 %v3481_v52, %v6856_v25  ;;  %v3580_v30 = vadd.f32 %v3483_v63, %v6858_v7  ;;  %v5044_v45 = vpop.f32.mrf.mxu0 }
 0x287   : > { %v3485_v56 = vrot.slane %v3284_v50, 2  ;;  %v3295_v59 = vadd.f32 %v5044_v45, %v6999_v39  ;;  %v3116_v4 = vpop.f32.mrf.mxu1 }
 0x288   : > { %v4661_v43 = vpack.c.bf16 %v3580_v30, %v3579_v60  ;;  %v3770_v9 = vadd.f32 %v3769_v40, %v3579_v60  ;;  %v3808_v48 = vmul.f32 %v3579_v60, %v3579_v60  ;;  %v3286_v61 = vpop.f32.mrf.mxu0  ;;  %v3809_v37 = vmul.f32 %v3580_v30, %v3580_v30 }
 0x289   : > { %v3486_v22 = vsel %vm3458_vm7, %v3484_v18, %v3485_v56  ;;  %v3490_v58 = vrot.slane %v3295_v59, 2  ;;  %v3287_v25 = vadd.f32 %v3286_v61, %v6973_v54  ;;  %v7097_v21 = vpop.f32.mrf.mxu1 }
 0x28a   : > { %4773 = vst [vmem:[%s5340_s30 + $0x20] sm:$0xff] %v4661_v43   ;;  %v3771_v7 = vadd.f32 %v3770_v9, %v3580_v30  ;;  %v3839_v36 = vadd.f32 %v3838_v46, %v3808_v48  ;;  %v3581_v34 = vadd.f32 %v3486_v22, %v6869_v33  ;;  %v5047_v47 = vpop.f32.mrf.mxu0 }
 0x28b   : > { %v3491_v39 = vsel %vm3458_vm7, %v3489_v38, %v3490_v58  ;;  %v3487_v1 = vrot.slane %v3287_v25, 2  ;;  %v3119_v19 = vpop.f32.mrf.mxu1  ;;  %v3308_v54 = vadd.f32 %v5047_v47, %v7032_v31 }
 0x28c   : > { %v3840_v16 = vadd.f32 %v3839_v36, %v3809_v37  ;;  %v3772_v3 = vadd.f32 %v3771_v7, %v3581_v34  ;;  %v3810_v40 = vmul.f32 %v3581_v34, %v3581_v34  ;;  %v3299_v12 = vpop.f32.mrf.mxu0  ;;  %v3583_v33 = vadd.f32 %v3491_v39, %v6876_v8 }
 0x28d   : > { %v3488_v15 = vsel %vm3458_vm7, %v3485_v56, %v3487_v1  ;;  %v3300_v2 = vadd.f32 %v3299_v12, %v7011_v23  ;;  %v7105_v32 = vpop.f32.mrf.mxu1  ;;  %v3495_v31 = vrot.slane %v3308_v54, 2 }
 0x28e   : > { %v3841_v27 = vadd.f32 %v3840_v16, %v3810_v40  ;;  %v3582_v46 = vadd.f32 %v3488_v15, %v6881_v41  ;;  %v5048_v13 = vpop.f32.mrf.mxu0  ;;  %v3812_v56 = vmul.f32 %v3583_v33, %v3583_v33 }
 0x28f   : > { %v3492_v52 = vrot.slane %v3300_v2, 2  ;;  %v3311_v63 = vadd.f32 %v5048_v13, %v7037_v49  ;;  %v3124_v45 = vpop.f32.mrf.mxu1 }
 0x290   : > { %v4666_v51 = vpack.c.bf16 %v3582_v46, %v3581_v34  ;;  %v3773_v50 = vadd.f32 %v3772_v3, %v3582_v46  ;;  %v3811_v60 = vmul.f32 %v3582_v46, %v3582_v46  ;;  %v3302_v30 = vpop.f32.mrf.mxu0 }
 0x291   : > { %v3493_v23 = vsel %vm3458_vm7, %v3490_v58, %v3492_v52  ;;  %v3497_v18 = vrot.slane %v3311_v63, 2  ;;  %v3303_v8 = vadd.f32 %v3302_v30, %v7022_v42  ;;  %v7112_v49 = vpop.f32.mrf.mxu1 }
 0x292   : > { %4774 = vst [vmem:[%s5340_s30 + $0x28] sm:$0xff] %v4666_v51   ;;  %v3842_v41 = vadd.f32 %v3841_v27, %v3811_v60  ;;  %v3584_v59 = vadd.f32 %v3493_v23, %v6892_v0  ;;  %v3774_v43 = vadd.f32 %v3773_v50, %v3583_v33  ;;  %v5051_v9 = vpop.f32.mrf.mxu0 }
 0x293   : > { %v3498_v48 = vsel %vm3458_vm7, %v3495_v31, %v3497_v18  ;;  %v3494_v61 = vrot.slane %v3303_v8, 2  ;;  %v3127_v7 = vpop.f32.mrf.mxu1  ;;  %v3324_v39 = vadd.f32 %v5051_v9, %v7061_v55 }
 0x294   : > { %v4671_v4 = vpack.c.bf16 %v3584_v59, %v3583_v33  ;;  %v3775_v38 = vadd.f32 %v3774_v43, %v3584_v59  ;;  %v3813_v22 = vmul.f32 %v3584_v59, %v3584_v59  ;;  %v3843_v58 = vadd.f32 %v3842_v41, %v3812_v56  ;;  %v3315_v25 = vpop.f32.mrf.mxu0 }
 0x295   : > { %v3496_v42 = vsel %vm3458_vm7, %v3494_v61, %v3495_v31  ;;  %v3586_v0 = vadd.f32 %v3498_v48, %v6899_v44  ;;  %v3130_v47 = vpop.f32.mrf.mxu1  ;;  %v3316_v1 = vadd.f32 %v3315_v25, %v7046_v26 }
 0x296   : > { %4775 = vst [vmem:[%s5340_s30 + $0x30] sm:$0xff] %v4671_v4   ;;  %v3844_v37 = vadd.f32 %v3843_v58, %v3813_v22  ;;  %v3585_v36 = vadd.f32 %v3496_v42, %v6902_v6  ;;  %v5052_v34 = vpop.f32.mrf.mxu0  ;;  %v3502_v6 = vrot.slane %v3324_v39, 2 }
 0x297   : > { %v3132_v19 = vpop.f32.mrf.mxu1  ;;  %v3815_v54 = vmul.f32 %v3586_v0, %v3586_v0  ;;  %v3499_v46 = vrot.slane %v3316_v1, 2  ;;  %v3327_v13 = vadd.f32 %v5052_v34, %v7068_v62 }
 0x298   : > { %v4676_v16 = vpack.c.bf16 %v3586_v0, %v3585_v36  ;;  %v3776_v3 = vadd.f32 %v3775_v38, %v3585_v36  ;;  %v3814_v40 = vmul.f32 %v3585_v36, %v3585_v36  ;;  %v3318_v12 = vpop.f32.mrf.mxu0 }
 0x299   : > { %v3319_v15 = vadd.f32 %v3318_v12, %v7053_v53  ;;  %v3133_v33 = vpop.f32.mrf.mxu1  ;;  %v3504_v62 = vrot.slane %v3327_v13, 2 }
 0x29a   : > { %4776 = vst [vmem:[%s5340_s30 + $0x38] sm:$0xff] %v4676_v16   ;;  %v3845_v2 = vadd.f32 %v3844_v37, %v3814_v40  ;;  %v3777_v27 = vadd.f32 %v3776_v3, %v3586_v0  ;;  %v5055_v44 = vpop.f32.mrf.mxu0  ;;  %v7357_v16 = vld [vmem:[#allocation20_spill] sm:$0xff]  ;;  %v7358_v40 = vld [vmem:[#allocation42_spill] sm:$0xff] }
 0x29b   : > { %v3500_v55 = vrot.slane %v3319_v15, 2  ;;  %v3135_v63 = vpop.f32.mrf.mxu1  ;;  %v3340_v53 = vadd.f32 %v5055_v44, %v7090_v29 }
 0x29c   : > { %v3846_v52 = vadd.f32 %v3845_v2, %v3815_v54  ;;  %v3331_v26 = vpop.f32.mrf.mxu0  ;;  %v7359_v63 = vld [vmem:[#allocation25_spill] sm:$0xff] }
 0x29d   : > { %v3501_v51 = vsel %vm3458_vm7, %v3499_v46, %v3500_v55  ;;  %v3503_v50 = vsel %vm3458_vm7, %v3500_v55, %v3502_v6  ;;  %v3332_v60 = vadd.f32 %v3331_v26, %v7075_v28  ;;  %v7130_v23 = vpop.f32.mrf.mxu1  ;;  %v3509_v29 = vrot.slane %v3340_v53, 2 }
 0x29e   : > { %v3587_v30 = vadd.f32 %v3501_v51, %v6920_v5  ;;  %v3588_v45 = vadd.f32 %v3503_v50, %v6922_v17  ;;  %v5056_v31 = vpop.f32.mrf.mxu0 }
 0x29f   : > { %v3505_v18 = vrot.slane %v3332_v60, 2  ;;  %v3343_v8 = vadd.f32 %v5056_v31, %v7097_v21  ;;  %v3140_v9 = vpop.f32.mrf.mxu1 }
 0x2a0   : > { %v4681_v56 = vpack.c.bf16 %v3588_v45, %v3587_v30  ;;  %v3778_v41 = vadd.f32 %v3777_v27, %v3587_v30  ;;  %v3816_v59 = vmul.f32 %v3587_v30, %v3587_v30  ;;  %v3334_v43 = vpop.f32.mrf.mxu0  ;;  %v3817_v61 = vmul.f32 %v3588_v45, %v3588_v45  ;;  %v7361_v9 = vld [vmem:[#allocation31_spill] sm:$0xff] }
 0x2a1   : > { %v3506_v28 = vsel %vm3458_vm7, %v3504_v62, %v3505_v18  ;;  %v3510_v48 = vrot.slane %v3343_v8, 2  ;;  %v3335_v5 = vadd.f32 %v3334_v43, %v7081_v20  ;;  %v3141_v58 = vpop.f32.mrf.mxu1 }
 0x2a2   : > { %4777 = vst [vmem:[%s5340_s30 + $0x40] sm:$0xff] %v4681_v56   ;;  %v3779_v17 = vadd.f32 %v3778_v41, %v3588_v45  ;;  %v3847_v4 = vadd.f32 %v3846_v52, %v3816_v59  ;;  %v3589_v38 = vadd.f32 %v3506_v28, %v6933_v24  ;;  %v5059_v22 = vpop.f32.mrf.mxu0  ;;  %v7360_v59 = vld [vmem:[#allocation39_spill] sm:$0xff] }
 0x2a3   : > { %v3511_v21 = vsel %vm3458_vm7, %v3509_v29, %v3510_v48  ;;  %v3507_v25 = vrot.slane %v3335_v5, 2  ;;  %v3143_v36 = vpop.f32.mrf.mxu1  ;;  %v3356_v39 = vadd.f32 %v5059_v22, %v3130_v47 }
 0x2a4   : > { %v3848_v7 = vadd.f32 %v3847_v4, %v3817_v61  ;;  %v3780_v42 = vadd.f32 %v3779_v17, %v3589_v38  ;;  %v3818_v37 = vmul.f32 %v3589_v38, %v3589_v38  ;;  %v3347_v0 = vpop.f32.mrf.mxu0  ;;  %v3591_v3 = vadd.f32 %v3511_v21, %v7357_v16 }
 0x2a5   : > { %v3508_v34 = vsel %vm3458_vm7, %v3505_v18, %v3507_v25  ;;  %v3348_v20 = vadd.f32 %v3347_v0, %v7105_v32  ;;  %v3146_v19 = vpop.f32.mrf.mxu1  ;;  %v3515_v13 = vrot.slane %v3356_v39, 2 }
 0x2a6   : > { %v3849_v1 = vadd.f32 %v3848_v7, %v3818_v37  ;;  %v3590_v24 = vadd.f32 %v3508_v34, %v7358_v40  ;;  %v5060_v12 = vpop.f32.mrf.mxu0  ;;  %v3820_v52 = vmul.f32 %v3591_v3, %v3591_v3 }
 0x2a7   : > { %v3512_v15 = vrot.slane %v3348_v20, 2  ;;  %v3359_v54 = vadd.f32 %v5060_v12, %v3133_v33  ;;  %v3148_v46 = vpop.f32.mrf.mxu1 }
 0x2a8   : > { %v4686_v2 = vpack.c.bf16 %v3590_v24, %v3589_v38  ;;  %v3781_v27 = vadd.f32 %v3780_v42, %v3590_v24  ;;  %v3819_v44 = vmul.f32 %v3590_v24, %v3590_v24  ;;  %v3350_v6 = vpop.f32.mrf.mxu0 }
 0x2a9   : > { %v3513_v47 = vsel %vm3458_vm7, %v3510_v48, %v3512_v15  ;;  %v3517_v55 = vrot.slane %v3359_v54, 2  ;;  %v3351_v32 = vadd.f32 %v3350_v6, %v7112_v49  ;;  %v3149_v33 = vpop.f32.mrf.mxu1 }
 0x2aa   : > { %4778 = vst [vmem:[%s5340_s30 + $0x48] sm:$0xff] %v4686_v2   ;;  %v3850_v26 = vadd.f32 %v3849_v1, %v3819_v44  ;;  %v3592_v51 = vadd.f32 %v3513_v47, %v7359_v63  ;;  %v3782_v50 = vadd.f32 %v3781_v27, %v3591_v3  ;;  %v5063_v53 = vpop.f32.mrf.mxu0 }
 0x2ab   : > { %v3518_v60 = vsel %vm3458_vm7, %v3515_v13, %v3517_v55  ;;  %v3514_v30 = vrot.slane %v3351_v32, 2  ;;  %v3151_v56 = vpop.f32.mrf.mxu1  ;;  %v3372_v5 = vadd.f32 %v5063_v53, %v3146_v19  ;;  %v7362_v19 = vld [vmem:[#allocation29_spill] sm:$0xff] }
 0x2ac   : > { %v4691_v45 = vpack.c.bf16 %v3592_v51, %v3591_v3  ;;  %v3783_v31 = vadd.f32 %v3782_v50, %v3592_v51  ;;  %v3821_v62 = vmul.f32 %v3592_v51, %v3592_v51  ;;  %v3851_v18 = vadd.f32 %v3850_v26, %v3820_v52  ;;  %v3363_v8 = vpop.f32.mrf.mxu0 }
 0x2ad   : > { %v3516_v49 = vsel %vm3458_vm7, %v3514_v30, %v3515_v13  ;;  %v3594_v43 = vadd.f32 %v3518_v60, %v7360_v59  ;;  %v3154_v48 = vpop.f32.mrf.mxu1  ;;  %v3364_v17 = vadd.f32 %v3363_v8, %v7130_v23  ;;  %v3522_v34 = vrot.slane %v3372_v5, 2 }
 0x2ae   : > { %4779 = vst [vmem:[%s5340_s30 + $0x50] sm:$0xff] %v4691_v45   ;;  %v3852_v41 = vadd.f32 %v3851_v18, %v3821_v62  ;;  %v3593_v29 = vadd.f32 %v3516_v49, %v7361_v9  ;;  %v5064_v28 = vpop.f32.mrf.mxu0 }
 0x2af   : > { %v3156_v21 = vpop.f32.mrf.mxu1  ;;  %v3823_v7 = vmul.f32 %v3594_v43, %v3594_v43  ;;  %v3519_v39 = vrot.slane %v3364_v17, 2  ;;  %v3375_v20 = vadd.f32 %v5064_v28, %v3149_v33 }
 0x2b0   : > { %v4696_v61 = vpack.c.bf16 %v3594_v43, %v3593_v29  ;;  %v3784_v4 = vadd.f32 %v3783_v31, %v3593_v29  ;;  %v3822_v38 = vmul.f32 %v3593_v29, %v3593_v29  ;;  %v3366_v22 = vpop.f32.mrf.mxu0 }
 0x2b1   : > { %v3367_v25 = vadd.f32 %v3366_v22, %v3141_v58  ;;  %v3157_v36 = vpop.f32.mrf.mxu1  ;;  %v3524_v27 = vrot.slane %v3375_v20, 2 }
 0x2b2   : > { %4780 = vst [vmem:[%s5340_s30 + $0x58] sm:$0xff] %v4696_v61   ;;  %v3853_v42 = vadd.f32 %v3852_v41, %v3822_v38  ;;  %v3785_v37 = vadd.f32 %v3784_v4, %v3594_v43  ;;  %v5067_v0 = vpop.f32.mrf.mxu0  ;;  %v7364_v38 = vld [vmem:[#allocation46_spill] sm:$0xff] }
 0x2b3   : > { %v3520_v1 = vrot.slane %v3367_v25, 2  ;;  %v3159_v40 = vpop.f32.mrf.mxu1 }
 0x2b4   : > { %v3854_v16 = vadd.f32 %v3853_v42, %v3823_v7  ;;  %v3379_v3 = vpop.f32.mrf.mxu0 }
 0x2b5   : > { %v3521_v23 = vsel %vm3458_vm7, %v3519_v39, %v3520_v1  ;;  %v3523_v24 = vsel %vm3458_vm7, %v3520_v1, %v3522_v34  ;;  %v3380_v12 = vadd.f32 %v3379_v3, %v3154_v48  ;;  %v3162_v2 = vpop.f32.mrf.mxu1 }
 0x2b6   : > { %v3595_v58 = vadd.f32 %v3521_v23, %v6984_v57  ;;  %v3596_v15 = vadd.f32 %v3523_v24, %v7362_v19  ;;  %v5068_v54 = vpop.f32.mrf.mxu0  ;;  %v3388_v50 = vadd.f32 %v5067_v0, %v3162_v2  ;;  %v7363_v57 = vld [vmem:[#allocation44_spill] sm:$0xff] }
 0x2b7   : > { %v3525_v44 = vrot.slane %v3380_v12, 2  ;;  %v3164_v55 = vpop.f32.mrf.mxu1 }
 0x2b8   : > { %v4701_v6 = vpack.c.bf16 %v3596_v15, %v3595_v58  ;;  %v3786_v46 = vadd.f32 %v3785_v37, %v3595_v58  ;;  %v3824_v13 = vmul.f32 %v3595_v58, %v3595_v58  ;;  %v3382_v47 = vpop.f32.mrf.mxu0  ;;  %v3825_v32 = vmul.f32 %v3596_v15, %v3596_v15 }
 0x2b9   : > { %v3526_v52 = vsel %vm3458_vm7, %v3524_v27, %v3525_v44  ;;  %v3383_v26 = vadd.f32 %v3382_v47, %v3157_v36  ;;  %v3165_v60 = vpop.f32.mrf.mxu1  ;;  %v3529_v41 = vrot.slane %v3388_v50, 2 }
 0x2ba   : > { %4781 = vst [vmem:[%s5340_s30 + $0x60] sm:$0xff] %v4701_v6   ;;  %v3787_v63 = vadd.f32 %v3786_v46, %v3596_v15  ;;  %v3855_v51 = vadd.f32 %v3854_v16, %v3824_v13  ;;  %v3597_v53 = vadd.f32 %v3526_v52, %v7363_v57  ;;  %v5071_v33 = vpop.f32.mrf.mxu0  ;;  %v3391_v18 = vadd.f32 %v5068_v54, %v3165_v60 }
 0x2bb   : > { %v3527_v30 = vrot.slane %v3383_v26, 2  ;;  %v3167_v56 = vpop.f32.mrf.mxu1 }
 0x2bc   : > { %v3856_v45 = vadd.f32 %v3855_v51, %v3825_v32  ;;  %v3788_v31 = vadd.f32 %v3787_v63, %v3597_v53  ;;  %v3826_v62 = vmul.f32 %v3597_v53, %v3597_v53  ;;  %v3395_v8 = vpop.f32.mrf.mxu0  ;;  %v3530_v43 = vrot.slane %v3391_v18, 2 }
 0x2bd   : > { %v3528_v49 = vsel %vm3458_vm7, %v3525_v44, %v3527_v30  ;;  %v3170_v28 = vpop.f32.mrf.mxu1 }
 0x2be   : > { %v3857_v59 = vadd.f32 %v3856_v45, %v3826_v62  ;;  %v3598_v9 = vadd.f32 %v3528_v49, %v7009_v10  ;;  %v5072_v29 = vpop.f32.mrf.mxu0  ;;  %v3531_v48 = vsel %vm3458_vm7, %v3529_v41, %v3530_v43  ;;  %v3396_v21 = vadd.f32 %v3395_v8, %v3170_v28 }
 0x2bf   : > { %v3172_v4 = vpop.f32.mrf.mxu1  ;;  %v3599_v22 = vadd.f32 %v3531_v48, %v7364_v38 }
 0x2c0   : > { %v4706_v5 = vpack.c.bf16 %v3598_v9, %v3597_v53  ;;  %v3789_v17 = vadd.f32 %v3788_v31, %v3598_v9  ;;  %v3827_v61 = vmul.f32 %v3598_v9, %v3598_v9  ;;  %v3398_v25 = vpop.f32.mrf.mxu0  ;;  %v3532_v0 = vrot.slane %v3396_v21, 2 }
 0x2c1   : > { %v3828_v42 = vmul.f32 %v3599_v22, %v3599_v22  ;;  %v3173_v37 = vpop.f32.mrf.mxu1 }
 0x2c2   : > { %4782 = vst [vmem:[%s5340_s30 + $0x68] sm:$0xff] %v4706_v5   ;;  %v3858_v7 = vadd.f32 %v3857_v59, %v3827_v61  ;;  %v3790_v36 = vadd.f32 %v3789_v17, %v3599_v22  ;;  %v3399_v10 = vadd.f32 %v3398_v25, %v3173_v37  ;;  %v3533_v39 = vsel %vm3458_vm7, %v3530_v43, %v3532_v0 }
 0x2c3   : > { %v3175_v34 = vpop.f32.mrf.mxu1  ;;  %v3600_v1 = vadd.f32 %v3533_v39, %v7020_v35 }
 0x2c4   : > { %v3859_v20 = vadd.f32 %v3858_v7, %v3828_v42  ;;  %v3534_v3 = vrot.slane %v3399_v10, 2 }
 0x2c5   : > { %v3178_v16 = vpop.f32.mrf.mxu1  ;;  %v4711_v23 = vpack.c.bf16 %v3600_v1, %v3599_v22  ;;  %v3791_v24 = vadd.f32 %v3790_v36, %v3600_v1  ;;  %v3829_v12 = vmul.f32 %v3600_v1, %v3600_v1 }
 0x2c6   : > { %v3404_v40 = vadd.f32 %v5071_v33, %v3178_v16 }
 0x2c7   : > { %v3180_v58 = vpop.f32.mrf.mxu1  ;;  %4783 = vst [vmem:[%s5340_s30 + $0x70] sm:$0xff] %v4711_v23   ;;  %v3860_v15 = vadd.f32 %v3859_v20, %v3829_v12 }
 0x2c8   : > { %v3535_v19 = vrot.slane %v3404_v40, 2 }
 0x2c9   : > { %v3181_v54 = vpop.f32.mrf.mxu1 }
 0x2ca   : > { %v3407_v2 = vadd.f32 %v5072_v29, %v3181_v54  ;;  %v3536_v27 = vsel %vm3458_vm7, %v3534_v3, %v3535_v19 }
 0x2cb   : > { %v3601_v44 = vadd.f32 %v3536_v27, %v7030_v11  ;;  %v3183_v6 = vpop.f32.mrf.mxu1 }
 0x2cc   : > { %v3537_v46 = vrot.slane %v3407_v2, 2 }
 0x2cd   : > { %v3792_v35 = vadd.f32 %v3791_v24, %v3601_v44  ;;  %v3830_v13 = vmul.f32 %v3601_v44, %v3601_v44 }
 0x2ce   : > { %v3538_v47 = vsel %vm3458_vm7, %v3535_v19, %v3537_v46 }
 0x2cf   : > { %v3602_v55 = vadd.f32 %v3538_v47, %v7027_v14  ;;  %v3861_v32 = vadd.f32 %v3860_v15, %v3830_v13 }
 0x2d1   : > { %v3831_v52 = vmul.f32 %v3602_v55, %v3602_v55  ;;  %v4716_v26 = vpack.c.bf16 %v3602_v55, %v3601_v44  ;;  %v3793_v63 = vadd.f32 %v3792_v35, %v3602_v55 }
 0x2d3   : > { %4784 = vst [vmem:[%s5340_s30 + $0x78] sm:$0xff] %v4716_v26   ;;  %v3794_v51 = vrot.slane %v3793_v63, 4  ;;  %v3862_v50 = vadd.f32 %v3861_v32, %v3831_v52 }
 0x2d5   : > { %v3795_v57 = vadd.f32 %v3794_v51, %v3793_v63  ;;  %v3863_v53 = vrot.slane %v3862_v50, 4 }
 0x2d7   : > { %v3796_v33 = vrot.slane %v3795_v57, 2  ;;  %v3864_v11 = vadd.f32 %v3863_v53, %v3862_v50 }
 0x2d9   : > { %v3797_v60 = vadd.f32 %v3796_v33, %v3795_v57  ;;  %v3865_v30 = vrot.slane %v3864_v11, 2 }
 0x2db   : > { %v3798_v45 = vrot.slane %v3797_v60, 1  ;;  %v3866_v31 = vadd.f32 %v3865_v30, %v3864_v11 }
 0x2dd   : > { %v3867_v62 = vrot.slane %v3866_v31, 1  ;;  %v3799_v18 = vadd.f32 %v3798_v45, %v3797_v60 }
 0x2df   : > { %v3868_v8 = vadd.f32 %v3867_v62, %v3866_v31 }
 0x2e1   : > { %v3870_v14 = vsel %vm1031_vm2, %v3799_v18, %v3868_v8 }
 0x2e2   : > { %3871 = vst [vmem:[%s5345_s8] sm:$0x3] %v3870_v14 }
 0x2e3 PF: > { %s16_s20 = sadd.s32 1, %s5272_s20   ;;  %s7365_s18 = smov %s5268_s19 }
 0x2e4   : > { %p13_p5 = scmp.ge.s32.totalorder %s16_s20, 4   ;;  %s7366_s19 = smov %s7368_s21 }
 0x2e6   :  { %15 = sbr.rel (!%p13_p5) target bundleno = 2 (0x2), region = 177 }
 0x2eb   :  { %3921 = vsyncmov [#allocation4] }
 0x2ee   :  { %s3922_s30 = vpop.sfrf %3921 }
 0x2ef   :  { %p4305_p6 = scmp.ne.s32.totalorder %s3922_s30, 0 }
 0x2f1   :  { %3926 = shalt.err (%p4305_p6)  }
 0x2f2   :  { %3928 = vsyncmov [#allocation4 + $0x1] }
 0x2f5   :  { %s3929_s11 = vpop.sfrf %3928 }
 0x2f6   :  { %p4306_p7 = scmp.ne.s32.totalorder %s3929_s11, 0 }
 0x2f8   :  { %3933 = shalt.err (%p4306_p7)  }

</bundles_post_ra>
